<compile_context>
chip_gen: v7x
topology: tpu7x:2x2x1
jax: 0.10.0
libtpu: 0.0.40
codegen_flags: <defaults>
</compile_context>

<pallas_src>
import functools
import math

import jax
import jax.numpy as jnp
from jax.experimental import pallas as pl
from jax.experimental.pallas import tpu as pltpu

BF16 = jnp.bfloat16


# ----------------------------------------------------------------------------
# Pallas kernels
# ----------------------------------------------------------------------------
def _conv_kernel(p_ref, w_ref, b_ref, o_ref, *, act):
    """One im2col conv tile: (rows*Wo, K) @ (K, Cout) on the MXU.

    p_ref : (1, rows, Wo, K)   im2col patches, K = KH*KW*Cin
    w_ref : (K, Cout)
    b_ref : (1, Cout)
    o_ref : (1, rows, Wo, Cout)
    """
    _, rows, wo, kc = p_ref.shape
    cout = o_ref.shape[-1]
    patches = p_ref[0].reshape(rows * wo, kc).astype(BF16)
    acc = jnp.dot(patches, w_ref[...].astype(BF16),
                  preferred_element_type=jnp.float32)
    acc = acc + b_ref[...]
    if act == "relu":
        acc = jnp.maximum(acc, 0.0)
    elif act == "sigmoid":
        acc = jax.nn.sigmoid(acc)
    o_ref[0] = acc.reshape(rows, wo, cout).astype(o_ref.dtype)


def _resblock_kernel(p1_ref, xres_ref, w1_ref, b1_ref, w2_ref, b2_ref,
                     o_ref, hpad_ref, *, H, W):
    """Fused common.ResBlock: conv3x3 + ReLU + conv3x3 + residual.

    p1_ref   : (1, H, W, 9C)  im2col patches of the (pre-combined) input x
    xres_ref : (1, H, W, C)   x itself (residual branch)
    w1_ref   : (9C, C)        first conv, flattened for one big matmul
    w2_ref   : (3, 3, C, C)   second conv (per-tap accumulation in VMEM)
    hpad_ref : VMEM scratch (H+2, W+2, C) holding the zero-padded intermediate
    """
    # TODO(synk): row-tile this kernel (halo'd BlockSpec) for feature maps
    # larger than ~64x64 so VMEM stays bounded and the grid feeds both cores.
    C = o_ref.shape[-1]
    # conv1 as one big MXU matmul (K = 9C), bf16 inputs / f32 accumulate.
    p1 = p1_ref[0].reshape(H * W, 9 * C).astype(BF16)
    h = jnp.dot(p1, w1_ref[...].astype(BF16),
                preferred_element_type=jnp.float32)
    h = jnp.maximum(h + b1_ref[...], 0.0)
    # zero-padded copy of the intermediate for the second 3x3 "same" conv.
    hpad_ref[...] = jnp.zeros((H + 2, W + 2, C), jnp.float32)
    hpad_ref[1:H + 1, 1:W + 1, :] = h.reshape(H, W, C)
    # conv2: per-tap MXU accumulation over the padded scratch (stays in VMEM,
    # no HBM round trip for the intermediate activation).
    acc = None
    for kh in range(3):
        for kw in range(3):
            win = hpad_ref[kh:kh + H, kw:kw + W, :].astype(BF16)
            d = jnp.dot(win.reshape(H * W, C), w2_ref[kh, kw].astype(BF16),
                        preferred_element_type=jnp.float32)
            acc = d if acc is None else acc + d
    y = acc + b2_ref[...]
    o_ref[0] = (y.reshape(H, W, C) + xres_ref[0]).astype(o_ref.dtype)


def _nonlocal_kernel(x_ref, wt_ref, bt_ref, wp_ref, bp_ref, wg_ref, bg_ref,
                     ww_ref, bw_ref, o_ref, *, H, W):
    """Fused common.NonLocalBlock2D for one batch element:
    theta/phi/g 1x1 convs -> softmax(theta @ phi^T) @ g -> W 1x1 conv -> + x.
    The softmax is normalized AFTER the second matmul (divide a (HW, Ci)
    result, not the (HW, HW) matrix) with an approximate EUP reciprocal.
    """
    C = x_ref.shape[-1]
    x = x_ref[0].reshape(H * W, C)
    xb = x.astype(BF16)

    def emb(w_ref, b_ref):
        return jnp.dot(xb, w_ref[...].astype(BF16),
                       preferred_element_type=jnp.float32) + b_ref[...]

    t = emb(wt_ref, bt_ref)
    p = emb(wp_ref, bp_ref)
    g = emb(wg_ref, bg_ref)
    s = jax.lax.dot_general(t.astype(BF16), p.astype(BF16),
                            (((1,), (1,)), ((), ())),
                            preferred_element_type=jnp.float32)      # (HW, HW)
    # TODO(synk): for large feature maps, tile the KV axis with an online
    # softmax accumulator instead of materializing (HW, HW) (VMEM on v7x).
    s = s - jnp.max(s, axis=-1, keepdims=True)
    e = jnp.exp(s)
    num = jnp.dot(e.astype(BF16), g.astype(BF16),
                  preferred_element_type=jnp.float32)                # (HW, Ci)
    y = num * pl.reciprocal(jnp.sum(e, axis=-1, keepdims=True), approx=True)
    z = jnp.dot(y.astype(BF16), ww_ref[...].astype(BF16),
                preferred_element_type=jnp.float32) + bw_ref[...] + x
    o_ref[0] = z.reshape(H, W, C).astype(o_ref.dtype)


# ----------------------------------------------------------------------------
# Wrapper-side glue (im2col / padding / pixel shuffle are XLA data movement)
# ----------------------------------------------------------------------------
def _im2col(xp, KH, KW):
    """(N, Hp, Wp, Cin) padded input -> (N, Ho, Wo, KH*KW*Cin) patches,
    channel-minor tap order (matches w.reshape(KH*KW*Cin, Cout))."""
    N, Hp, Wp, Cin = xp.shape
    Ho, Wo = Hp - KH + 1, Wp - KW + 1
    cols = [xp[:, kh:kh + Ho, kw:kw + Wo, :]
            for kh in range(KH) for kw in range(KW)]
    return cols[0] if len(cols) == 1 else jnp.concatenate(cols, axis=-1)


def pixel_shuffle(x, r):
    N, H, W, Crr = x.shape
    C = Crr // (r * r)
    x = x.reshape(N, H, W, C, r, r)
    x = jnp.transpose(x, (0, 1, 4, 2, 5, 3))
    return x.reshape(N, H * r, W * r, C)


# ----------------------------------------------------------------------------
# Pallas wrappers
# ----------------------------------------------------------------------------
def conv2d_pallas(patches, w_flat, b, *, act=None):
    """One MXU matmul per (batch, row-tile) grid step."""
    N, Ho, Wo, Kc = patches.shape
    Cout = w_flat.shape[-1]
    tr = 8 if Ho % 8 == 0 else Ho          # row tile -> longer parallel grid
    kern = functools.partial(_conv_kernel, act=act)
    return pl.pallas_call(
        kern,
        out_shape=jax.ShapeDtypeStruct((N, Ho, Wo, Cout), jnp.float32),
        grid=(N, Ho // tr),
        in_specs=[
            pl.BlockSpec((1, tr, Wo, Kc), lambda n, r: (n, r, 0, 0)),
            pl.BlockSpec((Kc, Cout), lambda n, r: (0, 0)),
            pl.BlockSpec((1, Cout), lambda n, r: (0, 0)),
        ],
        out_specs=pl.BlockSpec((1, tr, Wo, Cout), lambda n, r: (n, r, 0, 0)),
        compiler_params=pltpu.CompilerParams(
            dimension_semantics=("parallel", "parallel")),
    )(patches, w_flat, b.reshape(1, Cout))


def resblock_pallas(p, x, *, x2=None, x3=None, prologue="none"):
    """Fused ResBlock; optional fused elementwise prologue:
       'add'     : x <- x + x2        (mask branch: x_RB1 + x_Up)
       'mul_add' : x <- x * x2 + x3   (attention module: trunk*mask + res)"""
    if prologue == "add":
        xc = x + x2
    elif prologue == "mul_add":
        xc = x * x2 + x3
    else:
        xc = x
    N, H, W, C = xc.shape
    xp = jnp.pad(xc, ((0, 0), (1, 1), (1, 1), (0, 0)))
    patches = _im2col(xp, 3, 3)                                  # (N, H, W, 9C)
    kern = functools.partial(_resblock_kernel, H=H, W=W)
    return pl.pallas_call(
        kern,
        out_shape=jax.ShapeDtypeStruct((N, H, W, C), jnp.float32),
        grid=(N,),
        in_specs=[
            pl.BlockSpec((1, H, W, 9 * C), lambda n: (n, 0, 0, 0)),
            pl.BlockSpec((1, H, W, C), lambda n: (n, 0, 0, 0)),
            pl.BlockSpec((9 * C, C), lambda n: (0, 0)),
            pl.BlockSpec((1, C), lambda n: (0, 0)),
            pl.BlockSpec((3, 3, C, C), lambda n: (0, 0, 0, 0)),
            pl.BlockSpec((1, C), lambda n: (0, 0)),
        ],
        out_specs=pl.BlockSpec((1, H, W, C), lambda n: (n, 0, 0, 0)),
        scratch_shapes=[pltpu.VMEM((H + 2, W + 2, C), jnp.float32)],
        compiler_params=pltpu.CompilerParams(dimension_semantics=("parallel",)),
    )(patches, xc,
      p["c1"]["w"].reshape(9 * C, C), p["c1"]["b"].reshape(1, C),
      p["c2"]["w"], p["c2"]["b"].reshape(1, C))


def nonlocal_pallas(p, x):
    N, H, W, C = x.shape
    Ci = p["theta"]["w"].shape[-1]
    kern = functools.partial(_nonlocal_kernel, H=H, W=W)

    def w2d(name):                       # (1,1,cin,cout) -> (cin,cout)
        w = p[name]["w"]
        return w.reshape(w.shape[-2], w.shape[-1])

    return pl.pallas_call(
        kern,
        out_shape=jax.ShapeDtypeStruct((N, H, W, C), jnp.float32),
        grid=(N,),
        in_specs=[pl.BlockSpec((1, H, W, C), lambda n: (n, 0, 0, 0)),
                  pl.BlockSpec((C, Ci), lambda n: (0, 0)),
                  pl.BlockSpec((1, Ci), lambda n: (0, 0)),
                  pl.BlockSpec((C, Ci), lambda n: (0, 0)),
                  pl.BlockSpec((1, Ci), lambda n: (0, 0)),
                  pl.BlockSpec((C, Ci), lambda n: (0, 0)),
                  pl.BlockSpec((1, Ci), lambda n: (0, 0)),
                  pl.BlockSpec((Ci, C), lambda n: (0, 0)),
                  pl.BlockSpec((1, C), lambda n: (0, 0))],
        out_specs=pl.BlockSpec((1, H, W, C), lambda n: (n, 0, 0, 0)),
        compiler_params=pltpu.CompilerParams(dimension_semantics=("parallel",)),
    )(x,
      w2d("theta"), p["theta"]["b"].reshape(1, Ci),
      w2d("phi"), p["phi"]["b"].reshape(1, Ci),
      w2d("g"), p["g"]["b"].reshape(1, Ci),
      w2d("W"), p["W"]["b"].reshape(1, C))


# ----------------------------------------------------------------------------
# Layer helpers built on the kernels
# ----------------------------------------------------------------------------
def conv_same(p, x, *, act=None, add=None):
    """nn.Conv2d(cin, cout, k, padding=k//2); `add` is an optional elementwise
    term folded into the patch-extraction prologue (no separate kernel)."""
    k = p["w"].shape[0]
    cout = p["w"].shape[-1]
    xin = x if add is None else x + add
    pad = k // 2
    xp = jnp.pad(xin, ((0, 0), (pad, pad), (pad, pad), (0, 0))) if pad else xin
    return conv2d_pallas(_im2col(xp, k, k), p["w"].reshape(-1, cout), p["b"],
                         act=act)


def conv_down2(p, x):
    """nn.Conv2d(c, c, 3, stride=2, padding=1): only the subsampled outputs
    are gathered (stride-2 im2col) and computed -- no wasted MACs."""
    N, H, W, C = x.shape
    cout = p["w"].shape[-1]
    xp = jnp.pad(x, ((0, 0), (1, 1), (1, 1), (0, 0)))
    Ho, Wo = (H - 1) // 2 + 1, (W - 1) // 2 + 1
    cols = [xp[:, kh:kh + 2 * Ho - 1:2, kw:kw + 2 * Wo - 1:2, :]
            for kh in range(3) for kw in range(3)]
    patches = jnp.concatenate(cols, axis=-1)
    return conv2d_pallas(patches, p["w"].reshape(-1, cout), p["b"])


def conv_tconv_up2(p, x):
    """nn.ConvTranspose2d(c, c, 6, stride=2, padding=2) (expressed, as before,
    as zero-dilate + pad-3 + 6x6 conv) rewritten in polyphase form: one 3x3
    'same' conv with 4x output channels + 2x pixel shuffle.  Numerically the
    same result with ~4x fewer MACs and no zero-dilated intermediate."""
    N, H, W, C = x.shape
    w6, b = p["w"], p["b"]                                     # (6,6,C,Cout)
    cout = w6.shape[-1]
    # phase (py,px) uses taps w6[2*dy+1-py, 2*dx+1-px]; out channel co*4+py*2+px
    wps = jnp.stack([w6[1::2, 1::2], w6[1::2, 0::2],
                     w6[0::2, 1::2], w6[0::2, 0::2]], axis=-1)  # (3,3,C,Cout,4)
    wps = wps.reshape(3, 3, C, cout * 4)
    bps = jnp.repeat(b, 4)
    y = conv_same({"w": wps, "b": bps}, x)
    return pixel_shuffle(y, 2)


# ----------------------------------------------------------------------------
# Module forward functions (mirror RNAN common.py structure)
# ----------------------------------------------------------------------------
def resblock_fwd(p, x, **kw):                 # common.ResBlock (res_scale = 1)
    return resblock_pallas(p, x, **kw)


def trunk_fwd(p, x):                          # common.TrunkBranch
    return resblock_fwd(p["rb2"], resblock_fwd(p["rb1"], x))


def mask_fwd(p, x):                           # (NL)MaskBranchDownUp
    h = nonlocal_pallas(p["nl"], x) if "nl" in p else x
    x_rb1 = resblock_fwd(p["rb1"], h)
    x_down = conv_down2(p["down"], x_rb1)
    x_rb2 = resblock_fwd(p["rb2b"], resblock_fwd(p["rb2a"], x_down))
    x_up = conv_tconv_up2(p["up"], x_rb2)
    # (x_rb1 + x_up) is fused into the prologue of RB3
    x_rb3 = resblock_fwd(p["rb3"], x_rb1, x2=x_up, prologue="add")
    return conv_same(p["c1x1"], x_rb3, act="sigmoid")


def att_fwd(p, x):                            # (NL)ResAttModuleDownUpPlus
    rb1 = resblock_fwd(p["ra_rb1"], x)
    tx = trunk_fwd(p["trunk"], rb1)
    mx = mask_fwd(p["mask"], rb1)
    # hx = tx * mx + rb1 is fused into the prologue of the first tail ResBlock
    hx = resblock_fwd(p["tail1"], tx, x2=mx, x3=rb1, prologue="mul_add")
    return resblock_fwd(p["tail2"], hx)


def group_fwd(p, x):                          # _ResGroup / _NLResGroup
    return conv_same(p["conv"], att_fwd(p["att"], x))


def rnlransr_forward(params, x_nchw):
    """RNLRANSR.forward. Input NCHW, output NCHW (scale-2 upsampled)."""
    x = jnp.transpose(x_nchw, (0, 2, 3, 1))                # -> NHWC
    mean = params["rgb_mean"]
    # MeanShift folds: sub_mean (identity 1x1 conv, bias -mean) fused exactly
    # into the head conv's prologue; add_mean folded into the tail conv bias.
    feats = conv_same(params["head"], x, add=-mean)        # sub_mean + head
    res = group_fwd(params["g_low"], feats)                # body_nl_low
    for gp in params["g_mid"]:                             # body (ResGroups)
        res = group_fwd(gp, res)
    res = conv_same(params["body_conv"], res)              # ... trailing conv
    res = group_fwd(params["g_high"], res)                 # body_nl_high
    t = conv_same(params["tail_up"], res, add=feats)       # (res+feats) fused
    t = pixel_shuffle(t, 2)                                # PixelShuffle(2)
    tout = params["tail_out"]
    out = conv_same({"w": tout["w"], "b": tout["b"] + mean}, t)  # + add_mean
    return jnp.transpose(out, (0, 3, 1, 2))                # -> NCHW


# ----------------------------------------------------------------------------
# Deterministic synthetic parameters
# ----------------------------------------------------------------------------
class ParamGen:
    def __init__(self, seed=0):
        self.key = jax.random.PRNGKey(seed)
        self.count = 0

    def normal(self, shape, scale):
        k = jax.random.fold_in(self.key, self.count)
        self.count += 1
        return scale * jax.random.normal(k, shape, jnp.float32)


def init_params(seed=0, n_feats=16, n_colors=3, n_resgroups=3, scale=2,
                rgb_range=1.0):
    pg = ParamGen(seed)
    nf = n_feats

    def conv_p(cin, cout, k):
        fan = cin * k * k
        return {"w": pg.normal((k, k, cin, cout), 0.2 / math.sqrt(fan)),
                "b": pg.normal((cout,), 0.01)}

    def rb_p():
        return {"c1": conv_p(nf, nf, 3), "c2": conv_p(nf, nf, 3)}

    def mask_p(nl):
        d = {}
        if nl:
            ci = nf // 2
            # NOTE: original code zero-inits W (identity non-local block at
            # init); small random weights actually exercise the attention path.
            d["nl"] = {"theta": conv_p(nf, ci, 1), "phi": conv_p(nf, ci, 1),
                       "g": conv_p(nf, ci, 1), "W": conv_p(ci, nf, 1)}
        d.update(rb1=rb_p(), down=conv_p(nf, nf, 3), rb2a=rb_p(), rb2b=rb_p(),
                 up=conv_p(nf, nf, 6), rb3=rb_p(), c1x1=conv_p(nf, nf, 1))
        return d

    def att_p(nl):
        return {"ra_rb1": rb_p(),
                "trunk": {"rb1": rb_p(), "rb2": rb_p()},
                "mask": mask_p(nl),
                "tail1": rb_p(), "tail2": rb_p()}

    def group_p(nl):
        return {"att": att_p(nl), "conv": conv_p(nf, nf, 3)}

    rgb_mean = (0.4488, 0.4371, 0.4040)   # DIV2K mean, rgb_std = (1, 1, 1)

    return {"rgb_mean": rgb_range * jnp.asarray(rgb_mean, jnp.float32),
            "head": conv_p(n_colors, nf, 3),
            "g_low": group_p(True),
            "g_mid": [group_p(False) for _ in range(n_resgroups - 2)],
            "body_conv": conv_p(nf, nf, 3),
            "g_high": group_p(True),
            "tail_up": conv_p(nf, (scale ** 2) * nf, 3),
            "tail_out": conv_p(nf, n_colors, 3)}


# ----------------------------------------------------------------------------
if __name__ == "__main__":
    # args: n_resgroups=3, n_feats=16, n_colors=3, scale=[2], rgb_range=1.0,
    #       data_train='DIV2K'
    key = jax.random.PRNGKey(0)
    x = jax.random.uniform(key, (2, 3, 16, 16), jnp.float32)   # NCHW like PyTorch
    params = init_params(seed=0, n_feats=16, n_colors=3, n_resgroups=3, scale=2)

    fwd = jax.jit(rnlransr_forward)
    y = jax.block_until_ready(fwd(params, x))

    assert y.shape == (2, 3, 32, 32), y.shape                  # scale-2 SR output
    assert bool(jnp.all(jnp.isfinite(y)))
    print("KERNEL_OK")
</pallas_src>

<mosaic_0001>
module attributes {stable_mosaic.version = 11 : i64} {
  func.func @_conv_kernel(%arg0: i32, %arg1: i32, %arg2: memref<1x8x16x27xf32, #tpu.memory_space<vmem>>, %arg3: memref<27x16xf32, #tpu.memory_space<vmem>>, %arg4: memref<1x16xf32, #tpu.memory_space<vmem>>, %arg5: memref<1x8x16x16xf32, #tpu.memory_space<vmem>>) attributes {dimension_semantics = [#tpu.dimension_semantics<parallel>, #tpu.dimension_semantics<parallel>], iteration_bounds = array<i64: 2, 2>, scalar_prefetch = 0 : i64, scratch_operands = 0 : i64, tpu.core_type = #tpu.core_type<tc>, window_params = [{transform_indices = @transform_0, window_bounds = array<i64: 1, 8, 16, 27>}, {pipeline_mode = #tpu.pipeline_mode<synchronous>, transform_indices = @transform_1, window_bounds = array<i64: 27, 16>}, {pipeline_mode = #tpu.pipeline_mode<synchronous>, transform_indices = @transform_2, window_bounds = array<i64: 1, 16>}, {transform_indices = @transform_3, window_bounds = array<i64: 1, 8, 16, 16>}]} {
    %c0 = arith.constant 0 : index
    %c0_0 = arith.constant 0 : index
    %c0_1 = arith.constant 0 : index
    %c0_2 = arith.constant 0 : index
    %0 = vector.load %arg2[%c0, %c0_0, %c0_1, %c0_2] : memref<1x8x16x27xf32, #tpu.memory_space<vmem>>, vector<1x8x16x27xf32>
    %1 = vector.shape_cast %0 : vector<1x8x16x27xf32> to vector<8x16x27xf32>
    %2 = vector.shape_cast %1 : vector<8x16x27xf32> to vector<128x27xf32>
    %3 = arith.truncf %2 : vector<128x27xf32> to vector<128x27xbf16>
    %c0_3 = arith.constant 0 : index
    %c0_4 = arith.constant 0 : index
    %4 = vector.load %arg3[%c0_3, %c0_4] : memref<27x16xf32, #tpu.memory_space<vmem>>, vector<27x16xf32>
    %5 = arith.truncf %4 : vector<27x16xf32> to vector<27x16xbf16>
    %cst = arith.constant dense<0.000000e+00> : vector<128x16xf32>
    %6 = tpu.matmul %3, %5, %cst {dimension_numbers = #tpu.dot_dimension_numbers<[1], [0], [0], [1], [0, 0, 1, 1], [], []>} : vector<128x27xbf16>, vector<27x16xbf16>, vector<128x16xf32> -> vector<128x16xf32>
    %c0_5 = arith.constant 0 : index
    %c0_6 = arith.constant 0 : index
    %7 = vector.load %arg4[%c0_5, %c0_6] : memref<1x16xf32, #tpu.memory_space<vmem>>, vector<1x16xf32>
    %8 = vector.broadcast %7 : vector<1x16xf32> to vector<128x16xf32>
    %9 = arith.addf %6, %8 : vector<128x16xf32>
    %10 = vector.shape_cast %9 : vector<128x16xf32> to vector<8x16x16xf32>
    %c0_7 = arith.constant 0 : index
    %c0_8 = arith.constant 0 : index
    %c0_9 = arith.constant 0 : index
    %c0_10 = arith.constant 0 : index
    %11 = vector.load %arg5[%c0_7, %c0_8, %c0_9, %c0_10] : memref<1x8x16x16xf32, #tpu.memory_space<vmem>>, vector<1x8x16x16xf32>
    %12 = vector.shape_cast %11 : vector<1x8x16x16xf32> to vector<8x16x16xf32>
    %13 = vector.shape_cast %10 : vector<8x16x16xf32> to vector<1x8x16x16xf32>
    tpu.vector_store %arg5[%c0_7, %c0_8, %c0_9, %c0_10], %13 {strides = array<i32>} : memref<1x8x16x16xf32, #tpu.memory_space<vmem>>, vector<1x8x16x16xf32>,
    return
  }
  func.func @transform_0(%arg0: i32, %arg1: i32) -> (i32, i32, i32, i32) {
    %c0_i32 = arith.constant 0 : i32
    %c0_i32_0 = arith.constant 0 : i32
    %c0_i32_1 = arith.constant 0 : i32
    return %arg0, %arg1, %c0_i32, %c0_i32_0 : i32, i32, i32, i32
  }
  func.func @transform_1(%arg0: i32, %arg1: i32) -> (i32, i32) {
    %c0_i32 = arith.constant 0 : i32
    %c0_i32_0 = arith.constant 0 : i32
    %c0_i32_1 = arith.constant 0 : i32
    return %c0_i32, %c0_i32_0 : i32, i32
  }
  func.func @transform_2(%arg0: i32, %arg1: i32) -> (i32, i32) {
    %c0_i32 = arith.constant 0 : i32
    %c0_i32_0 = arith.constant 0 : i32
    %c0_i32_1 = arith.constant 0 : i32
    return %c0_i32, %c0_i32_0 : i32, i32
  }
  func.func @transform_3(%arg0: i32, %arg1: i32) -> (i32, i32, i32, i32) {
    %c0_i32 = arith.constant 0 : i32
    %c0_i32_0 = arith.constant 0 : i32
    %c0_i32_1 = arith.constant 0 : i32
    return %arg0, %arg1, %c0_i32, %c0_i32_0 : i32, i32, i32, i32
  }
}

module attributes {stable_mosaic.version = 11 : i64} {
  func.func @_resblock_kernel(%arg0: i32, %arg1: memref<1x16x16x144xf32, #tpu.memory_space<vmem>>, %arg2: memref<1x16x16x16xf32, #tpu.memory_space<vmem>>, %arg3: memref<144x16xf32, #tpu.memory_space<vmem>>, %arg4: memref<1x16xf32, #tpu.memory_space<vmem>>, %arg5: memref<3x3x16x16xf32, #tpu.memory_space<vmem>>, %arg6: memref<1x16xf32, #tpu.memory_space<vmem>>, %arg7: memref<1x16x16x16xf32, #tpu.memory_space<vmem>>, %arg8: memref<18x18x16xf32, #tpu.memory_space<vmem>>) attributes {dimension_semantics = [#tpu.dimension_semantics<parallel>], iteration_bounds = array<i64: 2>, scalar_prefetch = 0 : i64, scratch_operands = 1 : i64, tpu.core_type = #tpu.core_type<tc>, window_params = [{transform_indices = @transform_0, window_bounds = array<i64: 1, 16, 16, 144>}, {transform_indices = @transform_1, window_bounds = array<i64: 1, 16, 16, 16>}, {pipeline_mode = #tpu.pipeline_mode<synchronous>, transform_indices = @transform_2, window_bounds = array<i64: 144, 16>}, {pipeline_mode = #tpu.pipeline_mode<synchronous>, transform_indices = @transform_3, window_bounds = array<i64: 1, 16>}, {pipeline_mode = #tpu.pipeline_mode<synchronous>, transform_indices = @transform_4, window_bounds = array<i64: 3, 3, 16, 16>}, {pipeline_mode = #tpu.pipeline_mode<synchronous>, transform_indices = @transform_5, window_bounds = array<i64: 1, 16>}, {transform_indices = @transform_6, window_bounds = array<i64: 1, 16, 16, 16>}]} {
    %c0 = arith.constant 0 : index
    %c0_0 = arith.constant 0 : index
    %c0_1 = arith.constant 0 : index
    %c0_2 = arith.constant 0 : index
    %0 = vector.load %arg1[%c0, %c0_0, %c0_1, %c0_2] : memref<1x16x16x144xf32, #tpu.memory_space<vmem>>, vector<1x16x16x144xf32>
    %1 = vector.shape_cast %0 : vector<1x16x16x144xf32> to vector<16x16x144xf32>
    %2 = vector.shape_cast %1 : vector<16x16x144xf32> to vector<256x144xf32>
    %3 = arith.truncf %2 : vector<256x144xf32> to vector<256x144xbf16>
    %c0_3 = arith.constant 0 : index
    %c0_4 = arith.constant 0 : index
    %4 = vector.load %arg3[%c0_3, %c0_4] : memref<144x16xf32, #tpu.memory_space<vmem>>, vector<144x16xf32>
    %5 = arith.truncf %4 : vector<144x16xf32> to vector<144x16xbf16>
    %cst = arith.constant dense<0.000000e+00> : vector<256x16xf32>
    %6 = tpu.matmul %3, %5, %cst {dimension_numbers = #tpu.dot_dimension_numbers<[1], [0], [0], [1], [0, 0, 1, 1], [], []>} : vector<256x144xbf16>, vector<144x16xbf16>, vector<256x16xf32> -> vector<256x16xf32>
    %c0_5 = arith.constant 0 : index
    %c0_6 = arith.constant 0 : index
    %7 = vector.load %arg4[%c0_5, %c0_6] : memref<1x16xf32, #tpu.memory_space<vmem>>, vector<1x16xf32>
    %8 = vector.broadcast %7 : vector<1x16xf32> to vector<256x16xf32>
    %9 = arith.addf %6, %8 : vector<256x16xf32>
    %cst_7 = arith.constant 0.000000e+00 : f32
    %10 = vector.broadcast %cst_7 : f32 to vector<256x16xf32>
    %11 = arith.maximumf %9, %10 : vector<256x16xf32>
    %cst_8 = arith.constant 0.000000e+00 : f32
    %12 = vector.broadcast %cst_8 : f32 to vector<18x18x16xf32>
    %c0_9 = arith.constant 0 : index
    %c0_10 = arith.constant 0 : index
    %c0_11 = arith.constant 0 : index
    %13 = vector.load %arg8[%c0_9, %c0_10, %c0_11] : memref<18x18x16xf32, #tpu.memory_space<vmem>>, vector<18x18x16xf32>
    tpu.vector_store %arg8[%c0_9, %c0_10, %c0_11], %12 {strides = array<i32>} : memref<18x18x16xf32, #tpu.memory_space<vmem>>, vector<18x18x16xf32>,
    %14 = vector.shape_cast %11 : vector<256x16xf32> to vector<16x16x16xf32>
    %c1 = arith.constant 1 : index
    %c1_12 = arith.constant 1 : index
    %c0_13 = arith.constant 0 : index
    %15 = vector.load %arg8[%c1, %c1_12, %c0_13] : memref<18x18x16xf32, #tpu.memory_space<vmem>>, vector<16x16x16xf32>
    tpu.vector_store %arg8[%c1, %c1_12, %c0_13], %14 {strides = array<i32>} : memref<18x18x16xf32, #tpu.memory_space<vmem>>, vector<16x16x16xf32>,
    %c0_14 = arith.constant 0 : index
    %c0_15 = arith.constant 0 : index
    %c0_16 = arith.constant 0 : index
    %16 = vector.load %arg8[%c0_14, %c0_15, %c0_16] : memref<18x18x16xf32, #tpu.memory_space<vmem>>, vector<16x16x16xf32>
    %17 = arith.truncf %16 : vector<16x16x16xf32> to vector<16x16x16xbf16>
    %18 = vector.shape_cast %17 : vector<16x16x16xbf16> to vector<256x16xbf16>
    %c0_17 = arith.constant 0 : index
    %c0_18 = arith.constant 0 : index
    %c0_19 = arith.constant 0 : index
    %c0_20 = arith.constant 0 : index
    %19 = vector.load %arg5[%c0_17, %c0_18, %c0_19, %c0_20] : memref<3x3x16x16xf32, #tpu.memory_space<vmem>>, vector<1x1x16x16xf32>
    %20 = vector.shape_cast %19 : vector<1x1x16x16xf32> to vector<16x16xf32>
    %21 = arith.truncf %20 : vector<16x16xf32> to vector<16x16xbf16>
    %cst_21 = arith.constant dense<0.000000e+00> : vector<256x16xf32>
    %22 = tpu.matmul %18, %21, %cst_21 {dimension_numbers = #tpu.dot_dimension_numbers<[1], [0], [0], [1], [0, 0, 1, 1], [], []>} : vector<256x16xbf16>, vector<16x16xbf16>, vector<256x16xf32> -> vector<256x16xf32>
    %c0_22 = arith.constant 0 : index
    %c1_23 = arith.constant 1 : index
    %c0_24 = arith.constant 0 : index
    %23 = vector.load %arg8[%c0_22, %c1_23, %c0_24] : memref<18x18x16xf32, #tpu.memory_space<vmem>>, vector<16x16x16xf32>
    %24 = arith.truncf %23 : vector<16x16x16xf32> to vector<16x16x16xbf16>
    %25 = vector.shape_cast %24 : vector<16x16x16xbf16> to vector<256x16xbf16>
    %c0_25 = arith.constant 0 : index
    %c1_26 = arith.constant 1 : index
    %c0_27 = arith.constant 0 : index
    %c0_28 = arith.constant 0 : index
    %26 = vector.load %arg5[%c0_25, %c1_26, %c0_27, %c0_28] : memref<3x3x16x16xf32, #tpu.memory_space<vmem>>, vector<1x1x16x16xf32>
    %27 = vector.shape_cast %26 : vector<1x1x16x16xf32> to vector<16x16xf32>
    %28 = arith.truncf %27 : vector<16x16xf32> to vector<16x16xbf16>
    %cst_29 = arith.constant dense<0.000000e+00> : vector<256x16xf32>
    %29 = tpu.matmul %25, %28, %cst_29 {dimension_numbers = #tpu.dot_dimension_numbers<[1], [0], [0], [1], [0, 0, 1, 1], [], []>} : vector<256x16xbf16>, vector<16x16xbf16>, vector<256x16xf32> -> vector<256x16xf32>
    %30 = arith.addf %22, %29 : vector<256x16xf32>
    %c0_30 = arith.constant 0 : index
    %c2 = arith.constant 2 : index
    %c0_31 = arith.constant 0 : index
    %31 = vector.load %arg8[%c0_30, %c2, %c0_31] : memref<18x18x16xf32, #tpu.memory_space<vmem>>, vector<16x16x16xf32>
    %32 = arith.truncf %31 : vector<16x16x16xf32> to vector<16x16x16xbf16>
    %33 = vector.shape_cast %32 : vector<16x16x16xbf16> to vector<256x16xbf16>
    %c0_32 = arith.constant 0 : index
    %c2_33 = arith.constant 2 : index
    %c0_34 = arith.constant 0 : index
    %c0_35 = arith.constant 0 : index
    %34 = vector.load %arg5[%c0_32, %c2_33, %c0_34, %c0_35] : memref<3x3x16x16xf32, #tpu.memory_space<vmem>>, vector<1x1x16x16xf32>
    %35 = vector.shape_cast %34 : vector<1x1x16x16xf32> to vector<16x16xf32>
    %36 = arith.truncf %35 : vector<16x16xf32> to vector<16x16xbf16>
    %cst_36 = arith.constant dense<0.000000e+00> : vector<256x16xf32>
    %37 = tpu.matmul %33, %36, %cst_36 {dimension_numbers = #tpu.dot_dimension_numbers<[1], [0], [0], [1], [0, 0, 1, 1], [], []>} : vector<256x16xbf16>, vector<16x16xbf16>, vector<256x16xf32> -> vector<256x16xf32>
    %38 = arith.addf %30, %37 : vector<256x16xf32>
    %c1_37 = arith.constant 1 : index
    %c0_38 = arith.constant 0 : index
    %c0_39 = arith.constant 0 : index
    %39 = vector.load %arg8[%c1_37, %c0_38, %c0_39] : memref<18x18x16xf32, #tpu.memory_space<vmem>>, vector<16x16x16xf32>
    %40 = arith.truncf %39 : vector<16x16x16xf32> to vector<16x16x16xbf16>
    %41 = vector.shape_cast %40 : vector<16x16x16xbf16> to vector<256x16xbf16>
    %c1_40 = arith.constant 1 : index
    %c0_41 = arith.constant 0 : index
    %c0_42 = arith.constant 0 : index
    %c0_43 = arith.constant 0 : index
    %42 = vector.load %arg5[%c1_40, %c0_41, %c0_42, %c0_43] : memref<3x3x16x16xf32, #tpu.memory_space<vmem>>, vector<1x1x16x16xf32>
    %43 = vector.shape_cast %42 : vector<1x1x16x16xf32> to vector<16x16xf32>
    %44 = arith.truncf %43 : vector<16x16xf32> to vector<16x16xbf16>
    %cst_44 = arith.constant dense<0.000000e+00> : vector<256x16xf32>
    %45 = tpu.matmul %41, %44, %cst_44 {dimension_numbers = #tpu.dot_dimension_numbers<[1], [0], [0], [1], [0, 0, 1, 1], [], []>} : vector<256x16xbf16>, vector<16x16xbf16>, vector<256x16xf32> -> vector<256x16xf32>
    %46 = arith.addf %38, %45 : vector<256x16xf32>
    %c1_45 = arith.constant 1 : index
    %c1_46 = arith.constant 1 : index
    %c0_47 = arith.constant 0 : index
    %47 = vector.load %arg8[%c1_45, %c1_46, %c0_47] : memref<18x18x16xf32, #tpu.memory_space<vmem>>, vector<16x16x16xf32>
    %48 = arith.truncf %47 : vector<16x16x16xf32> to vector<16x16x16xbf16>
    %49 = vector.shape_cast %48 : vector<16x16x16xbf16> to vector<256x16xbf16>
    %c1_48 = arith.constant 1 : index
    %c1_49 = arith.constant 1 : index
    %c0_50 = arith.constant 0 : index
    %c0_51 = arith.constant 0 : index
    %50 = vector.load %arg5[%c1_48, %c1_49, %c0_50, %c0_51] : memref<3x3x16x16xf32, #tpu.memory_space<vmem>>, vector<1x1x16x16xf32>
    %51 = vector.shape_cast %50 : vector<1x1x16x16xf32> to vector<16x16xf32>
    %52 = arith.truncf %51 : vector<16x16xf32> to vector<16x16xbf16>
    %cst_52 = arith.constant dense<0.000000e+00> : vector<256x16xf32>
    %53 = tpu.matmul %49, %52, %cst_52 {dimension_numbers = #tpu.dot_dimension_numbers<[1], [0], [0], [1], [0, 0, 1, 1], [], []>} : vector<256x16xbf16>, vector<16x16xbf16>, vector<256x16xf32> -> vector<256x16xf32>
    %54 = arith.addf %46, %53 : vector<256x16xf32>
    %c1_53 = arith.constant 1 : index
    %c2_54 = arith.constant 2 : index
    %c0_55 = arith.constant 0 : index
    %55 = vector.load %arg8[%c1_53, %c2_54, %c0_55] : memref<18x18x16xf32, #tpu.memory_space<vmem>>, vector<16x16x16xf32>
    %56 = arith.truncf %55 : vector<16x16x16xf32> to vector<16x16x16xbf16>
    %57 = vector.shape_cast %56 : vector<16x16x16xbf16> to vector<256x16xbf16>
    %c1_56 = arith.constant 1 : index
    %c2_57 = arith.constant 2 : index
    %c0_58 = arith.constant 0 : index
    %c0_59 = arith.constant 0 : index
    %58 = vector.load %arg5[%c1_56, %c2_57, %c0_58, %c0_59] : memref<3x3x16x16xf32, #tpu.memory_space<vmem>>, vector<1x1x16x16xf32>
    %59 = vector.shape_cast %58 : vector<1x1x16x16xf32> to vector<16x16xf32>
    %60 = arith.truncf %59 : vector<16x16xf32> to vector<16x16xbf16>
    %cst_60 = arith.constant dense<0.000000e+00> : vector<256x16xf32>
    %61 = tpu.matmul %57, %60, %cst_60 {dimension_numbers = #tpu.dot_dimension_numbers<[1], [0], [0], [1], [0, 0, 1, 1], [], []>} : vector<256x16xbf16>, vector<16x16xbf16>, vector<256x16xf32> -> vector<256x16xf32>
    %62 = arith.addf %54, %61 : vector<256x16xf32>
    %c2_61 = arith.constant 2 : index
    %c0_62 = arith.constant 0 : index
    %c0_63 = arith.constant 0 : index
    %63 = vector.load %arg8[%c2_61, %c0_62, %c0_63] : memref<18x18x16xf32, #tpu.memory_space<vmem>>, vector<16x16x16xf32>
    %64 = arith.truncf %63 : vector<16x16x16xf32> to vector<16x16x16xbf16>
    %65 = vector.shape_cast %64 : vector<16x16x16xbf16> to vector<256x16xbf16>
    %c2_64 = arith.constant 2 : index
    %c0_65 = arith.constant 0 : index
    %c0_66 = arith.constant 0 : index
    %c0_67 = arith.constant 0 : index
    %66 = vector.load %arg5[%c2_64, %c0_65, %c0_66, %c0_67] : memref<3x3x16x16xf32, #tpu.memory_space<vmem>>, vector<1x1x16x16xf32>
    %67 = vector.shape_cast %66 : vector<1x1x16x16xf32> to vector<16x16xf32>
    %68 = arith.truncf %67 : vector<16x16xf32> to vector<16x16xbf16>
    %cst_68 = arith.constant dense<0.000000e+00> : vector<256x16xf32>
    %69 = tpu.matmul %65, %68, %cst_68 {dimension_numbers = #tpu.dot_dimension_numbers<[1], [0], [0], [1], [0, 0, 1, 1], [], []>} : vector<256x16xbf16>, vector<16x16xbf16>, vector<256x16xf32> -> vector<256x16xf32>
    %70 = arith.addf %62, %69 : vector<256x16xf32>
    %c2_69 = arith.constant 2 : index
    %c1_70 = arith.constant 1 : index
    %c0_71 = arith.constant 0 : index
    %71 = vector.load %arg8[%c2_69, %c1_70, %c0_71] : memref<18x18x16xf32, #tpu.memory_space<vmem>>, vector<16x16x16xf32>
    %72 = arith.truncf %71 : vector<16x16x16xf32> to vector<16x16x16xbf16>
    %73 = vector.shape_cast %72 : vector<16x16x16xbf16> to vector<256x16xbf16>
    %c2_72 = arith.constant 2 : index
    %c1_73 = arith.constant 1 : index
    %c0_74 = arith.constant 0 : index
    %c0_75 = arith.constant 0 : index
    %74 = vector.load %arg5[%c2_72, %c1_73, %c0_74, %c0_75] : memref<3x3x16x16xf32, #tpu.memory_space<vmem>>, vector<1x1x16x16xf32>
    %75 = vector.shape_cast %74 : vector<1x1x16x16xf32> to vector<16x16xf32>
    %76 = arith.truncf %75 : vector<16x16xf32> to vector<16x16xbf16>
    %cst_76 = arith.constant dense<0.000000e+00> : vector<256x16xf32>
    %77 = tpu.matmul %73, %76, %cst_76 {dimension_numbers = #tpu.dot_dimension_numbers<[1], [0], [0], [1], [0, 0, 1, 1], [], []>} : vector<256x16xbf16>, vector<16x16xbf16>, vector<256x16xf32> -> vector<256x16xf32>
    %78 = arith.addf %70, %77 : vector<256x16xf32>
    %c2_77 = arith.constant 2 : index
    %c2_78 = arith.constant 2 : index
    %c0_79 = arith.constant 0 : index
    %79 = vector.load %arg8[%c2_77, %c2_78, %c0_79] : memref<18x18x16xf32, #tpu.memory_space<vmem>>, vector<16x16x16xf32>
    %80 = arith.truncf %79 : vector<16x16x16xf32> to vector<16x16x16xbf16>
    %81 = vector.shape_cast %80 : vector<16x16x16xbf16> to vector<256x16xbf16>
    %c2_80 = arith.constant 2 : index
    %c2_81 = arith.constant 2 : index
    %c0_82 = arith.constant 0 : index
    %c0_83 = arith.constant 0 : index
    %82 = vector.load %arg5[%c2_80, %c2_81, %c0_82, %c0_83] : memref<3x3x16x16xf32, #tpu.memory_space<vmem>>, vector<1x1x16x16xf32>
    %83 = vector.shape_cast %82 : vector<1x1x16x16xf32> to vector<16x16xf32>
    %84 = arith.truncf %83 : vector<16x16xf32> to vector<16x16xbf16>
    %cst_84 = arith.constant dense<0.000000e+00> : vector<256x16xf32>
    %85 = tpu.matmul %81, %84, %cst_84 {dimension_numbers = #tpu.dot_dimension_numbers<[1], [0], [0], [1], [0, 0, 1, 1], [], []>} : vector<256x16xbf16>, vector<16x16xbf16>, vector<256x16xf32> -> vector<256x16xf32>
    %86 = arith.addf %78, %85 : vector<256x16xf32>
    %c0_85 = arith.constant 0 : index
    %c0_86 = arith.constant 0 : index
    %87 = vector.load %arg6[%c0_85, %c0_86] : memref<1x16xf32, #tpu.memory_space<vmem>>, vector<1x16xf32>
    %88 = vector.broadcast %87 : vector<1x16xf32> to vector<256x16xf32>
    %89 = arith.addf %86, %88 : vector<256x16xf32>
    %90 = vector.shape_cast %89 : vector<256x16xf32> to vector<16x16x16xf32>
    %c0_87 = arith.constant 0 : index
    %c0_88 = arith.constant 0 : index
    %c0_89 = arith.constant 0 : index
    %c0_90 = arith.constant 0 : index
    %91 = vector.load %arg2[%c0_87, %c0_88, %c0_89, %c0_90] : memref<1x16x16x16xf32, #tpu.memory_space<vmem>>, vector<1x16x16x16xf32>
    %92 = vector.shape_cast %91 : vector<1x16x16x16xf32> to vector<16x16x16xf32>
    %93 = arith.addf %90, %92 : vector<16x16x16xf32>
    %c0_91 = arith.constant 0 : index
    %c0_92 = arith.constant 0 : index
    %c0_93 = arith.constant 0 : index
    %c0_94 = arith.constant 0 : index
    %94 = vector.load %arg7[%c0_91, %c0_92, %c0_93, %c0_94] : memref<1x16x16x16xf32, #tpu.memory_space<vmem>>, vector<1x16x16x16xf32>
    %95 = vector.shape_cast %94 : vector<1x16x16x16xf32> to vector<16x16x16xf32>
    %96 = vector.shape_cast %93 : vector<16x16x16xf32> to vector<1x16x16x16xf32>
    tpu.vector_store %arg7[%c0_91, %c0_92, %c0_93, %c0_94], %96 {strides = array<i32>} : memref<1x16x16x16xf32, #tpu.memory_space<vmem>>, vector<1x16x16x16xf32>,
    return
  }
  func.func @transform_0(%arg0: i32) -> (i32, i32, i32, i32) {
    %c0_i32 = arith.constant 0 : i32
    %c0_i32_0 = arith.constant 0 : i32
    %c0_i32_1 = arith.constant 0 : i32
    %c0_i32_2 = arith.constant 0 : i32
    return %arg0, %c0_i32, %c0_i32_0, %c0_i32_1 : i32, i32, i32, i32
  }
  func.func @transform_1(%arg0: i32) -> (i32, i32, i32, i32) {
    %c0_i32 = arith.constant 0 : i32
    %c0_i32_0 = arith.constant 0 : i32
    %c0_i32_1 = arith.constant 0 : i32
    %c0_i32_2 = arith.constant 0 : i32
    return %arg0, %c0_i32, %c0_i32_0, %c0_i32_1 : i32, i32, i32, i32
  }
  func.func @transform_2(%arg0: i32) -> (i32, i32) {
    %c0_i32 = arith.constant 0 : i32
    %c0_i32_0 = arith.constant 0 : i32
    %c0_i32_1 = arith.constant 0 : i32
    return %c0_i32, %c0_i32_0 : i32, i32
  }
  func.func @transform_3(%arg0: i32) -> (i32, i32) {
    %c0_i32 = arith.constant 0 : i32
    %c0_i32_0 = arith.constant 0 : i32
    %c0_i32_1 = arith.constant 0 : i32
    return %c0_i32, %c0_i32_0 : i32, i32
  }
  func.func @transform_4(%arg0: i32) -> (i32, i32, i32, i32) {
    %c0_i32 = arith.constant 0 : i32
    %c0_i32_0 = arith.constant 0 : i32
    %c0_i32_1 = arith.constant 0 : i32
    %c0_i32_2 = arith.constant 0 : i32
    %c0_i32_3 = arith.constant 0 : i32
    return %c0_i32, %c0_i32_0, %c0_i32_1, %c0_i32_2 : i32, i32, i32, i32
  }
  func.func @transform_5(%arg0: i32) -> (i32, i32) {
    %c0_i32 = arith.constant 0 : i32
    %c0_i32_0 = arith.constant 0 : i32
    %c0_i32_1 = arith.constant 0 : i32
    return %c0_i32, %c0_i32_0 : i32, i32
  }
  func.func @transform_6(%arg0: i32) -> (i32, i32, i32, i32) {
    %c0_i32 = arith.constant 0 : i32
    %c0_i32_0 = arith.constant 0 : i32
    %c0_i32_1 = arith.constant 0 : i32
    %c0_i32_2 = arith.constant 0 : i32
    return %arg0, %c0_i32, %c0_i32_0, %c0_i32_1 : i32, i32, i32, i32
  }
}

module attributes {stable_mosaic.version = 11 : i64} {
  func.func @_nonlocal_kernel(%arg0: i32, %arg1: memref<1x16x16x16xf32, #tpu.memory_space<vmem>>, %arg2: memref<16x8xf32, #tpu.memory_space<vmem>>, %arg3: memref<1x8xf32, #tpu.memory_space<vmem>>, %arg4: memref<16x8xf32, #tpu.memory_space<vmem>>, %arg5: memref<1x8xf32, #tpu.memory_space<vmem>>, %arg6: memref<16x8xf32, #tpu.memory_space<vmem>>, %arg7: memref<1x8xf32, #tpu.memory_space<vmem>>, %arg8: memref<8x16xf32, #tpu.memory_space<vmem>>, %arg9: memref<1x16xf32, #tpu.memory_space<vmem>>, %arg10: memref<1x16x16x16xf32, #tpu.memory_space<vmem>>) attributes {dimension_semantics = [#tpu.dimension_semantics<parallel>], iteration_bounds = array<i64: 2>, scalar_prefetch = 0 : i64, scratch_operands = 0 : i64, tpu.core_type = #tpu.core_type<tc>, window_params = [{transform_indices = @transform_0, window_bounds = array<i64: 1, 16, 16, 16>}, {pipeline_mode = #tpu.pipeline_mode<synchronous>, transform_indices = @transform_1, window_bounds = array<i64: 16, 8>}, {pipeline_mode = #tpu.pipeline_mode<synchronous>, transform_indices = @transform_2, window_bounds = array<i64: 1, 8>}, {pipeline_mode = #tpu.pipeline_mode<synchronous>, transform_indices = @transform_3, window_bounds = array<i64: 16, 8>}, {pipeline_mode = #tpu.pipeline_mode<synchronous>, transform_indices = @transform_4, window_bounds = array<i64: 1, 8>}, {pipeline_mode = #tpu.pipeline_mode<synchronous>, transform_indices = @transform_5, window_bounds = array<i64: 16, 8>}, {pipeline_mode = #tpu.pipeline_mode<synchronous>, transform_indices = @transform_6, window_bounds = array<i64: 1, 8>}, {pipeline_mode = #tpu.pipeline_mode<synchronous>, transform_indices = @transform_7, window_bounds = array<i64: 8, 16>}, {pipeline_mode = #tpu.pipeline_mode<synchronous>, transform_indices = @transform_8, window_bounds = array<i64: 1, 16>}, {transform_indices = @transform_9, window_bounds = array<i64: 1, 16, 16, 16>}]} {
    %c0 = arith.constant 0 : index
    %c0_0 = arith.constant 0 : index
    %c0_1 = arith.constant 0 : index
    %c0_2 = arith.constant 0 : index
    %0 = vector.load %arg1[%c0, %c0_0, %c0_1, %c0_2] : memref<1x16x16x16xf32, #tpu.memory_space<vmem>>, vector<1x16x16x16xf32>
    %1 = vector.shape_cast %0 : vector<1x16x16x16xf32> to vector<16x16x16xf32>
    %2 = vector.shape_cast %1 : vector<16x16x16xf32> to vector<256x16xf32>
    %3 = arith.truncf %2 : vector<256x16xf32> to vector<256x16xbf16>
    %c0_3 = arith.constant 0 : index
    %c0_4 = arith.constant 0 : index
    %4 = vector.load %arg2[%c0_3, %c0_4] : memref<16x8xf32, #tpu.memory_space<vmem>>, vector<16x8xf32>
    %5 = arith.truncf %4 : vector<16x8xf32> to vector<16x8xbf16>
    %cst = arith.constant dense<0.000000e+00> : vector<256x8xf32>
    %6 = tpu.matmul %3, %5, %cst {dimension_numbers = #tpu.dot_dimension_numbers<[1], [0], [0], [1], [0, 0, 1, 1], [], []>} : vector<256x16xbf16>, vector<16x8xbf16>, vector<256x8xf32> -> vector<256x8xf32>
    %c0_5 = arith.constant 0 : index
    %c0_6 = arith.constant 0 : index
    %7 = vector.load %arg3[%c0_5, %c0_6] : memref<1x8xf32, #tpu.memory_space<vmem>>, vector<1x8xf32>
    %8 = vector.broadcast %7 : vector<1x8xf32> to vector<256x8xf32>
    %9 = arith.addf %6, %8 : vector<256x8xf32>
    %c0_7 = arith.constant 0 : index
    %c0_8 = arith.constant 0 : index
    %10 = vector.load %arg4[%c0_7, %c0_8] : memref<16x8xf32, #tpu.memory_space<vmem>>, vector<16x8xf32>
    %11 = arith.truncf %10 : vector<16x8xf32> to vector<16x8xbf16>
    %cst_9 = arith.constant dense<0.000000e+00> : vector<256x8xf32>
    %12 = tpu.matmul %3, %11, %cst_9 {dimension_numbers = #tpu.dot_dimension_numbers<[1], [0], [0], [1], [0, 0, 1, 1], [], []>} : vector<256x16xbf16>, vector<16x8xbf16>, vector<256x8xf32> -> vector<256x8xf32>
    %c0_10 = arith.constant 0 : index
    %c0_11 = arith.constant 0 : index
    %13 = vector.load %arg5[%c0_10, %c0_11] : memref<1x8xf32, #tpu.memory_space<vmem>>, vector<1x8xf32>
    %14 = vector.broadcast %13 : vector<1x8xf32> to vector<256x8xf32>
    %15 = arith.addf %12, %14 : vector<256x8xf32>
    %c0_12 = arith.constant 0 : index
    %c0_13 = arith.constant 0 : index
    %16 = vector.load %arg6[%c0_12, %c0_13] : memref<16x8xf32, #tpu.memory_space<vmem>>, vector<16x8xf32>
    %17 = arith.truncf %16 : vector<16x8xf32> to vector<16x8xbf16>
    %cst_14 = arith.constant dense<0.000000e+00> : vector<256x8xf32>
    %18 = tpu.matmul %3, %17, %cst_14 {dimension_numbers = #tpu.dot_dimension_numbers<[1], [0], [0], [1], [0, 0, 1, 1], [], []>} : vector<256x16xbf16>, vector<16x8xbf16>, vector<256x8xf32> -> vector<256x8xf32>
    %c0_15 = arith.constant 0 : index
    %c0_16 = arith.constant 0 : index
    %19 = vector.load %arg7[%c0_15, %c0_16] : memref<1x8xf32, #tpu.memory_space<vmem>>, vector<1x8xf32>
    %20 = vector.broadcast %19 : vector<1x8xf32> to vector<256x8xf32>
    %21 = arith.addf %18, %20 : vector<256x8xf32>
    %22 = arith.truncf %9 : vector<256x8xf32> to vector<256x8xbf16>
    %23 = arith.truncf %15 : vector<256x8xf32> to vector<256x8xbf16>
    %cst_17 = arith.constant dense<0.000000e+00> : vector<256x256xf32>
    %24 = tpu.matmul %22, %23, %cst_17 {dimension_numbers = #tpu.dot_dimension_numbers<[1], [1], [0], [0], [0, 0, 1, 0], [], []>} : vector<256x8xbf16>, vector<256x8xbf16>, vector<256x256xf32> -> vector<256x256xf32>
    %cst_18 = arith.constant dense<0xFF800000> : vector<256xf32>
    %25 = vector.multi_reduction <maximumf>, %24, %cst_18 [1] : vector<256x256xf32> to vector<256xf32>
    %26 = vector.shape_cast %25 : vector<256xf32> to vector<256x1xf32>
    %27 = vector.broadcast %26 : vector<256x1xf32> to vector<256x256xf32>
    %28 = arith.subf %24, %27 : vector<256x256xf32>
    %29 = math.exp %28 : vector<256x256xf32>
    %30 = arith.truncf %29 : vector<256x256xf32> to vector<256x256xbf16>
    %31 = arith.truncf %21 : vector<256x8xf32> to vector<256x8xbf16>
    %cst_19 = arith.constant dense<0.000000e+00> : vector<256x8xf32>
    %32 = tpu.matmul %30, %31, %cst_19 {dimension_numbers = #tpu.dot_dimension_numbers<[1], [0], [0], [1], [0, 0, 1, 1], [], []>} : vector<256x256xbf16>, vector<256x8xbf16>, vector<256x8xf32> -> vector<256x8xf32>
    %cst_20 = arith.constant dense<0.000000e+00> : vector<256xf32>
    %33 = vector.multi_reduction <add>, %29, %cst_20 [1] : vector<256x256xf32> to vector<256xf32>
    %34 = vector.shape_cast %33 : vector<256xf32> to vector<256x1xf32>
    %35 = tpu.reciprocal %34 {approx = true} : vector<256x1xf32> -> vector<256x1xf32>
    %36 = vector.broadcast %35 : vector<256x1xf32> to vector<256x8xf32>
    %37 = arith.mulf %32, %36 : vector<256x8xf32>
    %38 = arith.truncf %37 : vector<256x8xf32> to vector<256x8xbf16>
    %c0_21 = arith.constant 0 : index
    %c0_22 = arith.constant 0 : index
    %39 = vector.load %arg8[%c0_21, %c0_22] : memref<8x16xf32, #tpu.memory_space<vmem>>, vector<8x16xf32>
    %40 = arith.truncf %39 : vector<8x16xf32> to vector<8x16xbf16>
    %cst_23 = arith.constant dense<0.000000e+00> : vector<256x16xf32>
    %41 = tpu.matmul %38, %40, %cst_23 {dimension_numbers = #tpu.dot_dimension_numbers<[1], [0], [0], [1], [0, 0, 1, 1], [], []>} : vector<256x8xbf16>, vector<8x16xbf16>, vector<256x16xf32> -> vector<256x16xf32>
    %c0_24 = arith.constant 0 : index
    %c0_25 = arith.constant 0 : index
    %42 = vector.load %arg9[%c0_24, %c0_25] : memref<1x16xf32, #tpu.memory_space<vmem>>, vector<1x16xf32>
    %43 = vector.broadcast %42 : vector<1x16xf32> to vector<256x16xf32>
    %44 = arith.addf %41, %43 : vector<256x16xf32>
    %45 = arith.addf %44, %2 : vector<256x16xf32>
    %46 = vector.shape_cast %45 : vector<256x16xf32> to vector<16x16x16xf32>
    %c0_26 = arith.constant 0 : index
    %c0_27 = arith.constant 0 : index
    %c0_28 = arith.constant 0 : index
    %c0_29 = arith.constant 0 : index
    %47 = vector.load %arg10[%c0_26, %c0_27, %c0_28, %c0_29] : memref<1x16x16x16xf32, #tpu.memory_space<vmem>>, vector<1x16x16x16xf32>
    %48 = vector.shape_cast %47 : vector<1x16x16x16xf32> to vector<16x16x16xf32>
    %49 = vector.shape_cast %46 : vector<16x16x16xf32> to vector<1x16x16x16xf32>
    tpu.vector_store %arg10[%c0_26, %c0_27, %c0_28, %c0_29], %49 {strides = array<i32>} : memref<1x16x16x16xf32, #tpu.memory_space<vmem>>, vector<1x16x16x16xf32>,
    return
  }
  func.func @transform_0(%arg0: i32) -> (i32, i32, i32, i32) {
    %c0_i32 = arith.constant 0 : i32
    %c0_i32_0 = arith.constant 0 : i32
    %c0_i32_1 = arith.constant 0 : i32
    %c0_i32_2 = arith.constant 0 : i32
    return %arg0, %c0_i32, %c0_i32_0, %c0_i32_1 : i32, i32, i32, i32
  }
  func.func @transform_1(%arg0: i32) -> (i32, i32) {
    %c0_i32 = arith.constant 0 : i32
    %c0_i32_0 = arith.constant 0 : i32
    %c0_i32_1 = arith.constant 0 : i32
    return %c0_i32, %c0_i32_0 : i32, i32
  }
  func.func @transform_2(%arg0: i32) -> (i32, i32) {
    %c0_i32 = arith.constant 0 : i32
    %c0_i32_0 = arith.constant 0 : i32
    %c0_i32_1 = arith.constant 0 : i32
    return %c0_i32, %c0_i32_0 : i32, i32
  }
  func.func @transform_3(%arg0: i32) -> (i32, i32) {
    %c0_i32 = arith.constant 0 : i32
    %c0_i32_0 = arith.constant 0 : i32
    %c0_i32_1 = arith.constant 0 : i32
    return %c0_i32, %c0_i32_0 : i32, i32
  }
  func.func @transform_4(%arg0: i32) -> (i32, i32) {
    %c0_i32 = arith.constant 0 : i32
    %c0_i32_0 = arith.constant 0 : i32
    %c0_i32_1 = arith.constant 0 : i32
    return %c0_i32, %c0_i32_0 : i32, i32
  }
  func.func @transform_5(%arg0: i32) -> (i32, i32) {
    %c0_i32 = arith.constant 0 : i32
    %c0_i32_0 = arith.constant 0 : i32
    %c0_i32_1 = arith.constant 0 : i32
    return %c0_i32, %c0_i32_0 : i32, i32
  }
  func.func @transform_6(%arg0: i32) -> (i32, i32) {
    %c0_i32 = arith.constant 0 : i32
    %c0_i32_0 = arith.constant 0 : i32
    %c0_i32_1 = arith.constant 0 : i32
    return %c0_i32, %c0_i32_0 : i32, i32
  }
  func.func @transform_7(%arg0: i32) -> (i32, i32) {
    %c0_i32 = arith.constant 0 : i32
    %c0_i32_0 = arith.constant 0 : i32
    %c0_i32_1 = arith.constant 0 : i32
    return %c0_i32, %c0_i32_0 : i32, i32
  }
  func.func @transform_8(%arg0: i32) -> (i32, i32) {
    %c0_i32 = arith.constant 0 : i32
    %c0_i32_0 = arith.constant 0 : i32
    %c0_i32_1 = arith.constant 0 : i32
    return %c0_i32, %c0_i32_0 : i32, i32
  }
  func.func @transform_9(%arg0: i32) -> (i32, i32, i32, i32) {
    %c0_i32 = arith.constant 0 : i32
    %c0_i32_0 = arith.constant 0 : i32
    %c0_i32_1 = arith.constant 0 : i32
    %c0_i32_2 = arith.constant 0 : i32
    return %arg0, %c0_i32, %c0_i32_0, %c0_i32_1 : i32, i32, i32, i32
  }
}

module attributes {stable_mosaic.version = 11 : i64} {
  func.func @_conv_kernel(%arg0: i32, %arg1: i32, %arg2: memref<1x8x8x144xf32, #tpu.memory_space<vmem>>, %arg3: memref<144x16xf32, #tpu.memory_space<vmem>>, %arg4: memref<1x16xf32, #tpu.memory_space<vmem>>, %arg5: memref<1x8x8x16xf32, #tpu.memory_space<vmem>>) attributes {dimension_semantics = [#tpu.dimension_semantics<parallel>, #tpu.dimension_semantics<parallel>], iteration_bounds = array<i64: 2, 1>, scalar_prefetch = 0 : i64, scratch_operands = 0 : i64, tpu.core_type = #tpu.core_type<tc>, window_params = [{transform_indices = @transform_0, window_bounds = array<i64: 1, 8, 8, 144>}, {pipeline_mode = #tpu.pipeline_mode<synchronous>, transform_indices = @transform_1, window_bounds = array<i64: 144, 16>}, {pipeline_mode = #tpu.pipeline_mode<synchronous>, transform_indices = @transform_2, window_bounds = array<i64: 1, 16>}, {transform_indices = @transform_3, window_bounds = array<i64: 1, 8, 8, 16>}]} {
    %c0 = arith.constant 0 : index
    %c0_0 = arith.constant 0 : index
    %c0_1 = arith.constant 0 : index
    %c0_2 = arith.constant 0 : index
    %0 = vector.load %arg2[%c0, %c0_0, %c0_1, %c0_2] : memref<1x8x8x144xf32, #tpu.memory_space<vmem>>, vector<1x8x8x144xf32>
    %1 = vector.shape_cast %0 : vector<1x8x8x144xf32> to vector<8x8x144xf32>
    %2 = vector.shape_cast %1 : vector<8x8x144xf32> to vector<64x144xf32>
    %3 = arith.truncf %2 : vector<64x144xf32> to vector<64x144xbf16>
    %c0_3 = arith.constant 0 : index
    %c0_4 = arith.constant 0 : index
    %4 = vector.load %arg3[%c0_3, %c0_4] : memref<144x16xf32, #tpu.memory_space<vmem>>, vector<144x16xf32>
    %5 = arith.truncf %4 : vector<144x16xf32> to vector<144x16xbf16>
    %cst = arith.constant dense<0.000000e+00> : vector<64x16xf32>
    %6 = tpu.matmul %3, %5, %cst {dimension_numbers = #tpu.dot_dimension_numbers<[1], [0], [0], [1], [0, 0, 1, 1], [], []>} : vector<64x144xbf16>, vector<144x16xbf16>, vector<64x16xf32> -> vector<64x16xf32>
    %c0_5 = arith.constant 0 : index
    %c0_6 = arith.constant 0 : index
    %7 = vector.load %arg4[%c0_5, %c0_6] : memref<1x16xf32, #tpu.memory_space<vmem>>, vector<1x16xf32>
    %8 = vector.broadcast %7 : vector<1x16xf32> to vector<64x16xf32>
    %9 = arith.addf %6, %8 : vector<64x16xf32>
    %10 = vector.shape_cast %9 : vector<64x16xf32> to vector<8x8x16xf32>
    %c0_7 = arith.constant 0 : index
    %c0_8 = arith.constant 0 : index
    %c0_9 = arith.constant 0 : index
    %c0_10 = arith.constant 0 : index
    %11 = vector.load %arg5[%c0_7, %c0_8, %c0_9, %c0_10] : memref<1x8x8x16xf32, #tpu.memory_space<vmem>>, vector<1x8x8x16xf32>
    %12 = vector.shape_cast %11 : vector<1x8x8x16xf32> to vector<8x8x16xf32>
    %13 = vector.shape_cast %10 : vector<8x8x16xf32> to vector<1x8x8x16xf32>
    tpu.vector_store %arg5[%c0_7, %c0_8, %c0_9, %c0_10], %13 {strides = array<i32>} : memref<1x8x8x16xf32, #tpu.memory_space<vmem>>, vector<1x8x8x16xf32>,
    return
  }
  func.func @transform_0(%arg0: i32, %arg1: i32) -> (i32, i32, i32, i32) {
    %c0_i32 = arith.constant 0 : i32
    %c0_i32_0 = arith.constant 0 : i32
    %c0_i32_1 = arith.constant 0 : i32
    return %arg0, %arg1, %c0_i32, %c0_i32_0 : i32, i32, i32, i32
  }
  func.func @transform_1(%arg0: i32, %arg1: i32) -> (i32, i32) {
    %c0_i32 = arith.constant 0 : i32
    %c0_i32_0 = arith.constant 0 : i32
    %c0_i32_1 = arith.constant 0 : i32
    return %c0_i32, %c0_i32_0 : i32, i32
  }
  func.func @transform_2(%arg0: i32, %arg1: i32) -> (i32, i32) {
    %c0_i32 = arith.constant 0 : i32
    %c0_i32_0 = arith.constant 0 : i32
    %c0_i32_1 = arith.constant 0 : i32
    return %c0_i32, %c0_i32_0 : i32, i32
  }
  func.func @transform_3(%arg0: i32, %arg1: i32) -> (i32, i32, i32, i32) {
    %c0_i32 = arith.constant 0 : i32
    %c0_i32_0 = arith.constant 0 : i32
    %c0_i32_1 = arith.constant 0 : i32
    return %arg0, %arg1, %c0_i32, %c0_i32_0 : i32, i32, i32, i32
  }
}

module attributes {stable_mosaic.version = 11 : i64} {
  func.func @_resblock_kernel(%arg0: i32, %arg1: memref<1x8x8x144xf32, #tpu.memory_space<vmem>>, %arg2: memref<1x8x8x16xf32, #tpu.memory_space<vmem>>, %arg3: memref<144x16xf32, #tpu.memory_space<vmem>>, %arg4: memref<1x16xf32, #tpu.memory_space<vmem>>, %arg5: memref<3x3x16x16xf32, #tpu.memory_space<vmem>>, %arg6: memref<1x16xf32, #tpu.memory_space<vmem>>, %arg7: memref<1x8x8x16xf32, #tpu.memory_space<vmem>>, %arg8: memref<10x10x16xf32, #tpu.memory_space<vmem>>) attributes {dimension_semantics = [#tpu.dimension_semantics<parallel>], iteration_bounds = array<i64: 2>, scalar_prefetch = 0 : i64, scratch_operands = 1 : i64, tpu.core_type = #tpu.core_type<tc>, window_params = [{transform_indices = @transform_0, window_bounds = array<i64: 1, 8, 8, 144>}, {transform_indices = @transform_1, window_bounds = array<i64: 1, 8, 8, 16>}, {pipeline_mode = #tpu.pipeline_mode<synchronous>, transform_indices = @transform_2, window_bounds = array<i64: 144, 16>}, {pipeline_mode = #tpu.pipeline_mode<synchronous>, transform_indices = @transform_3, window_bounds = array<i64: 1, 16>}, {pipeline_mode = #tpu.pipeline_mode<synchronous>, transform_indices = @transform_4, window_bounds = array<i64: 3, 3, 16, 16>}, {pipeline_mode = #tpu.pipeline_mode<synchronous>, transform_indices = @transform_5, window_bounds = array<i64: 1, 16>}, {transform_indices = @transform_6, window_bounds = array<i64: 1, 8, 8, 16>}]} {
    %c0 = arith.constant 0 : index
    %c0_0 = arith.constant 0 : index
    %c0_1 = arith.constant 0 : index
    %c0_2 = arith.constant 0 : index
    %0 = vector.load %arg1[%c0, %c0_0, %c0_1, %c0_2] : memref<1x8x8x144xf32, #tpu.memory_space<vmem>>, vector<1x8x8x144xf32>
    %1 = vector.shape_cast %0 : vector<1x8x8x144xf32> to vector<8x8x144xf32>
    %2 = vector.shape_cast %1 : vector<8x8x144xf32> to vector<64x144xf32>
    %3 = arith.truncf %2 : vector<64x144xf32> to vector<64x144xbf16>
    %c0_3 = arith.constant 0 : index
    %c0_4 = arith.constant 0 : index
    %4 = vector.load %arg3[%c0_3, %c0_4] : memref<144x16xf32, #tpu.memory_space<vmem>>, vector<144x16xf32>
    %5 = arith.truncf %4 : vector<144x16xf32> to vector<144x16xbf16>
    %cst = arith.constant dense<0.000000e+00> : vector<64x16xf32>
    %6 = tpu.matmul %3, %5, %cst {dimension_numbers = #tpu.dot_dimension_numbers<[1], [0], [0], [1], [0, 0, 1, 1], [], []>} : vector<64x144xbf16>, vector<144x16xbf16>, vector<64x16xf32> -> vector<64x16xf32>
    %c0_5 = arith.constant 0 : index
    %c0_6 = arith.constant 0 : index
    %7 = vector.load %arg4[%c0_5, %c0_6] : memref<1x16xf32, #tpu.memory_space<vmem>>, vector<1x16xf32>
    %8 = vector.broadcast %7 : vector<1x16xf32> to vector<64x16xf32>
    %9 = arith.addf %6, %8 : vector<64x16xf32>
    %cst_7 = arith.constant 0.000000e+00 : f32
    %10 = vector.broadcast %cst_7 : f32 to vector<64x16xf32>
    %11 = arith.maximumf %9, %10 : vector<64x16xf32>
    %cst_8 = arith.constant 0.000000e+00 : f32
    %12 = vector.broadcast %cst_8 : f32 to vector<10x10x16xf32>
    %c0_9 = arith.constant 0 : index
    %c0_10 = arith.constant 0 : index
    %c0_11 = arith.constant 0 : index
    %13 = vector.load %arg8[%c0_9, %c0_10, %c0_11] : memref<10x10x16xf32, #tpu.memory_space<vmem>>, vector<10x10x16xf32>
    tpu.vector_store %arg8[%c0_9, %c0_10, %c0_11], %12 {strides = array<i32>} : memref<10x10x16xf32, #tpu.memory_space<vmem>>, vector<10x10x16xf32>,
    %14 = vector.shape_cast %11 : vector<64x16xf32> to vector<8x8x16xf32>
    %c1 = arith.constant 1 : index
    %c1_12 = arith.constant 1 : index
    %c0_13 = arith.constant 0 : index
    %15 = vector.load %arg8[%c1, %c1_12, %c0_13] : memref<10x10x16xf32, #tpu.memory_space<vmem>>, vector<8x8x16xf32>
    tpu.vector_store %arg8[%c1, %c1_12, %c0_13], %14 {strides = array<i32>} : memref<10x10x16xf32, #tpu.memory_space<vmem>>, vector<8x8x16xf32>,
    %c0_14 = arith.constant 0 : index
    %c0_15 = arith.constant 0 : index
    %c0_16 = arith.constant 0 : index
    %16 = vector.load %arg8[%c0_14, %c0_15, %c0_16] : memref<10x10x16xf32, #tpu.memory_space<vmem>>, vector<8x8x16xf32>
    %17 = arith.truncf %16 : vector<8x8x16xf32> to vector<8x8x16xbf16>
    %18 = vector.shape_cast %17 : vector<8x8x16xbf16> to vector<64x16xbf16>
    %c0_17 = arith.constant 0 : index
    %c0_18 = arith.constant 0 : index
    %c0_19 = arith.constant 0 : index
    %c0_20 = arith.constant 0 : index
    %19 = vector.load %arg5[%c0_17, %c0_18, %c0_19, %c0_20] : memref<3x3x16x16xf32, #tpu.memory_space<vmem>>, vector<1x1x16x16xf32>
    %20 = vector.shape_cast %19 : vector<1x1x16x16xf32> to vector<16x16xf32>
    %21 = arith.truncf %20 : vector<16x16xf32> to vector<16x16xbf16>
    %cst_21 = arith.constant dense<0.000000e+00> : vector<64x16xf32>
    %22 = tpu.matmul %18, %21, %cst_21 {dimension_numbers = #tpu.dot_dimension_numbers<[1], [0], [0], [1], [0, 0, 1, 1], [], []>} : vector<64x16xbf16>, vector<16x16xbf16>, vector<64x16xf32> -> vector<64x16xf32>
    %c0_22 = arith.constant 0 : index
    %c1_23 = arith.constant 1 : index
    %c0_24 = arith.constant 0 : index
    %23 = vector.load %arg8[%c0_22, %c1_23, %c0_24] : memref<10x10x16xf32, #tpu.memory_space<vmem>>, vector<8x8x16xf32>
    %24 = arith.truncf %23 : vector<8x8x16xf32> to vector<8x8x16xbf16>
    %25 = vector.shape_cast %24 : vector<8x8x16xbf16> to vector<64x16xbf16>
    %c0_25 = arith.constant 0 : index
    %c1_26 = arith.constant 1 : index
    %c0_27 = arith.constant 0 : index
    %c0_28 = arith.constant 0 : index
    %26 = vector.load %arg5[%c0_25, %c1_26, %c0_27, %c0_28] : memref<3x3x16x16xf32, #tpu.memory_space<vmem>>, vector<1x1x16x16xf32>
    %27 = vector.shape_cast %26 : vector<1x1x16x16xf32> to vector<16x16xf32>
    %28 = arith.truncf %27 : vector<16x16xf32> to vector<16x16xbf16>
    %cst_29 = arith.constant dense<0.000000e+00> : vector<64x16xf32>
    %29 = tpu.matmul %25, %28, %cst_29 {dimension_numbers = #tpu.dot_dimension_numbers<[1], [0], [0], [1], [0, 0, 1, 1], [], []>} : vector<64x16xbf16>, vector<16x16xbf16>, vector<64x16xf32> -> vector<64x16xf32>
    %30 = arith.addf %22, %29 : vector<64x16xf32>
    %c0_30 = arith.constant 0 : index
    %c2 = arith.constant 2 : index
    %c0_31 = arith.constant 0 : index
    %31 = vector.load %arg8[%c0_30, %c2, %c0_31] : memref<10x10x16xf32, #tpu.memory_space<vmem>>, vector<8x8x16xf32>
    %32 = arith.truncf %31 : vector<8x8x16xf32> to vector<8x8x16xbf16>
    %33 = vector.shape_cast %32 : vector<8x8x16xbf16> to vector<64x16xbf16>
    %c0_32 = arith.constant 0 : index
    %c2_33 = arith.constant 2 : index
    %c0_34 = arith.constant 0 : index
    %c0_35 = arith.constant 0 : index
    %34 = vector.load %arg5[%c0_32, %c2_33, %c0_34, %c0_35] : memref<3x3x16x16xf32, #tpu.memory_space<vmem>>, vector<1x1x16x16xf32>
    %35 = vector.shape_cast %34 : vector<1x1x16x16xf32> to vector<16x16xf32>
    %36 = arith.truncf %35 : vector<16x16xf32> to vector<16x16xbf16>
    %cst_36 = arith.constant dense<0.000000e+00> : vector<64x16xf32>
    %37 = tpu.matmul %33, %36, %cst_36 {dimension_numbers = #tpu.dot_dimension_numbers<[1], [0], [0], [1], [0, 0, 1, 1], [], []>} : vector<64x16xbf16>, vector<16x16xbf16>, vector<64x16xf32> -> vector<64x16xf32>
    %38 = arith.addf %30, %37 : vector<64x16xf32>
    %c1_37 = arith.constant 1 : index
    %c0_38 = arith.constant 0 : index
    %c0_39 = arith.constant 0 : index
    %39 = vector.load %arg8[%c1_37, %c0_38, %c0_39] : memref<10x10x16xf32, #tpu.memory_space<vmem>>, vector<8x8x16xf32>
    %40 = arith.truncf %39 : vector<8x8x16xf32> to vector<8x8x16xbf16>
    %41 = vector.shape_cast %40 : vector<8x8x16xbf16> to vector<64x16xbf16>
    %c1_40 = arith.constant 1 : index
    %c0_41 = arith.constant 0 : index
    %c0_42 = arith.constant 0 : index
    %c0_43 = arith.constant 0 : index
    %42 = vector.load %arg5[%c1_40, %c0_41, %c0_42, %c0_43] : memref<3x3x16x16xf32, #tpu.memory_space<vmem>>, vector<1x1x16x16xf32>
    %43 = vector.shape_cast %42 : vector<1x1x16x16xf32> to vector<16x16xf32>
    %44 = arith.truncf %43 : vector<16x16xf32> to vector<16x16xbf16>
    %cst_44 = arith.constant dense<0.000000e+00> : vector<64x16xf32>
    %45 = tpu.matmul %41, %44, %cst_44 {dimension_numbers = #tpu.dot_dimension_numbers<[1], [0], [0], [1], [0, 0, 1, 1], [], []>} : vector<64x16xbf16>, vector<16x16xbf16>, vector<64x16xf32> -> vector<64x16xf32>
    %46 = arith.addf %38, %45 : vector<64x16xf32>
    %c1_45 = arith.constant 1 : index
    %c1_46 = arith.constant 1 : index
    %c0_47 = arith.constant 0 : index
    %47 = vector.load %arg8[%c1_45, %c1_46, %c0_47] : memref<10x10x16xf32, #tpu.memory_space<vmem>>, vector<8x8x16xf32>
    %48 = arith.truncf %47 : vector<8x8x16xf32> to vector<8x8x16xbf16>
    %49 = vector.shape_cast %48 : vector<8x8x16xbf16> to vector<64x16xbf16>
    %c1_48 = arith.constant 1 : index
    %c1_49 = arith.constant 1 : index
    %c0_50 = arith.constant 0 : index
    %c0_51 = arith.constant 0 : index
    %50 = vector.load %arg5[%c1_48, %c1_49, %c0_50, %c0_51] : memref<3x3x16x16xf32, #tpu.memory_space<vmem>>, vector<1x1x16x16xf32>
    %51 = vector.shape_cast %50 : vector<1x1x16x16xf32> to vector<16x16xf32>
    %52 = arith.truncf %51 : vector<16x16xf32> to vector<16x16xbf16>
    %cst_52 = arith.constant dense<0.000000e+00> : vector<64x16xf32>
    %53 = tpu.matmul %49, %52, %cst_52 {dimension_numbers = #tpu.dot_dimension_numbers<[1], [0], [0], [1], [0, 0, 1, 1], [], []>} : vector<64x16xbf16>, vector<16x16xbf16>, vector<64x16xf32> -> vector<64x16xf32>
    %54 = arith.addf %46, %53 : vector<64x16xf32>
    %c1_53 = arith.constant 1 : index
    %c2_54 = arith.constant 2 : index
    %c0_55 = arith.constant 0 : index
    %55 = vector.load %arg8[%c1_53, %c2_54, %c0_55] : memref<10x10x16xf32, #tpu.memory_space<vmem>>, vector<8x8x16xf32>
    %56 = arith.truncf %55 : vector<8x8x16xf32> to vector<8x8x16xbf16>
    %57 = vector.shape_cast %56 : vector<8x8x16xbf16> to vector<64x16xbf16>
    %c1_56 = arith.constant 1 : index
    %c2_57 = arith.constant 2 : index
    %c0_58 = arith.constant 0 : index
    %c0_59 = arith.constant 0 : index
    %58 = vector.load %arg5[%c1_56, %c2_57, %c0_58, %c0_59] : memref<3x3x16x16xf32, #tpu.memory_space<vmem>>, vector<1x1x16x16xf32>
    %59 = vector.shape_cast %58 : vector<1x1x16x16xf32> to vector<16x16xf32>
    %60 = arith.truncf %59 : vector<16x16xf32> to vector<16x16xbf16>
    %cst_60 = arith.constant dense<0.000000e+00> : vector<64x16xf32>
    %61 = tpu.matmul %57, %60, %cst_60 {dimension_numbers = #tpu.dot_dimension_numbers<[1], [0], [0], [1], [0, 0, 1, 1], [], []>} : vector<64x16xbf16>, vector<16x16xbf16>, vector<64x16xf32> -> vector<64x16xf32>
    %62 = arith.addf %54, %61 : vector<64x16xf32>
    %c2_61 = arith.constant 2 : index
    %c0_62 = arith.constant 0 : index
    %c0_63 = arith.constant 0 : index
    %63 = vector.load %arg8[%c2_61, %c0_62, %c0_63] : memref<10x10x16xf32, #tpu.memory_space<vmem>>, vector<8x8x16xf32>
    %64 = arith.truncf %63 : vector<8x8x16xf32> to vector<8x8x16xbf16>
    %65 = vector.shape_cast %64 : vector<8x8x16xbf16> to vector<64x16xbf16>
    %c2_64 = arith.constant 2 : index
    %c0_65 = arith.constant 0 : index
    %c0_66 = arith.constant 0 : index
    %c0_67 = arith.constant 0 : index
    %66 = vector.load %arg5[%c2_64, %c0_65, %c0_66, %c0_67] : memref<3x3x16x16xf32, #tpu.memory_space<vmem>>, vector<1x1x16x16xf32>
    %67 = vector.shape_cast %66 : vector<1x1x16x16xf32> to vector<16x16xf32>
    %68 = arith.truncf %67 : vector<16x16xf32> to vector<16x16xbf16>
    %cst_68 = arith.constant dense<0.000000e+00> : vector<64x16xf32>
    %69 = tpu.matmul %65, %68, %cst_68 {dimension_numbers = #tpu.dot_dimension_numbers<[1], [0], [0], [1], [0, 0, 1, 1], [], []>} : vector<64x16xbf16>, vector<16x16xbf16>, vector<64x16xf32> -> vector<64x16xf32>
    %70 = arith.addf %62, %69 : vector<64x16xf32>
    %c2_69 = arith.constant 2 : index
    %c1_70 = arith.constant 1 : index
    %c0_71 = arith.constant 0 : index
    %71 = vector.load %arg8[%c2_69, %c1_70, %c0_71] : memref<10x10x16xf32, #tpu.memory_space<vmem>>, vector<8x8x16xf32>
    %72 = arith.truncf %71 : vector<8x8x16xf32> to vector<8x8x16xbf16>
    %73 = vector.shape_cast %72 : vector<8x8x16xbf16> to vector<64x16xbf16>
    %c2_72 = arith.constant 2 : index
    %c1_73 = arith.constant 1 : index
    %c0_74 = arith.constant 0 : index
    %c0_75 = arith.constant 0 : index
    %74 = vector.load %arg5[%c2_72, %c1_73, %c0_74, %c0_75] : memref<3x3x16x16xf32, #tpu.memory_space<vmem>>, vector<1x1x16x16xf32>
    %75 = vector.shape_cast %74 : vector<1x1x16x16xf32> to vector<16x16xf32>
    %76 = arith.truncf %75 : vector<16x16xf32> to vector<16x16xbf16>
    %cst_76 = arith.constant dense<0.000000e+00> : vector<64x16xf32>
    %77 = tpu.matmul %73, %76, %cst_76 {dimension_numbers = #tpu.dot_dimension_numbers<[1], [0], [0], [1], [0, 0, 1, 1], [], []>} : vector<64x16xbf16>, vector<16x16xbf16>, vector<64x16xf32> -> vector<64x16xf32>
    %78 = arith.addf %70, %77 : vector<64x16xf32>
    %c2_77 = arith.constant 2 : index
    %c2_78 = arith.constant 2 : index
    %c0_79 = arith.constant 0 : index
    %79 = vector.load %arg8[%c2_77, %c2_78, %c0_79] : memref<10x10x16xf32, #tpu.memory_space<vmem>>, vector<8x8x16xf32>
    %80 = arith.truncf %79 : vector<8x8x16xf32> to vector<8x8x16xbf16>
    %81 = vector.shape_cast %80 : vector<8x8x16xbf16> to vector<64x16xbf16>
    %c2_80 = arith.constant 2 : index
    %c2_81 = arith.constant 2 : index
    %c0_82 = arith.constant 0 : index
    %c0_83 = arith.constant 0 : index
    %82 = vector.load %arg5[%c2_80, %c2_81, %c0_82, %c0_83] : memref<3x3x16x16xf32, #tpu.memory_space<vmem>>, vector<1x1x16x16xf32>
    %83 = vector.shape_cast %82 : vector<1x1x16x16xf32> to vector<16x16xf32>
    %84 = arith.truncf %83 : vector<16x16xf32> to vector<16x16xbf16>
    %cst_84 = arith.constant dense<0.000000e+00> : vector<64x16xf32>
    %85 = tpu.matmul %81, %84, %cst_84 {dimension_numbers = #tpu.dot_dimension_numbers<[1], [0], [0], [1], [0, 0, 1, 1], [], []>} : vector<64x16xbf16>, vector<16x16xbf16>, vector<64x16xf32> -> vector<64x16xf32>
    %86 = arith.addf %78, %85 : vector<64x16xf32>
    %c0_85 = arith.constant 0 : index
    %c0_86 = arith.constant 0 : index
    %87 = vector.load %arg6[%c0_85, %c0_86] : memref<1x16xf32, #tpu.memory_space<vmem>>, vector<1x16xf32>
    %88 = vector.broadcast %87 : vector<1x16xf32> to vector<64x16xf32>
    %89 = arith.addf %86, %88 : vector<64x16xf32>
    %90 = vector.shape_cast %89 : vector<64x16xf32> to vector<8x8x16xf32>
    %c0_87 = arith.constant 0 : index
    %c0_88 = arith.constant 0 : index
    %c0_89 = arith.constant 0 : index
    %c0_90 = arith.constant 0 : index
    %91 = vector.load %arg2[%c0_87, %c0_88, %c0_89, %c0_90] : memref<1x8x8x16xf32, #tpu.memory_space<vmem>>, vector<1x8x8x16xf32>
    %92 = vector.shape_cast %91 : vector<1x8x8x16xf32> to vector<8x8x16xf32>
    %93 = arith.addf %90, %92 : vector<8x8x16xf32>
    %c0_91 = arith.constant 0 : index
    %c0_92 = arith.constant 0 : index
    %c0_93 = arith.constant 0 : index
    %c0_94 = arith.constant 0 : index
    %94 = vector.load %arg7[%c0_91, %c0_92, %c0_93, %c0_94] : memref<1x8x8x16xf32, #tpu.memory_space<vmem>>, vector<1x8x8x16xf32>
    %95 = vector.shape_cast %94 : vector<1x8x8x16xf32> to vector<8x8x16xf32>
    %96 = vector.shape_cast %93 : vector<8x8x16xf32> to vector<1x8x8x16xf32>
    tpu.vector_store %arg7[%c0_91, %c0_92, %c0_93, %c0_94], %96 {strides = array<i32>} : memref<1x8x8x16xf32, #tpu.memory_space<vmem>>, vector<1x8x8x16xf32>,
    return
  }
  func.func @transform_0(%arg0: i32) -> (i32, i32, i32, i32) {
    %c0_i32 = arith.constant 0 : i32
    %c0_i32_0 = arith.constant 0 : i32
    %c0_i32_1 = arith.constant 0 : i32
    %c0_i32_2 = arith.constant 0 : i32
    return %arg0, %c0_i32, %c0_i32_0, %c0_i32_1 : i32, i32, i32, i32
  }
  func.func @transform_1(%arg0: i32) -> (i32, i32, i32, i32) {
    %c0_i32 = arith.constant 0 : i32
    %c0_i32_0 = arith.constant 0 : i32
    %c0_i32_1 = arith.constant 0 : i32
    %c0_i32_2 = arith.constant 0 : i32
    return %arg0, %c0_i32, %c0_i32_0, %c0_i32_1 : i32, i32, i32, i32
  }
  func.func @transform_2(%arg0: i32) -> (i32, i32) {
    %c0_i32 = arith.constant 0 : i32
    %c0_i32_0 = arith.constant 0 : i32
    %c0_i32_1 = arith.constant 0 : i32
    return %c0_i32, %c0_i32_0 : i32, i32
  }
  func.func @transform_3(%arg0: i32) -> (i32, i32) {
    %c0_i32 = arith.constant 0 : i32
    %c0_i32_0 = arith.constant 0 : i32
    %c0_i32_1 = arith.constant 0 : i32
    return %c0_i32, %c0_i32_0 : i32, i32
  }
  func.func @transform_4(%arg0: i32) -> (i32, i32, i32, i32) {
    %c0_i32 = arith.constant 0 : i32
    %c0_i32_0 = arith.constant 0 : i32
    %c0_i32_1 = arith.constant 0 : i32
    %c0_i32_2 = arith.constant 0 : i32
    %c0_i32_3 = arith.constant 0 : i32
    return %c0_i32, %c0_i32_0, %c0_i32_1, %c0_i32_2 : i32, i32, i32, i32
  }
  func.func @transform_5(%arg0: i32) -> (i32, i32) {
    %c0_i32 = arith.constant 0 : i32
    %c0_i32_0 = arith.constant 0 : i32
    %c0_i32_1 = arith.constant 0 : i32
    return %c0_i32, %c0_i32_0 : i32, i32
  }
  func.func @transform_6(%arg0: i32) -> (i32, i32, i32, i32) {
    %c0_i32 = arith.constant 0 : i32
    %c0_i32_0 = arith.constant 0 : i32
    %c0_i32_1 = arith.constant 0 : i32
    %c0_i32_2 = arith.constant 0 : i32
    return %arg0, %c0_i32, %c0_i32_0, %c0_i32_1 : i32, i32, i32, i32
  }
}

module attributes {stable_mosaic.version = 11 : i64} {
  func.func @_conv_kernel(%arg0: i32, %arg1: i32, %arg2: memref<1x8x8x144xf32, #tpu.memory_space<vmem>>, %arg3: memref<144x64xf32, #tpu.memory_space<vmem>>, %arg4: memref<1x64xf32, #tpu.memory_space<vmem>>, %arg5: memref<1x8x8x64xf32, #tpu.memory_space<vmem>>) attributes {dimension_semantics = [#tpu.dimension_semantics<parallel>, #tpu.dimension_semantics<parallel>], iteration_bounds = array<i64: 2, 1>, scalar_prefetch = 0 : i64, scratch_operands = 0 : i64, tpu.core_type = #tpu.core_type<tc>, window_params = [{transform_indices = @transform_0, window_bounds = array<i64: 1, 8, 8, 144>}, {pipeline_mode = #tpu.pipeline_mode<synchronous>, transform_indices = @transform_1, window_bounds = array<i64: 144, 64>}, {pipeline_mode = #tpu.pipeline_mode<synchronous>, transform_indices = @transform_2, window_bounds = array<i64: 1, 64>}, {transform_indices = @transform_3, window_bounds = array<i64: 1, 8, 8, 64>}]} {
    %c0 = arith.constant 0 : index
    %c0_0 = arith.constant 0 : index
    %c0_1 = arith.constant 0 : index
    %c0_2 = arith.constant 0 : index
    %0 = vector.load %arg2[%c0, %c0_0, %c0_1, %c0_2] : memref<1x8x8x144xf32, #tpu.memory_space<vmem>>, vector<1x8x8x144xf32>
    %1 = vector.shape_cast %0 : vector<1x8x8x144xf32> to vector<8x8x144xf32>
    %2 = vector.shape_cast %1 : vector<8x8x144xf32> to vector<64x144xf32>
    %3 = arith.truncf %2 : vector<64x144xf32> to vector<64x144xbf16>
    %c0_3 = arith.constant 0 : index
    %c0_4 = arith.constant 0 : index
    %4 = vector.load %arg3[%c0_3, %c0_4] : memref<144x64xf32, #tpu.memory_space<vmem>>, vector<144x64xf32>
    %5 = arith.truncf %4 : vector<144x64xf32> to vector<144x64xbf16>
    %cst = arith.constant dense<0.000000e+00> : vector<64x64xf32>
    %6 = tpu.matmul %3, %5, %cst {dimension_numbers = #tpu.dot_dimension_numbers<[1], [0], [0], [1], [0, 0, 1, 1], [], []>} : vector<64x144xbf16>, vector<144x64xbf16>, vector<64x64xf32> -> vector<64x64xf32>
    %c0_5 = arith.constant 0 : index
    %c0_6 = arith.constant 0 : index
    %7 = vector.load %arg4[%c0_5, %c0_6] : memref<1x64xf32, #tpu.memory_space<vmem>>, vector<1x64xf32>
    %8 = vector.broadcast %7 : vector<1x64xf32> to vector<64x64xf32>
    %9 = arith.addf %6, %8 : vector<64x64xf32>
    %10 = vector.shape_cast %9 : vector<64x64xf32> to vector<8x8x64xf32>
    %c0_7 = arith.constant 0 : index
    %c0_8 = arith.constant 0 : index
    %c0_9 = arith.constant 0 : index
    %c0_10 = arith.constant 0 : index
    %11 = vector.load %arg5[%c0_7, %c0_8, %c0_9, %c0_10] : memref<1x8x8x64xf32, #tpu.memory_space<vmem>>, vector<1x8x8x64xf32>
    %12 = vector.shape_cast %11 : vector<1x8x8x64xf32> to vector<8x8x64xf32>
    %13 = vector.shape_cast %10 : vector<8x8x64xf32> to vector<1x8x8x64xf32>
    tpu.vector_store %arg5[%c0_7, %c0_8, %c0_9, %c0_10], %13 {strides = array<i32>} : memref<1x8x8x64xf32, #tpu.memory_space<vmem>>, vector<1x8x8x64xf32>,
    return
  }
  func.func @transform_0(%arg0: i32, %arg1: i32) -> (i32, i32, i32, i32) {
    %c0_i32 = arith.constant 0 : i32
    %c0_i32_0 = arith.constant 0 : i32
    %c0_i32_1 = arith.constant 0 : i32
    return %arg0, %arg1, %c0_i32, %c0_i32_0 : i32, i32, i32, i32
  }
  func.func @transform_1(%arg0: i32, %arg1: i32) -> (i32, i32) {
    %c0_i32 = arith.constant 0 : i32
    %c0_i32_0 = arith.constant 0 : i32
    %c0_i32_1 = arith.constant 0 : i32
    return %c0_i32, %c0_i32_0 : i32, i32
  }
  func.func @transform_2(%arg0: i32, %arg1: i32) -> (i32, i32) {
    %c0_i32 = arith.constant 0 : i32
    %c0_i32_0 = arith.constant 0 : i32
    %c0_i32_1 = arith.constant 0 : i32
    return %c0_i32, %c0_i32_0 : i32, i32
  }
  func.func @transform_3(%arg0: i32, %arg1: i32) -> (i32, i32, i32, i32) {
    %c0_i32 = arith.constant 0 : i32
    %c0_i32_0 = arith.constant 0 : i32
    %c0_i32_1 = arith.constant 0 : i32
    return %arg0, %arg1, %c0_i32, %c0_i32_0 : i32, i32, i32, i32
  }
}

module attributes {stable_mosaic.version = 11 : i64} {
  func.func @_conv_kernel(%arg0: i32, %arg1: i32, %arg2: memref<1x8x16x16xf32, #tpu.memory_space<vmem>>, %arg3: memref<16x16xf32, #tpu.memory_space<vmem>>, %arg4: memref<1x16xf32, #tpu.memory_space<vmem>>, %arg5: memref<1x8x16x16xf32, #tpu.memory_space<vmem>>) attributes {dimension_semantics = [#tpu.dimension_semantics<parallel>, #tpu.dimension_semantics<parallel>], iteration_bounds = array<i64: 2, 2>, scalar_prefetch = 0 : i64, scratch_operands = 0 : i64, tpu.core_type = #tpu.core_type<tc>, window_params = [{transform_indices = @transform_0, window_bounds = array<i64: 1, 8, 16, 16>}, {pipeline_mode = #tpu.pipeline_mode<synchronous>, transform_indices = @transform_1, window_bounds = array<i64: 16, 16>}, {pipeline_mode = #tpu.pipeline_mode<synchronous>, transform_indices = @transform_2, window_bounds = array<i64: 1, 16>}, {transform_indices = @transform_3, window_bounds = array<i64: 1, 8, 16, 16>}]} {
    %c0 = arith.constant 0 : index
    %c0_0 = arith.constant 0 : index
    %c0_1 = arith.constant 0 : index
    %c0_2 = arith.constant 0 : index
    %0 = vector.load %arg2[%c0, %c0_0, %c0_1, %c0_2] : memref<1x8x16x16xf32, #tpu.memory_space<vmem>>, vector<1x8x16x16xf32>
    %1 = vector.shape_cast %0 : vector<1x8x16x16xf32> to vector<8x16x16xf32>
    %2 = vector.shape_cast %1 : vector<8x16x16xf32> to vector<128x16xf32>
    %3 = arith.truncf %2 : vector<128x16xf32> to vector<128x16xbf16>
    %c0_3 = arith.constant 0 : index
    %c0_4 = arith.constant 0 : index
    %4 = vector.load %arg3[%c0_3, %c0_4] : memref<16x16xf32, #tpu.memory_space<vmem>>, vector<16x16xf32>
    %5 = arith.truncf %4 : vector<16x16xf32> to vector<16x16xbf16>
    %cst = arith.constant dense<0.000000e+00> : vector<128x16xf32>
    %6 = tpu.matmul %3, %5, %cst {dimension_numbers = #tpu.dot_dimension_numbers<[1], [0], [0], [1], [0, 0, 1, 1], [], []>} : vector<128x16xbf16>, vector<16x16xbf16>, vector<128x16xf32> -> vector<128x16xf32>
    %c0_5 = arith.constant 0 : index
    %c0_6 = arith.constant 0 : index
    %7 = vector.load %arg4[%c0_5, %c0_6] : memref<1x16xf32, #tpu.memory_space<vmem>>, vector<1x16xf32>
    %8 = vector.broadcast %7 : vector<1x16xf32> to vector<128x16xf32>
    %9 = arith.addf %6, %8 : vector<128x16xf32>
    %10 = arith.negf %9 : vector<128x16xf32>
    %11 = math.exp %10 : vector<128x16xf32>
    %cst_7 = arith.constant 1.000000e+00 : f32
    %12 = vector.broadcast %cst_7 : f32 to vector<128x16xf32>
    %13 = arith.addf %12, %11 : vector<128x16xf32>
    %14 = arith.divf %12, %13 : vector<128x16xf32>
    %15 = vector.shape_cast %14 : vector<128x16xf32> to vector<8x16x16xf32>
    %c0_8 = arith.constant 0 : index
    %c0_9 = arith.constant 0 : index
    %c0_10 = arith.constant 0 : index
    %c0_11 = arith.constant 0 : index
    %16 = vector.load %arg5[%c0_8, %c0_9, %c0_10, %c0_11] : memref<1x8x16x16xf32, #tpu.memory_space<vmem>>, vector<1x8x16x16xf32>
    %17 = vector.shape_cast %16 : vector<1x8x16x16xf32> to vector<8x16x16xf32>
    %18 = vector.shape_cast %15 : vector<8x16x16xf32> to vector<1x8x16x16xf32>
    tpu.vector_store %arg5[%c0_8, %c0_9, %c0_10, %c0_11], %18 {strides = array<i32>} : memref<1x8x16x16xf32, #tpu.memory_space<vmem>>, vector<1x8x16x16xf32>,
    return
  }
  func.func @transform_0(%arg0: i32, %arg1: i32) -> (i32, i32, i32, i32) {
    %c0_i32 = arith.constant 0 : i32
    %c0_i32_0 = arith.constant 0 : i32
    %c0_i32_1 = arith.constant 0 : i32
    return %arg0, %arg1, %c0_i32, %c0_i32_0 : i32, i32, i32, i32
  }
  func.func @transform_1(%arg0: i32, %arg1: i32) -> (i32, i32) {
    %c0_i32 = arith.constant 0 : i32
    %c0_i32_0 = arith.constant 0 : i32
    %c0_i32_1 = arith.constant 0 : i32
    return %c0_i32, %c0_i32_0 : i32, i32
  }
  func.func @transform_2(%arg0: i32, %arg1: i32) -> (i32, i32) {
    %c0_i32 = arith.constant 0 : i32
    %c0_i32_0 = arith.constant 0 : i32
    %c0_i32_1 = arith.constant 0 : i32
    return %c0_i32, %c0_i32_0 : i32, i32
  }
  func.func @transform_3(%arg0: i32, %arg1: i32) -> (i32, i32, i32, i32) {
    %c0_i32 = arith.constant 0 : i32
    %c0_i32_0 = arith.constant 0 : i32
    %c0_i32_1 = arith.constant 0 : i32
    return %arg0, %arg1, %c0_i32, %c0_i32_0 : i32, i32, i32, i32
  }
}

module attributes {stable_mosaic.version = 11 : i64} {
  func.func @_conv_kernel(%arg0: i32, %arg1: i32, %arg2: memref<1x8x16x144xf32, #tpu.memory_space<vmem>>, %arg3: memref<144x16xf32, #tpu.memory_space<vmem>>, %arg4: memref<1x16xf32, #tpu.memory_space<vmem>>, %arg5: memref<1x8x16x16xf32, #tpu.memory_space<vmem>>) attributes {dimension_semantics = [#tpu.dimension_semantics<parallel>, #tpu.dimension_semantics<parallel>], iteration_bounds = array<i64: 2, 2>, scalar_prefetch = 0 : i64, scratch_operands = 0 : i64, tpu.core_type = #tpu.core_type<tc>, window_params = [{transform_indices = @transform_0, window_bounds = array<i64: 1, 8, 16, 144>}, {pipeline_mode = #tpu.pipeline_mode<synchronous>, transform_indices = @transform_1, window_bounds = array<i64: 144, 16>}, {pipeline_mode = #tpu.pipeline_mode<synchronous>, transform_indices = @transform_2, window_bounds = array<i64: 1, 16>}, {transform_indices = @transform_3, window_bounds = array<i64: 1, 8, 16, 16>}]} {
    %c0 = arith.constant 0 : index
    %c0_0 = arith.constant 0 : index
    %c0_1 = arith.constant 0 : index
    %c0_2 = arith.constant 0 : index
    %0 = vector.load %arg2[%c0, %c0_0, %c0_1, %c0_2] : memref<1x8x16x144xf32, #tpu.memory_space<vmem>>, vector<1x8x16x144xf32>
    %1 = vector.shape_cast %0 : vector<1x8x16x144xf32> to vector<8x16x144xf32>
    %2 = vector.shape_cast %1 : vector<8x16x144xf32> to vector<128x144xf32>
    %3 = arith.truncf %2 : vector<128x144xf32> to vector<128x144xbf16>
    %c0_3 = arith.constant 0 : index
    %c0_4 = arith.constant 0 : index
    %4 = vector.load %arg3[%c0_3, %c0_4] : memref<144x16xf32, #tpu.memory_space<vmem>>, vector<144x16xf32>
    %5 = arith.truncf %4 : vector<144x16xf32> to vector<144x16xbf16>
    %cst = arith.constant dense<0.000000e+00> : vector<128x16xf32>
    %6 = tpu.matmul %3, %5, %cst {dimension_numbers = #tpu.dot_dimension_numbers<[1], [0], [0], [1], [0, 0, 1, 1], [], []>} : vector<128x144xbf16>, vector<144x16xbf16>, vector<128x16xf32> -> vector<128x16xf32>
    %c0_5 = arith.constant 0 : index
    %c0_6 = arith.constant 0 : index
    %7 = vector.load %arg4[%c0_5, %c0_6] : memref<1x16xf32, #tpu.memory_space<vmem>>, vector<1x16xf32>
    %8 = vector.broadcast %7 : vector<1x16xf32> to vector<128x16xf32>
    %9 = arith.addf %6, %8 : vector<128x16xf32>
    %10 = vector.shape_cast %9 : vector<128x16xf32> to vector<8x16x16xf32>
    %c0_7 = arith.constant 0 : index
    %c0_8 = arith.constant 0 : index
    %c0_9 = arith.constant 0 : index
    %c0_10 = arith.constant 0 : index
    %11 = vector.load %arg5[%c0_7, %c0_8, %c0_9, %c0_10] : memref<1x8x16x16xf32, #tpu.memory_space<vmem>>, vector<1x8x16x16xf32>
    %12 = vector.shape_cast %11 : vector<1x8x16x16xf32> to vector<8x16x16xf32>
    %13 = vector.shape_cast %10 : vector<8x16x16xf32> to vector<1x8x16x16xf32>
    tpu.vector_store %arg5[%c0_7, %c0_8, %c0_9, %c0_10], %13 {strides = array<i32>} : memref<1x8x16x16xf32, #tpu.memory_space<vmem>>, vector<1x8x16x16xf32>,
    return
  }
  func.func @transform_0(%arg0: i32, %arg1: i32) -> (i32, i32, i32, i32) {
    %c0_i32 = arith.constant 0 : i32
    %c0_i32_0 = arith.constant 0 : i32
    %c0_i32_1 = arith.constant 0 : i32
    return %arg0, %arg1, %c0_i32, %c0_i32_0 : i32, i32, i32, i32
  }
  func.func @transform_1(%arg0: i32, %arg1: i32) -> (i32, i32) {
    %c0_i32 = arith.constant 0 : i32
    %c0_i32_0 = arith.constant 0 : i32
    %c0_i32_1 = arith.constant 0 : i32
    return %c0_i32, %c0_i32_0 : i32, i32
  }
  func.func @transform_2(%arg0: i32, %arg1: i32) -> (i32, i32) {
    %c0_i32 = arith.constant 0 : i32
    %c0_i32_0 = arith.constant 0 : i32
    %c0_i32_1 = arith.constant 0 : i32
    return %c0_i32, %c0_i32_0 : i32, i32
  }
  func.func @transform_3(%arg0: i32, %arg1: i32) -> (i32, i32, i32, i32) {
    %c0_i32 = arith.constant 0 : i32
    %c0_i32_0 = arith.constant 0 : i32
    %c0_i32_1 = arith.constant 0 : i32
    return %arg0, %arg1, %c0_i32, %c0_i32_0 : i32, i32, i32, i32
  }
}

module attributes {stable_mosaic.version = 11 : i64} {
  func.func @_conv_kernel(%arg0: i32, %arg1: i32, %arg2: memref<1x8x16x144xf32, #tpu.memory_space<vmem>>, %arg3: memref<144x64xf32, #tpu.memory_space<vmem>>, %arg4: memref<1x64xf32, #tpu.memory_space<vmem>>, %arg5: memref<1x8x16x64xf32, #tpu.memory_space<vmem>>) attributes {dimension_semantics = [#tpu.dimension_semantics<parallel>, #tpu.dimension_semantics<parallel>], iteration_bounds = array<i64: 2, 2>, scalar_prefetch = 0 : i64, scratch_operands = 0 : i64, tpu.core_type = #tpu.core_type<tc>, window_params = [{transform_indices = @transform_0, window_bounds = array<i64: 1, 8, 16, 144>}, {pipeline_mode = #tpu.pipeline_mode<synchronous>, transform_indices = @transform_1, window_bounds = array<i64: 144, 64>}, {pipeline_mode = #tpu.pipeline_mode<synchronous>, transform_indices = @transform_2, window_bounds = array<i64: 1, 64>}, {transform_indices = @transform_3, window_bounds = array<i64: 1, 8, 16, 64>}]} {
    %c0 = arith.constant 0 : index
    %c0_0 = arith.constant 0 : index
    %c0_1 = arith.constant 0 : index
    %c0_2 = arith.constant 0 : index
    %0 = vector.load %arg2[%c0, %c0_0, %c0_1, %c0_2] : memref<1x8x16x144xf32, #tpu.memory_space<vmem>>, vector<1x8x16x144xf32>
    %1 = vector.shape_cast %0 : vector<1x8x16x144xf32> to vector<8x16x144xf32>
    %2 = vector.shape_cast %1 : vector<8x16x144xf32> to vector<128x144xf32>
    %3 = arith.truncf %2 : vector<128x144xf32> to vector<128x144xbf16>
    %c0_3 = arith.constant 0 : index
    %c0_4 = arith.constant 0 : index
    %4 = vector.load %arg3[%c0_3, %c0_4] : memref<144x64xf32, #tpu.memory_space<vmem>>, vector<144x64xf32>
    %5 = arith.truncf %4 : vector<144x64xf32> to vector<144x64xbf16>
    %cst = arith.constant dense<0.000000e+00> : vector<128x64xf32>
    %6 = tpu.matmul %3, %5, %cst {dimension_numbers = #tpu.dot_dimension_numbers<[1], [0], [0], [1], [0, 0, 1, 1], [], []>} : vector<128x144xbf16>, vector<144x64xbf16>, vector<128x64xf32> -> vector<128x64xf32>
    %c0_5 = arith.constant 0 : index
    %c0_6 = arith.constant 0 : index
    %7 = vector.load %arg4[%c0_5, %c0_6] : memref<1x64xf32, #tpu.memory_space<vmem>>, vector<1x64xf32>
    %8 = vector.broadcast %7 : vector<1x64xf32> to vector<128x64xf32>
    %9 = arith.addf %6, %8 : vector<128x64xf32>
    %10 = vector.shape_cast %9 : vector<128x64xf32> to vector<8x16x64xf32>
    %c0_7 = arith.constant 0 : index
    %c0_8 = arith.constant 0 : index
    %c0_9 = arith.constant 0 : index
    %c0_10 = arith.constant 0 : index
    %11 = vector.load %arg5[%c0_7, %c0_8, %c0_9, %c0_10] : memref<1x8x16x64xf32, #tpu.memory_space<vmem>>, vector<1x8x16x64xf32>
    %12 = vector.shape_cast %11 : vector<1x8x16x64xf32> to vector<8x16x64xf32>
    %13 = vector.shape_cast %10 : vector<8x16x64xf32> to vector<1x8x16x64xf32>
    tpu.vector_store %arg5[%c0_7, %c0_8, %c0_9, %c0_10], %13 {strides = array<i32>} : memref<1x8x16x64xf32, #tpu.memory_space<vmem>>, vector<1x8x16x64xf32>,
    return
  }
  func.func @transform_0(%arg0: i32, %arg1: i32) -> (i32, i32, i32, i32) {
    %c0_i32 = arith.constant 0 : i32
    %c0_i32_0 = arith.constant 0 : i32
    %c0_i32_1 = arith.constant 0 : i32
    return %arg0, %arg1, %c0_i32, %c0_i32_0 : i32, i32, i32, i32
  }
  func.func @transform_1(%arg0: i32, %arg1: i32) -> (i32, i32) {
    %c0_i32 = arith.constant 0 : i32
    %c0_i32_0 = arith.constant 0 : i32
    %c0_i32_1 = arith.constant 0 : i32
    return %c0_i32, %c0_i32_0 : i32, i32
  }
  func.func @transform_2(%arg0: i32, %arg1: i32) -> (i32, i32) {
    %c0_i32 = arith.constant 0 : i32
    %c0_i32_0 = arith.constant 0 : i32
    %c0_i32_1 = arith.constant 0 : i32
    return %c0_i32, %c0_i32_0 : i32, i32
  }
  func.func @transform_3(%arg0: i32, %arg1: i32) -> (i32, i32, i32, i32) {
    %c0_i32 = arith.constant 0 : i32
    %c0_i32_0 = arith.constant 0 : i32
    %c0_i32_1 = arith.constant 0 : i32
    return %arg0, %arg1, %c0_i32, %c0_i32_0 : i32, i32, i32, i32
  }
}

module attributes {stable_mosaic.version = 11 : i64} {
  func.func @_conv_kernel(%arg0: i32, %arg1: i32, %arg2: memref<1x8x32x144xf32, #tpu.memory_space<vmem>>, %arg3: memref<144x3xf32, #tpu.memory_space<vmem>>, %arg4: memref<1x3xf32, #tpu.memory_space<vmem>>, %arg5: memref<1x8x32x3xf32, #tpu.memory_space<vmem>>) attributes {dimension_semantics = [#tpu.dimension_semantics<parallel>, #tpu.dimension_semantics<parallel>], iteration_bounds = array<i64: 2, 4>, scalar_prefetch = 0 : i64, scratch_operands = 0 : i64, tpu.core_type = #tpu.core_type<tc>, window_params = [{transform_indices = @transform_0, window_bounds = array<i64: 1, 8, 32, 144>}, {pipeline_mode = #tpu.pipeline_mode<synchronous>, transform_indices = @transform_1, window_bounds = array<i64: 144, 3>}, {pipeline_mode = #tpu.pipeline_mode<synchronous>, transform_indices = @transform_2, window_bounds = array<i64: 1, 3>}, {transform_indices = @transform_3, window_bounds = array<i64: 1, 8, 32, 3>}]} {
    %c0 = arith.constant 0 : index
    %c0_0 = arith.constant 0 : index
    %c0_1 = arith.constant 0 : index
    %c0_2 = arith.constant 0 : index
    %0 = vector.load %arg2[%c0, %c0_0, %c0_1, %c0_2] : memref<1x8x32x144xf32, #tpu.memory_space<vmem>>, vector<1x8x32x144xf32>
    %1 = vector.shape_cast %0 : vector<1x8x32x144xf32> to vector<8x32x144xf32>
    %2 = vector.shape_cast %1 : vector<8x32x144xf32> to vector<256x144xf32>
    %3 = arith.truncf %2 : vector<256x144xf32> to vector<256x144xbf16>
    %c0_3 = arith.constant 0 : index
    %c0_4 = arith.constant 0 : index
    %4 = vector.load %arg3[%c0_3, %c0_4] : memref<144x3xf32, #tpu.memory_space<vmem>>, vector<144x3xf32>
    %5 = arith.truncf %4 : vector<144x3xf32> to vector<144x3xbf16>
    %cst = arith.constant dense<0.000000e+00> : vector<256x3xf32>
    %6 = tpu.matmul %3, %5, %cst {dimension_numbers = #tpu.dot_dimension_numbers<[1], [0], [0], [1], [0, 0, 1, 1], [], []>} : vector<256x144xbf16>, vector<144x3xbf16>, vector<256x3xf32> -> vector<256x3xf32>
    %c0_5 = arith.constant 0 : index
    %c0_6 = arith.constant 0 : index
    %7 = vector.load %arg4[%c0_5, %c0_6] : memref<1x3xf32, #tpu.memory_space<vmem>>, vector<1x3xf32>
    %8 = vector.broadcast %7 : vector<1x3xf32> to vector<256x3xf32>
    %9 = arith.addf %6, %8 : vector<256x3xf32>
    %10 = vector.shape_cast %9 : vector<256x3xf32> to vector<8x32x3xf32>
    %c0_7 = arith.constant 0 : index
    %c0_8 = arith.constant 0 : index
    %c0_9 = arith.constant 0 : index
    %c0_10 = arith.constant 0 : index
    %11 = vector.load %arg5[%c0_7, %c0_8, %c0_9, %c0_10] : memref<1x8x32x3xf32, #tpu.memory_space<vmem>>, vector<1x8x32x3xf32>
    %12 = vector.shape_cast %11 : vector<1x8x32x3xf32> to vector<8x32x3xf32>
    %13 = vector.shape_cast %10 : vector<8x32x3xf32> to vector<1x8x32x3xf32>
    tpu.vector_store %arg5[%c0_7, %c0_8, %c0_9, %c0_10], %13 {strides = array<i32>} : memref<1x8x32x3xf32, #tpu.memory_space<vmem>>, vector<1x8x32x3xf32>,
    return
  }
  func.func @transform_0(%arg0: i32, %arg1: i32) -> (i32, i32, i32, i32) {
    %c0_i32 = arith.constant 0 : i32
    %c0_i32_0 = arith.constant 0 : i32
    %c0_i32_1 = arith.constant 0 : i32
    return %arg0, %arg1, %c0_i32, %c0_i32_0 : i32, i32, i32, i32
  }
  func.func @transform_1(%arg0: i32, %arg1: i32) -> (i32, i32) {
    %c0_i32 = arith.constant 0 : i32
    %c0_i32_0 = arith.constant 0 : i32
    %c0_i32_1 = arith.constant 0 : i32
    return %c0_i32, %c0_i32_0 : i32, i32
  }
  func.func @transform_2(%arg0: i32, %arg1: i32) -> (i32, i32) {
    %c0_i32 = arith.constant 0 : i32
    %c0_i32_0 = arith.constant 0 : i32
    %c0_i32_1 = arith.constant 0 : i32
    return %c0_i32, %c0_i32_0 : i32, i32
  }
  func.func @transform_3(%arg0: i32, %arg1: i32) -> (i32, i32, i32, i32) {
    %c0_i32 = arith.constant 0 : i32
    %c0_i32_0 = arith.constant 0 : i32
    %c0_i32_1 = arith.constant 0 : i32
    return %arg0, %arg1, %c0_i32, %c0_i32_0 : i32, i32, i32, i32
  }
}

</mosaic_0001>

<bundles_post_ra>
// kernel: rnlransr_forward.45
= control target key start
LH: loop header
LB: loop body
LE: loop exit
PB: predicated region body
PF: predicated region fallthrough
CT: control target
= control target key end

     0   :  { %s658_s12 = smov 0   ;;  %s660_s13 = smov 0   ;;  %s780_s0 = inlined_call_operand.vmem [shape: f32[2,16,16,27], index: 0, kind: input, shape index: {}]   ;;  %s781_s1 = inlined_call_operand.vmem [shape: f32[27,16], index: 1, kind: input, shape index: {}]   ;;  %s782_s2 = inlined_call_operand.vmem [shape: f32[1,16], index: 2, kind: input, shape index: {}]   ;;  %s783_s3 = inlined_call_operand.vmem [shape: f32[2,16,16,16], index: 3, kind: output, shape index: {}]  }
   0x1   :  { %s662_s14 = smov 0   ;;  %s664_s15 = smov 0  }
   0x2   :  { %s666_s16 = smov 0  }
   0x3 LB: > { %s22_s17 = sadd.s32 1, %s627_s14  ;;  %s25_s18 = sadd.s32 1, %s631_s15  ;;  %s635_s16 = sphi %s666_s16, %s13_s16   ;;  %s631_s15 = sphi %s664_s15, %s787_s15   ;;  %s627_s14 = sphi %s662_s14, %s786_s14   ;;  %s623_s13 = sphi %s660_s13, %s785_s13   ;;  %s619_s12 = sphi %s658_s12, %s784_s12  }
   0x4   : > { %p23_p0 = scmp.ge.s32.totalorder %s22_s17, 2  ;;  %p502_p1 = scmp.ge.s32.totalorder %s635_s16, 1 }
   0x5   : > { %p159_p2 = scmp.lt.s32.totalorder %s635_s16, 5 }
   0x6   : > { %s789_s17 = smov (%p23_p0, %s22_s17), 0  ;;  %s791_s18 = smov (!%p23_p0, %s25_s18), %s631_s15 }
   0x7   : > { %p160_p3 = pnand %p502_p1, %p159_p2  ;;  %p27_p4 = scmp.ge.s32.totalorder %s791_s18, 2 }
   0x8   : > { %v240_v0 = vld [vmem:[%s781_s1] sm:$0xff] (!%p160_p3)  ;;  %v241_v1 = vld [vmem:[%s781_s1 + $0x8] sm:$0xff] (!%p160_p3)  ;;  %v242_v2 = vld [vmem:[%s781_s1 + $0x10] sm:$0xff] (!%p160_p3)  ;;  %vm278_vm0 = vcmask (!%p160_p3), 1044480   ;;  %vm279_vm1 = vcmask (!%p160_p3), 1045504   ;;  %v637_v5 = vmov (!%p160_p3), 65535  }
   0x9   : > { %s793_s18 = smov (%p27_p4, %s791_s18), 0  ;;  %163 = sbr.rel (%p160_p3) target bundleno = 252 (0xfc), region = 32 }
   0xa   : > { %v244_v3 = vpack.c.bf16 (!%p160_p3), %v241_v1, %v240_v0  ;;  %v243_v4 = vld [vmem:[%s781_s1 + $0x18] sm:$0x7] (!%p160_p3)  ;;  %v280_v6 = vsel (!%p160_p3), %vm278_vm0, 4294967295, %v637_v5  ;;  %s503_s27 = sshll.u32 (!%p160_p3), %s619_s12, 3  ;;  %p194_p5 = scmp.lt.s32.totalorder (!%p160_p3), %s623_s13, 1  ;;  %vm253_vm2 = vcmask (!%p160_p3), 220160  }
   0xb   : > { %v245_v7 = vpack.c.bf16 (!%p160_p3), %v243_v4, %v242_v2  ;;  %v281_v8 = vsel (!%p160_p3), %vm279_vm1, %v280_v6, 0  ;;  %p196_p6 = scmp.lt.s32.totalorder (!%p160_p3), %s503_s27, 15  ;;  %v511_v34 = vld [vmem:[%s782_s2] ss:$0 sm:$0xff] (!%p160_p3)  ;;  %vm382_vm3 = vcmask (!%p160_p3), 130048  }
   0xc   : > { %532 = vmatprep.subr.bf16.mxu0 (!%p160_p3), %v244_v3  ;;  %552 = vmatprep.subr.bf16.mxu1 (!%p160_p3), %v244_v3 }
   0xd   : > { %533 = vmatpush3.bf16.msra.mxu0 (!%p160_p3), %v244_v3  ;;  %554 = vmatpush3.bf16.msra.mxu1 (!%p160_p3), %v244_v3  ;;  %v283_v9 = vand.u32 (!%p160_p3), %v281_v8, %v245_v7 }
   0xf   : > { %534 = vmatprep.subr.bf16.mxu0 (!%p160_p3), %v283_v9  ;;  %553 = vmatprep.subr.bf16.mxu1 (!%p160_p3), %v283_v9 }
  0x10   : > { %s795_s13 = smov (!%p194_p5, %s623_s13), 1  ;;  %s797_s27 = smov (!%p196_p6, %s503_s27), 15 }
  0x11   : > { %s505_s28 = sshll.u32 %s795_s13, 5  ;;  %s504_s29 = sshll.u32 %s797_s27, 1  ;;  %535 = vmatpush3.bf16.msra.mxu0 %v283_v9  ;;  %555 = vmatpush3.bf16.msra.mxu1 %v283_v9 }
  0x12   : > { %s707_s30 = sadd.s32 %s505_s28, %s504_s29 }
  0x13   : > { %s506_s4 = sshll.u32 %s707_s30, 3 }
  0x14   : > { %s202_s7 = scalar_lea.vmem %s780_s0, %s506_s4  ;;  %s731_s12 = scalar_lea.vmem %s783_s3, %s506_s4 }
  0x15   : > { %v216_v10 = vld [vmem:[%s202_s7] sm:$0xff]  ;;  %v217_v11 = vld [vmem:[%s202_s7 + $0x8] sm:$0xff]  ;;  %v218_v15 = vld [vmem:[%s202_s7 + $0x10] sm:$0xff] }
  0x16   : > { %v224_v12 = vld [vmem:[%s202_s7 + $0x40] sm:$0xff]  ;;  %v232_v13 = vpack.c.bf16 %v217_v11, %v216_v10  ;;  %v225_v14 = vld [vmem:[%s202_s7 + $0x48] sm:$0xff]  ;;  %v219_v16 = vld [vmem:[%s202_s7 + $0x18] sm:$0xff] }
  0x17   : > { %v236_v17 = vpack.c.bf16 %v225_v14, %v224_v12  ;;  %v233_v18 = vpack.c.bf16 %v219_v16, %v218_v15  ;;  %v226_v19 = vld [vmem:[%s202_s7 + $0x50] sm:$0xff]  ;;  %v227_v20 = vld [vmem:[%s202_s7 + $0x58] sm:$0xff]  ;;  %v220_v21 = vld [vmem:[%s202_s7 + $0x20] sm:$0xff] }
  0x18   : > { %536 = vmatprep.mubr.msk.bf16.mxu0 %vm253_vm2, %v232_v13  ;;  %v237_v22 = vpack.c.bf16 %v227_v20, %v226_v19  ;;  %v221_v23 = vld [vmem:[%s202_s7 + $0x28] sm:$0xff]  ;;  %v228_v24 = vld [vmem:[%s202_s7 + $0x60] sm:$0xff]  ;;  %v222_v28 = vld [vmem:[%s202_s7 + $0x30] sm:$0xff] }
  0x19   : > { %v229_v25 = vld [vmem:[%s202_s7 + $0x68] sm:$0xff]  ;;  %544 = vmatprep.mubr.msk.bf16.mxu1 %vm253_vm2, %v236_v17  ;;  %537 = vmatmul.mubr.msk.bf16.vlgmr.msra.gmra.mrb[0].mxu0 %vm253_vm2, %v233_v18  ;;  %v234_v26 = vpack.c.bf16 %v221_v23, %v220_v21  ;;  %v223_v29 = vld [vmem:[%s202_s7 + $0x38] sm:$0xff]  ;;  %v230_v30 = vld [vmem:[%s202_s7 + $0x70] sm:$0xff] }
  0x1a   : > { %v238_v27 = vpack.c.bf16 %v229_v25, %v228_v24  ;;  %545 = vmatmul.mubr.msk.bf16.vlgmr.msra.gmra.mrb[0].mxu1 %vm253_vm2, %v237_v22  ;;  %v231_v31 = vld [vmem:[%s202_s7 + $0x78] sm:$0xff]  ;;  %v235_v32 = vpack.c.bf16 %v223_v29, %v222_v28 }
  0x1b   : > { %540 = vmatprep.mubr.msk.bf16.mxu0 %vm253_vm2, %v234_v26  ;;  %v239_v33 = vpack.c.bf16 %v231_v31, %v230_v30 }
  0x1c   : > { %548 = vmatprep.mubr.msk.bf16.mxu1 %vm253_vm2, %v238_v27 }
  0x21   : > { %541 = vmatmul.mubr.msk.bf16.gmra.mrb[4].mxu0 %vm253_vm2, %v235_v32 }
  0x22   : > { %549 = vmatmul.mubr.msk.bf16.gmra.mrb[4].mxu1 %vm253_vm2, %v239_v33 }
  0xec   : > { %v538_v35 = vpop.f32.mrb[0].mxu0 }
  0xed   : > { %v328_v36 = vadd.f32 %v538_v35, %v511_v34  ;;  %v546_v37 = vpop.f32.mrb[0].mxu1  ;;  %v319_v38 = vpop.f32.mrb[1].mxu0 }
  0xee   : > { %v360_v39 = vadd.f32 %v546_v37, %v511_v34  ;;  %v320_v40 = vadd.f32 %v511_v34, %v319_v38  ;;  %v351_v41 = vpop.f32.mrb[1].mxu1  ;;  %v539_v42 = vpop.f32.mrb[2].mxu0 }
  0xef   : > { %385 = vst.msk [vmem:[%s731_s12 + $0x10] sm:$0xff] %vm382_vm3, %v328_v36  ;;  %v352_v43 = vadd.f32 %v511_v34, %v351_v41  ;;  %v331_v44 = vadd.f32 %v539_v42, %v511_v34  ;;  %v547_v45 = vpop.f32.mrb[2].mxu1  ;;  %v322_v46 = vpop.f32.mrb[3].mxu0 }
  0xf0   : > { %393 = vst.msk [vmem:[%s731_s12 + $0x50] sm:$0xff] %vm382_vm3, %v360_v39  ;;  %383 = vst.msk [vmem:[%s731_s12] sm:$0xff] %vm382_vm3, %v320_v40  ;;  %v363_v47 = vadd.f32 %v547_v45, %v511_v34  ;;  %v323_v48 = vadd.f32 %v511_v34, %v322_v46  ;;  %v354_v49 = vpop.f32.mrb[3].mxu1 }
  0xf1   : > { %391 = vst.msk [vmem:[%s731_s12 + $0x40] sm:$0xff] %vm382_vm3, %v352_v43  ;;  %386 = vst.msk [vmem:[%s731_s12 + $0x18] sm:$0xff] %vm382_vm3, %v331_v44  ;;  %v355_v50 = vadd.f32 %v511_v34, %v354_v49 }
  0xf2   : > { %394 = vst.msk [vmem:[%s731_s12 + $0x58] sm:$0xff] %vm382_vm3, %v363_v47  ;;  %384 = vst.msk [vmem:[%s731_s12 + $0x8] sm:$0xff] %vm382_vm3, %v323_v48 }
  0xf3   : > { %392 = vst.msk [vmem:[%s731_s12 + $0x48] sm:$0xff] %vm382_vm3, %v355_v50 }
  0xf4   : > { %v542_v51 = vpop.f32.mrb[4].mxu0 }
  0xf5   : > { %v344_v52 = vadd.f32 %v542_v51, %v511_v34  ;;  %v550_v53 = vpop.f32.mrb[4].mxu1  ;;  %v335_v54 = vpop.f32.mrb[5].mxu0 }
  0xf6   : > { %v376_v55 = vadd.f32 %v550_v53, %v511_v34  ;;  %v336_v56 = vadd.f32 %v511_v34, %v335_v54  ;;  %v367_v57 = vpop.f32.mrb[5].mxu1  ;;  %v543_v58 = vpop.f32.mrb[6].mxu0 }
  0xf7   : > { %389 = vst.msk [vmem:[%s731_s12 + $0x30] sm:$0xff] %vm382_vm3, %v344_v52  ;;  %v368_v59 = vadd.f32 %v511_v34, %v367_v57  ;;  %v347_v60 = vadd.f32 %v543_v58, %v511_v34  ;;  %v551_v61 = vpop.f32.mrb[6].mxu1  ;;  %v338_v62 = vpop.f32.mrb[7].mxu0 }
  0xf8   : > { %397 = vst.msk [vmem:[%s731_s12 + $0x70] sm:$0xff] %vm382_vm3, %v376_v55  ;;  %387 = vst.msk [vmem:[%s731_s12 + $0x20] sm:$0xff] %vm382_vm3, %v336_v56  ;;  %v379_v63 = vadd.f32 %v551_v61, %v511_v34  ;;  %v339_v0 = vadd.f32 %v511_v34, %v338_v62  ;;  %v370_v1 = vpop.f32.mrb[7].mxu1 }
  0xf9   : > { %395 = vst.msk [vmem:[%s731_s12 + $0x60] sm:$0xff] %vm382_vm3, %v368_v59  ;;  %390 = vst.msk [vmem:[%s731_s12 + $0x38] sm:$0xff] %vm382_vm3, %v347_v60  ;;  %v371_v2 = vadd.f32 %v511_v34, %v370_v1 }
  0xfa   : > { %398 = vst.msk [vmem:[%s731_s12 + $0x78] sm:$0xff] %vm382_vm3, %v379_v63  ;;  %388 = vst.msk [vmem:[%s731_s12 + $0x28] sm:$0xff] %vm382_vm3, %v339_v0 }
  0xfb   : > { %396 = vst.msk [vmem:[%s731_s12 + $0x68] sm:$0xff] %vm382_vm3, %v371_v2 }
  0xfc PF: > { %s13_s16 = sadd.s32 1, %s635_s16   ;;  %s784_s12 = smov %s627_s14 }
  0xfd   : > { %p10_p7 = scmp.ge.s32.totalorder %s13_s16, 6   ;;  %s785_s13 = smov %s631_s15 }
  0xfe   : > { %s786_s14 = smov %s789_s17  ;;  %s787_s15 = smov %s793_s18 }
  0xff   :  { %12 = sbr.rel (!%p10_p7) target bundleno = 3 (0x3), region = 62 }

// kernel: rnlransr_forward.49
= control target key start
LH: loop header
LB: loop body
LE: loop exit
PB: predicated region body
PF: predicated region fallthrough
CT: control target
= control target key end

     0   :  { %s3040_s30 = smov 0   ;;  %s3945_s0 = inlined_call_operand.vmem [shape: f32[2,16,16,16], index: 0, kind: input, shape index: {}]   ;;  %s3946_s1 = inlined_call_operand.vmem [shape: f32[16,8], index: 1, kind: input, shape index: {}]   ;;  %s3947_s2 = inlined_call_operand.vmem [shape: f32[1,8], index: 2, kind: input, shape index: {}]   ;;  %s3948_s3 = inlined_call_operand.vmem [shape: f32[16,8], index: 3, kind: input, shape index: {}]   ;;  %s3949_s4 = inlined_call_operand.vmem [shape: f32[1,8], index: 4, kind: input, shape index: {}]   ;;  %s3950_s5 = inlined_call_operand.vmem [shape: f32[16,8], index: 5, kind: input, shape index: {}]   ;;  %s3951_s6 = inlined_call_operand.vmem [shape: f32[1,8], index: 6, kind: input, shape index: {}]   ;;  %s3952_s7 = inlined_call_operand.vmem [shape: f32[8,16], index: 7, kind: input, shape index: {}]   ;;  %s3953_s8 = inlined_call_operand.vmem [shape: f32[1,16], index: 8, kind: input, shape index: {}]   ;;  %s3954_s9 = inlined_call_operand.vmem [shape: f32[2,16,16,16], index: 9, kind: output, shape index: {}]  }
   0x1 LB: > { %s2280_s10 = sadd.s32 4294967295, %s2988_s30   ;;  %p2284_p0 = scmp.ge.s32.totalorder %s2988_s30, 1  ;;  %s2988_s30 = sphi %s3040_s30, %s19_s30  }
   0x2   : > { %p287_p1 = scmp.lt.s32.totalorder %s2988_s30, 3 }
   0x4   : > { %p288_p2 = pnand %p2284_p0, %p287_p1 }
   0x6   : > { %291 = sbr.rel (%p288_p2) target bundleno = 1278 (0x4fe), region = 56 }
   0xd   : > { %v602_v0 = vld [vmem:[%s3948_s3] sm:$0xff]  ;;  %v603_v1 = vld [vmem:[%s3948_s3 + $0x8] sm:$0xff]  ;;  %p323_p3 = scmp.lt.s32.totalorder %s2280_s10, 1  ;;  %vm392_vm0 = vcmask 130048   ;;  %vm976_vm1 = vcmask 64512   ;;  %vm1996_vm2 = vcmask 1043456  }
   0xe   : > { %v382_v2 = vld [vmem:[%s3946_s1] sm:$0xff]  ;;  %v604_v3 = vpack.c.bf16 %v603_v1, %v602_v0  ;;  %v383_v4 = vld [vmem:[%s3946_s1 + $0x8] sm:$0xff] }
   0xf   : > { %s3995_s10 = smov (!%p323_p3, %s2280_s10), 1  ;;  %v384_v5 = vpack.c.bf16 %v383_v4, %v382_v2  ;;  %v773_v54 = vld [vmem:[%s3950_s5] sm:$0xff]  ;;  %v774_v55 = vld [vmem:[%s3950_s5 + $0x8] sm:$0xff] }
  0x10   : > { %2639 = vmatprep.subr.bf16.mxu1 %v604_v3  ;;  %s2375_s19 = sshll.u32 %s3995_s10, 8  ;;  %v775_v56 = vpack.c.bf16 %v774_v55, %v773_v54  ;;  %v3209_v57 = vld [vmem:[%s3947_s2] ss:$0 sm:$0xff] }
  0x11   : > { %2640 = vmatpush3.bf16.msra.mxu1 %v604_v3  ;;  %2605 = vmatprep.subr.bf16.mxu0 %v384_v5  ;;  %s3068_s22 = scalar_lea.vmem %s3945_s0, %s2375_s19  ;;  %v3214_v59 = vld [vmem:[%s3949_s4] ss:$0 sm:$0xff]  ;;  %s3813_s21 = scalar_lea.vmem %s3954_s9, %s2375_s19 }
  0x12   : > { %2606 = vmatpush3.bf16.msra.mxu0 %v384_v5  ;;  %v334_v6 = vld [vmem:[%s3068_s22] sm:$0xff]  ;;  %v335_v7 = vld [vmem:[%s3068_s22 + $0x8] sm:$0xff]  ;;  %v336_v8 = vld [vmem:[%s3068_s22 + $0x10] sm:$0xff] }
  0x13   : > { %v3073_v9 = vpack.c.bf16 %v335_v7, %v334_v6  ;;  %v337_v10 = vld [vmem:[%s3068_s22 + $0x18] sm:$0xff]  ;;  %v338_v11 = vld [vmem:[%s3068_s22 + $0x20] sm:$0xff]  ;;  %v339_v12 = vld [vmem:[%s3068_s22 + $0x28] sm:$0xff]  ;;  %2673 = vmatprep.subr.bf16.mxu0 %v775_v56 }
  0x14   : > { %v3078_v13 = vpack.c.bf16 %v337_v10, %v336_v8  ;;  %v3080_v14 = vpack.c.bf16 %v339_v12, %v338_v11  ;;  %v340_v15 = vld [vmem:[%s3068_s22 + $0x30] sm:$0xff]  ;;  %v341_v16 = vld [vmem:[%s3068_s22 + $0x38] sm:$0xff]  ;;  %v342_v17 = vld [vmem:[%s3068_s22 + $0x40] sm:$0xff] }
  0x15   : > { %2641 = vmatprep.mubr.msk.bf16.mxu1 %vm392_vm0, %v3073_v9  ;;  %2607 = vmatprep.mubr.msk.bf16.mxu0 %vm392_vm0, %v3073_v9  ;;  %v343_v18 = vld [vmem:[%s3068_s22 + $0x48] sm:$0xff]  ;;  %v3098_v19 = vpack.c.bf16 %v341_v16, %v340_v15  ;;  %v344_v21 = vld [vmem:[%s3068_s22 + $0x50] sm:$0xff]  ;;  %v345_v22 = vld [vmem:[%s3068_s22 + $0x58] sm:$0xff] }
  0x16   : > { %2642 = vmatmul.mubr.msk.bf16.vlgmr.msra.gmra.mrb[0].mxu1 %vm392_vm0, %v3078_v13  ;;  %2608 = vmatmul.mubr.msk.bf16.vlgmr.msra.gmra.mrb[0].mxu0 %vm392_vm0, %v3078_v13  ;;  %v3100_v20 = vpack.c.bf16 %v343_v18, %v342_v17  ;;  %v346_v23 = vld [vmem:[%s3068_s22 + $0x60] sm:$0xff]  ;;  %v347_v24 = vld [vmem:[%s3068_s22 + $0x68] sm:$0xff]  ;;  %v3114_v25 = vpack.c.bf16 %v345_v22, %v344_v21  ;;  %v348_v27 = vld [vmem:[%s3068_s22 + $0x70] sm:$0xff] }
  0x17   : > { %2645 = vmatprep.mubr.msk.bf16.mxu1 %vm392_vm0, %v3080_v14  ;;  %2611 = vmatprep.mubr.msk.bf16.mxu0 %vm392_vm0, %v3080_v14  ;;  %v3116_v26 = vpack.c.bf16 %v347_v24, %v346_v23  ;;  %v349_v28 = vld [vmem:[%s3068_s22 + $0x78] sm:$0xff]  ;;  %v350_v29 = vld [vmem:[%s3068_s22 + $0x80] sm:$0xff]  ;;  %v351_v30 = vld [vmem:[%s3068_s22 + $0x88] sm:$0xff] }
  0x18   : > { %v3130_v31 = vpack.c.bf16 %v349_v28, %v348_v27  ;;  %v3132_v32 = vpack.c.bf16 %v351_v30, %v350_v29  ;;  %v352_v33 = vld [vmem:[%s3068_s22 + $0x90] sm:$0xff]  ;;  %v353_v34 = vld [vmem:[%s3068_s22 + $0x98] sm:$0xff]  ;;  %v354_v35 = vld [vmem:[%s3068_s22 + $0xa0] sm:$0xff]  ;;  %2674 = vmatpush3.bf16.msra.mxu0 %v775_v56 }
  0x19   : > { %v355_v36 = vld [vmem:[%s3068_s22 + $0xa8] sm:$0xff]  ;;  %v3146_v37 = vpack.c.bf16 %v353_v34, %v352_v33  ;;  %v356_v39 = vld [vmem:[%s3068_s22 + $0xb0] sm:$0xff]  ;;  %v357_v40 = vld [vmem:[%s3068_s22 + $0xb8] sm:$0xff] }
  0x1a   : > { %v3148_v38 = vpack.c.bf16 %v355_v36, %v354_v35  ;;  %v358_v41 = vld [vmem:[%s3068_s22 + $0xc0] sm:$0xff]  ;;  %v359_v42 = vld [vmem:[%s3068_s22 + $0xc8] sm:$0xff]  ;;  %v3162_v43 = vpack.c.bf16 %v357_v40, %v356_v39  ;;  %v360_v45 = vld [vmem:[%s3068_s22 + $0xd0] sm:$0xff] }
  0x1b   : > { %v3164_v44 = vpack.c.bf16 %v359_v42, %v358_v41  ;;  %v361_v46 = vld [vmem:[%s3068_s22 + $0xd8] sm:$0xff]  ;;  %v362_v47 = vld [vmem:[%s3068_s22 + $0xe0] sm:$0xff]  ;;  %v363_v48 = vld [vmem:[%s3068_s22 + $0xe8] sm:$0xff] }
  0x1c   : > { %v3178_v49 = vpack.c.bf16 %v361_v46, %v360_v45  ;;  %v3180_v50 = vpack.c.bf16 %v363_v48, %v362_v47  ;;  %v364_v51 = vld [vmem:[%s3068_s22 + $0xf0] sm:$0xff]  ;;  %v365_v52 = vld [vmem:[%s3068_s22 + $0xf8] sm:$0xff] }
  0x1d   : > { %v3192_v53 = vpack.c.bf16 %v365_v52, %v364_v51 }
  0x1e   : > { %2646 = vmatmul.mubr.msk.bf16.gmra.mrb[4].mxu1 %vm392_vm0, %v3098_v19  ;;  %2612 = vmatmul.mubr.msk.bf16.gmra.mrb[4].mxu0 %vm392_vm0, %v3098_v19 }
  0x1f   : > { %2649 = vmatprep.mubr.msk.bf16.mxu1 %vm392_vm0, %v3100_v20  ;;  %2615 = vmatprep.mubr.msk.bf16.mxu0 %vm392_vm0, %v3100_v20 }
  0x26   : > { %2650 = vmatmul.mubr.msk.bf16.gmra.mrb[8].mxu1 %vm392_vm0, %v3114_v25  ;;  %2616 = vmatmul.mubr.msk.bf16.gmra.mrb[8].mxu0 %vm392_vm0, %v3114_v25 }
  0x27   : > { %2653 = vmatprep.mubr.msk.bf16.mxu1 %vm392_vm0, %v3116_v26  ;;  %2619 = vmatprep.mubr.msk.bf16.mxu0 %vm392_vm0, %v3116_v26 }
  0x2e   : > { %2654 = vmatmul.mubr.msk.bf16.gmra.mrb[12].mxu1 %vm392_vm0, %v3130_v31  ;;  %2620 = vmatmul.mubr.msk.bf16.gmra.mrb[12].mxu0 %vm392_vm0, %v3130_v31 }
  0x2f   : > { %2657 = vmatprep.mubr.msk.bf16.mxu1 %vm392_vm0, %v3132_v32  ;;  %2623 = vmatprep.mubr.msk.bf16.mxu0 %vm392_vm0, %v3132_v32 }
  0x36   : > { %2658 = vmatmul.mubr.msk.bf16.gmra.mrb[16].mxu1 %vm392_vm0, %v3146_v37  ;;  %2624 = vmatmul.mubr.msk.bf16.gmra.mrb[16].mxu0 %vm392_vm0, %v3146_v37 }
  0x37   : > { %2661 = vmatprep.mubr.msk.bf16.mxu1 %vm392_vm0, %v3148_v38  ;;  %2627 = vmatprep.mubr.msk.bf16.mxu0 %vm392_vm0, %v3148_v38 }
  0x3e   : > { %2662 = vmatmul.mubr.msk.bf16.gmra.mrb[20].mxu1 %vm392_vm0, %v3162_v43  ;;  %2628 = vmatmul.mubr.msk.bf16.gmra.mrb[20].mxu0 %vm392_vm0, %v3162_v43 }
  0x3f   : > { %2665 = vmatprep.mubr.msk.bf16.mxu1 %vm392_vm0, %v3164_v44  ;;  %2631 = vmatprep.mubr.msk.bf16.mxu0 %vm392_vm0, %v3164_v44 }
  0x46   : > { %2666 = vmatmul.mubr.msk.bf16.gmra.mrb[24].mxu1 %vm392_vm0, %v3178_v49  ;;  %2632 = vmatmul.mubr.msk.bf16.gmra.mrb[24].mxu0 %vm392_vm0, %v3178_v49 }
  0x47   : > { %2669 = vmatprep.mubr.msk.bf16.mxu1 %vm392_vm0, %v3180_v50  ;;  %2635 = vmatprep.mubr.msk.bf16.mxu0 %vm392_vm0, %v3180_v50 }
  0x4e   : > { %2670 = vmatmul.mubr.msk.bf16.gmra.mrb[28].mxu1 %vm392_vm0, %v3192_v53  ;;  %2636 = vmatmul.mubr.msk.bf16.gmra.mrb[28].mxu0 %vm392_vm0, %v3192_v53 }
  0x4f   : > { %2675 = vmatprep.mubr.msk.bf16.mxu0 %vm392_vm0, %v3073_v9 }
  0x56   : > { %2676 = vmatmul.mubr.msk.bf16.vlgmr.msra.gmra.mrb[32].mxu0 %vm392_vm0, %v3078_v13 }
  0x57   : > { %2679 = vmatprep.mubr.msk.bf16.mxu0 %vm392_vm0, %v3080_v14 }
  0x5e   : > { %2680 = vmatmul.mubr.msk.bf16.gmra.mrb[36].mxu0 %vm392_vm0, %v3098_v19 }
  0x5f   : > { %2683 = vmatprep.mubr.msk.bf16.mxu0 %vm392_vm0, %v3100_v20 }
  0x66   : > { %2684 = vmatmul.mubr.msk.bf16.gmra.mrb[40].mxu0 %vm392_vm0, %v3114_v25 }
  0x67   : > { %2687 = vmatprep.mubr.msk.bf16.mxu0 %vm392_vm0, %v3116_v26 }
  0x6e   : > { %2688 = vmatmul.mubr.msk.bf16.gmra.mrb[44].mxu0 %vm392_vm0, %v3130_v31 }
  0x6f   : > { %2691 = vmatprep.mubr.msk.bf16.mxu0 %vm392_vm0, %v3132_v32 }
  0x76   : > { %2692 = vmatmul.mubr.msk.bf16.gmra.mrb[48].mxu0 %vm392_vm0, %v3146_v37 }
  0x77   : > { %2695 = vmatprep.mubr.msk.bf16.mxu0 %vm392_vm0, %v3148_v38 }
  0x7e   : > { %2696 = vmatmul.mubr.msk.bf16.gmra.mrb[52].mxu0 %vm392_vm0, %v3162_v43 }
  0x7f   : > { %2699 = vmatprep.mubr.msk.bf16.mxu0 %vm392_vm0, %v3164_v44 }
  0x86   : > { %2700 = vmatmul.mubr.msk.bf16.gmra.mrb[56].mxu0 %vm392_vm0, %v3178_v49 }
  0x87   : > { %2703 = vmatprep.mubr.msk.bf16.mxu0 %vm392_vm0, %v3180_v50 }
  0x8e   : > { %2704 = vmatmul.mubr.msk.bf16.gmra.mrb[60].mxu0 %vm392_vm0, %v3192_v53 }
  0xe9   : > { %v2643_v58 = vpop.f32.mrb[0].mxu1  ;;  %v2609_v60 = vpop.f32.mrb[0].mxu0 }
  0xea   : > { %v646_v61 = vpop.f32.mrb[1].mxu1  ;;  %v484_v62 = vadd.f32 %v2609_v60, %v3209_v57  ;;  %v475_v63 = vpop.f32.mrb[1].mxu0  ;;  %v3223_v3 = vadd.f32 %v2643_v58, %v3214_v59 }
  0xeb   : > { %v2644_v0 = vpop.f32.mrb[2].mxu1  ;;  %v476_v1 = vadd.f32 %v3209_v57, %v475_v63  ;;  %v2610_v2 = vpop.f32.mrb[2].mxu0  ;;  %v3230_v8 = vadd.f32 %v3214_v59, %v646_v61 }
  0xec   : > { %v3226_v4 = vadd.f32 %v2644_v0, %v3214_v59  ;;  %v649_v5 = vpop.f32.mrb[3].mxu1  ;;  %v487_v6 = vadd.f32 %v2610_v2, %v3209_v57  ;;  %v478_v7 = vpop.f32.mrb[3].mxu0 }
  0xed   : > { %v3233_v9 = vadd.f32 %v3214_v59, %v649_v5  ;;  %v479_v10 = vadd.f32 %v3209_v57, %v478_v7 }
  0xee   : > { %v961_v11 = vpack.c.bf16 %v3226_v4, %v3223_v3  ;;  %v3238_v12 = vpack.c.bf16 %v487_v6, %v484_v62 }
  0xef   : > { %v960_v13 = vpack.c.bf16 %v3233_v9, %v3230_v8  ;;  %v3242_v14 = vpack.c.bf16 %v479_v10, %v476_v1 }
  0xf0   : > { %v1029_v44 = vsel %vm976_vm1, %v961_v11, 0 }
  0xf1   : > { %v2647_v15 = vpop.f32.mrb[4].mxu1  ;;  %2444 = vmatprep.mubr.msk.bf16.mxu1 %vm976_vm1, %v3242_v14  ;;  %v2613_v16 = vpop.f32.mrb[4].mxu0 }
  0xf2   : > { %v662_v17 = vpop.f32.mrb[5].mxu1  ;;  %v500_v18 = vadd.f32 %v2613_v16, %v3209_v57  ;;  %v491_v21 = vpop.f32.mrb[5].mxu0  ;;  %v3253_v27 = vadd.f32 %v2647_v15, %v3214_v59 }
  0xf3   : > { %v2648_v22 = vpop.f32.mrb[6].mxu1  ;;  %v492_v23 = vadd.f32 %v3209_v57, %v491_v21  ;;  %v2614_v24 = vpop.f32.mrb[6].mxu0  ;;  %v3260_v33 = vadd.f32 %v3214_v59, %v662_v17 }
  0xf4   : > { %v3256_v28 = vadd.f32 %v2648_v22, %v3214_v59  ;;  %v665_v29 = vpop.f32.mrb[7].mxu1  ;;  %v503_v19 = vadd.f32 %v2614_v24, %v3209_v57  ;;  %v494_v30 = vpop.f32.mrb[7].mxu0 }
  0xf5   : > { %v3263_v34 = vadd.f32 %v3214_v59, %v665_v29  ;;  %v495_v20 = vadd.f32 %v3209_v57, %v494_v30 }
  0xf6   : > { %v963_v35 = vpack.c.bf16 %v3256_v28, %v3253_v27  ;;  %v3268_v36 = vpack.c.bf16 %v503_v19, %v500_v18 }
  0xf7   : > { %v962_v39 = vpack.c.bf16 %v3263_v34, %v3260_v33  ;;  %v3272_v40 = vpack.c.bf16 %v495_v20, %v492_v23 }
  0xf9   : > { %v2651_v41 = vpop.f32.mrb[8].mxu1  ;;  %v2617_v42 = vpop.f32.mrb[8].mxu0  ;;  %v1032_v50 = vsel %vm976_vm1, %v962_v39, 0 }
  0xfa   : > { %v678_v45 = vpop.f32.mrb[9].mxu1  ;;  %v516_v46 = vadd.f32 %v2617_v42, %v3209_v57  ;;  %v507_v47 = vpop.f32.mrb[9].mxu0  ;;  %v3281_v54 = vadd.f32 %v2651_v41, %v3214_v59 }
  0xfb   : > { %v2652_v48 = vpop.f32.mrb[10].mxu1  ;;  %v508_v51 = vadd.f32 %v3209_v57, %v507_v47  ;;  %v2618_v52 = vpop.f32.mrb[10].mxu0  ;;  %v3288_v60 = vadd.f32 %v3214_v59, %v678_v45 }
  0xfc   : > { %v3284_v55 = vadd.f32 %v2652_v48, %v3214_v59  ;;  %v681_v56 = vpop.f32.mrb[11].mxu1  ;;  %v519_v25 = vadd.f32 %v2618_v52, %v3209_v57  ;;  %v510_v58 = vpop.f32.mrb[11].mxu0 }
  0xfd   : > { %v3291_v61 = vadd.f32 %v3214_v59, %v681_v56  ;;  %v511_v26 = vadd.f32 %v3209_v57, %v510_v58 }
  0xfe   : > { %v965_v62 = vpack.c.bf16 %v3284_v55, %v3281_v54  ;;  %v3296_v63 = vpack.c.bf16 %v519_v25, %v516_v46 }
  0xff   : > { %v964_v0 = vpack.c.bf16 %v3291_v61, %v3288_v60  ;;  %v3300_v1 = vpack.c.bf16 %v511_v26, %v508_v51 }
 0x101   : > { %v2655_v2 = vpop.f32.mrb[12].mxu1  ;;  %v2621_v5 = vpop.f32.mrb[12].mxu0  ;;  %v1038_v27 = vsel %vm976_vm1, %v964_v0, 0 }
 0x102   : > { %v694_v6 = vpop.f32.mrb[13].mxu1  ;;  %v532_v7 = vadd.f32 %v2621_v5, %v3209_v57  ;;  %v523_v10 = vpop.f32.mrb[13].mxu0  ;;  %v3309_v18 = vadd.f32 %v2655_v2, %v3214_v59 }
 0x103   : > { %v2656_v15 = vpop.f32.mrb[14].mxu1  ;;  %v524_v16 = vadd.f32 %v3209_v57, %v523_v10  ;;  %v2622_v17 = vpop.f32.mrb[14].mxu0  ;;  %v3316_v24 = vadd.f32 %v3214_v59, %v694_v6 }
 0x104   : > { %v3312_v21 = vadd.f32 %v2656_v15, %v3214_v59  ;;  %v697_v22 = vpop.f32.mrb[15].mxu1  ;;  %v535_v31 = vadd.f32 %v2622_v17, %v3209_v57  ;;  %v526_v23 = vpop.f32.mrb[15].mxu0  ;;  %v1026_v17 = vsel %vm976_vm1, %v960_v13, 0 }
 0x105   : > { %v3319_v29 = vadd.f32 %v3214_v59, %v697_v22  ;;  %v527_v32 = vadd.f32 %v3209_v57, %v526_v23 }
 0x106   : > { %v967_v19 = vpack.c.bf16 %v3312_v21, %v3309_v18  ;;  %v3324_v30 = vpack.c.bf16 %v535_v31, %v532_v7 }
 0x107   : > { %v966_v20 = vpack.c.bf16 %v3319_v29, %v3316_v24  ;;  %v3328_v41 = vpack.c.bf16 %v527_v32, %v524_v16 }
 0x108   : > { %v1047_v55 = vsel %vm976_vm1, %v967_v19, 0 }
 0x109   : > { %v2659_v42 = vpop.f32.mrb[16].mxu1  ;;  %v2625_v45 = vpop.f32.mrb[16].mxu0  ;;  %v1044_v54 = vsel %vm976_vm1, %v966_v20, 0 }
 0x10a   : > { %v710_v46 = vpop.f32.mrb[17].mxu1  ;;  %v548_v47 = vadd.f32 %v2625_v45, %v3209_v57  ;;  %v539_v48 = vpop.f32.mrb[17].mxu0  ;;  %v719_v25 = vadd.f32 %v2659_v42, %v3214_v59 }
 0x10b   : > { %v2660_v51 = vpop.f32.mrb[18].mxu1  ;;  %v540_v52 = vadd.f32 %v3209_v57, %v539_v48  ;;  %v2626_v56 = vpop.f32.mrb[18].mxu0  ;;  %v711_v37 = vadd.f32 %v3214_v59, %v710_v46 }
 0x10c   : > { %v722_v58 = vadd.f32 %v2660_v51, %v3214_v59  ;;  %v713_v26 = vpop.f32.mrb[19].mxu1  ;;  %v551_v2 = vadd.f32 %v2626_v56, %v3209_v57  ;;  %v542_v5 = vpop.f32.mrb[19].mxu0 }
 0x10d   : > { %v714_v6 = vadd.f32 %v3214_v59, %v713_v26  ;;  %v543_v7 = vadd.f32 %v3209_v57, %v542_v5 }
 0x10e   : > { %v969_v10 = vpack.c.bf16 %v722_v58, %v719_v25  ;;  %v3342_v38 = vpack.c.bf16 %v551_v2, %v548_v47 }
 0x10f   : > { %v968_v15 = vpack.c.bf16 %v714_v6, %v711_v37  ;;  %v3344_v16 = vpack.c.bf16 %v543_v7, %v540_v52 }
 0x111   : > { %2741 = vmatprep.subr.msk.bf16.mxu1 %vm976_vm1, %v968_v15  ;;  %v2663_v22 = vpop.f32.mrb[20].mxu1  ;;  %v2629_v32 = vpop.f32.mrb[20].mxu0 }
 0x112   : > { %2429 = vmatpush3.bf16.xpose.msra.mxu1 %v1026_v17  ;;  %v735_v31 = vadd.f32 %v2663_v22, %v3214_v59  ;;  %v726_v23 = vpop.f32.mrb[21].mxu1  ;;  %v555_v8 = vpop.f32.mrb[21].mxu0  ;;  %v564_v48 = vadd.f32 %v2629_v32, %v3209_v57 }
 0x113   : > { %2742 = vmatprep.subr.msk.bf16.mxu1 %vm976_vm1, %v969_v10  ;;  %v727_v42 = vadd.f32 %v3214_v59, %v726_v23  ;;  %v2664_v45 = vpop.f32.mrb[22].mxu1  ;;  %v556_v52 = vadd.f32 %v3209_v57, %v555_v8  ;;  %v2630_v56 = vpop.f32.mrb[22].mxu0 }
 0x114   : > { %v738_v9 = vadd.f32 %v2664_v45, %v3214_v59  ;;  %v729_v13 = vpop.f32.mrb[23].mxu1  ;;  %v567_v26 = vadd.f32 %v2630_v56, %v3209_v57  ;;  %v558_v2 = vpop.f32.mrb[23].mxu0  ;;  %v1041_v56 = vsel %vm976_vm1, %v965_v62, 0 }
 0x115   : > { %v730_v46 = vadd.f32 %v3214_v59, %v729_v13  ;;  %v559_v11 = vadd.f32 %v3209_v57, %v558_v2  ;;  %v1035_v13 = vsel %vm976_vm1, %v963_v35, 0 }
 0x116   : > { %v971_v43 = vpack.c.bf16 %v738_v9, %v735_v31  ;;  %v3376_v37 = vpack.c.bf16 %v567_v26, %v564_v48 }
 0x117   : > { %v970_v47 = vpack.c.bf16 %v730_v46, %v727_v42  ;;  %v3379_v7 = vpack.c.bf16 %v559_v11, %v556_v52 }
 0x119   : > { %v2667_v51 = vpop.f32.mrb[24].mxu1  ;;  %v2633_v23 = vpop.f32.mrb[24].mxu0 }
 0x11a   : > { %2431 = vmatpush3.bf16.xpose.msra.mxu1 %v1029_v44  ;;  %v751_v25 = vadd.f32 %v2667_v51, %v3214_v59  ;;  %v742_v58 = vpop.f32.mrb[25].mxu1  ;;  %v571_v45 = vpop.f32.mrb[25].mxu0  ;;  %v580_v53 = vadd.f32 %v2633_v23, %v3209_v57 }
 0x11b   : > { %2743 = vmatprep.subr.msk.bf16.mxu1 %vm976_vm1, %v970_v47  ;;  %v743_v3 = vadd.f32 %v3214_v59, %v742_v58  ;;  %v2668_v4 = vpop.f32.mrb[26].mxu1  ;;  %v572_v46 = vadd.f32 %v3209_v57, %v571_v45 }
 0x11c   : > { %v754_v49 = vadd.f32 %v2668_v4, %v3214_v59  ;;  %v745_v5 = vpop.f32.mrb[27].mxu1 }
 0x11d   : > { %v746_v6 = vadd.f32 %v3214_v59, %v745_v5 }
 0x11e   : > { %v973_v10 = vpack.c.bf16 %v754_v49, %v751_v25 }
 0x11f   : > { %v972_v15 = vpack.c.bf16 %v746_v6, %v743_v3 }
 0x121   : > { %v2671_v17 = vpop.f32.mrb[28].mxu1 }
 0x122   : > { %2433 = vmatpush3.bf16.xpose.msra.mxu1 %v1032_v50  ;;  %v767_v22 = vadd.f32 %v2671_v17, %v3214_v59  ;;  %v758_v31 = vpop.f32.mrb[29].mxu1 }
 0x123   : > { %2744 = vmatprep.subr.msk.bf16.mxu1 %vm976_vm1, %v971_v43  ;;  %v759_v32 = vadd.f32 %v3214_v59, %v758_v31  ;;  %v2672_v42 = vpop.f32.mrb[30].mxu1  ;;  %v2634_v43 = vpop.f32.mrb[26].mxu0 }
 0x124   : > { %v770_v8 = vadd.f32 %v2672_v42, %v3214_v59  ;;  %v761_v33 = vpop.f32.mrb[31].mxu1  ;;  %v583_v47 = vadd.f32 %v2634_v43, %v3209_v57  ;;  %v574_v48 = vpop.f32.mrb[27].mxu0 }
 0x125   : > { %v762_v34 = vadd.f32 %v3214_v59, %v761_v33  ;;  %v575_v59 = vadd.f32 %v3209_v57, %v574_v48  ;;  %v2637_v28 = vpop.f32.mrb[28].mxu0 }
 0x126   : > { %v975_v39 = vpack.c.bf16 %v770_v8, %v767_v22  ;;  %v957_v44 = vpack.c.bf16 %v583_v47, %v580_v53  ;;  %v587_v35 = vpop.f32.mrb[29].mxu0  ;;  %v596_v52 = vadd.f32 %v2637_v28, %v3209_v57 }
 0x127   : > { %v974_v9 = vpack.c.bf16 %v762_v34, %v759_v32  ;;  %v956_v51 = vpack.c.bf16 %v575_v59, %v572_v46  ;;  %v588_v25 = vadd.f32 %v3209_v57, %v587_v35  ;;  %v2638_v58 = vpop.f32.mrb[30].mxu0 }
 0x128   : > { %v599_v60 = vadd.f32 %v2638_v58, %v3209_v57  ;;  %v590_v61 = vpop.f32.mrb[31].mxu0 }
 0x129   : > { %v591_v0 = vadd.f32 %v3209_v57, %v590_v61  ;;  %v2677_v57 = vpop.f32.mrb[32].mxu0 }
 0x12a   : > { %2435 = vmatpush3.bf16.xpose.msra.mxu1 %v1035_v13  ;;  %v959_v26 = vpack.c.bf16 %v599_v60, %v596_v52 }
 0x12b   : > { %2745 = vmatprep.subr.msk.bf16.mxu1 %vm976_vm1, %v972_v15  ;;  %v958_v2 = vpack.c.bf16 %v591_v0, %v588_v25 }
 0x132   : > { %2437 = vmatpush3.bf16.xpose.msra.mxu1 %v1038_v27 }
 0x133   : > { %2746 = vmatprep.subr.msk.bf16.mxu1 %vm976_vm1, %v973_v10 }
 0x13a   : > { %2439 = vmatpush3.bf16.xpose.msra.mxu1 %v1041_v56 }
 0x13b   : > { %2747 = vmatprep.subr.msk.bf16.mxu1 %vm976_vm1, %v974_v9 }
 0x142   : > { %2441 = vmatpush3.bf16.xpose.msra.mxu1 %v1044_v54 }
 0x143   : > { %2748 = vmatprep.subr.msk.bf16.mxu1 %vm976_vm1, %v975_v39 }
 0x14a   : > { %2443 = vmatpush3.bf16.xpose.msra.mxu1 %v1047_v55 }
 0x151   : > { %2445 = vmatmul.mubr.msk.bf16.vlgmr.msra.gmra.mrb[32].mxu1 %vm976_vm1, %v3242_v14 }
 0x152   : > { %2446 = vmatprep.mubr.msk.bf16.mxu1 %vm976_vm1, %v3238_v12 }
 0x159   : > { %2447 = vmatmul.mubr.msk.bf16.gmra.mrb[36].mxu1 %vm976_vm1, %v3238_v12  ;;  %v3481_v12 = vld [vmem:[%s3951_s6] ss:$0 sm:$0xff] }
 0x15a   : > { %2448 = vmatprep.mubr.msk.bf16.mxu1 %vm976_vm1, %v3272_v40  ;;  %v826_v14 = vadd.f32 %v2677_v57, %v3481_v12 }
 0x161   : > { %2449 = vmatmul.mubr.msk.bf16.gmra.mrb[40].mxu1 %vm976_vm1, %v3272_v40 }
 0x162   : > { %2450 = vmatprep.mubr.msk.bf16.mxu1 %vm976_vm1, %v3268_v36 }
 0x169   : > { %2451 = vmatmul.mubr.msk.bf16.gmra.mrb[44].mxu1 %vm976_vm1, %v3268_v36  ;;  %v817_v36 = vpop.f32.mrb[33].mxu0 }
 0x16a   : > { %2452 = vmatprep.mubr.msk.bf16.mxu1 %vm976_vm1, %v3300_v1  ;;  %v818_v40 = vadd.f32 %v3481_v12, %v817_v36  ;;  %v2678_v62 = vpop.f32.mrb[34].mxu0 }
 0x171   : > { %2453 = vmatmul.mubr.msk.bf16.gmra.mrb[48].mxu1 %vm976_vm1, %v3300_v1  ;;  %v820_v1 = vpop.f32.mrb[35].mxu0 }
 0x172   : > { %2454 = vmatprep.mubr.msk.bf16.mxu1 %vm976_vm1, %v3296_v63  ;;  %v821_v18 = vadd.f32 %v3481_v12, %v820_v1  ;;  %v2681_v21 = vpop.f32.mrb[36].mxu0 }
 0x173   : > { %v3488_v29 = vadd.f32 %v2681_v21, %v3481_v12  ;;  %v833_v19 = vpop.f32.mrb[37].mxu0 }
 0x174   : > { %v834_v20 = vadd.f32 %v3481_v12, %v833_v19 }
 0x179   : > { %2455 = vmatmul.mubr.msk.bf16.gmra.mrb[52].mxu1 %vm976_vm1, %v3296_v63  ;;  %v829_v63 = vadd.f32 %v2678_v62, %v3481_v12 }
 0x17a   : > { %2456 = vmatprep.mubr.msk.bf16.mxu1 %vm976_vm1, %v3328_v41 }
 0x17b   : > { %v1587_v24 = vpack.c.bf16 %v829_v63, %v826_v14 }
 0x181   : > { %2457 = vmatmul.mubr.msk.bf16.gmra.mrb[56].mxu1 %vm976_vm1, %v3328_v41  ;;  %v2682_v41 = vpop.f32.mrb[38].mxu0 }
 0x182   : > { %2458 = vmatprep.mubr.msk.bf16.mxu1 %vm976_vm1, %v3324_v30 }
 0x189   : > { %2459 = vmatmul.mubr.msk.bf16.gmra.mrb[60].mxu1 %vm976_vm1, %v3324_v30  ;;  %v1586_v30 = vpack.c.bf16 %v821_v18, %v818_v40 }
 0x18a   : > { %2460 = vmatprep.mubr.msk.bf16.mxu1 %vm976_vm1, %v3344_v16 }
 0x191   : > { %2461 = vmatmul.mubr.msk.bf16.gmra.mrb[64].mxu1 %vm976_vm1, %v3344_v16  ;;  %v836_v16 = vpop.f32.mrb[39].mxu0 }
 0x192   : > { %2462 = vmatprep.mubr.msk.bf16.mxu1 %vm976_vm1, %v3342_v38  ;;  %v837_v3 = vadd.f32 %v3481_v12, %v836_v16  ;;  %v2685_v4 = vpop.f32.mrb[40].mxu0 }
 0x193   : > { %v3495_v49 = vadd.f32 %v2685_v4, %v3481_v12  ;;  %v849_v5 = vpop.f32.mrb[41].mxu0 }
 0x194   : > { %v850_v6 = vadd.f32 %v3481_v12, %v849_v5 }
 0x199   : > { %2463 = vmatmul.mubr.msk.bf16.gmra.mrb[68].mxu1 %vm976_vm1, %v3342_v38  ;;  %v845_v38 = vadd.f32 %v2682_v41, %v3481_v12 }
 0x19a   : > { %2464 = vmatprep.mubr.msk.bf16.mxu1 %vm976_vm1, %v3379_v7 }
 0x19b   : > { %v1589_v11 = vpack.c.bf16 %v845_v38, %v3488_v29 }
 0x1a1   : > { %2465 = vmatmul.mubr.msk.bf16.gmra.mrb[72].mxu1 %vm976_vm1, %v3379_v7  ;;  %v2686_v7 = vpop.f32.mrb[42].mxu0 }
 0x1a2   : > { %2466 = vmatprep.mubr.msk.bf16.mxu1 %vm976_vm1, %v3376_v37  ;;  %v3499_v10 = vadd.f32 %v2686_v7, %v3481_v12  ;;  %v852_v15 = vpop.f32.mrb[43].mxu0 }
 0x1a3   : > { %v853_v50 = vadd.f32 %v3481_v12, %v852_v15  ;;  %v2689_v17 = vpop.f32.mrb[44].mxu0 }
 0x1a4   : > { %v1591_v22 = vpack.c.bf16 %v3499_v10, %v3495_v49  ;;  %v3505_v31 = vadd.f32 %v2689_v17, %v3481_v12  ;;  %v865_v23 = vpop.f32.mrb[45].mxu0 }
 0x1a5   : > { %v1590_v32 = vpack.c.bf16 %v853_v50, %v850_v6  ;;  %v866_v42 = vadd.f32 %v3481_v12, %v865_v23  ;;  %v2690_v45 = vpop.f32.mrb[46].mxu0 }
 0x1a6   : > { %v877_v8 = vadd.f32 %v2690_v45, %v3481_v12  ;;  %v868_v33 = vpop.f32.mrb[47].mxu0 }
 0x1a7   : > { %v869_v34 = vadd.f32 %v3481_v12, %v868_v33  ;;  %v2693_v9 = vpop.f32.mrb[48].mxu0 }
 0x1a8   : > { %v1593_v39 = vpack.c.bf16 %v877_v8, %v3505_v31  ;;  %v890_v13 = vadd.f32 %v2693_v9, %v3481_v12  ;;  %v881_v46 = vpop.f32.mrb[49].mxu0 }
 0x1a9   : > { %2467 = vmatmul.mubr.msk.bf16.gmra.mrb[76].mxu1 %vm976_vm1, %v3376_v37  ;;  %v1588_v37 = vpack.c.bf16 %v837_v3, %v834_v20  ;;  %v1592_v53 = vpack.c.bf16 %v869_v34, %v866_v42  ;;  %v882_v43 = vadd.f32 %v3481_v12, %v881_v46  ;;  %v2694_v47 = vpop.f32.mrb[50].mxu0 }
 0x1aa   : > { %2468 = vmatprep.mubr.msk.bf16.mxu1 %vm976_vm1, %v956_v51  ;;  %v893_v48 = vadd.f32 %v2694_v47, %v3481_v12  ;;  %v884_v59 = vpop.f32.mrb[51].mxu0 }
 0x1ab   : > { %v2697_v28 = vpop.f32.mrb[52].mxu0 }
 0x1ac   : > { %v906_v35 = vadd.f32 %v2697_v28, %v3481_v12  ;;  %v897_v52 = vpop.f32.mrb[53].mxu0 }
 0x1ad   : > { %v898_v56 = vadd.f32 %v3481_v12, %v897_v52  ;;  %v2698_v25 = vpop.f32.mrb[54].mxu0 }
 0x1ae   : > { %v909_v58 = vadd.f32 %v2698_v25, %v3481_v12  ;;  %v900_v60 = vpop.f32.mrb[55].mxu0 }
 0x1af   : > { %v901_v61 = vadd.f32 %v3481_v12, %v900_v60 }
 0x1b0   : > { %v1597_v0 = vpack.c.bf16 %v909_v58, %v906_v35 }
 0x1b1   : > { %2469 = vmatmul.mubr.msk.bf16.gmra.mrb[80].mxu1 %vm976_vm1, %v956_v51  ;;  %v1595_v51 = vpack.c.bf16 %v893_v48, %v890_v13 }
 0x1b2   : > { %2470 = vmatprep.mubr.msk.bf16.mxu1 %vm976_vm1, %v957_v44 }
 0x1b9   : > { %2471 = vmatmul.mubr.msk.bf16.gmra.mrb[84].mxu1 %vm976_vm1, %v957_v44  ;;  %v885_v44 = vadd.f32 %v3481_v12, %v884_v59 }
 0x1ba   : > { %2472 = vmatprep.mubr.msk.bf16.mxu1 %vm976_vm1, %v958_v2 }
 0x1bb   : > { %v1594_v27 = vpack.c.bf16 %v885_v44, %v882_v43 }
 0x1bd   : > { %2476 = vmatprep.subr.bf16.mxu0 %v1594_v27 }
 0x1be   : > { %2477 = vmatpush3.bf16.msra.mxu0 %v1586_v30 }
 0x1bf   : > { %2478 = vmatprep.subr.bf16.mxu0 %v1595_v51 }
 0x1c1   : > { %2473 = vmatmul.mubr.msk.bf16.gmra.mrb[88].mxu1 %vm976_vm1, %v958_v2  ;;  %v2701_v2 = vpop.f32.mrb[56].mxu0 }
 0x1c2   : > { %2474 = vmatprep.mubr.msk.bf16.mxu1 %vm976_vm1, %v959_v26  ;;  %2479 = vmatpush3.bf16.msra.mxu0 %v1587_v24  ;;  %v922_v54 = vadd.f32 %v2701_v2, %v3481_v12  ;;  %v913_v55 = vpop.f32.mrb[57].mxu0 }
 0x1c3   : > { %v914_v57 = vadd.f32 %v3481_v12, %v913_v55  ;;  %v2702_v14 = vpop.f32.mrb[58].mxu0 }
 0x1c4   : > { %v925_v36 = vadd.f32 %v2702_v14, %v3481_v12  ;;  %v916_v40 = vpop.f32.mrb[59].mxu0 }
 0x1c5   : > { %v917_v62 = vadd.f32 %v3481_v12, %v916_v40  ;;  %v2705_v18 = vpop.f32.mrb[60].mxu0 }
 0x1c6   : > { %v1599_v63 = vpack.c.bf16 %v925_v36, %v922_v54  ;;  %v938_v21 = vadd.f32 %v2705_v18, %v3481_v12  ;;  %v929_v24 = vpop.f32.mrb[61].mxu0 }
 0x1c7   : > { %v1598_v1 = vpack.c.bf16 %v917_v62, %v914_v57  ;;  %v930_v29 = vadd.f32 %v3481_v12, %v929_v24  ;;  %v2706_v19 = vpop.f32.mrb[62].mxu0 }
 0x1c8   : > { %v941_v30 = vadd.f32 %v2706_v19, %v3481_v12  ;;  %v932_v20 = vpop.f32.mrb[63].mxu0 }
 0x1c9   : > { %2475 = vmatmul.mubr.msk.bf16.gmra.mrb[92].mxu1 %vm976_vm1, %v959_v26  ;;  %v1596_v26 = vpack.c.bf16 %v901_v61, %v898_v56  ;;  %v933_v41 = vadd.f32 %v3481_v12, %v932_v20 }
 0x1ca   : > { %v1601_v38 = vpack.c.bf16 %v941_v30, %v938_v21 }
 0x1cb   : > { %2480 = vmatprep.subr.bf16.mxu0 %v1596_v26  ;;  %v1600_v16 = vpack.c.bf16 %v933_v41, %v930_v29 }
 0x1cc   : > { %2481 = vmatpush3.bf16.msra.mxu0 %v1588_v37 }
 0x1cd   : > { %2482 = vmatprep.subr.bf16.mxu0 %v1597_v0 }
 0x1d0   : > { %2483 = vmatpush3.bf16.msra.mxu0 %v1589_v11 }
 0x1d1   : > { %2484 = vmatprep.subr.bf16.mxu0 %v1598_v1 }
 0x1d4   : > { %2485 = vmatpush3.bf16.msra.mxu0 %v1590_v32 }
 0x1d5   : > { %2486 = vmatprep.subr.bf16.mxu0 %v1599_v63 }
 0x1d8   : > { %2487 = vmatpush3.bf16.msra.mxu0 %v1591_v22 }
 0x1d9   : > { %2488 = vmatprep.subr.bf16.mxu0 %v1600_v16 }
 0x1dc   : > { %2489 = vmatpush3.bf16.msra.mxu0 %v1592_v53 }
 0x1dd   : > { %2490 = vmatprep.subr.bf16.mxu0 %v1601_v38 }
 0x1e0   : > { %2491 = vmatpush3.bf16.msra.mxu0 %v1593_v39 }
 0x224   : > { %v3527_v3 = vpop.f32.mrb[32].mxu1 }
 0x225   : > { %v3529_v4 = vpop.f32.mrb[33].mxu1 }
 0x226   : > { %v3531_v11 = vpop.f32.mrb[34].mxu1  ;;  %v1266_v49 = vmax.f32 %v3527_v3, %v3529_v4 }
 0x227   : > { %v3535_v5 = vpop.f32.mrb[35].mxu1 }
 0x228   : > { %1267 = vmax.xlane.f32.xlu0 %v1266_v49  ;;  %v1269_v12 = vmax.f32 %v3531_v11, %v3535_v5 }
 0x22c   : > { %1270 = vmax.xlane.f32.xlu0 %v1269_v12  ;;  %v3539_v37 = vpop.f32.mrb[36].mxu1 }
 0x22d   : > { %v3541_v6 = vpop.f32.mrb[37].mxu1 }
 0x22e   : > { %v3543_v7 = vpop.f32.mrb[38].mxu1  ;;  %v1272_v10 = vmax.f32 %v3539_v37, %v3541_v6 }
 0x22f   : > { %v3547_v15 = vpop.f32.mrb[39].mxu1 }
 0x230   : > { %1273 = vmax.xlane.f32.xlu1 %v1272_v10  ;;  %v1275_v50 = vmax.f32 %v3543_v7, %v3547_v15 }
 0x234   : > { %1276 = vmax.xlane.f32.xlu1 %v1275_v50  ;;  %v3551_v17 = vpop.f32.mrb[40].mxu1 }
 0x235   : > { %v3553_v22 = vpop.f32.mrb[41].mxu1 }
 0x236   : > { %v3555_v31 = vpop.f32.mrb[42].mxu1  ;;  %v1278_v23 = vmax.f32 %v3551_v17, %v3553_v22 }
 0x237   : > { %v3559_v32 = vpop.f32.mrb[43].mxu1 }
 0x238   : > { %1279 = vmax.xlane.f32.xlu0 %v1278_v23  ;;  %v1281_v42 = vmax.f32 %v3555_v31, %v3559_v32 }
 0x23a   : > { %1282 = vmax.xlane.f32.xlu1 %v1281_v42 }
 0x23c   : > { %v3563_v45 = vpop.f32.mrb[44].mxu1 }
 0x23d   : > { %v3565_v8 = vpop.f32.mrb[45].mxu1 }
 0x23e   : > { %v3567_v33 = vpop.f32.mrb[46].mxu1  ;;  %v1284_v34 = vmax.f32 %v3563_v45, %v3565_v8 }
 0x23f   : > { %v3571_v39 = vpop.f32.mrb[47].mxu1 }
 0x240   : > { %1285 = vmax.xlane.f32.xlu0 %v1284_v34  ;;  %v1287_v9 = vmax.f32 %v3567_v33, %v3571_v39 }
 0x242   : > { %1288 = vmax.xlane.f32.xlu1 %v1287_v9 }
 0x244   : > { %v3575_v53 = vpop.f32.mrb[48].mxu1 }
 0x245   : > { %v3577_v13 = vpop.f32.mrb[49].mxu1 }
 0x246   : > { %v3579_v46 = vpop.f32.mrb[50].mxu1  ;;  %v1290_v43 = vmax.f32 %v3575_v53, %v3577_v13 }
 0x247   : > { %v3583_v47 = vpop.f32.mrb[51].mxu1 }
 0x248   : > { %1291 = vmax.xlane.f32.xlu0 %v1290_v43  ;;  %v1293_v48 = vmax.f32 %v3579_v46, %v3583_v47 }
 0x24a   : > { %1294 = vmax.xlane.f32.xlu1 %v1293_v48 }
 0x24c   : > { %v3587_v59 = vpop.f32.mrb[52].mxu1 }
 0x24d   : > { %v3589_v44 = vpop.f32.mrb[53].mxu1 }
 0x24e   : > { %v3591_v51 = vpop.f32.mrb[54].mxu1  ;;  %v1296_v27 = vmax.f32 %v3587_v59, %v3589_v44 }
 0x24f   : > { %v3595_v28 = vpop.f32.mrb[55].mxu1 }
 0x250   : > { %1297 = vmax.xlane.f32.xlu0 %v1296_v27  ;;  %v1299_v35 = vmax.f32 %v3591_v51, %v3595_v28 }
 0x252   : > { %1300 = vmax.xlane.f32.xlu1 %v1299_v35 }
 0x254   : > { %v3599_v52 = vpop.f32.mrb[56].mxu1 }
 0x255   : > { %v3601_v56 = vpop.f32.mrb[57].mxu1 }
 0x256   : > { %v3603_v25 = vpop.f32.mrb[58].mxu1  ;;  %v1302_v58 = vmax.f32 %v3599_v52, %v3601_v56 }
 0x257   : > { %v3607_v60 = vpop.f32.mrb[59].mxu1 }
 0x258   : > { %1303 = vmax.xlane.f32.xlu0 %v1302_v58  ;;  %v1305_v61 = vmax.f32 %v3603_v25, %v3607_v60 }
 0x25a   : > { %1306 = vmax.xlane.f32.xlu1 %v1305_v61 }
 0x25c   : > { %v3611_v0 = vpop.f32.mrb[60].mxu1 }
 0x25d   : > { %v3613_v26 = vpop.f32.mrb[61].mxu1 }
 0x25e   : > { %v3615_v2 = vpop.f32.mrb[62].mxu1  ;;  %v1308_v54 = vmax.f32 %v3611_v0, %v3613_v26 }
 0x25f   : > { %v3619_v55 = vpop.f32.mrb[63].mxu1 }
 0x260   : > { %1309 = vmax.xlane.f32.xlu0 %v1308_v54  ;;  %v1311_v57 = vmax.f32 %v3615_v2, %v3619_v55 }
 0x262   : > { %1312 = vmax.xlane.f32.xlu1 %v1311_v57 }
 0x264   : > { %v3623_v14 = vpop.f32.mrb[64].mxu1 }
 0x265   : > { %v3625_v36 = vpop.f32.mrb[65].mxu1 }
 0x266   : > { %v3627_v40 = vpop.f32.mrb[66].mxu1  ;;  %v1314_v62 = vmax.f32 %v3623_v14, %v3625_v36 }
 0x267   : > { %v3631_v63 = vpop.f32.mrb[67].mxu1 }
 0x268   : > { %1315 = vmax.xlane.f32.xlu0 %v1314_v62  ;;  %v1317_v1 = vmax.f32 %v3627_v40, %v3631_v63 }
 0x26a   : > { %1318 = vmax.xlane.f32.xlu1 %v1317_v1 }
 0x26c   : > { %v3635_v18 = vpop.f32.mrb[68].mxu1 }
 0x26d   : > { %v3637_v21 = vpop.f32.mrb[69].mxu1 }
 0x26e   : > { %v3639_v24 = vpop.f32.mrb[70].mxu1  ;;  %v1320_v29 = vmax.f32 %v3635_v18, %v3637_v21 }
 0x26f   : > { %v3643_v19 = vpop.f32.mrb[71].mxu1 }
 0x270   : > { %1321 = vmax.xlane.f32.xlu0 %v1320_v29  ;;  %v1323_v30 = vmax.f32 %v3639_v24, %v3643_v19 }
 0x272   : > { %1324 = vmax.xlane.f32.xlu1 %v1323_v30 }
 0x274   : > { %v3647_v20 = vpop.f32.mrb[72].mxu1 }
 0x275   : > { %v3649_v41 = vpop.f32.mrb[73].mxu1 }
 0x276   : > { %v3651_v38 = vpop.f32.mrb[74].mxu1  ;;  %v1326_v16 = vmax.f32 %v3647_v20, %v3649_v41 }
 0x277   : > { %v3655_v49 = vpop.f32.mrb[75].mxu1 }
 0x278   : > { %1327 = vmax.xlane.f32.xlu0 %v1326_v16  ;;  %v1329_v12 = vmax.f32 %v3651_v38, %v3655_v49 }
 0x27a   : > { %1330 = vmax.xlane.f32.xlu1 %v1329_v12 }
 0x27c   : > { %v3659_v10 = vpop.f32.mrb[76].mxu1 }
 0x27d   : > { %v3661_v50 = vpop.f32.mrb[77].mxu1 }
 0x27e   : > { %v3663_v23 = vpop.f32.mrb[78].mxu1  ;;  %v1332_v42 = vmax.f32 %v3659_v10, %v3661_v50 }
 0x27f   : > { %v3667_v34 = vpop.f32.mrb[79].mxu1 }
 0x280   : > { %1333 = vmax.xlane.f32.xlu0 %v1332_v42  ;;  %v1335_v9 = vmax.f32 %v3663_v23, %v3667_v34 }
 0x282   : > { %1336 = vmax.xlane.f32.xlu1 %v1335_v9 }
 0x284   : > { %v3671_v43 = vpop.f32.mrb[80].mxu1 }
 0x285   : > { %v3673_v48 = vpop.f32.mrb[81].mxu1 }
 0x286   : > { %v3675_v27 = vpop.f32.mrb[82].mxu1  ;;  %v1338_v35 = vmax.f32 %v3671_v43, %v3673_v48 }
 0x287   : > { %3968 = vst [vmem:[#allocation2_spill] sm:$0xff] %v3675_v27  ;;  %v3679_v58 = vpop.f32.mrb[83].mxu1 }
 0x288   : > { %3969 = vst [vmem:[#allocation3_spill] sm:$0xff] %v3679_v58  ;;  %1339 = vmax.xlane.f32.xlu0 %v1338_v35  ;;  %v1341_v61 = vmax.f32 %v3675_v27, %v3679_v58 }
 0x28a   : > { %1342 = vmax.xlane.f32.xlu1 %v1341_v61 }
 0x28c   : > { %v3683_v54 = vpop.f32.mrb[84].mxu1 }
 0x28d   : > { %3970 = vst [vmem:[#allocation4_spill] sm:$0xff] %v3683_v54  ;;  %v3685_v57 = vpop.f32.mrb[85].mxu1 }
 0x28e   : > { %3971 = vst [vmem:[#allocation5_spill] sm:$0xff] %v3685_v57  ;;  %v3687_v62 = vpop.f32.mrb[86].mxu1  ;;  %v1344_v1 = vmax.f32 %v3683_v54, %v3685_v57 }
 0x28f   : > { %3972 = vst [vmem:[#allocation6_spill] sm:$0xff] %v3687_v62  ;;  %v3691_v29 = vpop.f32.mrb[87].mxu1 }
 0x290   : > { %3973 = vst [vmem:[#allocation7_spill] sm:$0xff] %v3691_v29  ;;  %1345 = vmax.xlane.f32.xlu0 %v1344_v1  ;;  %v1347_v30 = vmax.f32 %v3687_v62, %v3691_v29 }
 0x292   : > { %1348 = vmax.xlane.f32.xlu1 %v1347_v30 }
 0x294   : > { %v3695_v16 = vpop.f32.mrb[88].mxu1 }
 0x295   : > { %3974 = vst [vmem:[#allocation8_spill] sm:$0xff] %v3695_v16  ;;  %v3697_v12 = vpop.f32.mrb[89].mxu1 }
 0x296   : > { %3975 = vst [vmem:[#allocation9_spill] sm:$0xff] %v3697_v12  ;;  %v3699_v42 = vpop.f32.mrb[90].mxu1  ;;  %v1350_v9 = vmax.f32 %v3695_v16, %v3697_v12 }
 0x297   : > { %3976 = vst [vmem:[#allocation10_spill] sm:$0xff] %v3699_v42  ;;  %v3703_v35 = vpop.f32.mrb[91].mxu1 }
 0x298   : > { %3977 = vst [vmem:[#allocation11_spill] sm:$0xff] %v3703_v35  ;;  %1351 = vmax.xlane.f32.xlu0 %v1350_v9  ;;  %v1353_v61 = vmax.f32 %v3699_v42, %v3703_v35 }
 0x29a   : > { %1354 = vmax.xlane.f32.xlu1 %v1353_v61 }
 0x29c   : > { %v3707_v1 = vpop.f32.mrb[92].mxu1 }
 0x29d   : > { %3978 = vst [vmem:[#allocation12_spill] sm:$0xff] %v3707_v1  ;;  %v3709_v29 = vpop.f32.mrb[93].mxu1 }
 0x29e   : > { %3979 = vst [vmem:[#allocation13_spill] sm:$0xff] %v3709_v29  ;;  %v3711_v30 = vpop.f32.mrb[94].mxu1  ;;  %v1356_v62 = vmax.f32 %v3707_v1, %v3709_v29 }
 0x29f   : > { %v3715_v57 = vpop.f32.mrb[95].mxu1 }
 0x2a0   : > { %3980 = vst [vmem:[#allocation14_spill] sm:$0xff] %v3715_v57  ;;  %1357 = vmax.xlane.f32.xlu0 %v1356_v62  ;;  %v1359_v12 = vmax.f32 %v3711_v30, %v3715_v57 }
 0x2a2   : > { %1360 = vmax.xlane.f32.xlu1 %v1359_v12 }
 0x2b5   : > { %v1268_v9 = vpop.xlane.xlu0 %1267 }
 0x2b6   : > { %v1362_v35 = vsub.f32 %v3527_v3, %v1268_v9  ;;  %v1363_v61 = vsub.f32 %v3529_v4, %v1268_v9 }
 0x2b8   : > { %v1426_v42 = vmul.f32 1.442695, %v1362_v35  ;;  %v1428_v16 = vmul.f32 1.442695, %v1363_v61 }
 0x2b9   : > { %v1271_v54 = vpop.xlane.xlu0 %1270 }
 0x2ba   : > { %2758 = vpow2.f32 %v1426_v42  ;;  %v1364_v58 = vsub.f32 %v3531_v11, %v1271_v54  ;;  %v1365_v29 = vsub.f32 %v3535_v5, %v1271_v54 }
 0x2bb   : > { %2760 = vpow2.f32 %v1428_v16 }
 0x2bc   : > { %v1430_v1 = vmul.f32 1.442695, %v1364_v58  ;;  %v1432_v62 = vmul.f32 1.442695, %v1365_v29 }
 0x2bd   : > { %v1274_v27 = vpop.xlane.xlu1 %1273 }
 0x2be   : > { %2762 = vpow2.f32 %v1430_v1  ;;  %v1366_v12 = vsub.f32 %v3539_v37, %v1274_v27  ;;  %v1367_v57 = vsub.f32 %v3541_v6, %v1274_v27 }
 0x2bf   : > { %2764 = vpow2.f32 %v1432_v62 }
 0x2c0   : > { %v1434_v3 = vmul.f32 1.442695, %v1366_v12  ;;  %v1436_v4 = vmul.f32 1.442695, %v1367_v57 }
 0x2c1   : > { %v1277_v35 = vpop.xlane.xlu1 %1276 }
 0x2c2   : > { %2766 = vpow2.f32 %v1434_v3  ;;  %v1368_v42 = vsub.f32 %v3543_v7, %v1277_v35  ;;  %v1369_v11 = vsub.f32 %v3547_v15, %v1277_v35 }
 0x2c3   : > { %2768 = vpow2.f32 %v1436_v4 }
 0x2c4   : > { %v2759_v5 = vpop.eup %2758  ;;  %v1438_v54 = vmul.f32 1.442695, %v1368_v42  ;;  %v1440_v58 = vmul.f32 1.442695, %v1369_v11 }
 0x2c5   : > { %v2761_v29 = vpop.eup %2760  ;;  %v1280_v16 = vpop.xlane.xlu0 %1279 }
 0x2c6   : > { %2770 = vpow2.f32 %v1438_v54  ;;  %v1370_v37 = vsub.f32 %v3551_v17, %v1280_v16  ;;  %v1371_v6 = vsub.f32 %v3553_v22, %v1280_v16  ;;  %v1763_v27 = vadd.f32 %v2761_v29, %v2759_v5 }
 0x2c7   : > { %2772 = vpow2.f32 %v1440_v58  ;;  %v1283_v57 = vpop.xlane.xlu1 %1282 }
 0x2c8   : > { %v2763_v1 = vpop.eup %2762  ;;  %v1442_v9 = vmul.f32 1.442695, %v1370_v37  ;;  %v1444_v61 = vmul.f32 1.442695, %v1371_v6  ;;  %v1372_v7 = vsub.f32 %v3555_v31, %v1283_v57  ;;  %v1373_v15 = vsub.f32 %v3559_v32, %v1283_v57  ;;  %1764 = vadd.xlane.f32.xlu0 %v1763_v27 }
 0x2c9   : > { %v2765_v62 = vpop.eup %2764  ;;  %v1554_v12 = vpack.c.bf16 %v2763_v1, %v2759_v5 }
 0x2ca   : > { %2774 = vpow2.f32 %v1442_v9  ;;  %v1446_v3 = vmul.f32 1.442695, %v1372_v7  ;;  %v1448_v4 = vmul.f32 1.442695, %v1373_v15  ;;  %v1555_v35 = vpack.c.bf16 %v2765_v62, %v2761_v29 }
 0x2cb   : > { %2776 = vpow2.f32 %v1444_v61  ;;  %v1766_v17 = vadd.f32 %v2765_v62, %v2763_v1 }
 0x2cc   : > { %v2767_v22 = vpop.eup %2766  ;;  %2778 = vpow2.f32 %v1446_v3  ;;  %1634 = vmatprep.mubr.bf16.mxu0 %v1555_v35 }
 0x2cd   : > { %v2769_v42 = vpop.eup %2768  ;;  %2780 = vpow2.f32 %v1448_v4  ;;  %1767 = vadd.xlane.f32.xlu1 %v1766_v17  ;;  %1635 = vmatmul.mubr.bf16.vlgmr.msra.gmra.mrb[64].mxu0 %v1554_v12  ;;  %v1286_v11 = vpop.xlane.xlu0 %1285 }
 0x2ce   : > { %v1374_v31 = vsub.f32 %v3563_v45, %v1286_v11  ;;  %v1375_v32 = vsub.f32 %v3565_v8, %v1286_v11  ;;  %v1769_v54 = vadd.f32 %v2769_v42, %v2767_v22 }
 0x2cf   : > { %v1289_v5 = vpop.xlane.xlu1 %1288 }
 0x2d0   : > { %v2771_v58 = vpop.eup %2770  ;;  %v1450_v16 = vmul.f32 1.442695, %v1374_v31  ;;  %v1452_v37 = vmul.f32 1.442695, %v1375_v32  ;;  %v1376_v29 = vsub.f32 %v3567_v33, %v1289_v5  ;;  %v1377_v6 = vsub.f32 %v3571_v39, %v1289_v5  ;;  %1770 = vadd.xlane.f32.xlu0 %v1769_v54 }
 0x2d1   : > { %v2773_v27 = vpop.eup %2772  ;;  %v1556_v57 = vpack.c.bf16 %v2771_v58, %v2767_v22 }
 0x2d2   : > { %2782 = vpow2.f32 %v1450_v16  ;;  %v1454_v1 = vmul.f32 1.442695, %v1376_v29  ;;  %v1456_v9 = vmul.f32 1.442695, %v1377_v6  ;;  %v1557_v61 = vpack.c.bf16 %v2773_v27, %v2769_v42 }
 0x2d3   : > { %2784 = vpow2.f32 %v1452_v37  ;;  %v1772_v45 = vadd.f32 %v2773_v27, %v2771_v58 }
 0x2d4   : > { %v2775_v7 = vpop.eup %2774  ;;  %2786 = vpow2.f32 %v1454_v1  ;;  %1642 = vmatprep.mubr.bf16.mxu0 %v1557_v61 }
 0x2d5   : > { %v2777_v8 = vpop.eup %2776  ;;  %2788 = vpow2.f32 %v1456_v9  ;;  %1773 = vadd.xlane.f32.xlu1 %v1772_v45  ;;  %1643 = vmatmul.mubr.bf16.gmra.mrb[68].mxu0 %v1556_v57  ;;  %v1292_v15 = vpop.xlane.xlu0 %1291 }
 0x2d6   : > { %v2779_v33 = vpop.eup %2778  ;;  %v1378_v39 = vsub.f32 %v3575_v53, %v1292_v15  ;;  %v1379_v62 = vsub.f32 %v3577_v13, %v1292_v15  ;;  %v1775_v12 = vadd.f32 %v2777_v8, %v2775_v7 }
 0x2d7   : > { %v2781_v3 = vpop.eup %2780  ;;  %v1295_v4 = vpop.xlane.xlu1 %1294  ;;  %v1558_v35 = vpack.c.bf16 %v2779_v33, %v2775_v7 }
 0x2d8   : > { %v1458_v17 = vmul.f32 1.442695, %v1378_v39  ;;  %v1460_v22 = vmul.f32 1.442695, %v1379_v62  ;;  %v1380_v42 = vsub.f32 %v3579_v46, %v1295_v4  ;;  %v1381_v11 = vsub.f32 %v3583_v47, %v1295_v4  ;;  %1776 = vadd.xlane.f32.xlu0 %v1775_v12 }
 0x2d9   : > { %v1559_v31 = vpack.c.bf16 %v2781_v3, %v2777_v8  ;;  %v1778_v32 = vadd.f32 %v2781_v3, %v2779_v33 }
 0x2da   : > { %2790 = vpow2.f32 %v1458_v17  ;;  %v1462_v54 = vmul.f32 1.442695, %v1380_v42  ;;  %v1464_v5 = vmul.f32 1.442695, %v1381_v11 }
 0x2db   : > { %2792 = vpow2.f32 %v1460_v22  ;;  %1650 = vmatprep.mubr.bf16.mxu0 %v1559_v31  ;;  %1779 = vadd.xlane.f32.xlu1 %v1778_v32  ;;  %v1939_v32 = vld [vmem:[%s3952_s7] sm:$0xff] }
 0x2dc   : > { %v2783_v53 = vpop.eup %2782  ;;  %2794 = vpow2.f32 %v1462_v54  ;;  %v1940_v54 = vpack.c.bf16 %v1939_v32, %v1939_v32 }
 0x2dd   : > { %v2785_v13 = vpop.eup %2784  ;;  %2796 = vpow2.f32 %v1464_v5  ;;  %1651 = vmatmul.mubr.bf16.gmra.mrb[72].mxu0 %v1558_v35  ;;  %v1298_v58 = vpop.xlane.xlu0 %1297 }
 0x2de   : > { %v2787_v16 = vpop.eup %2786  ;;  %v1382_v46 = vsub.f32 %v3587_v59, %v1298_v58  ;;  %v1383_v47 = vsub.f32 %v3589_v44, %v1298_v58  ;;  %v1781_v37 = vadd.f32 %v2785_v13, %v2783_v53  ;;  %2749 = vmatprep.subr.msk.bf16.mxu1 %vm1996_vm2, %v1940_v54 }
 0x2df   : > { %v2789_v29 = vpop.eup %2788  ;;  %v1301_v6 = vpop.xlane.xlu1 %1300  ;;  %v1560_v27 = vpack.c.bf16 %v2787_v16, %v2783_v53 }
 0x2e0   : > { %v1466_v57 = vmul.f32 1.442695, %v1382_v46  ;;  %v1468_v1 = vmul.f32 1.442695, %v1383_v47  ;;  %v1384_v9 = vsub.f32 %v3591_v51, %v1301_v6  ;;  %v1385_v61 = vsub.f32 %v3595_v28, %v1301_v6  ;;  %1782 = vadd.xlane.f32.xlu0 %v1781_v37 }
 0x2e1   : > { %v1561_v45 = vpack.c.bf16 %v2789_v29, %v2785_v13  ;;  %v1784_v7 = vadd.f32 %v2789_v29, %v2787_v16 }
 0x2e2   : > { %2798 = vpow2.f32 %v1466_v57  ;;  %v1470_v8 = vmul.f32 1.442695, %v1384_v9  ;;  %v1472_v15 = vmul.f32 1.442695, %v1385_v61 }
 0x2e3   : > { %2800 = vpow2.f32 %v1468_v1  ;;  %1658 = vmatprep.mubr.bf16.mxu0 %v1561_v45  ;;  %1785 = vadd.xlane.f32.xlu1 %v1784_v7 }
 0x2e4   : > { %v2791_v59 = vpop.eup %2790  ;;  %2802 = vpow2.f32 %v1470_v8 }
 0x2e5   : > { %v2793_v44 = vpop.eup %2792  ;;  %2804 = vpow2.f32 %v1472_v15  ;;  %1659 = vmatmul.mubr.bf16.gmra.mrb[76].mxu0 %v1560_v27  ;;  %v1304_v33 = vpop.xlane.xlu0 %1303 }
 0x2e6   : > { %v2795_v39 = vpop.eup %2794  ;;  %v1386_v51 = vsub.f32 %v3599_v52, %v1304_v33  ;;  %v1387_v28 = vsub.f32 %v3601_v56, %v1304_v33  ;;  %v1787_v62 = vadd.f32 %v2793_v44, %v2791_v59 }
 0x2e7   : > { %v2797_v12 = vpop.eup %2796  ;;  %v1307_v3 = vpop.xlane.xlu1 %1306  ;;  %v1562_v4 = vpack.c.bf16 %v2795_v39, %v2791_v59 }
 0x2e8   : > { %v1474_v35 = vmul.f32 1.442695, %v1386_v51  ;;  %v1476_v17 = vmul.f32 1.442695, %v1387_v28  ;;  %v1388_v22 = vsub.f32 %v3603_v25, %v1307_v3  ;;  %v1389_v42 = vsub.f32 %v3607_v60, %v1307_v3  ;;  %1788 = vadd.xlane.f32.xlu0 %v1787_v62 }
 0x2e9   : > { %v1563_v11 = vpack.c.bf16 %v2797_v12, %v2793_v44  ;;  %v1790_v31 = vadd.f32 %v2797_v12, %v2795_v39  ;;  %v1998_v25 = vsel %vm1996_vm2, %v1940_v54, 0 }
 0x2ea   : > { %2806 = vpow2.f32 %v1474_v35  ;;  %v1478_v52 = vmul.f32 1.442695, %v1388_v22  ;;  %v1480_v56 = vmul.f32 1.442695, %v1389_v42  ;;  %2708 = vmatpush3.bf16.msra.mxu1 %v1998_v25 }
 0x2eb   : > { %2808 = vpow2.f32 %v1476_v17  ;;  %1666 = vmatprep.mubr.bf16.mxu0 %v1563_v11  ;;  %1791 = vadd.xlane.f32.xlu1 %v1790_v31 }
 0x2ec   : > { %v2799_v5 = vpop.eup %2798  ;;  %2810 = vpow2.f32 %v1478_v52 }
 0x2ed   : > { %v2801_v60 = vpop.eup %2800  ;;  %2812 = vpow2.f32 %v1480_v56  ;;  %1667 = vmatmul.mubr.bf16.gmra.mrb[80].mxu0 %v1562_v4  ;;  %v1310_v53 = vpop.xlane.xlu0 %1309 }
 0x2ee   : > { %v2803_v13 = vpop.eup %2802  ;;  %v1390_v58 = vsub.f32 %v3611_v0, %v1310_v53  ;;  %v1391_v16 = vsub.f32 %v3613_v26, %v1310_v53  ;;  %v1793_v46 = vadd.f32 %v2801_v60, %v2799_v5 }
 0x2ef   : > { %v2805_v47 = vpop.eup %2804  ;;  %v1313_v37 = vpop.xlane.xlu1 %1312  ;;  %v1564_v29 = vpack.c.bf16 %v2803_v13, %v2799_v5 }
 0x2f0   : > { %v1482_v6 = vmul.f32 1.442695, %v1390_v58  ;;  %v1484_v27 = vmul.f32 1.442695, %v1391_v16  ;;  %v1392_v57 = vsub.f32 %v3615_v2, %v1313_v37  ;;  %v1393_v1 = vsub.f32 %v3619_v55, %v1313_v37  ;;  %1794 = vadd.xlane.f32.xlu0 %v1793_v46 }
 0x2f1   : > { %v1565_v9 = vpack.c.bf16 %v2805_v47, %v2801_v60  ;;  %v1796_v61 = vadd.f32 %v2805_v47, %v2803_v13 }
 0x2f2   : > { %2814 = vpow2.f32 %v1482_v6  ;;  %v1486_v45 = vmul.f32 1.442695, %v1392_v57  ;;  %v1488_v7 = vmul.f32 1.442695, %v1393_v1 }
 0x2f3   : > { %2816 = vpow2.f32 %v1484_v27  ;;  %1674 = vmatprep.mubr.bf16.mxu0 %v1565_v9  ;;  %1797 = vadd.xlane.f32.xlu1 %v1796_v61 }
 0x2f4   : > { %v2807_v0 = vpop.eup %2806  ;;  %2818 = vpow2.f32 %v1486_v45 }
 0x2f5   : > { %v2809_v26 = vpop.eup %2808  ;;  %2820 = vpow2.f32 %v1488_v7  ;;  %1675 = vmatmul.mubr.bf16.gmra.mrb[84].mxu0 %v1564_v29  ;;  %v1316_v8 = vpop.xlane.xlu0 %1315 }
 0x2f6   : > { %v2811_v15 = vpop.eup %2810  ;;  %v1394_v2 = vsub.f32 %v3623_v14, %v1316_v8  ;;  %v1395_v55 = vsub.f32 %v3625_v36, %v1316_v8  ;;  %v1799_v59 = vadd.f32 %v2809_v26, %v2807_v0 }
 0x2f7   : > { %v2813_v44 = vpop.eup %2812  ;;  %v1319_v33 = vpop.xlane.xlu1 %1318  ;;  %v1566_v39 = vpack.c.bf16 %v2811_v15, %v2807_v0 }
 0x2f8   : > { %v1490_v51 = vmul.f32 1.442695, %v1394_v2  ;;  %v1492_v28 = vmul.f32 1.442695, %v1395_v55  ;;  %v1396_v62 = vsub.f32 %v3627_v40, %v1319_v33  ;;  %v1397_v12 = vsub.f32 %v3631_v63, %v1319_v33  ;;  %1800 = vadd.xlane.f32.xlu0 %v1799_v59 }
 0x2f9   : > { %v1567_v3 = vpack.c.bf16 %v2813_v44, %v2809_v26  ;;  %v1802_v4 = vadd.f32 %v2813_v44, %v2811_v15 }
 0x2fa   : > { %2822 = vpow2.f32 %v1490_v51  ;;  %v1494_v35 = vmul.f32 1.442695, %v1396_v62  ;;  %v1496_v17 = vmul.f32 1.442695, %v1397_v12 }
 0x2fb   : > { %2824 = vpow2.f32 %v1492_v28  ;;  %1682 = vmatprep.mubr.bf16.mxu0 %v1567_v3  ;;  %1803 = vadd.xlane.f32.xlu1 %v1802_v4 }
 0x2fc   : > { %v2815_v14 = vpop.eup %2814  ;;  %2826 = vpow2.f32 %v1494_v35 }
 0x2fd   : > { %v2817_v36 = vpop.eup %2816  ;;  %2828 = vpow2.f32 %v1496_v17  ;;  %1683 = vmatmul.mubr.bf16.gmra.mrb[88].mxu0 %v1566_v39  ;;  %v1322_v22 = vpop.xlane.xlu0 %1321 }
 0x2fe   : > { %v2819_v42 = vpop.eup %2818  ;;  %v1398_v40 = vsub.f32 %v3635_v18, %v1322_v22  ;;  %v1399_v63 = vsub.f32 %v3637_v21, %v1322_v22  ;;  %v1805_v11 = vadd.f32 %v2817_v36, %v2815_v14 }
 0x2ff   : > { %v2821_v31 = vpop.eup %2820  ;;  %v1325_v32 = vpop.xlane.xlu1 %1324  ;;  %v1568_v52 = vpack.c.bf16 %v2819_v42, %v2815_v14 }
 0x300   : > { %v1498_v56 = vmul.f32 1.442695, %v1398_v40  ;;  %v1500_v54 = vmul.f32 1.442695, %v1399_v63  ;;  %v1400_v5 = vsub.f32 %v3639_v24, %v1325_v32  ;;  %v1401_v25 = vsub.f32 %v3643_v19, %v1325_v32  ;;  %1806 = vadd.xlane.f32.xlu0 %v1805_v11  ;;  %v3981_v63 = vld [vmem:[#allocation2_spill] sm:$0xff] }
 0x301   : > { %v1569_v60 = vpack.c.bf16 %v2821_v31, %v2817_v36  ;;  %v1808_v53 = vadd.f32 %v2821_v31, %v2819_v42  ;;  %v3982_v31 = vld [vmem:[#allocation3_spill] sm:$0xff] }
 0x302   : > { %2830 = vpow2.f32 %v1498_v56  ;;  %v1502_v13 = vmul.f32 1.442695, %v1400_v5  ;;  %v1504_v58 = vmul.f32 1.442695, %v1401_v25 }
 0x303   : > { %2832 = vpow2.f32 %v1500_v54  ;;  %1690 = vmatprep.mubr.bf16.mxu0 %v1569_v60  ;;  %1809 = vadd.xlane.f32.xlu1 %v1808_v53  ;;  %v3983_v53 = vld [vmem:[#allocation4_spill] sm:$0xff] }
 0x304   : > { %v2823_v18 = vpop.eup %2822  ;;  %2834 = vpow2.f32 %v1502_v13 }
 0x305   : > { %v2825_v21 = vpop.eup %2824  ;;  %2836 = vpow2.f32 %v1504_v58  ;;  %1691 = vmatmul.mubr.bf16.gmra.mrb[92].mxu0 %v1568_v52  ;;  %v1328_v16 = vpop.xlane.xlu0 %1327  ;;  %v3984_v58 = vld [vmem:[#allocation5_spill] sm:$0xff] }
 0x306   : > { %v2827_v46 = vpop.eup %2826  ;;  %v1402_v24 = vsub.f32 %v3647_v20, %v1328_v16  ;;  %v1403_v19 = vsub.f32 %v3649_v41, %v1328_v16  ;;  %v1811_v47 = vadd.f32 %v2825_v21, %v2823_v18 }
 0x307   : > { %v2829_v37 = vpop.eup %2828  ;;  %v1331_v29 = vpop.xlane.xlu1 %1330  ;;  %v1570_v6 = vpack.c.bf16 %v2827_v46, %v2823_v18 }
 0x308   : > { %v1506_v27 = vmul.f32 1.442695, %v1402_v24  ;;  %v1508_v57 = vmul.f32 1.442695, %v1403_v19  ;;  %v1404_v1 = vsub.f32 %v3651_v38, %v1331_v29  ;;  %v1405_v9 = vsub.f32 %v3655_v49, %v1331_v29  ;;  %1812 = vadd.xlane.f32.xlu0 %v1811_v47 }
 0x309   : > { %v1571_v61 = vpack.c.bf16 %v2829_v37, %v2825_v21  ;;  %v1814_v45 = vadd.f32 %v2829_v37, %v2827_v46  ;;  %v3985_v37 = vld [vmem:[#allocation6_spill] sm:$0xff] }
 0x30a   : > { %2838 = vpow2.f32 %v1506_v27  ;;  %v1510_v7 = vmul.f32 1.442695, %v1404_v1  ;;  %v1512_v0 = vmul.f32 1.442695, %v1405_v9 }
 0x30b   : > { %2840 = vpow2.f32 %v1508_v57  ;;  %1698 = vmatprep.mubr.bf16.mxu0 %v1571_v61  ;;  %1815 = vadd.xlane.f32.xlu1 %v1814_v45 }
 0x30c   : > { %v2831_v20 = vpop.eup %2830  ;;  %2842 = vpow2.f32 %v1510_v7 }
 0x30d   : > { %v2833_v41 = vpop.eup %2832  ;;  %2844 = vpow2.f32 %v1512_v0  ;;  %1699 = vmatmul.mubr.bf16.gmra.mrb[96].mxu0 %v1570_v6  ;;  %v1334_v26 = vpop.xlane.xlu0 %1333  ;;  %v3986_v6 = vld [vmem:[#allocation7_spill] sm:$0xff] }
 0x30e   : > { %v2835_v8 = vpop.eup %2834  ;;  %v1406_v38 = vsub.f32 %v3659_v10, %v1334_v26  ;;  %v1407_v49 = vsub.f32 %v3661_v50, %v1334_v26  ;;  %v1817_v15 = vadd.f32 %v2833_v41, %v2831_v20 }
 0x30f   : > { %v2837_v2 = vpop.eup %2836  ;;  %v1337_v55 = vpop.xlane.xlu1 %1336  ;;  %v1572_v59 = vpack.c.bf16 %v2835_v8, %v2831_v20 }
 0x310   : > { %v1514_v44 = vmul.f32 1.442695, %v1406_v38  ;;  %v1516_v33 = vmul.f32 1.442695, %v1407_v49  ;;  %v1408_v39 = vsub.f32 %v3663_v23, %v1337_v55  ;;  %v1409_v51 = vsub.f32 %v3667_v34, %v1337_v55  ;;  %1818 = vadd.xlane.f32.xlu0 %v1817_v15 }
 0x311   : > { %v1573_v28 = vpack.c.bf16 %v2837_v2, %v2833_v41  ;;  %v1820_v62 = vadd.f32 %v2837_v2, %v2835_v8  ;;  %v3987_v41 = vld [vmem:[#allocation8_spill] sm:$0xff]  ;;  %v3988_v8 = vld [vmem:[#allocation9_spill] sm:$0xff] }
 0x312   : > { %2846 = vpow2.f32 %v1514_v44  ;;  %v1518_v12 = vmul.f32 1.442695, %v1408_v39  ;;  %v1520_v3 = vmul.f32 1.442695, %v1409_v51  ;;  %v3990_v51 = vld [vmem:[#allocation11_spill] sm:$0xff] }
 0x313   : > { %2848 = vpow2.f32 %v1516_v33  ;;  %1706 = vmatprep.mubr.bf16.mxu0 %v1573_v28  ;;  %1821 = vadd.xlane.f32.xlu1 %v1820_v62  ;;  %v3989_v33 = vld [vmem:[#allocation10_spill] sm:$0xff] }
 0x314   : > { %v2839_v10 = vpop.eup %2838  ;;  %2850 = vpow2.f32 %v1518_v12 }
 0x315   : > { %v2841_v50 = vpop.eup %2840  ;;  %2852 = vpow2.f32 %v1520_v3  ;;  %1707 = vmatmul.mubr.bf16.gmra.mrb[100].mxu0 %v1572_v59  ;;  %v1340_v4 = vpop.xlane.xlu0 %1339 }
 0x316   : > { %v2843_v35 = vpop.eup %2842  ;;  %v1410_v23 = vsub.f32 %v3671_v43, %v1340_v4  ;;  %v1411_v34 = vsub.f32 %v3673_v48, %v1340_v4  ;;  %v1823_v17 = vadd.f32 %v2841_v50, %v2839_v10 }
 0x317   : > { %v2845_v14 = vpop.eup %2844  ;;  %v1343_v36 = vpop.xlane.xlu1 %1342  ;;  %v1574_v22 = vpack.c.bf16 %v2843_v35, %v2839_v10 }
 0x318   : > { %v1522_v42 = vmul.f32 1.442695, %v1410_v23  ;;  %v1524_v40 = vmul.f32 1.442695, %v1411_v34  ;;  %v1412_v11 = vsub.f32 %v3981_v63, %v1343_v36  ;;  %v1413_v32 = vsub.f32 %v3982_v31, %v1343_v36  ;;  %1824 = vadd.xlane.f32.xlu0 %v1823_v17  ;;  %v3991_v34 = vld [vmem:[#allocation12_spill] sm:$0xff] }
 0x319   : > { %v1575_v52 = vpack.c.bf16 %v2845_v14, %v2841_v50  ;;  %v1826_v56 = vadd.f32 %v2845_v14, %v2843_v35  ;;  %v3992_v14 = vld [vmem:[#allocation13_spill] sm:$0xff] }
 0x31a   : > { %2854 = vpow2.f32 %v1522_v42  ;;  %v1526_v54 = vmul.f32 1.442695, %v1412_v11  ;;  %v1528_v5 = vmul.f32 1.442695, %v1413_v32 }
 0x31b   : > { %2856 = vpow2.f32 %v1524_v40  ;;  %1714 = vmatprep.mubr.bf16.mxu0 %v1575_v52  ;;  %1827 = vadd.xlane.f32.xlu1 %v1826_v56  ;;  %v3993_v52 = vld [vmem:[#allocation14_spill] sm:$0xff] }
 0x31c   : > { %v2847_v43 = vpop.eup %2846  ;;  %2858 = vpow2.f32 %v1526_v54 }
 0x31d   : > { %v2849_v48 = vpop.eup %2848  ;;  %2860 = vpow2.f32 %v1528_v5  ;;  %1715 = vmatmul.mubr.bf16.gmra.mrb[104].mxu0 %v1574_v22  ;;  %v1346_v25 = vpop.xlane.xlu0 %1345 }
 0x31e   : > { %v2851_v60 = vpop.eup %2850  ;;  %v1414_v13 = vsub.f32 %v3983_v53, %v1346_v25  ;;  %v1415_v18 = vsub.f32 %v3984_v58, %v1346_v25  ;;  %v1829_v21 = vadd.f32 %v2849_v48, %v2847_v43 }
 0x31f   : > { %v2853_v16 = vpop.eup %2852  ;;  %v1349_v46 = vpop.xlane.xlu1 %1348  ;;  %v1576_v24 = vpack.c.bf16 %v2851_v60, %v2847_v43 }
 0x320   : > { %v1530_v19 = vmul.f32 1.442695, %v1414_v13  ;;  %v1532_v47 = vmul.f32 1.442695, %v1415_v18  ;;  %v1416_v29 = vsub.f32 %v3985_v37, %v1349_v46  ;;  %v1417_v27 = vsub.f32 %v3986_v6, %v1349_v46  ;;  %1830 = vadd.xlane.f32.xlu0 %v1829_v21 }
 0x321   : > { %v1577_v57 = vpack.c.bf16 %v2853_v16, %v2849_v48  ;;  %v1832_v1 = vadd.f32 %v2853_v16, %v2851_v60 }
 0x322   : > { %2862 = vpow2.f32 %v1530_v19  ;;  %v1534_v9 = vmul.f32 1.442695, %v1416_v29  ;;  %v1536_v61 = vmul.f32 1.442695, %v1417_v27 }
 0x323   : > { %2864 = vpow2.f32 %v1532_v47  ;;  %1722 = vmatprep.mubr.bf16.mxu0 %v1577_v57  ;;  %1833 = vadd.xlane.f32.xlu1 %v1832_v1 }
 0x324   : > { %v2855_v45 = vpop.eup %2854  ;;  %2866 = vpow2.f32 %v1534_v9 }
 0x325   : > { %v2857_v7 = vpop.eup %2856  ;;  %2868 = vpow2.f32 %v1536_v61  ;;  %1723 = vmatmul.mubr.bf16.gmra.mrb[108].mxu0 %v1576_v24  ;;  %v1352_v0 = vpop.xlane.xlu0 %1351 }
 0x326   : > { %v2859_v20 = vpop.eup %2858  ;;  %v1418_v26 = vsub.f32 %v3987_v41, %v1352_v0  ;;  %v1419_v38 = vsub.f32 %v3988_v8, %v1352_v0  ;;  %v1835_v49 = vadd.f32 %v2857_v7, %v2855_v45 }
 0x327   : > { %v2861_v15 = vpop.eup %2860  ;;  %v1355_v2 = vpop.xlane.xlu1 %1354  ;;  %v1578_v55 = vpack.c.bf16 %v2859_v20, %v2855_v45 }
 0x328   : > { %v1538_v59 = vmul.f32 1.442695, %v1418_v26  ;;  %v1540_v44 = vmul.f32 1.442695, %v1419_v38  ;;  %v1420_v39 = vsub.f32 %v3989_v33, %v1355_v2  ;;  %v1421_v28 = vsub.f32 %v3990_v51, %v1355_v2  ;;  %1836 = vadd.xlane.f32.xlu0 %v1835_v49 }
 0x329   : > { %v1579_v62 = vpack.c.bf16 %v2861_v15, %v2857_v7  ;;  %v1838_v12 = vadd.f32 %v2861_v15, %v2859_v20 }
 0x32a   : > { %2870 = vpow2.f32 %v1538_v59  ;;  %v1542_v3 = vmul.f32 1.442695, %v1420_v39  ;;  %v1544_v10 = vmul.f32 1.442695, %v1421_v28 }
 0x32b   : > { %2872 = vpow2.f32 %v1540_v44  ;;  %1730 = vmatprep.mubr.bf16.mxu0 %v1579_v62  ;;  %1839 = vadd.xlane.f32.xlu1 %v1838_v12 }
 0x32c   : > { %v2863_v50 = vpop.eup %2862  ;;  %2874 = vpow2.f32 %v1542_v3 }
 0x32d   : > { %v2865_v4 = vpop.eup %2864  ;;  %2876 = vpow2.f32 %v1544_v10  ;;  %1731 = vmatmul.mubr.bf16.gmra.mrb[112].mxu0 %v1578_v55  ;;  %v1358_v35 = vpop.xlane.xlu0 %1357 }
 0x32e   : > { %v2867_v23 = vpop.eup %2866  ;;  %v1422_v17 = vsub.f32 %v3991_v34, %v1358_v35  ;;  %v1423_v36 = vsub.f32 %v3992_v14, %v1358_v35  ;;  %v1841_v22 = vadd.f32 %v2865_v4, %v2863_v50 }
 0x32f   : > { %v2869_v42 = vpop.eup %2868  ;;  %v1361_v40 = vpop.xlane.xlu1 %1360  ;;  %v1580_v63 = vpack.c.bf16 %v2867_v23, %v2863_v50 }
 0x330   : > { %v1546_v11 = vmul.f32 1.442695, %v1422_v17  ;;  %v1548_v31 = vmul.f32 1.442695, %v1423_v36  ;;  %1842 = vadd.xlane.f32.xlu0 %v1841_v22  ;;  %v1424_v32 = vsub.f32 %v3711_v30, %v1361_v40  ;;  %v1425_v56 = vsub.f32 %v3993_v52, %v1361_v40 }
 0x331   : > { %v1581_v54 = vpack.c.bf16 %v2869_v42, %v2865_v4  ;;  %v1844_v5 = vadd.f32 %v2869_v42, %v2867_v23 }
 0x332   : > { %2878 = vpow2.f32 %v1546_v11  ;;  %v1550_v43 = vmul.f32 1.442695, %v1424_v32  ;;  %v1552_v48 = vmul.f32 1.442695, %v1425_v56 }
 0x333   : > { %2880 = vpow2.f32 %v1548_v31  ;;  %1738 = vmatprep.mubr.bf16.mxu0 %v1581_v54  ;;  %1845 = vadd.xlane.f32.xlu1 %v1844_v5 }
 0x334   : > { %v2871_v25 = vpop.eup %2870  ;;  %2882 = vpow2.f32 %v1550_v43 }
 0x335   : > { %v2873_v60 = vpop.eup %2872  ;;  %2884 = vpow2.f32 %v1552_v48  ;;  %1739 = vmatmul.mubr.bf16.gmra.mrb[116].mxu0 %v1580_v63 }
 0x336   : > { %v2875_v53 = vpop.eup %2874  ;;  %v1847_v13 = vadd.f32 %v2873_v60, %v2871_v25 }
 0x337   : > { %v2877_v58 = vpop.eup %2876  ;;  %v1582_v18 = vpack.c.bf16 %v2875_v53, %v2871_v25 }
 0x338   : > { %1848 = vadd.xlane.f32.xlu0 %v1847_v13  ;;  %v1583_v30 = vpack.c.bf16 %v2877_v58, %v2873_v60  ;;  %v1850_v21 = vadd.f32 %v2877_v58, %v2875_v53 }
 0x33a   : > { %1746 = vmatprep.mubr.bf16.mxu0 %v1583_v30  ;;  %1851 = vadd.xlane.f32.xlu1 %v1850_v21 }
 0x33c   : > { %v2879_v16 = vpop.eup %2878 }
 0x33d   : > { %v2881_v46 = vpop.eup %2880  ;;  %1747 = vmatmul.mubr.bf16.gmra.mrb[120].mxu0 %v1582_v18 }
 0x33e   : > { %v2883_v24 = vpop.eup %2882  ;;  %v1853_v19 = vadd.f32 %v2881_v46, %v2879_v16 }
 0x33f   : > { %v2885_v47 = vpop.eup %2884  ;;  %v1584_v37 = vpack.c.bf16 %v2883_v24, %v2879_v16 }
 0x340   : > { %1854 = vadd.xlane.f32.xlu0 %v1853_v19  ;;  %v1585_v29 = vpack.c.bf16 %v2885_v47, %v2881_v46  ;;  %v1856_v6 = vadd.f32 %v2885_v47, %v2883_v24 }
 0x342   : > { %1754 = vmatprep.mubr.bf16.mxu0 %v1585_v29  ;;  %1857 = vadd.xlane.f32.xlu1 %v1856_v6 }
 0x345   : > { %1755 = vmatmul.mubr.bf16.gmra.mrb[124].mxu0 %v1584_v37 }
 0x355   : > { %v1765_v27 = vpop.xlane.xlu0 %1764 }
 0x356   : > { %2886 = vrcp.f32 %v1765_v27 }
 0x35a   : > { %v1768_v57 = vpop.xlane.xlu1 %1767 }
 0x35b   : > { %2888 = vrcp.f32 %v1768_v57 }
 0x35d   : > { %v1771_v1 = vpop.xlane.xlu0 %1770 }
 0x35e   : > { %2890 = vrcp.f32 %v1771_v1 }
 0x360   : > { %v2887_v41 = vpop.eup %2886 }
 0x362   : > { %v1774_v9 = vpop.xlane.xlu1 %1773 }
 0x363   : > { %2892 = vrcp.f32 %v1774_v9 }
 0x365   : > { %v2889_v8 = vpop.eup %2888  ;;  %v1777_v15 = vpop.xlane.xlu0 %1776 }
 0x366   : > { %2894 = vrcp.f32 %v1777_v15 }
 0x368   : > { %v1780_v2 = vpop.xlane.xlu1 %1779  ;;  %v2891_v28 = vpop.eup %2890 }
 0x369   : > { %2896 = vrcp.f32 %v1780_v2 }
 0x36d   : > { %v2893_v12 = vpop.eup %2892  ;;  %v1783_v50 = vpop.xlane.xlu0 %1782 }
 0x36e   : > { %2898 = vrcp.f32 %v1783_v50 }
 0x370   : > { %v1786_v4 = vpop.xlane.xlu1 %1785  ;;  %v2895_v22 = vpop.eup %2894 }
 0x371   : > { %2900 = vrcp.f32 %v1786_v4 }
 0x373   : > { %v2897_v40 = vpop.eup %2896 }
 0x375   : > { %v1789_v31 = vpop.xlane.xlu0 %1788 }
 0x376   : > { %2902 = vrcp.f32 %v1789_v31 }
 0x378   : > { %v1792_v32 = vpop.xlane.xlu1 %1791  ;;  %v2899_v25 = vpop.eup %2898 }
 0x379   : > { %2904 = vrcp.f32 %v1792_v32 }
 0x37b   : > { %v2901_v53 = vpop.eup %2900 }
 0x37d   : > { %v1795_v18 = vpop.xlane.xlu0 %1794 }
 0x37e   : > { %2906 = vrcp.f32 %v1795_v18 }
 0x380   : > { %v1798_v30 = vpop.xlane.xlu1 %1797  ;;  %v2903_v37 = vpop.eup %2902 }
 0x381   : > { %2908 = vrcp.f32 %v1798_v30 }
 0x383   : > { %v2905_v6 = vpop.eup %2904 }
 0x385   : > { %v1801_v1 = vpop.xlane.xlu0 %1800 }
 0x386   : > { %2910 = vrcp.f32 %v1801_v1 }
 0x388   : > { %v1804_v9 = vpop.xlane.xlu1 %1803 }
 0x389   : > { %2912 = vrcp.f32 %v1804_v9 }
 0x38d   : > { %v1807_v2 = vpop.xlane.xlu0 %1806 }
 0x38e   : > { %2914 = vrcp.f32 %v1807_v2 }
 0x395   : > { %v1813_v4 = vpop.xlane.xlu0 %1812 }
 0x39d   : > { %v1819_v32 = vpop.xlane.xlu0 %1818 }
 0x3a0   : > { %v2492_v61 = vpop.f32.mrb[64].mxu0 }
 0x3a1   : > { %v2493_v45 = vpop.f32.mrb[65].mxu0 }
 0x3a2   : > { %v2494_v7 = vadd.f32 %v2493_v45, %v2492_v61  ;;  %v2495_v0 = vpop.f32.mrb[66].mxu0 }
 0x3a3   : > { %v2496_v20 = vpop.f32.mrb[67].mxu0 }
 0x3a4   : > { %v2497_v26 = vadd.f32 %v2496_v20, %v2495_v0  ;;  %v1891_v38 = vmul.f32 %v2887_v41, %v2494_v7 }
 0x3a5   : > { %v1825_v30 = vpop.xlane.xlu0 %1824 }
 0x3a6   : > { %v1892_v49 = vmul.f32 %v2889_v8, %v2497_v26  ;;  %v2907_v26 = vpop.eup %2906 }
 0x3a8   : > { %v1923_v55 = vpack.c.bf16 %v1892_v49, %v1891_v38  ;;  %v2498_v59 = vpop.f32.mrb[68].mxu0  ;;  %v2909_v38 = vpop.eup %2908 }
 0x3a9   : > { %v2499_v44 = vpop.f32.mrb[69].mxu0 }
 0x3aa   : > { %v2500_v33 = vadd.f32 %v2499_v44, %v2498_v59  ;;  %v2501_v39 = vpop.f32.mrb[70].mxu0  ;;  %2709 = vmatprep.mubr.msk.bf16.mxu1 %vm976_vm1, %v1923_v55  ;;  %v1810_v55 = vpop.xlane.xlu1 %1809 }
 0x3ab   : > { %v2502_v51 = vpop.f32.mrb[71].mxu0  ;;  %2916 = vrcp.f32 %v1810_v55 }
 0x3ac   : > { %v2503_v62 = vadd.f32 %v2502_v51, %v2501_v39  ;;  %v1893_v3 = vmul.f32 %v2891_v28, %v2500_v33  ;;  %2918 = vrcp.f32 %v1813_v4 }
 0x3ad   : > { %v1831_v9 = vpop.xlane.xlu0 %1830 }
 0x3ae   : > { %v1894_v10 = vmul.f32 %v2893_v12, %v2503_v62  ;;  %v2911_v62 = vpop.eup %2910 }
 0x3b0   : > { %v1924_v35 = vpack.c.bf16 %v1894_v10, %v1893_v3  ;;  %v2504_v23 = vpop.f32.mrb[72].mxu0  ;;  %v2913_v3 = vpop.eup %2912 }
 0x3b1   : > { %v2505_v34 = vpop.f32.mrb[73].mxu0 }
 0x3b2   : > { %v2506_v17 = vadd.f32 %v2505_v34, %v2504_v23  ;;  %v2507_v14 = vpop.f32.mrb[74].mxu0  ;;  %2710 = vmatmul.mubr.msk.bf16.vlgmr.msra.gmra.mrb[96].mxu1 %vm976_vm1, %v1924_v35  ;;  %v1816_v35 = vpop.xlane.xlu1 %1815 }
 0x3b3   : > { %v2508_v36 = vpop.f32.mrb[75].mxu0  ;;  %2920 = vrcp.f32 %v1816_v35 }
 0x3b4   : > { %v2509_v42 = vadd.f32 %v2508_v36, %v2507_v14  ;;  %v1895_v63 = vmul.f32 %v2895_v22, %v2506_v17  ;;  %2922 = vrcp.f32 %v1819_v32 }
 0x3b5   : > { %v1837_v55 = vpop.xlane.xlu0 %1836 }
 0x3b6   : > { %v1896_v11 = vmul.f32 %v2897_v40, %v2509_v42  ;;  %v2915_v42 = vpop.eup %2914 }
 0x3b8   : > { %v1925_v52 = vpack.c.bf16 %v1896_v11, %v1895_v63  ;;  %v2510_v56 = vpop.f32.mrb[76].mxu0  ;;  %v2917_v63 = vpop.eup %2916 }
 0x3b9   : > { %v2511_v54 = vpop.f32.mrb[77].mxu0 }
 0x3ba   : > { %v2512_v5 = vadd.f32 %v2511_v54, %v2510_v56  ;;  %v2513_v43 = vpop.f32.mrb[78].mxu0  ;;  %2713 = vmatprep.mubr.msk.bf16.mxu1 %vm976_vm1, %v1925_v52  ;;  %v1822_v52 = vpop.xlane.xlu1 %1821 }
 0x3bb   : > { %v2514_v48 = vpop.f32.mrb[79].mxu0  ;;  %2924 = vrcp.f32 %v1822_v52 }
 0x3bc   : > { %v2515_v60 = vadd.f32 %v2514_v48, %v2513_v43  ;;  %v1897_v13 = vmul.f32 %v2899_v25, %v2512_v5  ;;  %2926 = vrcp.f32 %v1825_v30 }
 0x3bd   : > { %v1843_v35 = vpop.xlane.xlu0 %1842 }
 0x3be   : > { %v1898_v58 = vmul.f32 %v2901_v53, %v2515_v60  ;;  %v2919_v60 = vpop.eup %2918 }
 0x3c0   : > { %v1926_v21 = vpack.c.bf16 %v1898_v58, %v1897_v13  ;;  %v2516_v16 = vpop.f32.mrb[80].mxu0  ;;  %v2921_v13 = vpop.eup %2920 }
 0x3c1   : > { %v2517_v46 = vpop.f32.mrb[81].mxu0 }
 0x3c2   : > { %v2518_v24 = vadd.f32 %v2517_v46, %v2516_v16  ;;  %v2519_v19 = vpop.f32.mrb[82].mxu0  ;;  %2714 = vmatmul.mubr.msk.bf16.gmra.mrb[100].mxu1 %vm976_vm1, %v1926_v21  ;;  %v1828_v21 = vpop.xlane.xlu1 %1827 }
 0x3c3   : > { %v2520_v47 = vpop.f32.mrb[83].mxu0  ;;  %2928 = vrcp.f32 %v1828_v21 }
 0x3c4   : > { %v2521_v29 = vadd.f32 %v2520_v47, %v2519_v19  ;;  %v1899_v27 = vmul.f32 %v2903_v37, %v2518_v24  ;;  %2930 = vrcp.f32 %v1831_v9 }
 0x3c5   : > { %v1849_v52 = vpop.xlane.xlu0 %1848 }
 0x3c6   : > { %v1900_v57 = vmul.f32 %v2905_v6, %v2521_v29  ;;  %v2923_v29 = vpop.eup %2922 }
 0x3c8   : > { %v1927_v61 = vpack.c.bf16 %v1900_v57, %v1899_v27  ;;  %v2522_v45 = vpop.f32.mrb[84].mxu0  ;;  %v2925_v27 = vpop.eup %2924 }
 0x3c9   : > { %v2523_v7 = vpop.f32.mrb[85].mxu0 }
 0x3ca   : > { %v2524_v0 = vadd.f32 %v2523_v7, %v2522_v45  ;;  %v2525_v20 = vpop.f32.mrb[86].mxu0  ;;  %2717 = vmatprep.mubr.msk.bf16.mxu1 %vm976_vm1, %v1927_v61  ;;  %v1834_v61 = vpop.xlane.xlu1 %1833 }
 0x3cb   : > { %v2526_v41 = vpop.f32.mrb[87].mxu0  ;;  %2932 = vrcp.f32 %v1834_v61 }
 0x3cc   : > { %v2527_v8 = vadd.f32 %v2526_v41, %v2525_v20  ;;  %v1901_v49 = vmul.f32 %v2907_v26, %v2524_v0  ;;  %2934 = vrcp.f32 %v1837_v55  ;;  %v3805_v55 = vld [vmem:[%s3953_s8] ss:$0 sm:$0xff] }
 0x3cd   : > { %v1855_v21 = vpop.xlane.xlu0 %1854 }
 0x3ce   : > { %v1902_v15 = vmul.f32 %v2909_v38, %v2527_v8  ;;  %v2927_v8 = vpop.eup %2926 }
 0x3d0   : > { %v1928_v59 = vpack.c.bf16 %v1902_v15, %v1901_v49  ;;  %v2528_v44 = vpop.f32.mrb[88].mxu0  ;;  %v2929_v49 = vpop.eup %2928 }
 0x3d1   : > { %v2529_v33 = vpop.f32.mrb[89].mxu0 }
 0x3d2   : > { %v2530_v39 = vadd.f32 %v2529_v33, %v2528_v44  ;;  %v2531_v51 = vpop.f32.mrb[90].mxu0  ;;  %2718 = vmatmul.mubr.msk.bf16.gmra.mrb[104].mxu1 %vm976_vm1, %v1928_v59  ;;  %v1840_v59 = vpop.xlane.xlu1 %1839 }
 0x3d3   : > { %v2532_v28 = vpop.f32.mrb[91].mxu0  ;;  %2936 = vrcp.f32 %v1840_v59 }
 0x3d4   : > { %v2533_v12 = vadd.f32 %v2532_v28, %v2531_v51  ;;  %v1903_v10 = vmul.f32 %v2911_v62, %v2530_v39  ;;  %2938 = vrcp.f32 %v1843_v35  ;;  %v2952_v35 = vld [vmem:[%s3068_s22 + $0x18] sm:$0xff] }
 0x3d6   : > { %v1904_v50 = vmul.f32 %v2913_v3, %v2533_v12  ;;  %v2931_v12 = vpop.eup %2930 }
 0x3d8   : > { %v1929_v23 = vpack.c.bf16 %v1904_v50, %v1903_v10  ;;  %v2534_v34 = vpop.f32.mrb[92].mxu0  ;;  %v2933_v10 = vpop.eup %2932 }
 0x3d9   : > { %v2535_v17 = vpop.f32.mrb[93].mxu0 }
 0x3da   : > { %v2536_v14 = vadd.f32 %v2535_v17, %v2534_v34  ;;  %v2537_v36 = vpop.f32.mrb[94].mxu0  ;;  %2721 = vmatprep.mubr.msk.bf16.mxu1 %vm976_vm1, %v1929_v23  ;;  %v1846_v23 = vpop.xlane.xlu1 %1845 }
 0x3db   : > { %v2538_v22 = vpop.f32.mrb[95].mxu0  ;;  %2940 = vrcp.f32 %v1846_v23 }
 0x3dc   : > { %v2539_v40 = vadd.f32 %v2538_v22, %v2537_v36  ;;  %v1905_v11 = vmul.f32 %v2915_v42, %v2536_v14  ;;  %2942 = vrcp.f32 %v1849_v52  ;;  %v2955_v52 = vld [vmem:[%s3068_s22 + $0x20] sm:$0xff] }
 0x3de   : > { %v1906_v31 = vmul.f32 %v2917_v63, %v2539_v40  ;;  %v2935_v40 = vpop.eup %2934 }
 0x3e0   : > { %v1930_v56 = vpack.c.bf16 %v1906_v31, %v1905_v11  ;;  %v2540_v54 = vpop.f32.mrb[96].mxu0  ;;  %v2937_v11 = vpop.eup %2936 }
 0x3e1   : > { %v2541_v5 = vpop.f32.mrb[97].mxu0 }
 0x3e2   : > { %v2542_v43 = vadd.f32 %v2541_v5, %v2540_v54  ;;  %v2543_v48 = vpop.f32.mrb[98].mxu0  ;;  %2722 = vmatmul.mubr.msk.bf16.gmra.mrb[108].mxu1 %vm976_vm1, %v1930_v56  ;;  %v1852_v56 = vpop.xlane.xlu1 %1851 }
 0x3e3   : > { %v2544_v25 = vpop.f32.mrb[99].mxu0  ;;  %2944 = vrcp.f32 %v1852_v56 }
 0x3e4   : > { %v2545_v53 = vadd.f32 %v2544_v25, %v2543_v48  ;;  %v1907_v58 = vmul.f32 %v2919_v60, %v2542_v43  ;;  %2946 = vrcp.f32 %v1855_v21 }
 0x3e6   : > { %v1908_v18 = vmul.f32 %v2921_v13, %v2545_v53  ;;  %v2939_v53 = vpop.eup %2938 }
 0x3e8   : > { %v1931_v16 = vpack.c.bf16 %v1908_v18, %v1907_v58  ;;  %v2546_v46 = vpop.f32.mrb[100].mxu0  ;;  %v2941_v58 = vpop.eup %2940 }
 0x3e9   : > { %v2547_v24 = vpop.f32.mrb[101].mxu0 }
 0x3ea   : > { %v2548_v19 = vadd.f32 %v2547_v24, %v2546_v46  ;;  %v2549_v47 = vpop.f32.mrb[102].mxu0  ;;  %2725 = vmatprep.mubr.msk.bf16.mxu1 %vm976_vm1, %v1931_v16  ;;  %v1858_v16 = vpop.xlane.xlu1 %1857 }
 0x3eb   : > { %v2550_v37 = vpop.f32.mrb[103].mxu0  ;;  %2948 = vrcp.f32 %v1858_v16 }
 0x3ec   : > { %v2551_v6 = vadd.f32 %v2550_v37, %v2549_v47  ;;  %v1909_v57 = vmul.f32 %v2923_v29, %v2548_v19 }
 0x3ee   : > { %v1910_v1 = vmul.f32 %v2925_v27, %v2551_v6  ;;  %v2943_v6 = vpop.eup %2942 }
 0x3f0   : > { %v1932_v45 = vpack.c.bf16 %v1910_v1, %v1909_v57  ;;  %v2552_v7 = vpop.f32.mrb[104].mxu0  ;;  %v2945_v57 = vpop.eup %2944 }
 0x3f1   : > { %v2553_v0 = vpop.f32.mrb[105].mxu0 }
 0x3f2   : > { %v2554_v20 = vadd.f32 %v2553_v0, %v2552_v7  ;;  %v2555_v41 = vpop.f32.mrb[106].mxu0  ;;  %2726 = vmatmul.mubr.msk.bf16.gmra.mrb[112].mxu1 %vm976_vm1, %v1932_v45 }
 0x3f3   : > { %v2556_v26 = vpop.f32.mrb[107].mxu0 }
 0x3f4   : > { %v2557_v38 = vadd.f32 %v2556_v26, %v2555_v41  ;;  %v1911_v15 = vmul.f32 %v2927_v8, %v2554_v20  ;;  %v2947_v26 = vpop.eup %2946 }
 0x3f6   : > { %v1912_v2 = vmul.f32 %v2929_v49, %v2557_v38  ;;  %v2949_v38 = vpop.eup %2948 }
 0x3f8   : > { %v1933_v44 = vpack.c.bf16 %v1912_v2, %v1911_v15  ;;  %v2558_v33 = vpop.f32.mrb[108].mxu0 }
 0x3f9   : > { %v2559_v39 = vpop.f32.mrb[109].mxu0 }
 0x3fa   : > { %v2560_v51 = vadd.f32 %v2559_v39, %v2558_v33  ;;  %v2561_v28 = vpop.f32.mrb[110].mxu0  ;;  %2729 = vmatprep.mubr.msk.bf16.mxu1 %vm976_vm1, %v1933_v44 }
 0x3fb   : > { %v2562_v62 = vpop.f32.mrb[111].mxu0 }
 0x3fc   : > { %v2563_v3 = vadd.f32 %v2562_v62, %v2561_v28  ;;  %v1913_v50 = vmul.f32 %v2931_v12, %v2560_v51  ;;  %v2950_v28 = vld [vmem:[%s3068_s22 + $0x10] sm:$0xff] }
 0x3fe   : > { %v1914_v4 = vmul.f32 %v2933_v10, %v2563_v3  ;;  %v2951_v10 = vld [vmem:[%s3068_s22] sm:$0xff] }
 0x400   : > { %v1934_v34 = vpack.c.bf16 %v1914_v4, %v1913_v50  ;;  %v2564_v17 = vpop.f32.mrb[112].mxu0 }
 0x401   : > { %v2565_v14 = vpop.f32.mrb[113].mxu0 }
 0x402   : > { %v2566_v36 = vadd.f32 %v2565_v14, %v2564_v17  ;;  %v2567_v22 = vpop.f32.mrb[114].mxu0  ;;  %2730 = vmatmul.mubr.msk.bf16.gmra.mrb[116].mxu1 %vm976_vm1, %v1934_v34  ;;  %v2953_v34 = vld [vmem:[%s3068_s22 + $0x8] sm:$0xff] }
 0x403   : > { %v2568_v42 = vpop.f32.mrb[115].mxu0 }
 0x404   : > { %v2569_v63 = vadd.f32 %v2568_v42, %v2567_v22  ;;  %v1915_v31 = vmul.f32 %v2935_v40, %v2566_v36 }
 0x406   : > { %v1916_v32 = vmul.f32 %v2937_v11, %v2569_v63  ;;  %v2954_v63 = vld [vmem:[%s3068_s22 + $0x30] sm:$0xff] }
 0x408   : > { %v1935_v54 = vpack.c.bf16 %v1916_v32, %v1915_v31  ;;  %v2570_v5 = vpop.f32.mrb[116].mxu0 }
 0x409   : > { %v2571_v43 = vpop.f32.mrb[117].mxu0 }
 0x40a   : > { %v2572_v48 = vadd.f32 %v2571_v43, %v2570_v5  ;;  %v2573_v25 = vpop.f32.mrb[118].mxu0  ;;  %2733 = vmatprep.mubr.msk.bf16.mxu1 %vm976_vm1, %v1935_v54  ;;  %v2956_v5 = vld [vmem:[%s3068_s22 + $0x38] sm:$0xff] }
 0x40b   : > { %v2574_v60 = vpop.f32.mrb[119].mxu0 }
 0x40c   : > { %v2575_v13 = vadd.f32 %v2574_v60, %v2573_v25  ;;  %v1917_v18 = vmul.f32 %v2939_v53, %v2572_v48  ;;  %v2957_v48 = vld [vmem:[%s3068_s22 + $0x28] sm:$0xff] }
 0x40e   : > { %v1918_v30 = vmul.f32 %v2941_v58, %v2575_v13 }
 0x410   : > { %v1936_v46 = vpack.c.bf16 %v1918_v30, %v1917_v18  ;;  %v2576_v24 = vpop.f32.mrb[120].mxu0  ;;  %v2958_v30 = vld [vmem:[%s3068_s22 + $0x50] sm:$0xff] }
 0x411   : > { %v2577_v19 = vpop.f32.mrb[121].mxu0 }
 0x412   : > { %v2578_v47 = vadd.f32 %v2577_v19, %v2576_v24  ;;  %v2579_v37 = vpop.f32.mrb[122].mxu0  ;;  %2734 = vmatmul.mubr.msk.bf16.gmra.mrb[120].mxu1 %vm976_vm1, %v1936_v46  ;;  %v2959_v24 = vld [vmem:[%s3068_s22 + $0x40] sm:$0xff] }
 0x413   : > { %v2580_v29 = vpop.f32.mrb[123].mxu0 }
 0x414   : > { %v2581_v27 = vadd.f32 %v2580_v29, %v2579_v37  ;;  %v1919_v1 = vmul.f32 %v2943_v6, %v2578_v47  ;;  %v2960_v37 = vld [vmem:[%s3068_s22 + $0x58] sm:$0xff]  ;;  %v2961_v6 = vld [vmem:[%s3068_s22 + $0x48] sm:$0xff] }
 0x416   : > { %v1920_v9 = vmul.f32 %v2945_v57, %v2581_v27 }
 0x418   : > { %v1937_v61 = vpack.c.bf16 %v1920_v9, %v1919_v1  ;;  %v2582_v45 = vpop.f32.mrb[124].mxu0 }
 0x419   : > { %v2583_v7 = vpop.f32.mrb[125].mxu0 }
 0x41a   : > { %v2584_v0 = vadd.f32 %v2583_v7, %v2582_v45  ;;  %v2585_v20 = vpop.f32.mrb[126].mxu0  ;;  %2737 = vmatprep.mubr.msk.bf16.mxu1 %vm976_vm1, %v1937_v61  ;;  %v2962_v7 = vld [vmem:[%s3068_s22 + $0x70] sm:$0xff] }
 0x41b   : > { %v2586_v41 = vpop.f32.mrb[127].mxu0 }
 0x41c   : > { %v2587_v8 = vadd.f32 %v2586_v41, %v2585_v20  ;;  %v1921_v49 = vmul.f32 %v2947_v26, %v2584_v0  ;;  %v2963_v26 = vld [vmem:[%s3068_s22 + $0x60] sm:$0xff] }
 0x41e   : > { %v1922_v15 = vmul.f32 %v2949_v38, %v2587_v8 }
 0x420   : > { %v1938_v2 = vpack.c.bf16 %v1922_v15, %v1921_v49  ;;  %v2964_v49 = vld [vmem:[%s3068_s22 + $0x78] sm:$0xff] }
 0x422   : > { %2738 = vmatmul.mubr.msk.bf16.gmra.mrb[124].mxu1 %vm976_vm1, %v1938_v2  ;;  %v2965_v2 = vld [vmem:[%s3068_s22 + $0x68] sm:$0xff] }
 0x485   : > { %v2711_v59 = vpop.f32.mrb[96].mxu1 }
 0x486   : > { %v2043_v44 = vadd.f32 %v2711_v59, %v3805_v55  ;;  %v2034_v33 = vpop.f32.mrb[97].mxu1 }
 0x487   : > { %v2035_v39 = vadd.f32 %v3805_v55, %v2034_v33  ;;  %v2712_v51 = vpop.f32.mrb[98].mxu1 }
 0x488   : > { %v2163_v62 = vadd.f32 %v2950_v28, %v2043_v44  ;;  %v2046_v12 = vadd.f32 %v2712_v51, %v3805_v55  ;;  %v2037_v3 = vpop.f32.mrb[99].mxu1 }
 0x489   : > { %v2161_v50 = vadd.f32 %v2951_v10, %v2035_v39  ;;  %v2038_v4 = vadd.f32 %v3805_v55, %v2037_v3 }
 0x48a   : > { %2195 = vst.msk [vmem:[%s3813_s21 + $0x10] sm:$0xff] %vm392_vm0, %v2163_v62  ;;  %v2164_v23 = vadd.f32 %v2952_v35, %v2046_v12  ;;  %v2966_v62 = vld [vmem:[%s3068_s22 + $0x90] sm:$0xff] }
 0x48b   : > { %2193 = vst.msk [vmem:[%s3813_s21] sm:$0xff] %vm392_vm0, %v2161_v50  ;;  %v2162_v17 = vadd.f32 %v2953_v34, %v2038_v4  ;;  %v2967_v50 = vld [vmem:[%s3068_s22 + $0x80] sm:$0xff] }
 0x48c   : > { %2196 = vst.msk [vmem:[%s3813_s21 + $0x18] sm:$0xff] %vm392_vm0, %v2164_v23  ;;  %v2968_v23 = vld [vmem:[%s3068_s22 + $0x98] sm:$0xff] }
 0x48d   : > { %2194 = vst.msk [vmem:[%s3813_s21 + $0x8] sm:$0xff] %vm392_vm0, %v2162_v17  ;;  %v2969_v17 = vld [vmem:[%s3068_s22 + $0x88] sm:$0xff] }
 0x495   : > { %v2715_v14 = vpop.f32.mrb[100].mxu1 }
 0x496   : > { %v2059_v36 = vadd.f32 %v2715_v14, %v3805_v55  ;;  %v2050_v22 = vpop.f32.mrb[101].mxu1 }
 0x497   : > { %v2051_v42 = vadd.f32 %v3805_v55, %v2050_v22  ;;  %v2716_v40 = vpop.f32.mrb[102].mxu1 }
 0x498   : > { %v2167_v11 = vadd.f32 %v2954_v63, %v2059_v36  ;;  %v2062_v31 = vadd.f32 %v2716_v40, %v3805_v55  ;;  %v2053_v32 = vpop.f32.mrb[103].mxu1 }
 0x499   : > { %v2165_v56 = vadd.f32 %v2955_v52, %v2051_v42  ;;  %v2054_v54 = vadd.f32 %v3805_v55, %v2053_v32 }
 0x49a   : > { %2199 = vst.msk [vmem:[%s3813_s21 + $0x30] sm:$0xff] %vm392_vm0, %v2167_v11  ;;  %v2168_v43 = vadd.f32 %v2956_v5, %v2062_v31  ;;  %v2970_v11 = vld [vmem:[%s3068_s22 + $0xb0] sm:$0xff] }
 0x49b   : > { %2197 = vst.msk [vmem:[%s3813_s21 + $0x20] sm:$0xff] %vm392_vm0, %v2165_v56  ;;  %v2166_v25 = vadd.f32 %v2957_v48, %v2054_v54  ;;  %v2971_v56 = vld [vmem:[%s3068_s22 + $0xa0] sm:$0xff] }
 0x49c   : > { %2200 = vst.msk [vmem:[%s3813_s21 + $0x38] sm:$0xff] %vm392_vm0, %v2168_v43  ;;  %v2972_v43 = vld [vmem:[%s3068_s22 + $0xb8] sm:$0xff] }
 0x49d   : > { %2198 = vst.msk [vmem:[%s3813_s21 + $0x28] sm:$0xff] %vm392_vm0, %v2166_v25  ;;  %v2973_v25 = vld [vmem:[%s3068_s22 + $0xa8] sm:$0xff] }
 0x4a5   : > { %v2719_v60 = vpop.f32.mrb[104].mxu1 }
 0x4a6   : > { %v2075_v53 = vadd.f32 %v2719_v60, %v3805_v55  ;;  %v2066_v13 = vpop.f32.mrb[105].mxu1 }
 0x4a7   : > { %v2067_v58 = vadd.f32 %v3805_v55, %v2066_v13  ;;  %v2720_v18 = vpop.f32.mrb[106].mxu1 }
 0x4a8   : > { %v2171_v21 = vadd.f32 %v2958_v30, %v2075_v53  ;;  %v2078_v16 = vadd.f32 %v2720_v18, %v3805_v55  ;;  %v2069_v46 = vpop.f32.mrb[107].mxu1 }
 0x4a9   : > { %v2169_v19 = vadd.f32 %v2959_v24, %v2067_v58  ;;  %v2070_v47 = vadd.f32 %v3805_v55, %v2069_v46 }
 0x4aa   : > { %2203 = vst.msk [vmem:[%s3813_s21 + $0x50] sm:$0xff] %vm392_vm0, %v2171_v21  ;;  %v2172_v29 = vadd.f32 %v2960_v37, %v2078_v16  ;;  %v2974_v21 = vld [vmem:[%s3068_s22 + $0xd0] sm:$0xff] }
 0x4ab   : > { %2201 = vst.msk [vmem:[%s3813_s21 + $0x40] sm:$0xff] %vm392_vm0, %v2169_v19  ;;  %v2170_v27 = vadd.f32 %v2961_v6, %v2070_v47  ;;  %v2975_v19 = vld [vmem:[%s3068_s22 + $0xc0] sm:$0xff] }
 0x4ac   : > { %2204 = vst.msk [vmem:[%s3813_s21 + $0x58] sm:$0xff] %vm392_vm0, %v2172_v29  ;;  %v2976_v29 = vld [vmem:[%s3068_s22 + $0xd8] sm:$0xff] }
 0x4ad   : > { %2202 = vst.msk [vmem:[%s3813_s21 + $0x48] sm:$0xff] %vm392_vm0, %v2170_v27  ;;  %v2977_v27 = vld [vmem:[%s3068_s22 + $0xc8] sm:$0xff] }
 0x4b5   : > { %v2723_v57 = vpop.f32.mrb[108].mxu1 }
 0x4b6   : > { %v2091_v1 = vadd.f32 %v2723_v57, %v3805_v55  ;;  %v2082_v9 = vpop.f32.mrb[109].mxu1 }
 0x4b7   : > { %v2083_v61 = vadd.f32 %v3805_v55, %v2082_v9  ;;  %v2724_v45 = vpop.f32.mrb[110].mxu1 }
 0x4b8   : > { %v2175_v0 = vadd.f32 %v2962_v7, %v2091_v1  ;;  %v2094_v20 = vadd.f32 %v2724_v45, %v3805_v55  ;;  %v2085_v41 = vpop.f32.mrb[111].mxu1 }
 0x4b9   : > { %v2173_v8 = vadd.f32 %v2963_v26, %v2083_v61  ;;  %v2086_v38 = vadd.f32 %v3805_v55, %v2085_v41 }
 0x4ba   : > { %2207 = vst.msk [vmem:[%s3813_s21 + $0x70] sm:$0xff] %vm392_vm0, %v2175_v0  ;;  %v2176_v15 = vadd.f32 %v2964_v49, %v2094_v20  ;;  %v2978_v0 = vld [vmem:[%s3068_s22 + $0xf0] sm:$0xff] }
 0x4bb   : > { %2205 = vst.msk [vmem:[%s3813_s21 + $0x60] sm:$0xff] %vm392_vm0, %v2173_v8  ;;  %v2174_v59 = vadd.f32 %v2965_v2, %v2086_v38  ;;  %v2979_v8 = vld [vmem:[%s3068_s22 + $0xe0] sm:$0xff] }
 0x4bc   : > { %2208 = vst.msk [vmem:[%s3813_s21 + $0x78] sm:$0xff] %vm392_vm0, %v2176_v15  ;;  %v2980_v15 = vld [vmem:[%s3068_s22 + $0xf8] sm:$0xff] }
 0x4bd   : > { %2206 = vst.msk [vmem:[%s3813_s21 + $0x68] sm:$0xff] %vm392_vm0, %v2174_v59  ;;  %v2981_v59 = vld [vmem:[%s3068_s22 + $0xe8] sm:$0xff] }
 0x4c5   : > { %v2727_v44 = vpop.f32.mrb[112].mxu1 }
 0x4c6   : > { %v2107_v33 = vadd.f32 %v2727_v44, %v3805_v55  ;;  %v2098_v39 = vpop.f32.mrb[113].mxu1 }
 0x4c7   : > { %v2099_v51 = vadd.f32 %v3805_v55, %v2098_v39  ;;  %v2728_v28 = vpop.f32.mrb[114].mxu1 }
 0x4c8   : > { %v2179_v12 = vadd.f32 %v2966_v62, %v2107_v33  ;;  %v2110_v3 = vadd.f32 %v2728_v28, %v3805_v55  ;;  %v2101_v10 = vpop.f32.mrb[115].mxu1 }
 0x4c9   : > { %v2177_v4 = vadd.f32 %v2967_v50, %v2099_v51  ;;  %v2102_v35 = vadd.f32 %v3805_v55, %v2101_v10 }
 0x4ca   : > { %2211 = vst.msk [vmem:[%s3813_s21 + $0x90] sm:$0xff] %vm392_vm0, %v2179_v12  ;;  %v2180_v34 = vadd.f32 %v2968_v23, %v2110_v3 }
 0x4cb   : > { %2209 = vst.msk [vmem:[%s3813_s21 + $0x80] sm:$0xff] %vm392_vm0, %v2177_v4  ;;  %v2178_v14 = vadd.f32 %v2969_v17, %v2102_v35 }
 0x4cc   : > { %2212 = vst.msk [vmem:[%s3813_s21 + $0x98] sm:$0xff] %vm392_vm0, %v2180_v34 }
 0x4cd   : > { %2210 = vst.msk [vmem:[%s3813_s21 + $0x88] sm:$0xff] %vm392_vm0, %v2178_v14 }
 0x4d5   : > { %v2731_v36 = vpop.f32.mrb[116].mxu1 }
 0x4d6   : > { %v2123_v22 = vadd.f32 %v2731_v36, %v3805_v55  ;;  %v2114_v42 = vpop.f32.mrb[117].mxu1 }
 0x4d7   : > { %v2115_v40 = vadd.f32 %v3805_v55, %v2114_v42  ;;  %v2732_v63 = vpop.f32.mrb[118].mxu1 }
 0x4d8   : > { %v2183_v31 = vadd.f32 %v2970_v11, %v2123_v22  ;;  %v2126_v32 = vadd.f32 %v2732_v63, %v3805_v55  ;;  %v2117_v52 = vpop.f32.mrb[119].mxu1 }
 0x4d9   : > { %v2181_v54 = vadd.f32 %v2971_v56, %v2115_v40  ;;  %v2118_v5 = vadd.f32 %v3805_v55, %v2117_v52 }
 0x4da   : > { %2215 = vst.msk [vmem:[%s3813_s21 + $0xb0] sm:$0xff] %vm392_vm0, %v2183_v31  ;;  %v2184_v48 = vadd.f32 %v2972_v43, %v2126_v32 }
 0x4db   : > { %2213 = vst.msk [vmem:[%s3813_s21 + $0xa0] sm:$0xff] %vm392_vm0, %v2181_v54  ;;  %v2182_v60 = vadd.f32 %v2973_v25, %v2118_v5 }
 0x4dc   : > { %2216 = vst.msk [vmem:[%s3813_s21 + $0xb8] sm:$0xff] %vm392_vm0, %v2184_v48 }
 0x4dd   : > { %2214 = vst.msk [vmem:[%s3813_s21 + $0xa8] sm:$0xff] %vm392_vm0, %v2182_v60 }
 0x4e5   : > { %v2735_v53 = vpop.f32.mrb[120].mxu1 }
 0x4e6   : > { %v2139_v13 = vadd.f32 %v2735_v53, %v3805_v55  ;;  %v2130_v58 = vpop.f32.mrb[121].mxu1 }
 0x4e7   : > { %v2131_v18 = vadd.f32 %v3805_v55, %v2130_v58  ;;  %v2736_v30 = vpop.f32.mrb[122].mxu1 }
 0x4e8   : > { %v2187_v16 = vadd.f32 %v2974_v21, %v2139_v13  ;;  %v2142_v46 = vadd.f32 %v2736_v30, %v3805_v55  ;;  %v2133_v24 = vpop.f32.mrb[123].mxu1 }
 0x4e9   : > { %v2185_v47 = vadd.f32 %v2975_v19, %v2131_v18  ;;  %v2134_v37 = vadd.f32 %v3805_v55, %v2133_v24 }
 0x4ea   : > { %2219 = vst.msk [vmem:[%s3813_s21 + $0xd0] sm:$0xff] %vm392_vm0, %v2187_v16  ;;  %v2188_v6 = vadd.f32 %v2976_v29, %v2142_v46 }
 0x4eb   : > { %2217 = vst.msk [vmem:[%s3813_s21 + $0xc0] sm:$0xff] %vm392_vm0, %v2185_v47  ;;  %v2186_v57 = vadd.f32 %v2977_v27, %v2134_v37 }
 0x4ec   : > { %2220 = vst.msk [vmem:[%s3813_s21 + $0xd8] sm:$0xff] %vm392_vm0, %v2188_v6 }
 0x4ed   : > { %2218 = vst.msk [vmem:[%s3813_s21 + $0xc8] sm:$0xff] %vm392_vm0, %v2186_v57 }
 0x4f5   : > { %v2739_v1 = vpop.f32.mrb[124].mxu1 }
 0x4f6   : > { %v2155_v9 = vadd.f32 %v2739_v1, %v3805_v55  ;;  %v2146_v61 = vpop.f32.mrb[125].mxu1 }
 0x4f7   : > { %v2147_v45 = vadd.f32 %v3805_v55, %v2146_v61  ;;  %v2740_v7 = vpop.f32.mrb[126].mxu1 }
 0x4f8   : > { %v2191_v20 = vadd.f32 %v2978_v0, %v2155_v9  ;;  %v2158_v41 = vadd.f32 %v2740_v7, %v3805_v55  ;;  %v2149_v26 = vpop.f32.mrb[127].mxu1 }
 0x4f9   : > { %v2189_v38 = vadd.f32 %v2979_v8, %v2147_v45  ;;  %v2150_v49 = vadd.f32 %v3805_v55, %v2149_v26 }
 0x4fa   : > { %2223 = vst.msk [vmem:[%s3813_s21 + $0xf0] sm:$0xff] %vm392_vm0, %v2191_v20  ;;  %v2192_v2 = vadd.f32 %v2980_v15, %v2158_v41 }
 0x4fb   : > { %2221 = vst.msk [vmem:[%s3813_s21 + $0xe0] sm:$0xff] %vm392_vm0, %v2189_v38  ;;  %v2190_v44 = vadd.f32 %v2981_v59, %v2150_v49 }
 0x4fc   : > { %2224 = vst.msk [vmem:[%s3813_s21 + $0xf8] sm:$0xff] %vm392_vm0, %v2192_v2 }
 0x4fd   : > { %2222 = vst.msk [vmem:[%s3813_s21 + $0xe8] sm:$0xff] %vm392_vm0, %v2190_v44 }
 0x4fe PF: > { %s19_s30 = sadd.s32 1, %s2988_s30  }
 0x4ff   : > { %p16_p4 = scmp.ge.s32.totalorder %s19_s30, 4  }
 0x501   :  { %18 = sbr.rel (!%p16_p4) target bundleno = 1 (0x1), region = 86 }

// kernel: rnlransr_forward.51
= control target key start
LH: loop header
LB: loop body
LE: loop exit
PB: predicated region body
PF: predicated region fallthrough
CT: control target
= control target key end

     0   :  { %s554_s12 = smov 0   ;;  %s556_s13 = smov 0   ;;  %s706_s0 = inlined_call_operand.vmem [shape: f32[2,8,8,144], index: 0, kind: input, shape index: {}]   ;;  %s707_s1 = inlined_call_operand.vmem [shape: f32[144,16], index: 1, kind: input, shape index: {}]   ;;  %s708_s2 = inlined_call_operand.vmem [shape: f32[1,16], index: 2, kind: input, shape index: {}]   ;;  %s709_s3 = inlined_call_operand.vmem [shape: f32[2,8,8,16], index: 3, kind: output, shape index: {}]  }
   0x1   :  { %s558_s14 = smov 0  }
   0x2 LB: > { %s25_s15 = sadd.s32 1, %s527_s13  ;;  %p452_p0 = scmp.ge.s32.totalorder %s531_s14, 1  ;;  %s531_s14 = sphi %s558_s14, %s13_s14   ;;  %s527_s13 = sphi %s556_s13, %s711_s13   ;;  %s523_s12 = sphi %s554_s12, %s710_s12  }
   0x3   : > { %p27_p1 = scmp.ge.s32.totalorder %s25_s15, 2  ;;  %p159_p2 = scmp.lt.s32.totalorder %s531_s14, 3 }
   0x5   : > { %s713_s15 = smov (%p27_p1, %s25_s15), 0  ;;  %p160_p3 = pnand %p452_p0, %p159_p2 }
   0x6   : > { %v238_v0 = vld [vmem:[%s707_s1] sm:$0xff] (!%p160_p3)  ;;  %v239_v1 = vld [vmem:[%s707_s1 + $0x8] sm:$0xff] (!%p160_p3)  ;;  %v240_v2 = vld [vmem:[%s707_s1 + $0x10] sm:$0xff] (!%p160_p3)  ;;  %p193_p4 = scmp.lt.s32.totalorder (!%p160_p3), %s523_s12, 1  ;;  %v533_v3 = vmov (!%p160_p3), 0   ;;  %vm272_vm0 = vcmask (!%p160_p3), 130048  }
   0x7   : > { %163 = sbr.rel (%p160_p3) target bundleno = 270 (0x10e), region = 32  ;;  %285 = vmatprep.subr.bf16.mxu0 (!%p160_p3), %v533_v3  ;;  %466 = vmatprep.subr.bf16.mxu1 (!%p160_p3), %v533_v3  ;;  %v256_v4 = vpack.c.bf16 (!%p160_p3), %v239_v1, %v238_v0  ;;  %v241_v5 = vld [vmem:[%s707_s1 + $0x18] sm:$0xff] (!%p160_p3)  ;;  %v242_v7 = vld [vmem:[%s707_s1 + $0x20] sm:$0xff] (!%p160_p3)  ;;  %v243_v8 = vld [vmem:[%s707_s1 + $0x28] sm:$0xff] (!%p160_p3) }
   0x8   : > { %v257_v6 = vpack.c.bf16 (!%p160_p3), %v241_v5, %v240_v2  ;;  %v258_v12 = vpack.c.bf16 (!%p160_p3), %v243_v8, %v242_v7  ;;  %v244_v15 = vld [vmem:[%s707_s1 + $0x30] sm:$0xff] (!%p160_p3)  ;;  %v245_v16 = vld [vmem:[%s707_s1 + $0x38] sm:$0xff] (!%p160_p3)  ;;  %v246_v19 = vld [vmem:[%s707_s1 + $0x40] sm:$0xff] (!%p160_p3) }
   0x9   : > { %286 = vmatpush1.bf16.msra.mxu0 (!%p160_p3), %v256_v4  ;;  %475 = vmatpush1.bf16.msra.mxu1 (!%p160_p3), %v256_v4  ;;  %v259_v18 = vpack.c.bf16 (!%p160_p3), %v245_v16, %v244_v15  ;;  %v247_v20 = vld [vmem:[%s707_s1 + $0x48] sm:$0xff] (!%p160_p3)  ;;  %v248_v22 = vld [vmem:[%s707_s1 + $0x50] sm:$0xff] (!%p160_p3)  ;;  %v249_v23 = vld [vmem:[%s707_s1 + $0x58] sm:$0xff] (!%p160_p3) }
   0xa   : > { %287 = vmatprep.subr.bf16.mxu0 (!%p160_p3), %v533_v3  ;;  %467 = vmatprep.subr.bf16.mxu1 (!%p160_p3), %v533_v3  ;;  %v260_v21 = vpack.c.bf16 (!%p160_p3), %v247_v20, %v246_v19  ;;  %v261_v24 = vpack.c.bf16 (!%p160_p3), %v249_v23, %v248_v22  ;;  %v250_v25 = vld [vmem:[%s707_s1 + $0x60] sm:$0xff] (!%p160_p3)  ;;  %v251_v26 = vld [vmem:[%s707_s1 + $0x68] sm:$0xff] (!%p160_p3)  ;;  %v252_v28 = vld [vmem:[%s707_s1 + $0x70] sm:$0xff] (!%p160_p3) }
   0xb   : > { %v262_v27 = vpack.c.bf16 (!%p160_p3), %v251_v26, %v250_v25  ;;  %v253_v29 = vld [vmem:[%s707_s1 + $0x78] sm:$0xff] (!%p160_p3)  ;;  %v254_v31 = vld [vmem:[%s707_s1 + $0x80] sm:$0xff] (!%p160_p3)  ;;  %v255_v32 = vld [vmem:[%s707_s1 + $0x88] sm:$0xff] (!%p160_p3) }
   0xc   : > { %v263_v30 = vpack.c.bf16 (!%p160_p3), %v253_v29, %v252_v28  ;;  %v264_v35 = vpack.c.bf16 (!%p160_p3), %v255_v32, %v254_v31  ;;  %v457_v52 = vld [vmem:[%s708_s2] ss:$0 sm:$0xff] (!%p160_p3) }
   0xd   : > { %288 = vmatpush1.bf16.msra.mxu0 (!%p160_p3), %v257_v6  ;;  %476 = vmatpush1.bf16.msra.mxu1 (!%p160_p3), %v257_v6 }
   0xe   : > { %s715_s12 = smov (!%p193_p4, %s523_s12), 1  ;;  %289 = vmatprep.subr.bf16.mxu0 %v533_v3  ;;  %468 = vmatprep.subr.bf16.mxu1 %v533_v3 }
   0xf   : > { %s464_s28 = sshll.u32 %s715_s12, 7  ;;  %s465_s7 = sshll.u32 %s715_s12, 6 }
  0x10   : > { %s600_s4 = scalar_lea.vmem %s706_s0, %s464_s28  ;;  %s679_s16 = scalar_lea.vmem %s709_s3, %s465_s7 }
  0x11   : > { %v215_v9 = vld [vmem:[%s600_s4 + $0x8] sm:$0xff]  ;;  %v217_v10 = vld [vmem:[%s600_s4 + $0x18] sm:$0xff]  ;;  %290 = vmatpush1.bf16.msra.mxu0 %v258_v12  ;;  %477 = vmatpush1.bf16.msra.mxu1 %v258_v12  ;;  %v214_v33 = vld [vmem:[%s600_s4] sm:$0xff] }
  0x12   : > { %v223_v11 = vld [vmem:[%s600_s4 + $0x48] sm:$0xff]  ;;  %v231_v13 = vpack.c.bf16 %v217_v10, %v215_v9  ;;  %v225_v14 = vld [vmem:[%s600_s4 + $0x58] sm:$0xff]  ;;  %291 = vmatprep.subr.bf16.mxu0 %v533_v3  ;;  %469 = vmatprep.subr.bf16.mxu1 %v533_v3  ;;  %v216_v34 = vld [vmem:[%s600_s4 + $0x10] sm:$0xff] }
  0x13   : > { %v235_v17 = vpack.c.bf16 %v225_v14, %v223_v11  ;;  %v222_v36 = vld [vmem:[%s600_s4 + $0x40] sm:$0xff]  ;;  %v224_v37 = vld [vmem:[%s600_s4 + $0x50] sm:$0xff]  ;;  %v219_v38 = vld [vmem:[%s600_s4 + $0x28] sm:$0xff]  ;;  %v230_v42 = vpack.c.bf16 %v216_v34, %v214_v33 }
  0x14   : > { %458 = vmatprep.mubr.msk.bf16.mxu0 %vm272_vm0, %v231_v13  ;;  %v221_v39 = vld [vmem:[%s600_s4 + $0x38] sm:$0xff]  ;;  %v227_v40 = vld [vmem:[%s600_s4 + $0x68] sm:$0xff]  ;;  %v234_v43 = vpack.c.bf16 %v224_v37, %v222_v36  ;;  %v218_v46 = vld [vmem:[%s600_s4 + $0x20] sm:$0xff] }
  0x15   : > { %460 = vmatprep.mubr.msk.bf16.mxu1 %vm272_vm0, %v235_v17  ;;  %292 = vmatpush1.bf16.msra.mxu0 %v259_v18  ;;  %v229_v41 = vld [vmem:[%s600_s4 + $0x78] sm:$0xff]  ;;  %v233_v44 = vpack.c.bf16 %v221_v39, %v219_v38  ;;  %v220_v47 = vld [vmem:[%s600_s4 + $0x30] sm:$0xff]  ;;  %v226_v48 = vld [vmem:[%s600_s4 + $0x60] sm:$0xff] }
  0x16   : > { %478 = vmatpush1.bf16.msra.mxu1 %v259_v18  ;;  %293 = vmatprep.subr.bf16.mxu0 %v533_v3  ;;  %v237_v45 = vpack.c.bf16 %v229_v41, %v227_v40  ;;  %v228_v49 = vld [vmem:[%s600_s4 + $0x70] sm:$0xff]  ;;  %v232_v50 = vpack.c.bf16 %v220_v47, %v218_v46 }
  0x17   : > { %470 = vmatprep.subr.bf16.mxu1 %v533_v3  ;;  %v236_v51 = vpack.c.bf16 %v228_v49, %v226_v48 }
  0x19   : > { %294 = vmatpush1.bf16.msra.mxu0 %v260_v21 }
  0x1a   : > { %479 = vmatpush1.bf16.msra.mxu1 %v260_v21  ;;  %295 = vmatprep.subr.bf16.mxu0 %v533_v3 }
  0x1b   : > { %471 = vmatprep.subr.bf16.mxu1 %v533_v3 }
  0x1d   : > { %296 = vmatpush1.bf16.msra.mxu0 %v261_v24 }
  0x1e   : > { %480 = vmatpush1.bf16.msra.mxu1 %v261_v24  ;;  %297 = vmatprep.subr.bf16.mxu0 %v533_v3 }
  0x1f   : > { %472 = vmatprep.subr.bf16.mxu1 %v533_v3 }
  0x21   : > { %298 = vmatpush1.bf16.msra.mxu0 %v262_v27 }
  0x22   : > { %481 = vmatpush1.bf16.msra.mxu1 %v262_v27  ;;  %299 = vmatprep.subr.bf16.mxu0 %v533_v3 }
  0x23   : > { %473 = vmatprep.subr.bf16.mxu1 %v533_v3 }
  0x25   : > { %300 = vmatpush1.bf16.msra.mxu0 %v263_v30 }
  0x26   : > { %482 = vmatpush1.bf16.msra.mxu1 %v263_v30  ;;  %301 = vmatprep.subr.bf16.mxu0 %v533_v3 }
  0x27   : > { %474 = vmatprep.subr.bf16.mxu1 %v533_v3 }
  0x29   : > { %302 = vmatpush1.bf16.msra.mxu0 %v264_v35 }
  0x2a   : > { %483 = vmatpush1.bf16.msra.mxu1 %v264_v35 }
  0x2c   : > { %318 = vmatmul.mubr.bf16.vlgmr.msra.gmra.mrb[0].mxu0 %v230_v42 }
  0x2d   : > { %334 = vmatmul.mubr.bf16.vlgmr.msra.gmra.mrb[0].mxu1 %v234_v43  ;;  %459 = vmatprep.mubr.msk.bf16.mxu0 %vm272_vm0, %v233_v44 }
  0x2e   : > { %461 = vmatprep.mubr.msk.bf16.mxu1 %vm272_vm0, %v237_v45 }
  0x34   : > { %326 = vmatmul.mubr.bf16.gmra.mrb[4].mxu0 %v232_v50 }
  0x35   : > { %342 = vmatmul.mubr.bf16.gmra.mrb[4].mxu1 %v236_v51 }
  0xff   : > { %v319_v53 = vpop.f32.mrb[0].mxu0 }
 0x100   : > { %v335_v54 = vpop.f32.mrb[0].mxu1  ;;  %v320_v55 = vadd.f32 %v457_v52, %v319_v53  ;;  %v321_v57 = vpop.f32.mrb[1].mxu0 }
 0x101   : > { %v336_v56 = vadd.f32 %v457_v52, %v335_v54  ;;  %v337_v58 = vpop.f32.mrb[1].mxu1  ;;  %v322_v59 = vpop.f32.mrb[2].mxu0 }
 0x102   : > { %v338_v60 = vpop.f32.mrb[2].mxu1  ;;  %350 = vst.msk [vmem:[%s679_s16] sm:$0xff] %vm272_vm0, %v320_v55  ;;  %v323_v61 = vadd.f32 %v457_v52, %v322_v59  ;;  %v324_v63 = vpop.f32.mrb[3].mxu0 }
 0x103   : > { %354 = vst.msk [vmem:[%s679_s16 + $0x20] sm:$0xff] %vm272_vm0, %v336_v56  ;;  %v339_v62 = vadd.f32 %v457_v52, %v338_v60  ;;  %v340_v0 = vpop.f32.mrb[3].mxu1 }
 0x104   : > { %351 = vst.msk [vmem:[%s679_s16 + $0x8] sm:$0xff] %vm272_vm0, %v323_v61 }
 0x105   : > { %355 = vst.msk [vmem:[%s679_s16 + $0x28] sm:$0xff] %vm272_vm0, %v339_v62 }
 0x107   : > { %v327_v1 = vpop.f32.mrb[4].mxu0 }
 0x108   : > { %v343_v2 = vpop.f32.mrb[4].mxu1  ;;  %v328_v3 = vadd.f32 %v457_v52, %v327_v1  ;;  %v329_v5 = vpop.f32.mrb[5].mxu0 }
 0x109   : > { %v344_v4 = vadd.f32 %v457_v52, %v343_v2  ;;  %v345_v6 = vpop.f32.mrb[5].mxu1  ;;  %v330_v7 = vpop.f32.mrb[6].mxu0 }
 0x10a   : > { %v346_v8 = vpop.f32.mrb[6].mxu1  ;;  %352 = vst.msk [vmem:[%s679_s16 + $0x10] sm:$0xff] %vm272_vm0, %v328_v3  ;;  %v331_v9 = vadd.f32 %v457_v52, %v330_v7  ;;  %v332_v11 = vpop.f32.mrb[7].mxu0 }
 0x10b   : > { %356 = vst.msk [vmem:[%s679_s16 + $0x30] sm:$0xff] %vm272_vm0, %v344_v4  ;;  %v347_v10 = vadd.f32 %v457_v52, %v346_v8  ;;  %v348_v12 = vpop.f32.mrb[7].mxu1 }
 0x10c   : > { %353 = vst.msk [vmem:[%s679_s16 + $0x18] sm:$0xff] %vm272_vm0, %v331_v9 }
 0x10d   : > { %357 = vst.msk [vmem:[%s679_s16 + $0x38] sm:$0xff] %vm272_vm0, %v347_v10 }
 0x10e PF: > { %s13_s14 = sadd.s32 1, %s531_s14   ;;  %s710_s12 = smov %s527_s13 }
 0x10f   : > { %p10_p5 = scmp.ge.s32.totalorder %s13_s14, 4   ;;  %s711_s13 = smov %s713_s15 }
 0x111   :  { %12 = sbr.rel (!%p10_p5) target bundleno = 2 (0x2), region = 62 }

// kernel: rnlransr_forward.46
= control target key start
LH: loop header
LB: loop body
LE: loop exit
PB: predicated region body
PF: predicated region fallthrough
CT: control target
= control target key end

     0   :  { %s4474_s21 = smov 0   ;;  %s5408_s0 = inlined_call_operand.vmem [shape: f32[2,16,16,144], index: 0, kind: input, shape index: {}]   ;;  %s5409_s1 = inlined_call_operand.vmem [shape: f32[2,16,16,16], index: 1, kind: input, shape index: {}]   ;;  %s5410_s2 = inlined_call_operand.vmem [shape: f32[144,16], index: 2, kind: input, shape index: {}]   ;;  %s5411_s3 = inlined_call_operand.vmem [shape: f32[1,16], index: 3, kind: input, shape index: {}]   ;;  %s5412_s4 = inlined_call_operand.vmem [shape: f32[3,3,16,16], index: 4, kind: input, shape index: {}]   ;;  %s5413_s5 = inlined_call_operand.vmem [shape: f32[1,16], index: 5, kind: input, shape index: {}]   ;;  %s5414_s6 = inlined_call_operand.vmem [shape: f32[2,16,16,16], index: 6, kind: output, shape index: {}]  }
   0x1 LB: > { %s3508_s22 = sadd.s32 4294967295, %s4435_s21   ;;  %p3512_p0 = scmp.ge.s32.totalorder %s4435_s21, 1  ;;  %s4435_s21 = sphi %s4474_s21, %s16_s21  }
   0x2   : > { %p222_p1 = scmp.lt.s32.totalorder %s4435_s21, 3 }
   0x4   : > { %p223_p2 = pnand %p3512_p0, %p222_p1 }
   0x5   : > { %v369_v0 = vld [vmem:[%s5410_s2] sm:$0xff] (!%p223_p2)  ;;  %v370_v1 = vld [vmem:[%s5410_s2 + $0x8] sm:$0xff] (!%p223_p2)  ;;  %v371_v2 = vld [vmem:[%s5410_s2 + $0x10] sm:$0xff] (!%p223_p2)  ;;  %p257_p3 = scmp.lt.s32.totalorder (!%p223_p2), %s3508_s22, 1  ;;  %v4437_v3 = vmov (!%p223_p2), 0   ;;  %vm403_vm0 = vcmask (!%p223_p2), 130048  }
   0x6   : > { %226 = sbr.rel (%p223_p2) target bundleno = 933 (0x3a5), region = 44  ;;  %452 = vmatprep.subr.bf16.mxu0 (!%p223_p2), %v4437_v3  ;;  %v387_v4 = vpack.c.bf16 (!%p223_p2), %v370_v1, %v369_v0  ;;  %v372_v5 = vld [vmem:[%s5410_s2 + $0x18] sm:$0xff] (!%p223_p2)  ;;  %v373_v7 = vld [vmem:[%s5410_s2 + $0x20] sm:$0xff] (!%p223_p2)  ;;  %v374_v8 = vld [vmem:[%s5410_s2 + $0x28] sm:$0xff] (!%p223_p2)  ;;  %vm647_vm1 = vcmask (!%p223_p2), 123904  }
   0x7   : > { %v388_v6 = vpack.c.bf16 (!%p223_p2), %v372_v5, %v371_v2  ;;  %v389_v11 = vpack.c.bf16 (!%p223_p2), %v374_v8, %v373_v7  ;;  %v375_v13 = vld [vmem:[%s5410_s2 + $0x30] sm:$0xff] (!%p223_p2)  ;;  %v376_v14 = vld [vmem:[%s5410_s2 + $0x38] sm:$0xff] (!%p223_p2)  ;;  %v377_v16 = vld [vmem:[%s5410_s2 + $0x40] sm:$0xff] (!%p223_p2) }
   0x8   : > { %453 = vmatpush1.bf16.msra.mxu0 (!%p223_p2), %v387_v4  ;;  %v390_v15 = vpack.c.bf16 (!%p223_p2), %v376_v14, %v375_v13  ;;  %v378_v17 = vld [vmem:[%s5410_s2 + $0x48] sm:$0xff] (!%p223_p2)  ;;  %v379_v19 = vld [vmem:[%s5410_s2 + $0x50] sm:$0xff] (!%p223_p2)  ;;  %v380_v20 = vld [vmem:[%s5410_s2 + $0x58] sm:$0xff] (!%p223_p2) }
   0x9   : > { %454 = vmatprep.subr.bf16.mxu0 (!%p223_p2), %v4437_v3  ;;  %v391_v18 = vpack.c.bf16 (!%p223_p2), %v378_v17, %v377_v16  ;;  %v392_v21 = vpack.c.bf16 (!%p223_p2), %v380_v20, %v379_v19  ;;  %v381_v22 = vld [vmem:[%s5410_s2 + $0x60] sm:$0xff] (!%p223_p2)  ;;  %v382_v23 = vld [vmem:[%s5410_s2 + $0x68] sm:$0xff] (!%p223_p2)  ;;  %v383_v25 = vld [vmem:[%s5410_s2 + $0x70] sm:$0xff] (!%p223_p2) }
   0xa   : > { %v393_v24 = vpack.c.bf16 (!%p223_p2), %v382_v23, %v381_v22  ;;  %v384_v26 = vld [vmem:[%s5410_s2 + $0x78] sm:$0xff] (!%p223_p2)  ;;  %v385_v28 = vld [vmem:[%s5410_s2 + $0x80] sm:$0xff] (!%p223_p2)  ;;  %v386_v29 = vld [vmem:[%s5410_s2 + $0x88] sm:$0xff] (!%p223_p2) }
   0xb   : > { %v394_v27 = vpack.c.bf16 (!%p223_p2), %v384_v26, %v383_v25  ;;  %v395_v30 = vpack.c.bf16 (!%p223_p2), %v386_v29, %v385_v28 }
   0xc   : > { %455 = vmatpush1.bf16.msra.mxu0 (!%p223_p2), %v388_v6 }
   0xd   : > { %s5416_s22 = smov (!%p257_p3, %s3508_s22), 1  ;;  %456 = vmatprep.subr.bf16.mxu0 %v4437_v3 }
   0xe   : > { %s3699_s11 = sshll.u32 %s5416_s22, 9 }
   0xf   : > { %s4506_s14 = scalar_lea.vmem %s5408_s0, %s3699_s11  ;;  %s3700_s11 = sshll.u32 %s5416_s22, 8 }
  0x10   : > { %v274_v9 = vld [vmem:[%s4506_s14 + $0x8] sm:$0xff]  ;;  %v276_v10 = vld [vmem:[%s4506_s14 + $0x18] sm:$0xff]  ;;  %457 = vmatpush1.bf16.msra.mxu0 %v389_v11  ;;  %v273_v31 = vld [vmem:[%s4506_s14] sm:$0xff]  ;;  %s5241_s15 = scalar_lea.vmem %s5409_s1, %s3700_s11  ;;  %s5254_s19 = scalar_lea.vmem %s5414_s6, %s3700_s11 }
  0x11   : > { %v338_v12 = vpack.c.bf16 %v276_v10, %v274_v9  ;;  %458 = vmatprep.subr.bf16.mxu0 %v4437_v3  ;;  %v275_v32 = vld [vmem:[%s4506_s14 + $0x10] sm:$0xff]  ;;  %v278_v33 = vld [vmem:[%s4506_s14 + $0x28] sm:$0xff]  ;;  %v280_v34 = vld [vmem:[%s4506_s14 + $0x38] sm:$0xff] }
  0x12   : > { %v337_v35 = vpack.c.bf16 %v275_v32, %v273_v31  ;;  %v340_v36 = vpack.c.bf16 %v280_v34, %v278_v33  ;;  %v277_v37 = vld [vmem:[%s4506_s14 + $0x20] sm:$0xff]  ;;  %v279_v38 = vld [vmem:[%s4506_s14 + $0x30] sm:$0xff]  ;;  %v282_v39 = vld [vmem:[%s4506_s14 + $0x48] sm:$0xff] }
  0x13   : > { %3520 = vmatprep.mubr.msk.bf16.mxu0 %vm403_vm0, %v338_v12  ;;  %v284_v40 = vld [vmem:[%s4506_s14 + $0x58] sm:$0xff]  ;;  %v339_v41 = vpack.c.bf16 %v279_v38, %v277_v37  ;;  %v281_v43 = vld [vmem:[%s4506_s14 + $0x40] sm:$0xff]  ;;  %v283_v44 = vld [vmem:[%s4506_s14 + $0x50] sm:$0xff] }
  0x14   : > { %459 = vmatpush1.bf16.msra.mxu0 %v390_v15  ;;  %v342_v42 = vpack.c.bf16 %v284_v40, %v282_v39  ;;  %v286_v45 = vld [vmem:[%s4506_s14 + $0x68] sm:$0xff]  ;;  %v288_v46 = vld [vmem:[%s4506_s14 + $0x78] sm:$0xff]  ;;  %v341_v47 = vpack.c.bf16 %v283_v44, %v281_v43  ;;  %v285_v49 = vld [vmem:[%s4506_s14 + $0x60] sm:$0xff]  ;;  %v4438_v39 = vmov 0.0  }
  0x15   : > { %460 = vmatprep.subr.bf16.mxu0 %v4437_v3  ;;  %v344_v48 = vpack.c.bf16 %v288_v46, %v286_v45  ;;  %v287_v50 = vld [vmem:[%s4506_s14 + $0x70] sm:$0xff]  ;;  %v290_v51 = vld [vmem:[%s4506_s14 + $0x88] sm:$0xff]  ;;  %v292_v52 = vld [vmem:[%s4506_s14 + $0x98] sm:$0xff]  ;;  %649 = vst.msk [vmem:[#allocation2 + $0x18] sm:$0xff] %vm403_vm0, %v4438_v39 }
  0x16   : > { %v343_v53 = vpack.c.bf16 %v287_v50, %v285_v49  ;;  %v346_v54 = vpack.c.bf16 %v292_v52, %v290_v51  ;;  %v289_v55 = vld [vmem:[%s4506_s14 + $0x80] sm:$0xff]  ;;  %v291_v56 = vld [vmem:[%s4506_s14 + $0x90] sm:$0xff]  ;;  %v294_v57 = vld [vmem:[%s4506_s14 + $0xa8] sm:$0xff]  ;;  %650 = vst.msk [vmem:[#allocation2 + $0x20] sm:$0xff] %vm403_vm0, %v4438_v39 }
  0x17   : > { %v296_v58 = vld [vmem:[%s4506_s14 + $0xb8] sm:$0xff]  ;;  %v345_v59 = vpack.c.bf16 %v291_v56, %v289_v55  ;;  %v293_v61 = vld [vmem:[%s4506_s14 + $0xa0] sm:$0xff]  ;;  %v295_v62 = vld [vmem:[%s4506_s14 + $0xb0] sm:$0xff]  ;;  %645 = vst.msk [vmem:[#allocation2] sm:$0xff] %vm403_vm0, %v4438_v39 }
  0x18   : > { %461 = vmatpush1.bf16.msra.mxu0 %v391_v18  ;;  %v348_v60 = vpack.c.bf16 %v296_v58, %v294_v57  ;;  %v298_v63 = vld [vmem:[%s4506_s14 + $0xc8] sm:$0xff]  ;;  %v300_v0 = vld [vmem:[%s4506_s14 + $0xd8] sm:$0xff]  ;;  %v347_v1 = vpack.c.bf16 %v295_v62, %v293_v61  ;;  %v299_v4 = vld [vmem:[%s4506_s14 + $0xd0] sm:$0xff]  ;;  %646 = vst.msk [vmem:[#allocation2 + $0x8] sm:$0xff] %vm403_vm0, %v4438_v39 }
  0x19   : > { %462 = vmatprep.subr.bf16.mxu0 %v4437_v3  ;;  %v350_v2 = vpack.c.bf16 %v300_v0, %v298_v63  ;;  %v302_v5 = vld [vmem:[%s4506_s14 + $0xe8] sm:$0xff]  ;;  %v304_v6 = vld [vmem:[%s4506_s14 + $0xf8] sm:$0xff]  ;;  %v301_v9 = vld [vmem:[%s4506_s14 + $0xe0] sm:$0xff]  ;;  %652 = vst.msk [vmem:[#allocation2 + $0x30] sm:$0xff] %vm403_vm0, %v4438_v39 }
  0x1a   : > { %v352_v8 = vpack.c.bf16 %v304_v6, %v302_v5  ;;  %v303_v10 = vld [vmem:[%s4506_s14 + $0xf0] sm:$0xff]  ;;  %v306_v11 = vld [vmem:[%s4506_s14 + $0x108] sm:$0xff]  ;;  %v308_v12 = vld [vmem:[%s4506_s14 + $0x118] sm:$0xff]  ;;  %653 = vst.msk [vmem:[#allocation2 + $0x38] sm:$0xff] %vm403_vm0, %v4438_v39 }
  0x1b   : > { %v351_v13 = vpack.c.bf16 %v303_v10, %v301_v9  ;;  %v354_v14 = vpack.c.bf16 %v308_v12, %v306_v11  ;;  %v305_v15 = vld [vmem:[%s4506_s14 + $0x100] sm:$0xff]  ;;  %v307_v16 = vld [vmem:[%s4506_s14 + $0x110] sm:$0xff]  ;;  %v310_v17 = vld [vmem:[%s4506_s14 + $0x128] sm:$0xff]  ;;  %655 = vst.msk [vmem:[#allocation2 + $0x48] sm:$0xff] %vm403_vm0, %v4438_v39 }
  0x1c   : > { %463 = vmatpush1.bf16.msra.mxu0 %v392_v21  ;;  %v312_v18 = vld [vmem:[%s4506_s14 + $0x138] sm:$0xff]  ;;  %v353_v19 = vpack.c.bf16 %v307_v16, %v305_v15  ;;  %v309_v21 = vld [vmem:[%s4506_s14 + $0x120] sm:$0xff]  ;;  %v311_v22 = vld [vmem:[%s4506_s14 + $0x130] sm:$0xff]  ;;  %656 = vst.msk [vmem:[#allocation2 + $0x50] sm:$0xff] %vm403_vm0, %v4438_v39 }
  0x1d   : > { %464 = vmatprep.subr.bf16.mxu0 %v4437_v3  ;;  %v356_v20 = vpack.c.bf16 %v312_v18, %v310_v17  ;;  %v314_v23 = vld [vmem:[%s4506_s14 + $0x148] sm:$0xff]  ;;  %v355_v25 = vpack.c.bf16 %v311_v22, %v309_v21  ;;  %v315_v28 = vld [vmem:[%s4506_s14 + $0x150] sm:$0xff]  ;;  %v317_v33 = vld [vmem:[%s4506_s14 + $0x160] sm:$0xff]  ;;  %658 = vst.msk [vmem:[#allocation2 + $0x60] sm:$0xff] %vm403_vm0, %v4438_v39 }
  0x1e   : > { %v318_v29 = vld [vmem:[%s4506_s14 + $0x168] sm:$0xff]  ;;  %v319_v34 = vld [vmem:[%s4506_s14 + $0x170] sm:$0xff]  ;;  %659 = vst.msk [vmem:[#allocation2 + $0x68] sm:$0xff] %vm403_vm0, %v4438_v39  ;;  %661 = vst.msk [vmem:[#allocation2 + $0x78] sm:$0xff] %vm403_vm0, %v4438_v39 }
  0x1f   : > { %v359_v37 = vpack.c.bf16 %v319_v34, %v317_v33  ;;  %662 = vst.msk [vmem:[#allocation2 + $0x80] sm:$0xff] %vm403_vm0, %v4438_v39  ;;  %664 = vst.msk [vmem:[#allocation2 + $0x90] sm:$0xff] %vm403_vm0, %v4438_v39  ;;  %v321_v40 = vld [vmem:[%s4506_s14 + $0x180] sm:$0xff]  ;;  %v328_v43 = vld [vmem:[%s4506_s14 + $0x1b8] sm:$0xff] }
  0x20   : > { %465 = vmatpush1.bf16.msra.mxu0 %v393_v24  ;;  %v316_v24 = vld [vmem:[%s4506_s14 + $0x158] sm:$0xff]  ;;  %665 = vst.msk [vmem:[#allocation2 + $0x98] sm:$0xff] %vm403_vm0, %v4438_v39  ;;  %667 = vst.msk [vmem:[#allocation2 + $0xa8] sm:$0xff] %vm403_vm0, %v4438_v39  ;;  %v3536_v46 = vld [vmem:[%s5412_s4 + $0x10] sm:$0xff] }
  0x21   : > { %466 = vmatprep.subr.bf16.mxu0 %v4437_v3  ;;  %v358_v26 = vpack.c.bf16 %v316_v24, %v314_v23  ;;  %668 = vst.msk [vmem:[#allocation2 + $0xb0] sm:$0xff] %vm403_vm0, %v4438_v39  ;;  %670 = vst.msk [vmem:[#allocation2 + $0xc0] sm:$0xff] %vm403_vm0, %v4438_v39  ;;  %v325_v49 = vld [vmem:[%s4506_s14 + $0x1a0] sm:$0xff]  ;;  %v327_v50 = vld [vmem:[%s4506_s14 + $0x1b0] sm:$0xff] }
  0x22   : > { %671 = vst.msk [vmem:[#allocation2 + $0xc8] sm:$0xff] %vm403_vm0, %v4438_v39  ;;  %673 = vst.msk [vmem:[#allocation2 + $0xd8] sm:$0xff] %vm403_vm0, %v4438_v39  ;;  %v330_v51 = vld [vmem:[%s4506_s14 + $0x1c8] sm:$0xff]  ;;  %v332_v52 = vld [vmem:[%s4506_s14 + $0x1d8] sm:$0xff] }
  0x23   : > { %674 = vst.msk [vmem:[#allocation2 + $0xe0] sm:$0xff] %vm403_vm0, %v4438_v39  ;;  %676 = vst.msk [vmem:[#allocation2 + $0xf0] sm:$0xff] %vm403_vm0, %v4438_v39  ;;  %v329_v55 = vld [vmem:[%s4506_s14 + $0x1c0] sm:$0xff]  ;;  %v331_v56 = vld [vmem:[%s4506_s14 + $0x1d0] sm:$0xff] }
  0x24   : > { %467 = vmatpush1.bf16.msra.mxu0 %v394_v27  ;;  %v313_v27 = vld [vmem:[%s4506_s14 + $0x140] sm:$0xff]  ;;  %677 = vst.msk [vmem:[#allocation2 + $0xf8] sm:$0xff] %vm403_vm0, %v4438_v39  ;;  %679 = vst.msk [vmem:[#allocation2 + $0x108] sm:$0xff] %vm403_vm0, %v4438_v39  ;;  %v334_v57 = vld [vmem:[%s4506_s14 + $0x1e8] sm:$0xff] }
  0x25   : > { %468 = vmatprep.subr.bf16.mxu0 %v4437_v3  ;;  %v297_v3 = vld [vmem:[%s4506_s14 + $0xc0] sm:$0xff]  ;;  %v357_v31 = vpack.c.bf16 %v315_v28, %v313_v27  ;;  %680 = vst.msk [vmem:[#allocation2 + $0x110] sm:$0xff] %vm403_vm0, %v4438_v39  ;;  %682 = vst.msk [vmem:[#allocation2 + $0x120] sm:$0xff] %vm403_vm0, %v4438_v39  ;;  %v336_v58 = vld [vmem:[%s4506_s14 + $0x1f8] sm:$0xff] }
  0x26   : > { %v349_v7 = vpack.c.bf16 %v299_v4, %v297_v3  ;;  %683 = vst.msk [vmem:[#allocation2 + $0x128] sm:$0xff] %vm403_vm0, %v4438_v39  ;;  %685 = vst.msk [vmem:[#allocation2 + $0x138] sm:$0xff] %vm403_vm0, %v4438_v39  ;;  %v333_v61 = vld [vmem:[%s4506_s14 + $0x1e0] sm:$0xff]  ;;  %v335_v62 = vld [vmem:[%s4506_s14 + $0x1f0] sm:$0xff] }
  0x27   : > { %686 = vst.msk [vmem:[#allocation2 + $0x140] sm:$0xff] %vm403_vm0, %v4438_v39  ;;  %688 = vst.msk [vmem:[#allocation2 + $0x150] sm:$0xff] %vm403_vm0, %v4438_v39  ;;  %v784_v63 = vld [vmem:[#allocation2 + $0x1] sm:$0xff]  ;;  %v3588_v3 = vld [vmem:[%s5412_s4 + $0x30] sm:$0xff] }
  0x28   : > { %469 = vmatpush1.bf16.msra.mxu0 %v395_v30  ;;  %v320_v30 = vld [vmem:[%s4506_s14 + $0x178] sm:$0xff]  ;;  %689 = vst.msk [vmem:[#allocation2 + $0x158] sm:$0xff] %vm403_vm0, %v4438_v39  ;;  %691 = vst.msk [vmem:[#allocation2 + $0x168] sm:$0xff] %vm403_vm0, %v4438_v39  ;;  %v3606_v6 = vld [vmem:[%s5412_s4 + $0x40] sm:$0xff] }
  0x29   : > { %v360_v32 = vpack.c.bf16 %v320_v30, %v318_v29  ;;  %692 = vst.msk [vmem:[#allocation2 + $0x170] sm:$0xff] %vm403_vm0, %v4438_v39  ;;  %694 = vst.msk [vmem:[#allocation2 + $0x180] sm:$0xff] %vm403_vm0, %v4438_v39  ;;  %v3589_v4 = vld [vmem:[%s5412_s4 + $0x38] sm:$0xff]  ;;  %v4707_v9 = vld [vmem:[%s5411_s3] ss:$0 sm:$0xff] }
  0x2a   : > { %695 = vst.msk [vmem:[#allocation2 + $0x188] sm:$0xff] %vm403_vm0, %v4438_v39  ;;  %697 = vst.msk [vmem:[#allocation2 + $0x198] sm:$0xff] %vm403_vm0, %v4438_v39  ;;  %v4691_v5 = vpack.c.bf16 %v3589_v4, %v3588_v3 }
  0x2b   : > { %485 = vmatmul.mubr.bf16.vlgmr.msra.gmra.mrb[0].mxu0 %v337_v35  ;;  %v322_v35 = vld [vmem:[%s4506_s14 + $0x188] sm:$0xff]  ;;  %698 = vst.msk [vmem:[#allocation2 + $0x1a0] sm:$0xff] %vm403_vm0, %v4438_v39 }
  0x2c   : > { %3521 = vmatprep.mubr.msk.bf16.mxu0 %vm403_vm0, %v340_v36  ;;  %v324_v36 = vld [vmem:[%s4506_s14 + $0x198] sm:$0xff]  ;;  %651 = vst.msk [vmem:[#allocation2 + $0x28] sm:$0x3] %vm647_vm1, %v4438_v39  ;;  %648 = vst.msk [vmem:[#allocation2 + $0x10] sm:$0x3] %vm647_vm1, %v4438_v39  ;;  %4161 = vmatprep.subr.bf16.mxu1 %v4691_v5 }
  0x2d   : > { %v362_v38 = vpack.c.bf16 %v324_v36, %v322_v35  ;;  %654 = vst.msk [vmem:[#allocation2 + $0x40] sm:$0x3] %vm647_vm1, %v4438_v39  ;;  %657 = vst.msk [vmem:[#allocation2 + $0x58] sm:$0x3] %vm647_vm1, %v4438_v39  ;;  %4162 = vmatpush3.bf16.msra.mxu1 %v4691_v5 }
  0x2e   : > { %660 = vst.msk [vmem:[#allocation2 + $0x70] sm:$0x3] %vm647_vm1, %v4438_v39  ;;  %663 = vst.msk [vmem:[#allocation2 + $0x88] sm:$0x3] %vm647_vm1, %v4438_v39 }
  0x2f   : > { %666 = vst.msk [vmem:[#allocation2 + $0xa0] sm:$0x3] %vm647_vm1, %v4438_v39  ;;  %669 = vst.msk [vmem:[#allocation2 + $0xb8] sm:$0x3] %vm647_vm1, %v4438_v39 }
  0x30   : > { %672 = vst.msk [vmem:[#allocation2 + $0xd0] sm:$0x3] %vm647_vm1, %v4438_v39  ;;  %675 = vst.msk [vmem:[#allocation2 + $0xe8] sm:$0x3] %vm647_vm1, %v4438_v39 }
  0x31   : > { %678 = vst.msk [vmem:[#allocation2 + $0x100] sm:$0x3] %vm647_vm1, %v4438_v39  ;;  %681 = vst.msk [vmem:[#allocation2 + $0x118] sm:$0x3] %vm647_vm1, %v4438_v39 }
  0x32   : > { %684 = vst.msk [vmem:[#allocation2 + $0x130] sm:$0x3] %vm647_vm1, %v4438_v39  ;;  %687 = vst.msk [vmem:[#allocation2 + $0x148] sm:$0x3] %vm647_vm1, %v4438_v39 }
  0x33   : > { %493 = vmatmul.mubr.bf16.gmra.mrb[4].mxu0 %v339_v41  ;;  %v323_v41 = vld [vmem:[%s4506_s14 + $0x190] sm:$0xff]  ;;  %690 = vst.msk [vmem:[#allocation2 + $0x160] sm:$0x3] %vm647_vm1, %v4438_v39  ;;  %693 = vst.msk [vmem:[#allocation2 + $0x178] sm:$0x3] %vm647_vm1, %v4438_v39 }
  0x34   : > { %3522 = vmatprep.mubr.msk.bf16.mxu0 %vm403_vm0, %v342_v42  ;;  %696 = vst.msk [vmem:[#allocation2 + $0x190] sm:$0x3] %vm647_vm1, %v4438_v39  ;;  %699 = vst.msk [vmem:[#allocation2 + $0x1a8] sm:$0x3] %vm647_vm1, %v4438_v39  ;;  %v326_v42 = vld [vmem:[%s4506_s14 + $0x1a8] sm:$0xff]  ;;  %v361_v44 = vpack.c.bf16 %v323_v41, %v321_v40 }
  0x35   : > { %v364_v45 = vpack.c.bf16 %v328_v43, %v326_v42  ;;  %v785_v0 = vld [vmem:[#allocation2 + $0x9] sm:$0xff] }
  0x3b   : > { %501 = vmatmul.mubr.bf16.gmra.mrb[8].mxu0 %v341_v47  ;;  %v3537_v47 = vld [vmem:[%s5412_s4 + $0x18] sm:$0xff] }
  0x3c   : > { %3523 = vmatprep.mubr.msk.bf16.mxu0 %vm403_vm0, %v344_v48  ;;  %v835_v48 = vpack.c.bf16 %v3537_v47, %v3536_v46 }
  0x3e   : > { %3855 = vmatprep.subr.bf16.mxu0 %v835_v48 }
  0x3f   : > { %3856 = vmatpush3.bf16.msra.mxu0 %v835_v48 }
  0x43   : > { %509 = vmatmul.mubr.bf16.gmra.mrb[12].mxu0 %v343_v53  ;;  %v363_v53 = vpack.c.bf16 %v327_v50, %v325_v49 }
  0x44   : > { %3524 = vmatprep.mubr.msk.bf16.mxu0 %vm403_vm0, %v346_v54  ;;  %v366_v54 = vpack.c.bf16 %v332_v52, %v330_v51 }
  0x4b   : > { %517 = vmatmul.mubr.bf16.gmra.mrb[16].mxu0 %v345_v59  ;;  %v365_v59 = vpack.c.bf16 %v331_v56, %v329_v55 }
  0x4c   : > { %3525 = vmatprep.mubr.msk.bf16.mxu0 %vm403_vm0, %v348_v60  ;;  %v368_v60 = vpack.c.bf16 %v336_v58, %v334_v57 }
  0x53   : > { %525 = vmatmul.mubr.bf16.gmra.mrb[20].mxu0 %v347_v1  ;;  %v367_v1 = vpack.c.bf16 %v335_v62, %v333_v61 }
  0x54   : > { %3526 = vmatprep.mubr.msk.bf16.mxu0 %vm403_vm0, %v350_v2  ;;  %v816_v2 = vpack.c.bf16 %v785_v0, %v784_v63 }
  0x5b   : > { %533 = vmatmul.mubr.bf16.gmra.mrb[24].mxu0 %v349_v7  ;;  %v3607_v7 = vld [vmem:[%s5412_s4 + $0x48] sm:$0xff] }
  0x5c   : > { %3527 = vmatprep.mubr.msk.bf16.mxu0 %vm403_vm0, %v352_v8  ;;  %v4701_v8 = vpack.c.bf16 %v3607_v7, %v3606_v6 }
  0x5e   : > { %3991 = vmatprep.subr.bf16.mxu1 %v4701_v8 }
  0x63   : > { %541 = vmatmul.mubr.bf16.gmra.mrb[28].mxu0 %v351_v13  ;;  %v781_v13 = vld [vmem:[%s5412_s4] sm:$0xff] }
  0x64   : > { %3528 = vmatprep.mubr.msk.bf16.mxu0 %vm403_vm0, %v354_v14  ;;  %v782_v14 = vld [vmem:[%s5412_s4 + $0x8] sm:$0xff] }
  0x65   : > { %v783_v16 = vpack.c.bf16 %v782_v14, %v781_v13 }
  0x67   : > { %3889 = vmatprep.subr.bf16.mxu0 %v783_v16 }
  0x6b   : > { %549 = vmatmul.mubr.bf16.gmra.mrb[32].mxu0 %v353_v19 }
  0x6c   : > { %3529 = vmatprep.mubr.msk.bf16.mxu0 %vm403_vm0, %v356_v20 }
  0x73   : > { %557 = vmatmul.mubr.bf16.gmra.mrb[36].mxu0 %v355_v25 }
  0x74   : > { %3530 = vmatprep.mubr.msk.bf16.mxu0 %vm403_vm0, %v358_v26 }
  0x7b   : > { %565 = vmatmul.mubr.bf16.gmra.mrb[40].mxu0 %v357_v31 }
  0x7c   : > { %3531 = vmatprep.mubr.msk.bf16.mxu0 %vm403_vm0, %v360_v32 }
  0x83   : > { %573 = vmatmul.mubr.bf16.gmra.mrb[44].mxu0 %v359_v37 }
  0x84   : > { %3532 = vmatprep.mubr.msk.bf16.mxu0 %vm403_vm0, %v362_v38 }
  0x8b   : > { %581 = vmatmul.mubr.bf16.gmra.mrb[48].mxu0 %v361_v44 }
  0x8c   : > { %3533 = vmatprep.mubr.msk.bf16.mxu0 %vm403_vm0, %v364_v45 }
  0x93   : > { %589 = vmatmul.mubr.bf16.gmra.mrb[52].mxu0 %v363_v53 }
  0x94   : > { %3534 = vmatprep.mubr.msk.bf16.mxu0 %vm403_vm0, %v366_v54 }
  0x9b   : > { %597 = vmatmul.mubr.bf16.gmra.mrb[56].mxu0 %v365_v59 }
  0x9c   : > { %3535 = vmatprep.mubr.msk.bf16.mxu0 %vm403_vm0, %v368_v60 }
  0xa3   : > { %605 = vmatmul.mubr.bf16.gmra.mrb[60].mxu0 %v367_v1 }
  0xa4   : > { %3857 = vmatprep.mubr.msk.bf16.mxu0 %vm403_vm0, %v816_v2 }
  0xfe   : > { %v486_v10 = vpop.f32.mrb[0].mxu0 }
  0xff   : > { %v487_v11 = vadd.f32 %v4707_v9, %v486_v10  ;;  %v488_v12 = vpop.f32.mrb[1].mxu0 }
 0x100   : > { %v489_v15 = vpop.f32.mrb[2].mxu0 }
 0x101   : > { %v613_v17 = vmax.f32 %v487_v11, 0.0  ;;  %v490_v18 = vadd.f32 %v4707_v9, %v489_v15  ;;  %v491_v19 = vpop.f32.mrb[3].mxu0 }
 0x103   : > { %701 = vst.msk [vmem:[#allocation2 + $0x19] sm:$0xff] %vm403_vm0, %v613_v17  ;;  %v614_v20 = vmax.f32 %v490_v18, 0.0 }
 0x105   : > { %702 = vst.msk [vmem:[#allocation2 + $0x21] sm:$0xff] %vm403_vm0, %v614_v20 }
 0x106   : > { %v494_v21 = vpop.f32.mrb[4].mxu0 }
 0x107   : > { %v495_v22 = vadd.f32 %v4707_v9, %v494_v21  ;;  %v496_v23 = vpop.f32.mrb[5].mxu0 }
 0x108   : > { %v497_v24 = vpop.f32.mrb[6].mxu0 }
 0x109   : > { %v615_v25 = vmax.f32 %v495_v22, 0.0  ;;  %v498_v26 = vadd.f32 %v4707_v9, %v497_v24  ;;  %v499_v27 = vpop.f32.mrb[7].mxu0 }
 0x10a   : > { %v786_v29 = vld [vmem:[#allocation2 + $0x19] sm:$0xff] }
 0x10b   : > { %703 = vst.msk [vmem:[#allocation2 + $0x31] sm:$0xff] %vm403_vm0, %v615_v25  ;;  %v616_v28 = vmax.f32 %v498_v26, 0.0  ;;  %v3624_v25 = vld [vmem:[%s5412_s4 + $0x50] sm:$0xff]  ;;  %v3625_v26 = vld [vmem:[%s5412_s4 + $0x58] sm:$0xff] }
 0x10c   : > { %v787_v30 = vld [vmem:[#allocation2 + $0x21] sm:$0xff] }
 0x10d   : > { %704 = vst.msk [vmem:[#allocation2 + $0x39] sm:$0xff] %vm403_vm0, %v616_v28  ;;  %v4723_v31 = vpack.c.bf16 %v787_v30, %v786_v29 }
 0x10e   : > { %v502_v32 = vpop.f32.mrb[8].mxu0 }
 0x10f   : > { %v503_v33 = vadd.f32 %v4707_v9, %v502_v32  ;;  %v504_v34 = vpop.f32.mrb[9].mxu0  ;;  %3858 = vmatmul.mubr.msk.bf16.vlgmr.msra.gmra.mrb[64].mxu0 %vm403_vm0, %v4723_v31 }
 0x110   : > { %v505_v35 = vpop.f32.mrb[10].mxu0  ;;  %3890 = vmatpush3.bf16.msra.mxu0 %v783_v16 }
 0x111   : > { %v617_v36 = vmax.f32 %v503_v33, 0.0  ;;  %v506_v37 = vadd.f32 %v4707_v9, %v505_v35  ;;  %v507_v38 = vpop.f32.mrb[11].mxu0  ;;  %v4777_v35 = vpack.c.bf16 %v3625_v26, %v3624_v25 }
 0x112   : > { %v788_v40 = vld [vmem:[#allocation2 + $0x31] sm:$0xff] }
 0x113   : > { %705 = vst.msk [vmem:[#allocation2 + $0x49] sm:$0xff] %vm403_vm0, %v617_v36  ;;  %v618_v39 = vmax.f32 %v506_v37, 0.0 }
 0x114   : > { %v789_v41 = vld [vmem:[#allocation2 + $0x39] sm:$0xff] }
 0x115   : > { %706 = vst.msk [vmem:[#allocation2 + $0x51] sm:$0xff] %vm403_vm0, %v618_v39  ;;  %v4731_v42 = vpack.c.bf16 %v789_v41, %v788_v40 }
 0x116   : > { %v510_v43 = vpop.f32.mrb[12].mxu0 }
 0x117   : > { %v511_v44 = vadd.f32 %v4707_v9, %v510_v43  ;;  %v512_v45 = vpop.f32.mrb[13].mxu0  ;;  %3861 = vmatprep.mubr.msk.bf16.mxu0 %vm403_vm0, %v4731_v42 }
 0x118   : > { %v513_v46 = vpop.f32.mrb[14].mxu0 }
 0x119   : > { %v619_v47 = vmax.f32 %v511_v44, 0.0  ;;  %v514_v48 = vadd.f32 %v4707_v9, %v513_v46  ;;  %v515_v49 = vpop.f32.mrb[15].mxu0 }
 0x11a   : > { %v790_v51 = vld [vmem:[#allocation2 + $0x49] sm:$0xff] }
 0x11b   : > { %707 = vst.msk [vmem:[#allocation2 + $0x61] sm:$0xff] %vm403_vm0, %v619_v47  ;;  %v620_v50 = vmax.f32 %v514_v48, 0.0 }
 0x11c   : > { %v791_v52 = vld [vmem:[#allocation2 + $0x51] sm:$0xff] }
 0x11d   : > { %708 = vst.msk [vmem:[#allocation2 + $0x69] sm:$0xff] %vm403_vm0, %v620_v50  ;;  %v4739_v53 = vpack.c.bf16 %v791_v52, %v790_v51 }
 0x11e   : > { %v518_v54 = vpop.f32.mrb[16].mxu0 }
 0x11f   : > { %v519_v55 = vadd.f32 %v4707_v9, %v518_v54  ;;  %v520_v56 = vpop.f32.mrb[17].mxu0  ;;  %3862 = vmatmul.mubr.msk.bf16.gmra.mrb[68].mxu0 %vm403_vm0, %v4739_v53 }
 0x120   : > { %v521_v57 = vpop.f32.mrb[18].mxu0  ;;  %v3571_v56 = vld [vmem:[%s5412_s4 + $0x28] sm:$0xff] }
 0x121   : > { %v621_v58 = vmax.f32 %v519_v55, 0.0  ;;  %v522_v59 = vadd.f32 %v4707_v9, %v521_v57  ;;  %v523_v60 = vpop.f32.mrb[19].mxu0  ;;  %v3570_v55 = vld [vmem:[%s5412_s4 + $0x20] sm:$0xff] }
 0x122   : > { %v792_v62 = vld [vmem:[#allocation2 + $0x61] sm:$0xff]  ;;  %v4805_v60 = vpack.c.bf16 %v3571_v56, %v3570_v55 }
 0x123   : > { %709 = vst.msk [vmem:[#allocation2 + $0x79] sm:$0xff] %vm403_vm0, %v621_v58  ;;  %v622_v61 = vmax.f32 %v522_v59, 0.0 }
 0x124   : > { %v793_v63 = vld [vmem:[#allocation2 + $0x69] sm:$0xff]  ;;  %3923 = vmatprep.subr.bf16.mxu0 %v4805_v60 }
 0x125   : > { %710 = vst.msk [vmem:[#allocation2 + $0x81] sm:$0xff] %vm403_vm0, %v622_v61  ;;  %v4747_v0 = vpack.c.bf16 %v793_v63, %v792_v62 }
 0x126   : > { %v526_v1 = vpop.f32.mrb[20].mxu0 }
 0x127   : > { %v527_v2 = vadd.f32 %v4707_v9, %v526_v1  ;;  %v528_v3 = vpop.f32.mrb[21].mxu0  ;;  %3865 = vmatprep.mubr.msk.bf16.mxu0 %vm403_vm0, %v4747_v0 }
 0x128   : > { %v529_v4 = vpop.f32.mrb[22].mxu0 }
 0x129   : > { %v623_v6 = vmax.f32 %v527_v2, 0.0  ;;  %v530_v7 = vadd.f32 %v4707_v9, %v529_v4  ;;  %v531_v10 = vpop.f32.mrb[23].mxu0 }
 0x12a   : > { %v794_v12 = vld [vmem:[#allocation2 + $0x79] sm:$0xff] }
 0x12b   : > { %711 = vst.msk [vmem:[#allocation2 + $0x91] sm:$0xff] %vm403_vm0, %v623_v6  ;;  %v624_v11 = vmax.f32 %v530_v7, 0.0  ;;  %v1555_v14 = vld [vmem:[#allocation2 + $0x78] sm:$0xff] }
 0x12c   : > { %v795_v13 = vld [vmem:[#allocation2 + $0x81] sm:$0xff] }
 0x12d   : > { %v1556_v15 = vld [vmem:[#allocation2 + $0x80] sm:$0xff]  ;;  %712 = vst.msk [vmem:[#allocation2 + $0x99] sm:$0xff] %vm403_vm0, %v624_v11  ;;  %v4755_v16 = vpack.c.bf16 %v795_v13, %v794_v12 }
 0x12e   : > { %v4757_v17 = vpack.c.bf16 %v1556_v15, %v1555_v14  ;;  %v534_v18 = vpop.f32.mrb[24].mxu0 }
 0x12f   : > { %v535_v19 = vadd.f32 %v4707_v9, %v534_v18  ;;  %v536_v20 = vpop.f32.mrb[25].mxu0  ;;  %3866 = vmatmul.mubr.msk.bf16.gmra.mrb[72].mxu0 %vm403_vm0, %v4755_v16 }
 0x130   : > { %3967 = vmatprep.mubr.msk.bf16.mxu1 %vm403_vm0, %v4757_v17  ;;  %v537_v21 = vpop.f32.mrb[26].mxu0 }
 0x131   : > { %v625_v22 = vmax.f32 %v535_v19, 0.0  ;;  %v538_v23 = vadd.f32 %v4707_v9, %v537_v21  ;;  %v539_v24 = vpop.f32.mrb[27].mxu0 }
 0x132   : > { %v796_v28 = vld [vmem:[#allocation2 + $0x91] sm:$0xff] }
 0x133   : > { %713 = vst.msk [vmem:[#allocation2 + $0xa9] sm:$0xff] %vm403_vm0, %v625_v22  ;;  %v626_v27 = vmax.f32 %v538_v23, 0.0  ;;  %v1557_v30 = vld [vmem:[#allocation2 + $0x90] sm:$0xff] }
 0x134   : > { %v797_v29 = vld [vmem:[#allocation2 + $0x99] sm:$0xff] }
 0x135   : > { %v1558_v32 = vld [vmem:[#allocation2 + $0x98] sm:$0xff]  ;;  %714 = vst.msk [vmem:[#allocation2 + $0xb1] sm:$0xff] %vm403_vm0, %v626_v27  ;;  %v4773_v33 = vpack.c.bf16 %v797_v29, %v796_v28 }
 0x136   : > { %v4775_v34 = vpack.c.bf16 %v1558_v32, %v1557_v30  ;;  %v542_v36 = vpop.f32.mrb[28].mxu0 }
 0x137   : > { %v543_v37 = vadd.f32 %v4707_v9, %v542_v36  ;;  %v544_v38 = vpop.f32.mrb[29].mxu0  ;;  %3869 = vmatprep.mubr.msk.bf16.mxu0 %vm403_vm0, %v4773_v33 }
 0x138   : > { %3968 = vmatmul.mubr.msk.bf16.vlgmr.msra.gmra.mrb[0].mxu1 %vm403_vm0, %v4775_v34  ;;  %v545_v39 = vpop.f32.mrb[30].mxu0 }
 0x139   : > { %3992 = vmatpush3.bf16.msra.mxu1 %v4701_v8  ;;  %v627_v40 = vmax.f32 %v543_v37, 0.0  ;;  %v546_v41 = vadd.f32 %v4707_v9, %v545_v39  ;;  %v547_v43 = vpop.f32.mrb[31].mxu0 }
 0x13a   : > { %4025 = vmatprep.subr.bf16.mxu1 %v4777_v35  ;;  %v798_v45 = vld [vmem:[#allocation2 + $0xa9] sm:$0xff] }
 0x13b   : > { %715 = vst.msk [vmem:[#allocation2 + $0xc1] sm:$0xff] %vm403_vm0, %v627_v40  ;;  %v628_v44 = vmax.f32 %v546_v41, 0.0  ;;  %v1559_v47 = vld [vmem:[#allocation2 + $0xa8] sm:$0xff] }
 0x13c   : > { %v799_v46 = vld [vmem:[#allocation2 + $0xb1] sm:$0xff] }
 0x13d   : > { %v1560_v48 = vld [vmem:[#allocation2 + $0xb0] sm:$0xff]  ;;  %716 = vst.msk [vmem:[#allocation2 + $0xc9] sm:$0xff] %vm403_vm0, %v628_v44  ;;  %v4789_v49 = vpack.c.bf16 %v799_v46, %v798_v45 }
 0x13e   : > { %v4791_v50 = vpack.c.bf16 %v1560_v48, %v1559_v47  ;;  %v550_v8 = vpop.f32.mrb[32].mxu0 }
 0x13f   : > { %v551_v51 = vadd.f32 %v4707_v9, %v550_v8  ;;  %v552_v52 = vpop.f32.mrb[33].mxu0  ;;  %3870 = vmatmul.mubr.msk.bf16.gmra.mrb[76].mxu0 %vm403_vm0, %v4789_v49 }
 0x140   : > { %3971 = vmatprep.mubr.msk.bf16.mxu1 %vm403_vm0, %v4791_v50  ;;  %v553_v54 = vpop.f32.mrb[34].mxu0 }
 0x141   : > { %v629_v57 = vmax.f32 %v551_v51, 0.0  ;;  %v554_v58 = vadd.f32 %v4707_v9, %v553_v54  ;;  %v555_v59 = vpop.f32.mrb[35].mxu0 }
 0x142   : > { %v800_v62 = vld [vmem:[#allocation2 + $0xc1] sm:$0xff] }
 0x143   : > { %717 = vst.msk [vmem:[#allocation2 + $0xd9] sm:$0xff] %vm403_vm0, %v629_v57  ;;  %v630_v61 = vmax.f32 %v554_v58, 0.0  ;;  %v1561_v1 = vld [vmem:[#allocation2 + $0xc0] sm:$0xff] }
 0x144   : > { %v801_v63 = vld [vmem:[#allocation2 + $0xc9] sm:$0xff] }
 0x145   : > { %v1562_v2 = vld [vmem:[#allocation2 + $0xc8] sm:$0xff]  ;;  %718 = vst.msk [vmem:[#allocation2 + $0xe1] sm:$0xff] %vm403_vm0, %v630_v61  ;;  %v4810_v3 = vpack.c.bf16 %v801_v63, %v800_v62 }
 0x146   : > { %v4812_v4 = vpack.c.bf16 %v1562_v2, %v1561_v1  ;;  %v558_v6 = vpop.f32.mrb[36].mxu0 }
 0x147   : > { %v559_v7 = vadd.f32 %v4707_v9, %v558_v6  ;;  %v560_v10 = vpop.f32.mrb[37].mxu0  ;;  %3873 = vmatprep.mubr.msk.bf16.mxu0 %vm403_vm0, %v4810_v3 }
 0x148   : > { %3972 = vmatmul.mubr.msk.bf16.gmra.mrb[4].mxu1 %vm403_vm0, %v4812_v4  ;;  %v561_v11 = vpop.f32.mrb[38].mxu0 }
 0x149   : > { %v631_v12 = vmax.f32 %v559_v7, 0.0  ;;  %v562_v13 = vadd.f32 %v4707_v9, %v561_v11  ;;  %v563_v14 = vpop.f32.mrb[39].mxu0 }
 0x14a   : > { %v802_v18 = vld [vmem:[#allocation2 + $0xd9] sm:$0xff] }
 0x14b   : > { %719 = vst.msk [vmem:[#allocation2 + $0xf1] sm:$0xff] %vm403_vm0, %v631_v12  ;;  %v632_v15 = vmax.f32 %v562_v13, 0.0  ;;  %v1563_v20 = vld [vmem:[#allocation2 + $0xd8] sm:$0xff] }
 0x14c   : > { %v803_v19 = vld [vmem:[#allocation2 + $0xe1] sm:$0xff] }
 0x14d   : > { %v1564_v21 = vld [vmem:[#allocation2 + $0xe0] sm:$0xff]  ;;  %720 = vst.msk [vmem:[#allocation2 + $0xf9] sm:$0xff] %vm403_vm0, %v632_v15  ;;  %v4822_v22 = vpack.c.bf16 %v803_v19, %v802_v18 }
 0x14e   : > { %v4824_v23 = vpack.c.bf16 %v1564_v21, %v1563_v20  ;;  %v566_v24 = vpop.f32.mrb[40].mxu0 }
 0x14f   : > { %v567_v25 = vadd.f32 %v4707_v9, %v566_v24  ;;  %v568_v26 = vpop.f32.mrb[41].mxu0  ;;  %3874 = vmatmul.mubr.msk.bf16.gmra.mrb[80].mxu0 %vm403_vm0, %v4822_v22 }
 0x150   : > { %3975 = vmatprep.mubr.msk.bf16.mxu1 %vm403_vm0, %v4824_v23  ;;  %v569_v27 = vpop.f32.mrb[42].mxu0 }
 0x151   : > { %v633_v28 = vmax.f32 %v567_v25, 0.0  ;;  %v570_v29 = vadd.f32 %v4707_v9, %v569_v27  ;;  %v571_v30 = vpop.f32.mrb[43].mxu0 }
 0x152   : > { %v804_v36 = vld [vmem:[#allocation2 + $0xf1] sm:$0xff] }
 0x153   : > { %721 = vst.msk [vmem:[#allocation2 + $0x109] sm:$0xff] %vm403_vm0, %v633_v28  ;;  %v634_v32 = vmax.f32 %v570_v29, 0.0  ;;  %v1565_v38 = vld [vmem:[#allocation2 + $0xf0] sm:$0xff] }
 0x154   : > { %v805_v37 = vld [vmem:[#allocation2 + $0xf9] sm:$0xff] }
 0x155   : > { %v1566_v39 = vld [vmem:[#allocation2 + $0xf8] sm:$0xff]  ;;  %722 = vst.msk [vmem:[#allocation2 + $0x111] sm:$0xff] %vm403_vm0, %v634_v32  ;;  %v4834_v40 = vpack.c.bf16 %v805_v37, %v804_v36 }
 0x156   : > { %v4836_v41 = vpack.c.bf16 %v1566_v39, %v1565_v38  ;;  %v574_v43 = vpop.f32.mrb[44].mxu0 }
 0x157   : > { %v575_v44 = vadd.f32 %v4707_v9, %v574_v43  ;;  %v576_v45 = vpop.f32.mrb[45].mxu0  ;;  %3877 = vmatprep.mubr.msk.bf16.mxu0 %vm403_vm0, %v4834_v40 }
 0x158   : > { %3976 = vmatmul.mubr.msk.bf16.gmra.mrb[8].mxu1 %vm403_vm0, %v4836_v41  ;;  %v577_v46 = vpop.f32.mrb[46].mxu0 }
 0x159   : > { %v635_v47 = vmax.f32 %v575_v44, 0.0  ;;  %v578_v48 = vadd.f32 %v4707_v9, %v577_v46  ;;  %v579_v8 = vpop.f32.mrb[47].mxu0 }
 0x15a   : > { %v806_v52 = vld [vmem:[#allocation2 + $0x109] sm:$0xff] }
 0x15b   : > { %723 = vst.msk [vmem:[#allocation2 + $0x121] sm:$0xff] %vm403_vm0, %v635_v47  ;;  %v636_v51 = vmax.f32 %v578_v48, 0.0  ;;  %v1567_v55 = vld [vmem:[#allocation2 + $0x108] sm:$0xff] }
 0x15c   : > { %v807_v54 = vld [vmem:[#allocation2 + $0x111] sm:$0xff] }
 0x15d   : > { %v1568_v56 = vld [vmem:[#allocation2 + $0x110] sm:$0xff]  ;;  %724 = vst.msk [vmem:[#allocation2 + $0x129] sm:$0xff] %vm403_vm0, %v636_v51  ;;  %v4846_v57 = vpack.c.bf16 %v807_v54, %v806_v52 }
 0x15e   : > { %v4848_v58 = vpack.c.bf16 %v1568_v56, %v1567_v55  ;;  %v582_v59 = vpop.f32.mrb[48].mxu0 }
 0x15f   : > { %v583_v61 = vadd.f32 %v4707_v9, %v582_v59  ;;  %v584_v62 = vpop.f32.mrb[49].mxu0  ;;  %3878 = vmatmul.mubr.msk.bf16.gmra.mrb[84].mxu0 %vm403_vm0, %v4846_v57 }
 0x160   : > { %3979 = vmatprep.mubr.msk.bf16.mxu1 %vm403_vm0, %v4848_v58  ;;  %v585_v63 = vpop.f32.mrb[50].mxu0 }
 0x161   : > { %v637_v1 = vmax.f32 %v583_v61, 0.0  ;;  %v586_v2 = vadd.f32 %v4707_v9, %v585_v63  ;;  %v587_v6 = vpop.f32.mrb[51].mxu0 }
 0x162   : > { %v808_v10 = vld [vmem:[#allocation2 + $0x121] sm:$0xff] }
 0x163   : > { %725 = vst.msk [vmem:[#allocation2 + $0x139] sm:$0xff] %vm403_vm0, %v637_v1  ;;  %v638_v7 = vmax.f32 %v586_v2, 0.0  ;;  %v1569_v12 = vld [vmem:[#allocation2 + $0x120] sm:$0xff] }
 0x164   : > { %v809_v11 = vld [vmem:[#allocation2 + $0x129] sm:$0xff] }
 0x165   : > { %v1570_v13 = vld [vmem:[#allocation2 + $0x128] sm:$0xff]  ;;  %726 = vst.msk [vmem:[#allocation2 + $0x141] sm:$0xff] %vm403_vm0, %v638_v7  ;;  %v4858_v14 = vpack.c.bf16 %v809_v11, %v808_v10  ;;  %v733_v7 = vld [vmem:[#allocation2] sm:$0xff] }
 0x166   : > { %v4860_v15 = vpack.c.bf16 %v1570_v13, %v1569_v12  ;;  %v590_v18 = vpop.f32.mrb[52].mxu0  ;;  %v734_v10 = vld [vmem:[#allocation2 + $0x8] sm:$0xff] }
 0x167   : > { %v591_v19 = vadd.f32 %v4707_v9, %v590_v18  ;;  %v592_v20 = vpop.f32.mrb[53].mxu0  ;;  %3881 = vmatprep.mubr.msk.bf16.mxu0 %vm403_vm0, %v4858_v14 }
 0x168   : > { %3980 = vmatmul.mubr.msk.bf16.gmra.mrb[12].mxu1 %vm403_vm0, %v4860_v15  ;;  %v593_v21 = vpop.f32.mrb[54].mxu0  ;;  %v765_v20 = vpack.c.bf16 %v734_v10, %v733_v7  ;;  %v1265_v10 = vld [vmem:[#allocation2 + $0x82] sm:$0xff] }
 0x169   : > { %v639_v24 = vmax.f32 %v591_v19, 0.0  ;;  %v594_v25 = vadd.f32 %v4707_v9, %v593_v21  ;;  %v595_v26 = vpop.f32.mrb[55].mxu0 }
 0x16a   : > { %v810_v28 = vld [vmem:[#allocation2 + $0x139] sm:$0xff] }
 0x16b   : > { %727 = vst.msk [vmem:[#allocation2 + $0x151] sm:$0xff] %vm403_vm0, %v639_v24  ;;  %v640_v27 = vmax.f32 %v594_v25, 0.0  ;;  %v1571_v30 = vld [vmem:[#allocation2 + $0x138] sm:$0xff] }
 0x16c   : > { %v811_v29 = vld [vmem:[#allocation2 + $0x141] sm:$0xff]  ;;  %v738_v25 = vld [vmem:[#allocation2 + $0x38] sm:$0xff] }
 0x16d   : > { %v1572_v32 = vld [vmem:[#allocation2 + $0x140] sm:$0xff]  ;;  %728 = vst.msk [vmem:[#allocation2 + $0x159] sm:$0xff] %vm403_vm0, %v640_v27  ;;  %v4870_v36 = vpack.c.bf16 %v811_v29, %v810_v28  ;;  %v735_v26 = vld [vmem:[#allocation2 + $0x18] sm:$0xff] }
 0x16e   : > { %v4872_v37 = vpack.c.bf16 %v1572_v32, %v1571_v30  ;;  %v598_v38 = vpop.f32.mrb[56].mxu0  ;;  %v737_v32 = vld [vmem:[#allocation2 + $0x30] sm:$0xff] }
 0x16f   : > { %v599_v39 = vadd.f32 %v4707_v9, %v598_v38  ;;  %v600_v43 = vpop.f32.mrb[57].mxu0  ;;  %3882 = vmatmul.mubr.msk.bf16.gmra.mrb[88].mxu0 %vm403_vm0, %v4870_v36  ;;  %v4907_v38 = vpack.c.bf16 %v738_v25, %v737_v32  ;;  %v1271_v25 = vld [vmem:[#allocation2 + $0xca] sm:$0xff]  ;;  %v1273_v32 = vld [vmem:[#allocation2 + $0xe2] sm:$0xff] }
 0x170   : > { %3983 = vmatprep.mubr.msk.bf16.mxu1 %vm403_vm0, %v4872_v37  ;;  %v601_v44 = vpop.f32.mrb[58].mxu0  ;;  %v3642_v43 = vld [vmem:[%s5412_s4 + $0x60] sm:$0xff] }
 0x171   : > { %v641_v45 = vmax.f32 %v599_v39, 0.0  ;;  %v602_v46 = vadd.f32 %v4707_v9, %v601_v44  ;;  %v603_v47 = vpop.f32.mrb[59].mxu0  ;;  %v740_v39 = vld [vmem:[#allocation2 + $0x50] sm:$0xff]  ;;  %v3643_v44 = vld [vmem:[%s5412_s4 + $0x68] sm:$0xff] }
 0x172   : > { %v812_v8 = vld [vmem:[#allocation2 + $0x151] sm:$0xff] }
 0x173   : > { %729 = vst.msk [vmem:[#allocation2 + $0x169] sm:$0xff] %vm403_vm0, %v641_v45  ;;  %v642_v48 = vmax.f32 %v602_v46, 0.0  ;;  %v1573_v52 = vld [vmem:[#allocation2 + $0x150] sm:$0xff]  ;;  %v742_v45 = vld [vmem:[#allocation2 + $0x68] sm:$0xff] }
 0x174   : > { %v813_v51 = vld [vmem:[#allocation2 + $0x159] sm:$0xff]  ;;  %v739_v46 = vld [vmem:[#allocation2 + $0x48] sm:$0xff] }
 0x175   : > { %v1574_v54 = vld [vmem:[#allocation2 + $0x158] sm:$0xff]  ;;  %730 = vst.msk [vmem:[#allocation2 + $0x171] sm:$0xff] %vm403_vm0, %v642_v48  ;;  %v4882_v55 = vpack.c.bf16 %v813_v51, %v812_v8  ;;  %v4925_v47 = vpack.c.bf16 %v740_v39, %v739_v46  ;;  %v741_v48 = vld [vmem:[#allocation2 + $0x60] sm:$0xff]  ;;  %v2478_v8 = vpack.c.bf16 %v3643_v44, %v3642_v43  ;;  %v1276_v46 = vld [vmem:[#allocation2 + $0x10a] sm:$0xff] }
 0x176   : > { %v4884_v56 = vpack.c.bf16 %v1574_v54, %v1573_v52  ;;  %v606_v59 = vpop.f32.mrb[60].mxu0  ;;  %v1260_v54 = vld [vmem:[#allocation2 + $0x4a] sm:$0xff]  ;;  %v1274_v39 = vld [vmem:[#allocation2 + $0xf2] sm:$0xff]  ;;  %v1275_v43 = vld [vmem:[#allocation2 + $0xfa] sm:$0xff] }
 0x177   : > { %v607_v61 = vadd.f32 %v4707_v9, %v606_v59  ;;  %v608_v62 = vpop.f32.mrb[61].mxu0  ;;  %3885 = vmatprep.mubr.msk.bf16.mxu0 %vm403_vm0, %v4882_v55  ;;  %v1261_v59 = vld [vmem:[#allocation2 + $0x52] sm:$0xff] }
 0x178   : > { %3984 = vmatmul.mubr.msk.bf16.gmra.mrb[16].mxu1 %vm403_vm0, %v4884_v56  ;;  %v609_v63 = vpop.f32.mrb[62].mxu0  ;;  %v3661_v62 = vld [vmem:[%s5412_s4 + $0x78] sm:$0xff] }
 0x179   : > { %v643_v1 = vmax.f32 %v607_v61, 0.0  ;;  %v610_v2 = vadd.f32 %v4707_v9, %v609_v63  ;;  %v611_v6 = vpop.f32.mrb[63].mxu0  ;;  %v736_v9 = vld [vmem:[#allocation2 + $0x20] sm:$0xff]  ;;  %v3660_v61 = vld [vmem:[%s5412_s4 + $0x70] sm:$0xff] }
 0x17a   : > { %v814_v12 = vld [vmem:[#allocation2 + $0x169] sm:$0xff]  ;;  %v4903_v29 = vpack.c.bf16 %v736_v9, %v735_v26  ;;  %v5004_v6 = vpack.c.bf16 %v3661_v62, %v3660_v61 }
 0x17b   : > { %731 = vst.msk [vmem:[#allocation2 + $0x181] sm:$0xff] %vm403_vm0, %v643_v1  ;;  %v644_v11 = vmax.f32 %v610_v2, 0.0  ;;  %v1575_v18 = vld [vmem:[#allocation2 + $0x168] sm:$0xff]  ;;  %v5002_v2 = vpack.c.bf16 %v1261_v59, %v1260_v54 }
 0x17c   : > { %v815_v13 = vld [vmem:[#allocation2 + $0x171] sm:$0xff]  ;;  %v1262_v63 = vld [vmem:[#allocation2 + $0x62] sm:$0xff] }
 0x17d   : > { %v1576_v19 = vld [vmem:[#allocation2 + $0x170] sm:$0xff]  ;;  %732 = vst.msk [vmem:[#allocation2 + $0x189] sm:$0xff] %vm403_vm0, %v644_v11  ;;  %v4894_v21 = vpack.c.bf16 %v815_v13, %v814_v12  ;;  %v1267_v12 = vld [vmem:[#allocation2 + $0x9a] sm:$0xff]  ;;  %v1270_v9 = vld [vmem:[#allocation2 + $0xc2] sm:$0xff] }
 0x17e   : > { %v4896_v24 = vpack.c.bf16 %v1576_v19, %v1575_v18  ;;  %v1263_v1 = vld [vmem:[#allocation2 + $0x6a] sm:$0xff]  ;;  %v1266_v11 = vld [vmem:[#allocation2 + $0x92] sm:$0xff] }
 0x17f   : > { %3886 = vmatmul.mubr.msk.bf16.gmra.mrb[92].mxu0 %vm403_vm0, %v4894_v21  ;;  %v5006_v7 = vpack.c.bf16 %v1263_v1, %v1262_v63  ;;  %v5019_v18 = vpack.c.bf16 %v1267_v12, %v1266_v11  ;;  %v1268_v19 = vld [vmem:[#allocation2 + $0xaa] sm:$0xff]  ;;  %v1285_v54 = vld [vmem:[#allocation2 + $0x172] sm:$0xff] }
 0x180   : > { %3987 = vmatprep.mubr.msk.bf16.mxu1 %vm403_vm0, %v4896_v24  ;;  %3891 = vmatprep.mubr.msk.bf16.mxu0 %vm403_vm0, %v765_v20  ;;  %v1269_v20 = vld [vmem:[#allocation2 + $0xb2] sm:$0xff]  ;;  %v3679_v1 = vld [vmem:[%s5412_s4 + $0x88] sm:$0xff] }
 0x181   : > { %v5029_v26 = vpack.c.bf16 %v1269_v20, %v1268_v19  ;;  %v2731_v12 = vld [vmem:[#allocation2 + $0xb1] sm:$0xff]  ;;  %v2733_v19 = vld [vmem:[#allocation2 + $0xc9] sm:$0xff] }
 0x182   : > { %v1577_v27 = vld [vmem:[#allocation2 + $0x180] sm:$0xff]  ;;  %v2730_v20 = vld [vmem:[#allocation2 + $0xa9] sm:$0xff] }
 0x184   : > { %v1578_v28 = vld [vmem:[#allocation2 + $0x188] sm:$0xff] }
 0x185   : > { %v4905_v30 = vpack.c.bf16 %v1578_v28, %v1577_v27  ;;  %v5031_v27 = vpack.c.bf16 %v1271_v25, %v1270_v9  ;;  %v1272_v28 = vld [vmem:[#allocation2 + $0xda] sm:$0xff]  ;;  %v2163_v61 = vld [vmem:[#allocation2 + $0x182] sm:$0xff]  ;;  %v2164_v62 = vld [vmem:[#allocation2 + $0x18a] sm:$0xff]  ;;  %v2757_v9 = vpack.c.bf16 %v2731_v12, %v2730_v20 }
 0x186   : > { %v5041_v44 = vpack.c.bf16 %v1273_v32, %v1272_v28  ;;  %v5087_v63 = vpack.c.bf16 %v2164_v62, %v2163_v61  ;;  %v2732_v25 = vld [vmem:[#allocation2 + $0xc1] sm:$0xff] }
 0x187   : > { %3892 = vmatmul.mubr.msk.bf16.vlgmr.msra.gmra.mrb[64].mxu0 %vm403_vm0, %v4903_v29  ;;  %3988 = vmatmul.mubr.msk.bf16.gmra.mrb[20].mxu1 %vm403_vm0, %v4905_v30  ;;  %v2758_v28 = vpack.c.bf16 %v2733_v19, %v2732_v25  ;;  %v2735_v32 = vld [vmem:[#allocation2 + $0xe1] sm:$0xff] }
 0x188   : > { %3895 = vmatprep.mubr.msk.bf16.mxu0 %vm403_vm0, %v4907_v38  ;;  %3993 = vmatprep.mubr.msk.bf16.mxu1 %vm403_vm0, %v4723_v31  ;;  %v4927_v31 = vpack.c.bf16 %v742_v45, %v741_v48  ;;  %v5043_v45 = vpack.c.bf16 %v1275_v43, %v1274_v39  ;;  %v1277_v48 = vld [vmem:[#allocation2 + $0x112] sm:$0xff] }
 0x189   : > { %3924 = vmatpush3.bf16.msra.mxu0 %v4805_v60  ;;  %v1259_v60 = vld [vmem:[#allocation2 + $0x3a] sm:$0xff] }
 0x18a   : > { %3957 = vmatprep.subr.bf16.mxu0 %v4691_v5  ;;  %v2734_v39 = vld [vmem:[#allocation2 + $0xd9] sm:$0xff] }
 0x18b   : > { %v2759_v43 = vpack.c.bf16 %v2735_v32, %v2734_v39  ;;  %v3351_v39 = vld [vmem:[%s5241_s15 + $0x30] sm:$0xff] }
 0x18f   : > { %3896 = vmatmul.mubr.msk.bf16.gmra.mrb[68].mxu0 %vm403_vm0, %v4925_v47  ;;  %3994 = vmatmul.mubr.msk.bf16.vlgmr.msra.gmra.mrb[24].mxu1 %vm403_vm0, %v4731_v42  ;;  %v1254_v42 = vld [vmem:[#allocation2 + $0x2] sm:$0xff] }
 0x190   : > { %4026 = vmatpush3.bf16.msra.mxu1 %v4777_v35  ;;  %3899 = vmatprep.mubr.msk.bf16.mxu0 %vm403_vm0, %v4927_v31  ;;  %v1871_v35 = vld [vmem:[#allocation2 + $0x189] sm:$0xff] }
 0x191   : > { %3997 = vmatprep.mubr.msk.bf16.mxu1 %vm403_vm0, %v4739_v53  ;;  %4059 = vmatprep.subr.bf16.mxu1 %v2478_v8  ;;  %v1255_v53 = vld [vmem:[#allocation2 + $0xa] sm:$0xff] }
 0x197   : > { %3900 = vmatmul.mubr.msk.bf16.gmra.mrb[72].mxu0 %vm403_vm0, %v4757_v17  ;;  %3998 = vmatmul.mubr.msk.bf16.gmra.mrb[28].mxu1 %vm403_vm0, %v4747_v0  ;;  %v1286_v0 = vpack.c.bf16 %v1255_v53, %v1254_v42  ;;  %v1279_v42 = vld [vmem:[#allocation2 + $0x12a] sm:$0xff]  ;;  %v5053_v53 = vpack.c.bf16 %v1277_v48, %v1276_v46  ;;  %v2750_v46 = vld [vmem:[#allocation2 + $0x199] sm:$0xff] }
 0x198   : > { %3903 = vmatprep.mubr.msk.bf16.mxu0 %vm403_vm0, %v4775_v34  ;;  %4001 = vmatprep.mubr.msk.bf16.mxu1 %vm403_vm0, %v4755_v16  ;;  %v1256_v16 = vld [vmem:[#allocation2 + $0x1a] sm:$0xff] }
 0x19f   : > { %3904 = vmatmul.mubr.msk.bf16.gmra.mrb[76].mxu0 %vm403_vm0, %v4791_v50  ;;  %4002 = vmatmul.mubr.msk.bf16.gmra.mrb[0].mxu1 %vm403_vm0, %v4773_v33  ;;  %v1257_v33 = vld [vmem:[#allocation2 + $0x22] sm:$0xff] }
 0x1a0   : > { %3907 = vmatprep.mubr.msk.bf16.mxu0 %vm403_vm0, %v4812_v4  ;;  %4005 = vmatprep.mubr.msk.bf16.mxu1 %vm403_vm0, %v4789_v49  ;;  %v1258_v49 = vld [vmem:[#allocation2 + $0x32] sm:$0xff] }
 0x1a1   : > { %v4987_v52 = vpack.c.bf16 %v1259_v60, %v1258_v49  ;;  %v1283_v49 = vld [vmem:[#allocation2 + $0x15a] sm:$0xff] }
 0x1a7   : > { %3908 = vmatmul.mubr.msk.bf16.gmra.mrb[80].mxu0 %vm403_vm0, %v4824_v23  ;;  %4006 = vmatmul.mubr.msk.bf16.gmra.mrb[4].mxu1 %vm403_vm0, %v4810_v3  ;;  %v1870_v3 = vld [vmem:[#allocation2 + $0x181] sm:$0xff] }
 0x1a8   : > { %3911 = vmatprep.mubr.msk.bf16.mxu0 %vm403_vm0, %v4836_v41  ;;  %4009 = vmatprep.mubr.msk.bf16.mxu1 %vm403_vm0, %v4822_v22  ;;  %v1287_v22 = vpack.c.bf16 %v1257_v33, %v1256_v16  ;;  %v4985_v51 = vpack.c.bf16 %v1871_v35, %v1870_v3  ;;  %v1280_v16 = vld [vmem:[#allocation2 + $0x13a] sm:$0xff]  ;;  %v1281_v33 = vld [vmem:[#allocation2 + $0x142] sm:$0xff]  ;;  %v1282_v35 = vld [vmem:[#allocation2 + $0x152] sm:$0xff] }
 0x1a9   : > { %v5065_v60 = vpack.c.bf16 %v1281_v33, %v1280_v16  ;;  %v5067_v3 = vpack.c.bf16 %v1283_v49, %v1282_v35 }
 0x1af   : > { %3912 = vmatmul.mubr.msk.bf16.gmra.mrb[84].mxu0 %vm403_vm0, %v4848_v58  ;;  %4010 = vmatmul.mubr.msk.bf16.gmra.mrb[8].mxu1 %vm403_vm0, %v4834_v40 }
 0x1b0   : > { %3915 = vmatprep.mubr.msk.bf16.mxu0 %vm403_vm0, %v4860_v15  ;;  %4013 = vmatprep.mubr.msk.bf16.mxu1 %vm403_vm0, %v4846_v57 }
 0x1b7   : > { %3916 = vmatmul.mubr.msk.bf16.gmra.mrb[88].mxu0 %vm403_vm0, %v4872_v37  ;;  %4014 = vmatmul.mubr.msk.bf16.gmra.mrb[12].mxu1 %vm403_vm0, %v4858_v14 }
 0x1b8   : > { %3919 = vmatprep.mubr.msk.bf16.mxu0 %vm403_vm0, %v4884_v56  ;;  %4017 = vmatprep.mubr.msk.bf16.mxu1 %vm403_vm0, %v4870_v36 }
 0x1bf   : > { %3920 = vmatmul.mubr.msk.bf16.gmra.mrb[92].mxu0 %vm403_vm0, %v4896_v24  ;;  %4018 = vmatmul.mubr.msk.bf16.gmra.mrb[16].mxu1 %vm403_vm0, %v4882_v55 }
 0x1c0   : > { %4021 = vmatprep.mubr.msk.bf16.mxu1 %vm403_vm0, %v4894_v21  ;;  %3925 = vmatprep.mubr.msk.bf16.mxu0 %vm403_vm0, %v1286_v0 }
 0x1c7   : > { %3926 = vmatmul.mubr.msk.bf16.vlgmr.msra.gmra.mrb[64].mxu0 %vm403_vm0, %v1287_v22  ;;  %4022 = vmatmul.mubr.msk.bf16.gmra.mrb[20].mxu1 %vm403_vm0, %v4985_v51 }
 0x1c8   : > { %3929 = vmatprep.mubr.msk.bf16.mxu0 %vm403_vm0, %v4987_v52  ;;  %4027 = vmatprep.mubr.msk.bf16.mxu1 %vm403_vm0, %v1287_v22  ;;  %v1284_v22 = vld [vmem:[#allocation2 + $0x16a] sm:$0xff] }
 0x1c9   : > { %3958 = vmatpush3.bf16.msra.mxu0 %v4691_v5  ;;  %v1264_v5 = vld [vmem:[#allocation2 + $0x7a] sm:$0xff]  ;;  %v5077_v59 = vpack.c.bf16 %v1285_v54, %v1284_v22 }
 0x1ca   : > { %v5017_v13 = vpack.c.bf16 %v1265_v10, %v1264_v5  ;;  %v2728_v10 = vld [vmem:[#allocation2 + $0x91] sm:$0xff] }
 0x1cf   : > { %3930 = vmatmul.mubr.msk.bf16.gmra.mrb[68].mxu0 %vm403_vm0, %v5002_v2  ;;  %4028 = vmatmul.mubr.msk.bf16.vlgmr.msra.gmra.mrb[24].mxu1 %vm403_vm0, %v4987_v52 }
 0x1d0   : > { %4060 = vmatpush3.bf16.msra.mxu1 %v2478_v8  ;;  %3933 = vmatprep.mubr.msk.bf16.mxu0 %vm403_vm0, %v5006_v7  ;;  %v1278_v8 = vld [vmem:[#allocation2 + $0x122] sm:$0xff] }
 0x1d1   : > { %4031 = vmatprep.mubr.msk.bf16.mxu1 %vm403_vm0, %v5002_v2  ;;  %4093 = vmatprep.subr.bf16.mxu1 %v5004_v6  ;;  %v5055_v0 = vpack.c.bf16 %v1279_v42, %v1278_v8 }
 0x1d7   : > { %3934 = vmatmul.mubr.msk.bf16.gmra.mrb[72].mxu0 %vm403_vm0, %v5017_v13  ;;  %4032 = vmatmul.mubr.msk.bf16.gmra.mrb[28].mxu1 %vm403_vm0, %v5006_v7 }
 0x1d8   : > { %3937 = vmatprep.mubr.msk.bf16.mxu0 %vm403_vm0, %v5019_v18  ;;  %4035 = vmatprep.mubr.msk.bf16.mxu1 %vm403_vm0, %v5017_v13 }
 0x1df   : > { %3938 = vmatmul.mubr.msk.bf16.gmra.mrb[76].mxu0 %vm403_vm0, %v5029_v26  ;;  %4036 = vmatmul.mubr.msk.bf16.gmra.mrb[0].mxu1 %vm403_vm0, %v5019_v18 }
 0x1e0   : > { %3941 = vmatprep.mubr.msk.bf16.mxu0 %vm403_vm0, %v5031_v27  ;;  %4039 = vmatprep.mubr.msk.bf16.mxu1 %vm403_vm0, %v5029_v26 }
 0x1e7   : > { %3942 = vmatmul.mubr.msk.bf16.gmra.mrb[80].mxu0 %vm403_vm0, %v5041_v44  ;;  %4040 = vmatmul.mubr.msk.bf16.gmra.mrb[4].mxu1 %vm403_vm0, %v5031_v27 }
 0x1e8   : > { %3945 = vmatprep.mubr.msk.bf16.mxu0 %vm403_vm0, %v5043_v45  ;;  %4043 = vmatprep.mubr.msk.bf16.mxu1 %vm403_vm0, %v5041_v44 }
 0x1ef   : > { %3946 = vmatmul.mubr.msk.bf16.gmra.mrb[84].mxu0 %vm403_vm0, %v5053_v53  ;;  %4044 = vmatmul.mubr.msk.bf16.gmra.mrb[8].mxu1 %vm403_vm0, %v5043_v45 }
 0x1f0   : > { %3949 = vmatprep.mubr.msk.bf16.mxu0 %vm403_vm0, %v5055_v0  ;;  %4047 = vmatprep.mubr.msk.bf16.mxu1 %vm403_vm0, %v5053_v53 }
 0x1f7   : > { %3950 = vmatmul.mubr.msk.bf16.gmra.mrb[88].mxu0 %vm403_vm0, %v5065_v60  ;;  %4048 = vmatmul.mubr.msk.bf16.gmra.mrb[12].mxu1 %vm403_vm0, %v5055_v0 }
 0x1f8   : > { %3953 = vmatprep.mubr.msk.bf16.mxu0 %vm403_vm0, %v5067_v3  ;;  %4051 = vmatprep.mubr.msk.bf16.mxu1 %vm403_vm0, %v5065_v60 }
 0x1ff   : > { %3954 = vmatmul.mubr.msk.bf16.gmra.mrb[92].mxu0 %vm403_vm0, %v5077_v59  ;;  %4052 = vmatmul.mubr.msk.bf16.gmra.mrb[16].mxu1 %vm403_vm0, %v5067_v3 }
 0x200   : > { %3959 = vmatprep.mubr.msk.bf16.mxu0 %vm403_vm0, %v4903_v29  ;;  %4055 = vmatprep.mubr.msk.bf16.mxu1 %vm403_vm0, %v5077_v59  ;;  %v3678_v29 = vld [vmem:[%s5412_s4 + $0x80] sm:$0xff] }
 0x201   : > { %v3064_v5 = vpack.c.bf16 %v3679_v1, %v3678_v29 }
 0x207   : > { %3960 = vmatmul.mubr.msk.bf16.vlgmr.msra.gmra.mrb[64].mxu0 %vm403_vm0, %v4907_v38  ;;  %4056 = vmatmul.mubr.msk.bf16.gmra.mrb[20].mxu1 %vm403_vm0, %v5087_v63 }
 0x208   : > { %3963 = vmatprep.mubr.msk.bf16.mxu0 %vm403_vm0, %v4925_v47  ;;  %4061 = vmatprep.mubr.msk.bf16.mxu1 %vm403_vm0, %v4907_v38  ;;  %v2724_v38 = vld [vmem:[#allocation2 + $0x61] sm:$0xff] }
 0x20f   : > { %3964 = vmatmul.mubr.msk.bf16.gmra.mrb[68].mxu0 %vm403_vm0, %v4927_v31  ;;  %4062 = vmatmul.mubr.msk.bf16.vlgmr.msra.gmra.mrb[24].mxu1 %vm403_vm0, %v4925_v47 }
 0x210   : > { %4094 = vmatpush3.bf16.msra.mxu1 %v5004_v6  ;;  %4065 = vmatprep.mubr.msk.bf16.mxu1 %vm403_vm0, %v4927_v31  ;;  %v2726_v31 = vld [vmem:[#allocation2 + $0x79] sm:$0xff] }
 0x211   : > { %4127 = vmatprep.subr.bf16.mxu1 %v3064_v5 }
 0x217   : > { %4066 = vmatmul.mubr.msk.bf16.gmra.mrb[28].mxu1 %vm403_vm0, %v4757_v17  ;;  %v2457_v17 = vld [vmem:[#allocation2 + $0x198] sm:$0xff] }
 0x218   : > { %4069 = vmatprep.mubr.msk.bf16.mxu1 %vm403_vm0, %v4775_v34  ;;  %v2458_v34 = vld [vmem:[#allocation2 + $0x1a0] sm:$0xff] }
 0x21f   : > { %4070 = vmatmul.mubr.msk.bf16.gmra.mrb[0].mxu1 %vm403_vm0, %v4791_v50  ;;  %v2474_v50 = vpack.c.bf16 %v2458_v34, %v2457_v17 }
 0x220   : > { %4073 = vmatprep.mubr.msk.bf16.mxu1 %vm403_vm0, %v4812_v4  ;;  %v2721_v4 = vld [vmem:[#allocation2 + $0x39] sm:$0xff] }
 0x227   : > { %4074 = vmatmul.mubr.msk.bf16.gmra.mrb[4].mxu1 %vm403_vm0, %v4824_v23  ;;  %v2720_v23 = vld [vmem:[#allocation2 + $0x31] sm:$0xff] }
 0x228   : > { %4077 = vmatprep.mubr.msk.bf16.mxu1 %vm403_vm0, %v4836_v41  ;;  %v2752_v41 = vpack.c.bf16 %v2721_v4, %v2720_v23 }
 0x22f   : > { %4078 = vmatmul.mubr.msk.bf16.gmra.mrb[8].mxu1 %vm403_vm0, %v4848_v58  ;;  %v2723_v58 = vld [vmem:[#allocation2 + $0x51] sm:$0xff] }
 0x230   : > { %4081 = vmatprep.mubr.msk.bf16.mxu1 %vm403_vm0, %v4860_v15  ;;  %v2725_v15 = vld [vmem:[#allocation2 + $0x69] sm:$0xff] }
 0x231   : > { %v2754_v47 = vpack.c.bf16 %v2725_v15, %v2724_v38 }
 0x237   : > { %4082 = vmatmul.mubr.msk.bf16.gmra.mrb[12].mxu1 %vm403_vm0, %v4872_v37  ;;  %v2722_v37 = vld [vmem:[#allocation2 + $0x49] sm:$0xff] }
 0x238   : > { %4085 = vmatprep.mubr.msk.bf16.mxu1 %vm403_vm0, %v4884_v56  ;;  %v2753_v56 = vpack.c.bf16 %v2723_v58, %v2722_v37 }
 0x23f   : > { %4086 = vmatmul.mubr.msk.bf16.gmra.mrb[16].mxu1 %vm403_vm0, %v4896_v24  ;;  %v2727_v24 = vld [vmem:[#allocation2 + $0x81] sm:$0xff] }
 0x240   : > { %4089 = vmatprep.mubr.msk.bf16.mxu1 %vm403_vm0, %v4905_v30  ;;  %v2729_v30 = vld [vmem:[#allocation2 + $0x99] sm:$0xff]  ;;  %v2755_v6 = vpack.c.bf16 %v2727_v24, %v2726_v31 }
 0x241   : > { %v2756_v11 = vpack.c.bf16 %v2729_v30, %v2728_v10  ;;  %v3348_v30 = vld [vmem:[%s5241_s15 + $0x18] sm:$0xff] }
 0x247   : > { %4090 = vmatmul.mubr.msk.bf16.gmra.mrb[20].mxu1 %vm403_vm0, %v2474_v50  ;;  %v5246_v50 = vld [vmem:[%s5413_s5] ss:$0 sm:$0xff] }
 0x248   : > { %4095 = vmatprep.mubr.msk.bf16.mxu1 %vm403_vm0, %v2752_v41  ;;  %v3347_v41 = vld [vmem:[%s5241_s15 + $0x10] sm:$0xff] }
 0x24f   : > { %4096 = vmatmul.mubr.msk.bf16.vlgmr.msra.gmra.mrb[24].mxu1 %vm403_vm0, %v2753_v56  ;;  %v3345_v56 = vld [vmem:[%s5241_s15] sm:$0xff] }
 0x250   : > { %4128 = vmatpush3.bf16.msra.mxu1 %v3064_v5  ;;  %4099 = vmatprep.mubr.msk.bf16.mxu1 %vm403_vm0, %v2754_v47 }
 0x257   : > { %4100 = vmatmul.mubr.msk.bf16.gmra.mrb[28].mxu1 %vm403_vm0, %v2755_v6 }
 0x258   : > { %4103 = vmatprep.mubr.msk.bf16.mxu1 %vm403_vm0, %v2756_v11  ;;  %v3346_v11 = vld [vmem:[%s5241_s15 + $0x8] sm:$0xff] }
 0x25f   : > { %4104 = vmatmul.mubr.msk.bf16.gmra.mrb[0].mxu1 %vm403_vm0, %v2757_v9 }
 0x260   : > { %4107 = vmatprep.mubr.msk.bf16.mxu1 %vm403_vm0, %v2758_v28 }
 0x267   : > { %4108 = vmatmul.mubr.msk.bf16.gmra.mrb[4].mxu1 %vm403_vm0, %v2759_v43 }
 0x268   : > { %4111 = vmatprep.mubr.msk.bf16.mxu1 %vm403_vm0, %v4834_v40  ;;  %v2751_v40 = vld [vmem:[#allocation2 + $0x1a1] sm:$0xff] }
 0x269   : > { %v2767_v48 = vpack.c.bf16 %v2751_v40, %v2750_v46 }
 0x26f   : > { %4112 = vmatmul.mubr.msk.bf16.gmra.mrb[8].mxu1 %vm403_vm0, %v4846_v57 }
 0x270   : > { %4115 = vmatprep.mubr.msk.bf16.mxu1 %vm403_vm0, %v4858_v14 }
 0x277   : > { %4116 = vmatmul.mubr.msk.bf16.gmra.mrb[12].mxu1 %vm403_vm0, %v4870_v36 }
 0x278   : > { %4119 = vmatprep.mubr.msk.bf16.mxu1 %vm403_vm0, %v4882_v55 }
 0x27f   : > { %4120 = vmatmul.mubr.msk.bf16.gmra.mrb[16].mxu1 %vm403_vm0, %v4894_v21 }
 0x280   : > { %4123 = vmatprep.mubr.msk.bf16.mxu1 %vm403_vm0, %v4985_v51 }
 0x287   : > { %4124 = vmatmul.mubr.msk.bf16.gmra.mrb[20].mxu1 %vm403_vm0, %v2767_v48  ;;  %v3349_v48 = vld [vmem:[%s5241_s15 + $0x20] sm:$0xff] }
 0x288   : > { %4129 = vmatprep.mubr.msk.bf16.mxu1 %vm403_vm0, %v4987_v52 }
 0x28f   : > { %4130 = vmatmul.mubr.msk.bf16.vlgmr.msra.gmra.mrb[24].mxu1 %vm403_vm0, %v5002_v2 }
 0x290   : > { %4133 = vmatprep.mubr.msk.bf16.mxu1 %vm403_vm0, %v5006_v7 }
 0x297   : > { %4134 = vmatmul.mubr.msk.bf16.gmra.mrb[28].mxu1 %vm403_vm0, %v5017_v13 }
 0x298   : > { %4137 = vmatprep.mubr.msk.bf16.mxu1 %vm403_vm0, %v5019_v18 }
 0x29f   : > { %4138 = vmatmul.mubr.msk.bf16.gmra.mrb[0].mxu1 %vm403_vm0, %v5029_v26 }
 0x2a0   : > { %4141 = vmatprep.mubr.msk.bf16.mxu1 %vm403_vm0, %v5031_v27  ;;  %v3043_v27 = vld [vmem:[#allocation2 + $0x19a] sm:$0xff] }
 0x2a7   : > { %4142 = vmatmul.mubr.msk.bf16.gmra.mrb[4].mxu1 %vm403_vm0, %v5041_v44  ;;  %v3044_v44 = vld [vmem:[#allocation2 + $0x1a2] sm:$0xff] }
 0x2a8   : > { %4145 = vmatprep.mubr.msk.bf16.mxu1 %vm403_vm0, %v5043_v45  ;;  %v3060_v42 = vpack.c.bf16 %v3044_v44, %v3043_v27 }
 0x2aa   : > { %v5176_v57 = vpop.f32.mrb[72].mxu0 }
 0x2ab   : > { %v5178_v14 = vpop.f32.mrb[73].mxu0 }
 0x2ac   : > { %v5180_v36 = vpop.f32.mrb[74].mxu0 }
 0x2ad   : > { %v5182_v55 = vpop.f32.mrb[75].mxu0 }
 0x2af   : > { %4146 = vmatmul.mubr.msk.bf16.gmra.mrb[8].mxu1 %vm403_vm0, %v5053_v53 }
 0x2b0   : > { %4149 = vmatprep.mubr.msk.bf16.mxu1 %vm403_vm0, %v5055_v0 }
 0x2b2   : > { %v5188_v21 = vpop.f32.mrb[76].mxu0 }
 0x2b3   : > { %v5190_v51 = vpop.f32.mrb[77].mxu0 }
 0x2b4   : > { %v5192_v52 = vpop.f32.mrb[78].mxu0 }
 0x2b5   : > { %v5194_v2 = vpop.f32.mrb[79].mxu0 }
 0x2b7   : > { %4150 = vmatmul.mubr.msk.bf16.gmra.mrb[12].mxu1 %vm403_vm0, %v5065_v60 }
 0x2b8   : > { %4153 = vmatprep.mubr.msk.bf16.mxu1 %vm403_vm0, %v5067_v3 }
 0x2ba   : > { %v5200_v7 = vpop.f32.mrb[80].mxu0 }
 0x2bb   : > { %v5202_v13 = vpop.f32.mrb[81].mxu0 }
 0x2bc   : > { %v5204_v18 = vpop.f32.mrb[82].mxu0 }
 0x2bd   : > { %v5206_v26 = vpop.f32.mrb[83].mxu0 }
 0x2bf   : > { %4154 = vmatmul.mubr.msk.bf16.gmra.mrb[16].mxu1 %vm403_vm0, %v5077_v59 }
 0x2c0   : > { %4157 = vmatprep.mubr.msk.bf16.mxu1 %vm403_vm0, %v5087_v63 }
 0x2c2   : > { %v5212_v45 = vpop.f32.mrb[84].mxu0 }
 0x2c3   : > { %v5214_v8 = vpop.f32.mrb[85].mxu0 }
 0x2c4   : > { %v5216_v53 = vpop.f32.mrb[86].mxu0 }
 0x2c5   : > { %v5218_v0 = vpop.f32.mrb[87].mxu0 }
 0x2c7   : > { %4158 = vmatmul.mubr.msk.bf16.gmra.mrb[20].mxu1 %vm403_vm0, %v3060_v42 }
 0x2ca   : > { %v5221_v16 = vpop.f32.mrb[88].mxu0 }
 0x2cb   : > { %v5223_v33 = vpop.f32.mrb[89].mxu0 }
 0x2cc   : > { %v5225_v35 = vpop.f32.mrb[90].mxu0 }
 0x2cd   : > { %v5227_v49 = vpop.f32.mrb[91].mxu0 }
 0x2d2   : > { %v5229_v60 = vpop.f32.mrb[92].mxu0 }
 0x2d3   : > { %v5231_v3 = vpop.f32.mrb[93].mxu0 }
 0x2d4   : > { %v5233_v22 = vpop.f32.mrb[94].mxu0 }
 0x2d5   : > { %v5235_v54 = vpop.f32.mrb[95].mxu0 }
 0x2da   : > { %v3961_v59 = vpop.f32.mrb[64].mxu0 }
 0x2db   : > { %v1681_v61 = vpop.f32.mrb[65].mxu0 }
 0x2dc   : > { %v3962_v62 = vpop.f32.mrb[66].mxu0 }
 0x2dd   : > { %v1684_v63 = vpop.f32.mrb[67].mxu0 }
 0x2e2   : > { %v3965_v29 = vpop.f32.mrb[68].mxu0 }
 0x2e3   : > { %v1697_v1 = vpop.f32.mrb[69].mxu0 }
 0x2e4   : > { %v3966_v5 = vpop.f32.mrb[70].mxu0 }
 0x2e5   : > { %v1700_v17 = vpop.f32.mrb[71].mxu0 }
 0x362   : > { %v4131_v34 = vpop.f32.mrb[24].mxu1 }
 0x363   : > { %v4163_v4 = vadd.f32 %v4131_v34, %v3961_v59  ;;  %v3147_v23 = vpop.f32.mrb[25].mxu1  ;;  %v3352_v59 = vld [vmem:[%s5241_s15 + $0x38] sm:$0xff] }
 0x364   : > { %v4164_v58 = vadd.f32 %v3147_v23, %v1681_v61  ;;  %v4132_v15 = vpop.f32.mrb[26].mxu1 }
 0x365   : > { %v3315_v37 = vadd.f32 %v4163_v4, %v5246_v50  ;;  %v4165_v38 = vadd.f32 %v4132_v15, %v3962_v62  ;;  %v3150_v47 = vpop.f32.mrb[27].mxu1 }
 0x366   : > { %v3313_v24 = vadd.f32 %v4164_v58, %v5246_v50  ;;  %v4166_v31 = vadd.f32 %v3150_v47, %v1684_v63  ;;  %v3355_v58 = vld [vmem:[%s5241_s15 + $0x50] sm:$0xff] }
 0x367   : > { %v3379_v6 = vadd.f32 %v3347_v41, %v3315_v37  ;;  %v3316_v10 = vadd.f32 %v4165_v38, %v5246_v50  ;;  %v3353_v38 = vld [vmem:[%s5241_s15 + $0x40] sm:$0xff] }
 0x368   : > { %v3377_v12 = vadd.f32 %v3345_v56, %v3313_v24  ;;  %v3314_v19 = vadd.f32 %v4166_v31, %v5246_v50 }
 0x369   : > { %3411 = vst.msk [vmem:[%s5254_s19 + $0x10] sm:$0xff] %vm403_vm0, %v3379_v6  ;;  %v3380_v20 = vadd.f32 %v3348_v30, %v3316_v10 }
 0x36a   : > { %3409 = vst.msk [vmem:[%s5254_s19] sm:$0xff] %vm403_vm0, %v3377_v12  ;;  %v3378_v9 = vadd.f32 %v3346_v11, %v3314_v19  ;;  %v4135_v25 = vpop.f32.mrb[28].mxu1 }
 0x36b   : > { %3412 = vst.msk [vmem:[%s5254_s19 + $0x18] sm:$0xff] %vm403_vm0, %v3380_v20  ;;  %v4167_v28 = vadd.f32 %v4135_v25, %v3965_v29  ;;  %v3163_v32 = vpop.f32.mrb[29].mxu1  ;;  %v3350_v29 = vld [vmem:[%s5241_s15 + $0x28] sm:$0xff]  ;;  %v3359_v25 = vld [vmem:[%s5241_s15 + $0x70] sm:$0xff] }
 0x36c   : > { %3410 = vst.msk [vmem:[%s5254_s19 + $0x8] sm:$0xff] %vm403_vm0, %v3378_v9  ;;  %v4168_v43 = vadd.f32 %v3163_v32, %v1697_v1  ;;  %v4136_v46 = vpop.f32.mrb[30].mxu1 }
 0x36d   : > { %v3319_v40 = vadd.f32 %v4167_v28, %v5246_v50  ;;  %v4169_v27 = vadd.f32 %v4136_v46, %v3966_v5  ;;  %v3166_v44 = vpop.f32.mrb[31].mxu1 }
 0x36e   : > { %v3317_v42 = vadd.f32 %v4168_v43, %v5246_v50  ;;  %v4170_v61 = vadd.f32 %v3166_v44, %v1700_v17  ;;  %v3357_v43 = vld [vmem:[%s5241_s15 + $0x60] sm:$0xff] }
 0x36f   : > { %v3383_v62 = vadd.f32 %v3351_v39, %v3319_v40  ;;  %v3320_v63 = vadd.f32 %v4169_v27, %v5246_v50 }
 0x370   : > { %v3381_v1 = vadd.f32 %v3349_v48, %v3317_v42  ;;  %v3318_v34 = vadd.f32 %v4170_v61, %v5246_v50 }
 0x371   : > { %3415 = vst.msk [vmem:[%s5254_s19 + $0x30] sm:$0xff] %vm403_vm0, %v3383_v62  ;;  %v3384_v4 = vadd.f32 %v3352_v59, %v3320_v63 }
 0x372   : > { %3413 = vst.msk [vmem:[%s5254_s19 + $0x20] sm:$0xff] %vm403_vm0, %v3381_v1  ;;  %v3382_v5 = vadd.f32 %v3350_v29, %v3318_v34  ;;  %v4139_v23 = vpop.f32.mrb[0].mxu1  ;;  %v3363_v1 = vld [vmem:[%s5241_s15 + $0x90] sm:$0xff] }
 0x373   : > { %3416 = vst.msk [vmem:[%s5254_s19 + $0x38] sm:$0xff] %vm403_vm0, %v3384_v4  ;;  %v4171_v17 = vadd.f32 %v4139_v23, %v5176_v57  ;;  %v3179_v41 = vpop.f32.mrb[1].mxu1  ;;  %v3356_v57 = vld [vmem:[%s5241_s15 + $0x58] sm:$0xff]  ;;  %v3361_v23 = vld [vmem:[%s5241_s15 + $0x80] sm:$0xff] }
 0x374   : > { %3414 = vst.msk [vmem:[%s5254_s19 + $0x28] sm:$0xff] %vm403_vm0, %v3382_v5  ;;  %v4172_v15 = vadd.f32 %v3179_v41, %v5178_v14  ;;  %v4140_v37 = vpop.f32.mrb[2].mxu1  ;;  %v3354_v14 = vld [vmem:[%s5241_s15 + $0x48] sm:$0xff] }
 0x375   : > { %v3323_v56 = vadd.f32 %v4171_v17, %v5246_v50  ;;  %v4173_v47 = vadd.f32 %v4140_v37, %v5180_v36  ;;  %v3182_v24 = vpop.f32.mrb[3].mxu1 }
 0x376   : > { %v3321_v30 = vadd.f32 %v4172_v15, %v5246_v50  ;;  %v4174_v31 = vadd.f32 %v3182_v24, %v5182_v55 }
 0x377   : > { %v3387_v6 = vadd.f32 %v3355_v58, %v3323_v56  ;;  %v3324_v10 = vadd.f32 %v4173_v47, %v5246_v50 }
 0x378   : > { %v3385_v11 = vadd.f32 %v3353_v38, %v3321_v30  ;;  %v3322_v12 = vadd.f32 %v4174_v31, %v5246_v50  ;;  %v3367_v31 = vld [vmem:[%s5241_s15 + $0xb0] sm:$0xff] }
 0x379   : > { %3419 = vst.msk [vmem:[%s5254_s19 + $0x50] sm:$0xff] %vm403_vm0, %v3387_v6  ;;  %v3388_v19 = vadd.f32 %v3356_v57, %v3324_v10 }
 0x37a   : > { %3417 = vst.msk [vmem:[%s5254_s19 + $0x40] sm:$0xff] %vm403_vm0, %v3385_v11  ;;  %v3386_v36 = vadd.f32 %v3354_v14, %v3322_v12  ;;  %v4143_v20 = vpop.f32.mrb[4].mxu1  ;;  %v3365_v11 = vld [vmem:[%s5241_s15 + $0xa0] sm:$0xff] }
 0x37b   : > { %3420 = vst.msk [vmem:[%s5254_s19 + $0x58] sm:$0xff] %vm403_vm0, %v3388_v19  ;;  %v4175_v55 = vadd.f32 %v4143_v20, %v5188_v21  ;;  %v3195_v9 = vpop.f32.mrb[5].mxu1  ;;  %v3360_v21 = vld [vmem:[%s5241_s15 + $0x78] sm:$0xff] }
 0x37c   : > { %3418 = vst.msk [vmem:[%s5254_s19 + $0x48] sm:$0xff] %vm403_vm0, %v3386_v36  ;;  %v4176_v28 = vadd.f32 %v3195_v9, %v5190_v51  ;;  %v4144_v32 = vpop.f32.mrb[6].mxu1  ;;  %v3358_v51 = vld [vmem:[%s5241_s15 + $0x68] sm:$0xff] }
 0x37d   : > { %v3327_v39 = vadd.f32 %v4175_v55, %v5246_v50  ;;  %v4177_v46 = vadd.f32 %v4144_v32, %v5192_v52  ;;  %v3198_v40 = vpop.f32.mrb[7].mxu1 }
 0x37e   : > { %v3325_v48 = vadd.f32 %v4176_v28, %v5246_v50  ;;  %v4178_v27 = vadd.f32 %v3198_v40, %v5194_v2 }
 0x37f   : > { %v3391_v44 = vadd.f32 %v3359_v25, %v3327_v39  ;;  %v3328_v42 = vadd.f32 %v4177_v46, %v5246_v50  ;;  %v3371_v46 = vld [vmem:[%s5241_s15 + $0xd0] sm:$0xff] }
 0x380   : > { %v3389_v59 = vadd.f32 %v3357_v43, %v3325_v48  ;;  %v3326_v61 = vadd.f32 %v4178_v27, %v5246_v50  ;;  %v3369_v27 = vld [vmem:[%s5241_s15 + $0xc0] sm:$0xff] }
 0x381   : > { %3423 = vst.msk [vmem:[%s5254_s19 + $0x70] sm:$0xff] %vm403_vm0, %v3391_v44  ;;  %v3392_v62 = vadd.f32 %v3360_v21, %v3328_v42 }
 0x382   : > { %3421 = vst.msk [vmem:[%s5254_s19 + $0x60] sm:$0xff] %vm403_vm0, %v3389_v59  ;;  %v3390_v52 = vadd.f32 %v3358_v51, %v3326_v61  ;;  %v4147_v63 = vpop.f32.mrb[8].mxu1 }
 0x383   : > { %3424 = vst.msk [vmem:[%s5254_s19 + $0x78] sm:$0xff] %vm403_vm0, %v3392_v62  ;;  %v4179_v2 = vadd.f32 %v4147_v63, %v5200_v7  ;;  %v3211_v29 = vpop.f32.mrb[9].mxu1  ;;  %v3364_v7 = vld [vmem:[%s5241_s15 + $0x98] sm:$0xff] }
 0x384   : > { %3422 = vst.msk [vmem:[%s5254_s19 + $0x68] sm:$0xff] %vm403_vm0, %v3390_v52  ;;  %v4180_v34 = vadd.f32 %v3211_v29, %v5202_v13  ;;  %v4148_v4 = vpop.f32.mrb[10].mxu1  ;;  %v3362_v13 = vld [vmem:[%s5241_s15 + $0x88] sm:$0xff] }
 0x385   : > { %v3331_v5 = vadd.f32 %v4179_v2, %v5246_v50  ;;  %v4181_v17 = vadd.f32 %v4148_v4, %v5204_v18  ;;  %v3214_v41 = vpop.f32.mrb[11].mxu1 }
 0x386   : > { %v3329_v58 = vadd.f32 %v4180_v34, %v5246_v50  ;;  %v4182_v15 = vadd.f32 %v3214_v41, %v5206_v26  ;;  %v3375_v34 = vld [vmem:[%s5241_s15 + $0xf0] sm:$0xff] }
 0x387   : > { %v3395_v37 = vadd.f32 %v3363_v1, %v3331_v5  ;;  %v3332_v56 = vadd.f32 %v4181_v17, %v5246_v50  ;;  %v3373_v17 = vld [vmem:[%s5241_s15 + $0xe0] sm:$0xff] }
 0x388   : > { %v3393_v38 = vadd.f32 %v3361_v23, %v3329_v58  ;;  %v3330_v47 = vadd.f32 %v4182_v15, %v5246_v50 }
 0x389   : > { %3427 = vst.msk [vmem:[%s5254_s19 + $0x90] sm:$0xff] %vm403_vm0, %v3395_v37  ;;  %v3396_v24 = vadd.f32 %v3364_v7, %v3332_v56 }
 0x38a   : > { %3425 = vst.msk [vmem:[%s5254_s19 + $0x80] sm:$0xff] %vm403_vm0, %v3393_v38  ;;  %v3394_v18 = vadd.f32 %v3362_v13, %v3330_v47  ;;  %v4151_v30 = vpop.f32.mrb[12].mxu1  ;;  %v3374_v13 = vld [vmem:[%s5241_s15 + $0xe8] sm:$0xff] }
 0x38b   : > { %3428 = vst.msk [vmem:[%s5254_s19 + $0x98] sm:$0xff] %vm403_vm0, %v3396_v24  ;;  %v4183_v26 = vadd.f32 %v4151_v30, %v5212_v45  ;;  %v3227_v57 = vpop.f32.mrb[13].mxu1  ;;  %v3368_v45 = vld [vmem:[%s5241_s15 + $0xb8] sm:$0xff] }
 0x38c   : > { %3426 = vst.msk [vmem:[%s5254_s19 + $0x88] sm:$0xff] %vm403_vm0, %v3394_v18  ;;  %v4184_v6 = vadd.f32 %v3227_v57, %v5214_v8  ;;  %v4152_v10 = vpop.f32.mrb[14].mxu1  ;;  %v3366_v8 = vld [vmem:[%s5241_s15 + $0xa8] sm:$0xff] }
 0x38d   : > { %v3335_v14 = vadd.f32 %v4183_v26, %v5246_v50  ;;  %v4185_v12 = vadd.f32 %v4152_v10, %v5216_v53  ;;  %v3230_v19 = vpop.f32.mrb[15].mxu1 }
 0x38e   : > { %v3333_v36 = vadd.f32 %v4184_v6, %v5246_v50  ;;  %v4186_v20 = vadd.f32 %v3230_v19, %v5218_v0 }
 0x38f   : > { %v3399_v55 = vadd.f32 %v3367_v31, %v3335_v14  ;;  %v3336_v9 = vadd.f32 %v4185_v12, %v5246_v50 }
 0x390   : > { %v3397_v25 = vadd.f32 %v3365_v11, %v3333_v36  ;;  %v3334_v28 = vadd.f32 %v4186_v20, %v5246_v50 }
 0x391   : > { %3431 = vst.msk [vmem:[%s5254_s19 + $0xb0] sm:$0xff] %vm403_vm0, %v3399_v55  ;;  %v3400_v32 = vadd.f32 %v3368_v45, %v3336_v9 }
 0x392   : > { %3429 = vst.msk [vmem:[%s5254_s19 + $0xa0] sm:$0xff] %vm403_vm0, %v3397_v25  ;;  %v3398_v53 = vadd.f32 %v3366_v8, %v3334_v28  ;;  %v4155_v39 = vpop.f32.mrb[16].mxu1 }
 0x393   : > { %3432 = vst.msk [vmem:[%s5254_s19 + $0xb8] sm:$0xff] %vm403_vm0, %v3400_v32  ;;  %v4187_v0 = vadd.f32 %v4155_v39, %v5221_v16  ;;  %v3243_v43 = vpop.f32.mrb[17].mxu1  ;;  %v3372_v16 = vld [vmem:[%s5241_s15 + $0xd8] sm:$0xff] }
 0x394   : > { %3430 = vst.msk [vmem:[%s5254_s19 + $0xa8] sm:$0xff] %vm403_vm0, %v3398_v53  ;;  %v4188_v40 = vadd.f32 %v3243_v43, %v5223_v33  ;;  %v4156_v48 = vpop.f32.mrb[18].mxu1  ;;  %v3370_v33 = vld [vmem:[%s5241_s15 + $0xc8] sm:$0xff] }
 0x395   : > { %v3339_v21 = vadd.f32 %v4187_v0, %v5246_v50  ;;  %v4189_v44 = vadd.f32 %v4156_v48, %v5225_v35  ;;  %v3246_v42 = vpop.f32.mrb[19].mxu1 }
 0x396   : > { %v3337_v51 = vadd.f32 %v4188_v40, %v5246_v50  ;;  %v4190_v59 = vadd.f32 %v3246_v42, %v5227_v49 }
 0x397   : > { %v3403_v61 = vadd.f32 %v3371_v46, %v3339_v21  ;;  %v3340_v62 = vadd.f32 %v4189_v44, %v5246_v50 }
 0x398   : > { %v3401_v52 = vadd.f32 %v3369_v27, %v3337_v51  ;;  %v3338_v63 = vadd.f32 %v4190_v59, %v5246_v50 }
 0x399   : > { %3435 = vst.msk [vmem:[%s5254_s19 + $0xd0] sm:$0xff] %vm403_vm0, %v3403_v61  ;;  %v3404_v2 = vadd.f32 %v3372_v16, %v3340_v62 }
 0x39a   : > { %3433 = vst.msk [vmem:[%s5254_s19 + $0xc0] sm:$0xff] %vm403_vm0, %v3401_v52  ;;  %v3402_v35 = vadd.f32 %v3370_v33, %v3338_v63  ;;  %v4159_v29 = vpop.f32.mrb[20].mxu1 }
 0x39b   : > { %3436 = vst.msk [vmem:[%s5254_s19 + $0xd8] sm:$0xff] %vm403_vm0, %v3404_v2  ;;  %v4191_v49 = vadd.f32 %v4159_v29, %v5229_v60  ;;  %v3259_v1 = vpop.f32.mrb[21].mxu1  ;;  %v3376_v60 = vld [vmem:[%s5241_s15 + $0xf8] sm:$0xff] }
 0x39c   : > { %3434 = vst.msk [vmem:[%s5254_s19 + $0xc8] sm:$0xff] %vm403_vm0, %v3402_v35  ;;  %v4192_v4 = vadd.f32 %v3259_v1, %v5231_v3  ;;  %v4160_v5 = vpop.f32.mrb[22].mxu1 }
 0x39d   : > { %v3343_v23 = vadd.f32 %v4191_v49, %v5246_v50  ;;  %v4193_v41 = vadd.f32 %v4160_v5, %v5233_v22  ;;  %v3262_v58 = vpop.f32.mrb[23].mxu1 }
 0x39e   : > { %v3341_v7 = vadd.f32 %v4192_v4, %v5246_v50  ;;  %v4194_v15 = vadd.f32 %v3262_v58, %v5235_v54 }
 0x39f   : > { %v3407_v37 = vadd.f32 %v3375_v34, %v3343_v23  ;;  %v3344_v56 = vadd.f32 %v4193_v41, %v5246_v50 }
 0x3a0   : > { %v3405_v3 = vadd.f32 %v3373_v17, %v3341_v7  ;;  %v3342_v38 = vadd.f32 %v4194_v15, %v5246_v50 }
 0x3a1   : > { %3439 = vst.msk [vmem:[%s5254_s19 + $0xf0] sm:$0xff] %vm403_vm0, %v3407_v37  ;;  %v3408_v47 = vadd.f32 %v3376_v60, %v3344_v56 }
 0x3a2   : > { %3437 = vst.msk [vmem:[%s5254_s19 + $0xe0] sm:$0xff] %vm403_vm0, %v3405_v3  ;;  %v3406_v24 = vadd.f32 %v3374_v13, %v3342_v38 }
 0x3a3   : > { %3440 = vst.msk [vmem:[%s5254_s19 + $0xf8] sm:$0xff] %vm403_vm0, %v3408_v47 }
 0x3a4   : > { %3438 = vst.msk [vmem:[%s5254_s19 + $0xe8] sm:$0xff] %vm403_vm0, %v3406_v24 }
 0x3a5 PF: > { %s16_s21 = sadd.s32 1, %s4435_s21  }
 0x3a6   : > { %p13_p4 = scmp.ge.s32.totalorder %s16_s21, 4  }
 0x3a8   :  { %15 = sbr.rel (!%p13_p4) target bundleno = 1 (0x1), region = 87 }

// kernel: rnlransr_forward.52
= control target key start
LH: loop header
LB: loop body
LE: loop exit
PB: predicated region body
PF: predicated region fallthrough
CT: control target
= control target key end

     0   :  { %s2064_s21 = smov 0   ;;  %s2382_s0 = inlined_call_operand.vmem [shape: f32[2,8,8,144], index: 0, kind: input, shape index: {}]   ;;  %s2383_s1 = inlined_call_operand.vmem [shape: f32[2,8,8,16], index: 1, kind: input, shape index: {}]   ;;  %s2384_s2 = inlined_call_operand.vmem [shape: f32[144,16], index: 2, kind: input, shape index: {}]   ;;  %s2385_s3 = inlined_call_operand.vmem [shape: f32[1,16], index: 3, kind: input, shape index: {}]   ;;  %s2386_s4 = inlined_call_operand.vmem [shape: f32[3,3,16,16], index: 4, kind: input, shape index: {}]   ;;  %s2387_s5 = inlined_call_operand.vmem [shape: f32[1,16], index: 5, kind: input, shape index: {}]   ;;  %s2388_s6 = inlined_call_operand.vmem [shape: f32[2,8,8,16], index: 6, kind: output, shape index: {}]  }
   0x1 LB: > { %s1662_s22 = sadd.s32 4294967295, %s2025_s21   ;;  %p1666_p0 = scmp.ge.s32.totalorder %s2025_s21, 1  ;;  %s2025_s21 = sphi %s2064_s21, %s16_s21  }
   0x2   : > { %p222_p1 = scmp.lt.s32.totalorder %s2025_s21, 3 }
   0x4   : > { %p223_p2 = pnand %p1666_p0, %p222_p1 }
   0x5   : > { %v297_v0 = vld [vmem:[%s2384_s2] sm:$0xff] (!%p223_p2)  ;;  %v298_v1 = vld [vmem:[%s2384_s2 + $0x8] sm:$0xff] (!%p223_p2)  ;;  %v299_v2 = vld [vmem:[%s2384_s2 + $0x10] sm:$0xff] (!%p223_p2)  ;;  %p257_p3 = scmp.lt.s32.totalorder (!%p223_p2), %s1662_s22, 1  ;;  %v2027_v3 = vmov (!%p223_p2), 0   ;;  %vm331_vm0 = vcmask (!%p223_p2), 130048  }
   0x6   : > { %226 = sbr.rel (%p223_p2) target bundleno = 612 (0x264), region = 44  ;;  %344 = vmatprep.subr.bf16.mxu0 (!%p223_p2), %v2027_v3  ;;  %v315_v4 = vpack.c.bf16 (!%p223_p2), %v298_v1, %v297_v0  ;;  %v300_v5 = vld [vmem:[%s2384_s2 + $0x18] sm:$0xff] (!%p223_p2)  ;;  %v301_v7 = vld [vmem:[%s2384_s2 + $0x20] sm:$0xff] (!%p223_p2)  ;;  %v302_v8 = vld [vmem:[%s2384_s2 + $0x28] sm:$0xff] (!%p223_p2)  ;;  %vm418_vm1 = vcmask (!%p223_p2), 123904   ;;  %v2028_v52 = vmov (!%p223_p2), 0.0  }
   0x7   : > { %v316_v6 = vpack.c.bf16 (!%p223_p2), %v300_v5, %v299_v2  ;;  %v317_v11 = vpack.c.bf16 (!%p223_p2), %v302_v8, %v301_v7  ;;  %v303_v13 = vld [vmem:[%s2384_s2 + $0x30] sm:$0xff] (!%p223_p2)  ;;  %v304_v14 = vld [vmem:[%s2384_s2 + $0x38] sm:$0xff] (!%p223_p2)  ;;  %v305_v16 = vld [vmem:[%s2384_s2 + $0x40] sm:$0xff] (!%p223_p2)  ;;  %420 = vst.msk [vmem:[#allocation2 + $0x10] sm:$0xff] (!%p223_p2), %vm331_vm0, %v2028_v52 }
   0x8   : > { %345 = vmatpush1.bf16.msra.mxu0 (!%p223_p2), %v315_v4  ;;  %v318_v15 = vpack.c.bf16 (!%p223_p2), %v304_v14, %v303_v13  ;;  %v306_v17 = vld [vmem:[%s2384_s2 + $0x48] sm:$0xff] (!%p223_p2)  ;;  %v307_v19 = vld [vmem:[%s2384_s2 + $0x50] sm:$0xff] (!%p223_p2)  ;;  %v308_v20 = vld [vmem:[%s2384_s2 + $0x58] sm:$0xff] (!%p223_p2)  ;;  %421 = vst.msk [vmem:[#allocation2 + $0x18] sm:$0x3] (!%p223_p2), %vm418_vm1, %v2028_v52 }
   0x9   : > { %346 = vmatprep.subr.bf16.mxu0 (!%p223_p2), %v2027_v3  ;;  %v319_v18 = vpack.c.bf16 (!%p223_p2), %v306_v17, %v305_v16  ;;  %v320_v21 = vpack.c.bf16 (!%p223_p2), %v308_v20, %v307_v19  ;;  %v309_v22 = vld [vmem:[%s2384_s2 + $0x60] sm:$0xff] (!%p223_p2)  ;;  %v310_v23 = vld [vmem:[%s2384_s2 + $0x68] sm:$0xff] (!%p223_p2)  ;;  %v311_v25 = vld [vmem:[%s2384_s2 + $0x70] sm:$0xff] (!%p223_p2)  ;;  %417 = vst.msk [vmem:[#allocation2] sm:$0xff] (!%p223_p2), %vm331_vm0, %v2028_v52 }
   0xa   : > { %v321_v24 = vpack.c.bf16 (!%p223_p2), %v310_v23, %v309_v22  ;;  %v312_v26 = vld [vmem:[%s2384_s2 + $0x78] sm:$0xff] (!%p223_p2)  ;;  %v313_v28 = vld [vmem:[%s2384_s2 + $0x80] sm:$0xff] (!%p223_p2)  ;;  %v314_v29 = vld [vmem:[%s2384_s2 + $0x88] sm:$0xff] (!%p223_p2)  ;;  %419 = vst.msk [vmem:[#allocation2 + $0x8] sm:$0x3] (!%p223_p2), %vm418_vm1, %v2028_v52 }
   0xb   : > { %v322_v27 = vpack.c.bf16 (!%p223_p2), %v312_v26, %v311_v25  ;;  %v323_v30 = vpack.c.bf16 (!%p223_p2), %v314_v29, %v313_v28  ;;  %422 = vst.msk [vmem:[#allocation2 + $0x20] sm:$0xff] (!%p223_p2), %vm331_vm0, %v2028_v52  ;;  %424 = vst.msk [vmem:[#allocation2 + $0x30] sm:$0xff] (!%p223_p2), %vm331_vm0, %v2028_v52  ;;  %v1678_v53 = vld [vmem:[%s2386_s4 + $0x10] sm:$0xff] (!%p223_p2)  ;;  %v1679_v54 = vld [vmem:[%s2386_s4 + $0x18] sm:$0xff] (!%p223_p2) }
   0xc   : > { %347 = vmatpush1.bf16.msra.mxu0 (!%p223_p2), %v316_v6  ;;  %423 = vst.msk [vmem:[#allocation2 + $0x28] sm:$0x3] (!%p223_p2), %vm418_vm1, %v2028_v52  ;;  %425 = vst.msk [vmem:[#allocation2 + $0x38] sm:$0x3] (!%p223_p2), %vm418_vm1, %v2028_v52  ;;  %v485_v55 = vpack.c.bf16 (!%p223_p2), %v1679_v54, %v1678_v53  ;;  %v1696_v56 = vld [vmem:[%s2386_s4 + $0x20] sm:$0xff] (!%p223_p2)  ;;  %v1697_v57 = vld [vmem:[%s2386_s4 + $0x28] sm:$0xff] (!%p223_p2) }
   0xd   : > { %s2390_s22 = smov (!%p257_p3, %s1662_s22), 1  ;;  %348 = vmatprep.subr.bf16.mxu0 %v2027_v3  ;;  %426 = vst.msk [vmem:[#allocation2 + $0x40] sm:$0xff] %vm331_vm0, %v2028_v52  ;;  %428 = vst.msk [vmem:[#allocation2 + $0x50] sm:$0xff] %vm331_vm0, %v2028_v52  ;;  %v1706_v58 = vld [vmem:[%s2386_s4 + $0x30] sm:$0xff]  ;;  %v2189_v59 = vpack.c.bf16 %v1697_v57, %v1696_v56  ;;  %v1707_v60 = vld [vmem:[%s2386_s4 + $0x38] sm:$0xff] }
   0xe   : > { %s1769_s11 = sshll.u32 %s2390_s22, 7  ;;  %427 = vst.msk [vmem:[#allocation2 + $0x48] sm:$0x3] %vm418_vm1, %v2028_v52  ;;  %429 = vst.msk [vmem:[#allocation2 + $0x58] sm:$0x3] %vm418_vm1, %v2028_v52  ;;  %v2194_v61 = vpack.c.bf16 %v1707_v60, %v1706_v58  ;;  %v463_v62 = vld [vmem:[%s2386_s4] sm:$0xff] }
   0xf   : > { %s2096_s14 = scalar_lea.vmem %s2382_s0, %s1769_s11  ;;  %430 = vst.msk [vmem:[#allocation2 + $0x60] sm:$0xff] %vm331_vm0, %v2028_v52  ;;  %432 = vst.msk [vmem:[#allocation2 + $0x70] sm:$0xff] %vm331_vm0, %v2028_v52  ;;  %1943 = vmatprep.subr.bf16.mxu1 %v2189_v59  ;;  %v464_v63 = vld [vmem:[%s2386_s4 + $0x8] sm:$0xff]  ;;  %v1673_v1 = vld [vmem:[%s2385_s3] ss:$0 sm:$0xff]  ;;  %s1770_s11 = sshll.u32 %s2390_s22, 6 }
  0x10   : > { %v274_v9 = vld [vmem:[%s2096_s14 + $0x8] sm:$0xff]  ;;  %v276_v10 = vld [vmem:[%s2096_s14 + $0x18] sm:$0xff]  ;;  %349 = vmatpush1.bf16.msra.mxu0 %v317_v11  ;;  %v273_v31 = vld [vmem:[%s2096_s14] sm:$0xff]  ;;  %431 = vst.msk [vmem:[#allocation2 + $0x68] sm:$0x3] %vm418_vm1, %v2028_v52  ;;  %1944 = vmatpush3.bf16.msra.mxu1 %v2189_v59  ;;  %v465_v0 = vpack.c.bf16 %v464_v63, %v463_v62  ;;  %s2345_s15 = scalar_lea.vmem %s2383_s1, %s1770_s11  ;;  %s2355_s18 = scalar_lea.vmem %s2388_s6, %s1770_s11 }
  0x11   : > { %v290_v12 = vpack.c.bf16 %v276_v10, %v274_v9  ;;  %350 = vmatprep.subr.bf16.mxu0 %v2027_v3  ;;  %v275_v32 = vld [vmem:[%s2096_s14 + $0x10] sm:$0xff]  ;;  %v278_v33 = vld [vmem:[%s2096_s14 + $0x28] sm:$0xff]  ;;  %v280_v34 = vld [vmem:[%s2096_s14 + $0x38] sm:$0xff]  ;;  %433 = vst.msk [vmem:[#allocation2 + $0x78] sm:$0x3] %vm418_vm1, %v2028_v52  ;;  %1883 = vmatprep.subr.bf16.mxu1 %v2194_v61 }
  0x12   : > { %v289_v35 = vpack.c.bf16 %v275_v32, %v273_v31  ;;  %v292_v36 = vpack.c.bf16 %v280_v34, %v278_v33  ;;  %v277_v37 = vld [vmem:[%s2096_s14 + $0x20] sm:$0xff]  ;;  %v279_v38 = vld [vmem:[%s2096_s14 + $0x30] sm:$0xff]  ;;  %v282_v39 = vld [vmem:[%s2096_s14 + $0x48] sm:$0xff]  ;;  %434 = vst.msk [vmem:[#allocation2 + $0x80] sm:$0xff] %vm331_vm0, %v2028_v52 }
  0x13   : > { %1674 = vmatprep.mubr.msk.bf16.mxu0 %vm331_vm0, %v290_v12  ;;  %v284_v40 = vld [vmem:[%s2096_s14 + $0x58] sm:$0xff]  ;;  %v291_v41 = vpack.c.bf16 %v279_v38, %v277_v37  ;;  %v281_v43 = vld [vmem:[%s2096_s14 + $0x40] sm:$0xff]  ;;  %v283_v44 = vld [vmem:[%s2096_s14 + $0x50] sm:$0xff]  ;;  %435 = vst.msk [vmem:[#allocation2 + $0x88] sm:$0x3] %vm418_vm1, %v2028_v52 }
  0x14   : > { %351 = vmatpush1.bf16.msra.mxu0 %v318_v15  ;;  %v294_v42 = vpack.c.bf16 %v284_v40, %v282_v39  ;;  %v286_v45 = vld [vmem:[%s2096_s14 + $0x68] sm:$0xff]  ;;  %v288_v46 = vld [vmem:[%s2096_s14 + $0x78] sm:$0xff]  ;;  %v293_v47 = vpack.c.bf16 %v283_v44, %v281_v43  ;;  %v285_v49 = vld [vmem:[%s2096_s14 + $0x60] sm:$0xff]  ;;  %436 = vst.msk [vmem:[#allocation2 + $0x90] sm:$0xff] %vm331_vm0, %v2028_v52 }
  0x15   : > { %352 = vmatprep.subr.bf16.mxu0 %v2027_v3  ;;  %v296_v48 = vpack.c.bf16 %v288_v46, %v286_v45  ;;  %v287_v50 = vld [vmem:[%s2096_s14 + $0x70] sm:$0xff]  ;;  %437 = vst.msk [vmem:[#allocation2 + $0x98] sm:$0x3] %vm418_vm1, %v2028_v52  ;;  %v466_v14 = vld [vmem:[#allocation2 + $0x1] sm:$0xff] }
  0x16   : > { %v295_v51 = vpack.c.bf16 %v287_v50, %v285_v49  ;;  %v447_v46 = vld [vmem:[#allocation2] sm:$0xff] }
  0x18   : > { %353 = vmatpush1.bf16.msra.mxu0 %v319_v18 }
  0x19   : > { %354 = vmatprep.subr.bf16.mxu0 %v2027_v3 }
  0x1c   : > { %355 = vmatpush1.bf16.msra.mxu0 %v320_v21 }
  0x1d   : > { %356 = vmatprep.subr.bf16.mxu0 %v2027_v3 }
  0x20   : > { %357 = vmatpush1.bf16.msra.mxu0 %v321_v24 }
  0x21   : > { %358 = vmatprep.subr.bf16.mxu0 %v2027_v3 }
  0x24   : > { %359 = vmatpush1.bf16.msra.mxu0 %v322_v27 }
  0x25   : > { %360 = vmatprep.subr.bf16.mxu0 %v2027_v3 }
  0x28   : > { %361 = vmatpush1.bf16.msra.mxu0 %v323_v30 }
  0x29   : > { %1853 = vmatprep.subr.bf16.mxu0 %v485_v55 }
  0x2b   : > { %377 = vmatmul.mubr.bf16.vlgmr.msra.gmra.mrb[0].mxu0 %v289_v35 }
  0x2c   : > { %1675 = vmatprep.mubr.msk.bf16.mxu0 %vm331_vm0, %v292_v36  ;;  %1854 = vmatpush3.bf16.msra.mxu0 %v485_v55 }
  0x2d   : > { %1863 = vmatprep.subr.bf16.mxu0 %v465_v0 }
  0x33   : > { %385 = vmatmul.mubr.bf16.gmra.mrb[4].mxu0 %v291_v41 }
  0x34   : > { %1676 = vmatprep.mubr.msk.bf16.mxu0 %vm331_vm0, %v294_v42 }
  0x3b   : > { %393 = vmatmul.mubr.bf16.gmra.mrb[8].mxu0 %v293_v47  ;;  %v1716_v47 = vld [vmem:[%s2386_s4 + $0x40] sm:$0xff] }
  0x3c   : > { %1677 = vmatprep.mubr.msk.bf16.mxu0 %vm331_vm0, %v296_v48  ;;  %v1717_v48 = vld [vmem:[%s2386_s4 + $0x48] sm:$0xff] }
  0x3d   : > { %v949_v57 = vpack.c.bf16 %v1717_v48, %v1716_v47 }
  0x43   : > { %401 = vmatmul.mubr.bf16.gmra.mrb[12].mxu0 %v295_v51 }
  0xfe   : > { %v378_v2 = vpop.f32.mrb[0].mxu0 }
  0xff   : > { %v379_v3 = vadd.f32 %v1673_v1, %v378_v2  ;;  %v380_v4 = vpop.f32.mrb[1].mxu0  ;;  %v1727_v2 = vld [vmem:[%s2386_s4 + $0x58] sm:$0xff] }
 0x100   : > { %v381_v5 = vpop.f32.mrb[2].mxu0 }
 0x101   : > { %v409_v6 = vmax.f32 %v379_v3, 0.0  ;;  %v382_v7 = vadd.f32 %v1673_v1, %v381_v5  ;;  %v383_v8 = vpop.f32.mrb[3].mxu0 }
 0x103   : > { %439 = vst.msk [vmem:[#allocation2 + $0x11] sm:$0xff] %vm331_vm0, %v409_v6  ;;  %v410_v9 = vmax.f32 %v382_v7, 0.0 }
 0x105   : > { %440 = vst.msk [vmem:[#allocation2 + $0x21] sm:$0xff] %vm331_vm0, %v410_v9 }
 0x106   : > { %v386_v10 = vpop.f32.mrb[4].mxu0 }
 0x107   : > { %v387_v11 = vadd.f32 %v1673_v1, %v386_v10  ;;  %v388_v12 = vpop.f32.mrb[5].mxu0  ;;  %v680_v10 = vld [vmem:[#allocation2 + $0x2] sm:$0xff] }
 0x108   : > { %v389_v13 = vpop.f32.mrb[6].mxu0 }
 0x109   : > { %v411_v15 = vmax.f32 %v387_v11, 0.0  ;;  %v390_v16 = vadd.f32 %v1673_v1, %v389_v13  ;;  %v391_v17 = vpop.f32.mrb[7].mxu0 }
 0x10a   : > { %v2210_v18 = vld [vmem:[#allocation2 + $0x11] sm:$0xff]  ;;  %v1737_v17 = vld [vmem:[%s2386_s4 + $0x68] sm:$0xff] }
 0x10b   : > { %441 = vst.msk [vmem:[#allocation2 + $0x31] sm:$0xff] %vm331_vm0, %v411_v15  ;;  %v412_v19 = vmax.f32 %v390_v16, 0.0  ;;  %v1772_v20 = vpack.c.bf16 %v2210_v18, %v466_v14  ;;  %v448_v50 = vld [vmem:[#allocation2 + $0x10] sm:$0xff]  ;;  %v1736_v16 = vld [vmem:[%s2386_s4 + $0x60] sm:$0xff] }
 0x10c   : > { %v2216_v28 = vld [vmem:[#allocation2 + $0x21] sm:$0xff]  ;;  %v1776_v58 = vpack.c.bf16 %v448_v50, %v447_v46  ;;  %v681_v11 = vld [vmem:[#allocation2 + $0x12] sm:$0xff] }
 0x10d   : > { %442 = vst.msk [vmem:[#allocation2 + $0x41] sm:$0xff] %vm331_vm0, %v412_v19  ;;  %1855 = vmatprep.mubr.msk.bf16.mxu0 %vm331_vm0, %v1772_v20  ;;  %v806_v51 = vld [vmem:[#allocation2 + $0x20] sm:$0xff]  ;;  %v1780_v14 = vpack.c.bf16 %v681_v11, %v680_v10  ;;  %v1788_v15 = vpack.c.bf16 %v2216_v28, %v2210_v18 }
 0x10e   : > { %v394_v21 = vpop.f32.mrb[8].mxu0  ;;  %v1784_v60 = vpack.c.bf16 %v806_v51, %v448_v50  ;;  %v682_v19 = vld [vmem:[#allocation2 + $0x22] sm:$0xff] }
 0x10f   : > { %v395_v22 = vadd.f32 %v1673_v1, %v394_v21  ;;  %v396_v23 = vpop.f32.mrb[9].mxu0  ;;  %v1200_v21 = vpack.c.bf16 %v1737_v17, %v1736_v16 }
 0x110   : > { %v397_v24 = vpop.f32.mrb[10].mxu0 }
 0x111   : > { %v413_v25 = vmax.f32 %v395_v22, 0.0  ;;  %v398_v26 = vadd.f32 %v1673_v1, %v397_v24  ;;  %v399_v27 = vpop.f32.mrb[11].mxu0 }
 0x112   : > { %v2218_v29 = vld [vmem:[#allocation2 + $0x31] sm:$0xff] }
 0x113   : > { %443 = vst.msk [vmem:[#allocation2 + $0x51] sm:$0xff] %vm331_vm0, %v413_v25  ;;  %v414_v30 = vmax.f32 %v398_v26, 0.0  ;;  %v2223_v31 = vpack.c.bf16 %v2218_v29, %v2216_v28  ;;  %v450_v62 = vld [vmem:[#allocation2 + $0x30] sm:$0xff]  ;;  %v1792_v25 = vpack.c.bf16 %v682_v19, %v681_v11  ;;  %v1747_v27 = vld [vmem:[%s2386_s4 + $0x78] sm:$0xff] }
 0x114   : > { %v2229_v39 = vld [vmem:[#allocation2 + $0x41] sm:$0xff]  ;;  %v1777_v4 = vpack.c.bf16 %v450_v62, %v806_v51  ;;  %v1746_v26 = vld [vmem:[%s2386_s4 + $0x70] sm:$0xff]  ;;  %v1766_v51 = vld [vmem:[%s2387_s5] ss:$0 sm:$0xff] }
 0x115   : > { %444 = vst.msk [vmem:[#allocation2 + $0x61] sm:$0xff] %vm331_vm0, %v414_v30  ;;  %1856 = vmatmul.mubr.msk.bf16.vlgmr.msra.gmra.mrb[16].mxu0 %vm331_vm0, %v2223_v31  ;;  %v2233_v41 = vld [vmem:[#allocation2 + $0x42] sm:$0xff]  ;;  %v1789_v18 = vpack.c.bf16 %v2229_v39, %v2218_v29  ;;  %v1325_v29 = vpack.c.bf16 %v1747_v27, %v1746_v26  ;;  %v1577_v11 = vld [vmem:[%s2345_s15 + $0x30] sm:$0xff] }
 0x116   : > { %v402_v32 = vpop.f32.mrb[12].mxu0  ;;  %1864 = vmatpush3.bf16.msra.mxu0 %v465_v0  ;;  %v808_v63 = vld [vmem:[#allocation2 + $0x40] sm:$0xff] }
 0x117   : > { %v403_v33 = vadd.f32 %v1673_v1, %v402_v32  ;;  %v404_v34 = vpop.f32.mrb[13].mxu0  ;;  %1873 = vmatprep.subr.bf16.mxu0 %v2189_v59  ;;  %v1785_v5 = vpack.c.bf16 %v808_v63, %v450_v62 }
 0x118   : > { %v405_v35 = vpop.f32.mrb[14].mxu0  ;;  %v1756_v34 = vld [vmem:[%s2386_s4 + $0x80] sm:$0xff] }
 0x119   : > { %v415_v36 = vmax.f32 %v403_v33, 0.0  ;;  %v406_v37 = vadd.f32 %v1673_v1, %v405_v35  ;;  %v407_v38 = vpop.f32.mrb[15].mxu0  ;;  %v1726_v1 = vld [vmem:[%s2386_s4 + $0x50] sm:$0xff]  ;;  %v1757_v35 = vld [vmem:[%s2386_s4 + $0x88] sm:$0xff] }
 0x11a   : > { %v2231_v40 = vld [vmem:[#allocation2 + $0x51] sm:$0xff]  ;;  %v1074_v6 = vpack.c.bf16 %v1727_v2, %v1726_v1 }
 0x11b   : > { %v2235_v42 = vld [vmem:[#allocation2 + $0x52] sm:$0xff]  ;;  %445 = vst.msk [vmem:[#allocation2 + $0x71] sm:$0xff] %vm331_vm0, %v415_v36  ;;  %v416_v43 = vmax.f32 %v406_v37, 0.0  ;;  %v2240_v44 = vpack.c.bf16 %v2231_v40, %v2229_v39  ;;  %v1450_v36 = vpack.c.bf16 %v1757_v35, %v1756_v34 }
 0x11c   : > { %v2244_v45 = vpack.c.bf16 %v2235_v42, %v2233_v41  ;;  %v472_v49 = vld [vmem:[#allocation2 + $0x61] sm:$0xff]  ;;  %v452_v0 = vld [vmem:[#allocation2 + $0x50] sm:$0xff] }
 0x11d   : > { %446 = vst.msk [vmem:[#allocation2 + $0x81] sm:$0xff] %vm331_vm0, %v416_v43  ;;  %1859 = vmatprep.mubr.msk.bf16.mxu0 %vm331_vm0, %v2240_v44  ;;  %v2257_v53 = vld [vmem:[#allocation2 + $0x62] sm:$0xff]  ;;  %v1790_v22 = vpack.c.bf16 %v472_v49, %v2231_v40  ;;  %v1188_v37 = vld [vmem:[#allocation2 + $0x90] sm:$0xff] }
 0x11e   : > { %1879 = vmatprep.mubr.msk.bf16.mxu1 %vm331_vm0, %v2244_v45  ;;  %v810_v3 = vld [vmem:[#allocation2 + $0x60] sm:$0xff]  ;;  %v1794_v30 = vpack.c.bf16 %v2257_v53, %v2235_v42  ;;  %v1313_v39 = vld [vmem:[#allocation2 + $0x91] sm:$0xff] }
 0x11f   : > { %v1786_v7 = vpack.c.bf16 %v810_v3, %v452_v0 }
 0x122   : > { %v473_v52 = vld [vmem:[#allocation2 + $0x71] sm:$0xff] }
 0x123   : > { %v2259_v54 = vld [vmem:[#allocation2 + $0x72] sm:$0xff]  ;;  %v2261_v55 = vpack.c.bf16 %v473_v52, %v472_v49 }
 0x124   : > { %v2265_v56 = vpack.c.bf16 %v2259_v54, %v2257_v53  ;;  %v454_v8 = vld [vmem:[#allocation2 + $0x70] sm:$0xff]  ;;  %v812_v9 = vld [vmem:[#allocation2 + $0x80] sm:$0xff] }
 0x125   : > { %1860 = vmatmul.mubr.msk.bf16.gmra.mrb[20].mxu0 %vm331_vm0, %v2261_v55  ;;  %v1779_v12 = vpack.c.bf16 %v454_v8, %v810_v3  ;;  %v1787_v13 = vpack.c.bf16 %v812_v9, %v454_v8  ;;  %v937_v23 = vld [vmem:[#allocation2 + $0x81] sm:$0xff]  ;;  %v1799_v38 = vpack.c.bf16 %v1188_v37, %v812_v9 }
 0x126   : > { %1880 = vmatmul.mubr.msk.bf16.vlgmr.msra.gmra.mrb[0].mxu1 %vm331_vm0, %v2265_v56  ;;  %1865 = vmatprep.mubr.msk.bf16.mxu0 %vm331_vm0, %v1776_v58  ;;  %v1791_v24 = vpack.c.bf16 %v937_v23, %v473_v52  ;;  %v1062_v32 = vld [vmem:[#allocation2 + $0x82] sm:$0xff]  ;;  %v1803_v40 = vpack.c.bf16 %v1313_v39, %v937_v23 }
 0x127   : > { %1884 = vmatpush3.bf16.msra.mxu1 %v2194_v61  ;;  %1885 = vmatprep.mubr.msk.bf16.mxu1 %vm331_vm0, %v1784_v60  ;;  %v1778_v61 = vpack.c.bf16 %v452_v0, %v808_v63  ;;  %v1795_v33 = vpack.c.bf16 %v1062_v32, %v2259_v54  ;;  %v1573_v54 = vld [vmem:[%s2345_s15 + $0x10] sm:$0xff]  ;;  %v1571_v58 = vld [vmem:[%s2345_s15] sm:$0xff]  ;;  %v1574_v0 = vld [vmem:[%s2345_s15 + $0x18] sm:$0xff] }
 0x128   : > { %1893 = vmatprep.subr.bf16.mxu1 %v949_v57 }
 0x12d   : > { %1866 = vmatmul.mubr.msk.bf16.vlgmr.msra.gmra.mrb[16].mxu0 %vm331_vm0, %v1777_v4 }
 0x12e   : > { %1886 = vmatmul.mubr.msk.bf16.vlgmr.msra.gmra.mrb[4].mxu1 %vm331_vm0, %v1785_v5  ;;  %1869 = vmatprep.mubr.msk.bf16.mxu0 %vm331_vm0, %v1778_v61 }
 0x12f   : > { %1894 = vmatpush3.bf16.msra.mxu1 %v949_v57  ;;  %1889 = vmatprep.mubr.msk.bf16.mxu1 %vm331_vm0, %v1786_v7 }
 0x130   : > { %1874 = vmatpush3.bf16.msra.mxu0 %v2189_v59  ;;  %1903 = vmatprep.subr.bf16.mxu1 %v1074_v6  ;;  %v683_v59 = vld [vmem:[#allocation2 + $0x32] sm:$0xff] }
 0x131   : > { %v1781_v20 = vpack.c.bf16 %v683_v59, %v682_v19  ;;  %v1793_v28 = vpack.c.bf16 %v2233_v41, %v683_v59  ;;  %v1578_v19 = vld [vmem:[%s2345_s15 + $0x38] sm:$0xff] }
 0x135   : > { %1870 = vmatmul.mubr.msk.bf16.gmra.mrb[20].mxu0 %vm331_vm0, %v1779_v12 }
 0x136   : > { %1890 = vmatmul.mubr.msk.bf16.gmra.mrb[0].mxu1 %vm331_vm0, %v1787_v13  ;;  %1875 = vmatprep.mubr.msk.bf16.mxu0 %vm331_vm0, %v1780_v14 }
 0x137   : > { %1895 = vmatprep.mubr.msk.bf16.mxu1 %vm331_vm0, %v1788_v15  ;;  %v1575_v15 = vld [vmem:[%s2345_s15 + $0x20] sm:$0xff] }
 0x13d   : > { %1876 = vmatmul.mubr.msk.bf16.vlgmr.msra.gmra.mrb[16].mxu0 %vm331_vm0, %v1781_v20 }
 0x13e   : > { %1896 = vmatmul.mubr.msk.bf16.vlgmr.msra.gmra.mrb[4].mxu1 %vm331_vm0, %v1789_v18 }
 0x13f   : > { %1904 = vmatpush3.bf16.msra.mxu1 %v1074_v6  ;;  %1899 = vmatprep.mubr.msk.bf16.mxu1 %vm331_vm0, %v1790_v22  ;;  %v1576_v22 = vld [vmem:[%s2345_s15 + $0x28] sm:$0xff] }
 0x140   : > { %1913 = vmatprep.subr.bf16.mxu1 %v1200_v21 }
 0x146   : > { %1900 = vmatmul.mubr.msk.bf16.gmra.mrb[0].mxu1 %vm331_vm0, %v1791_v24 }
 0x147   : > { %1905 = vmatprep.mubr.msk.bf16.mxu1 %vm331_vm0, %v1792_v25 }
 0x14e   : > { %1906 = vmatmul.mubr.msk.bf16.vlgmr.msra.gmra.mrb[4].mxu1 %vm331_vm0, %v1793_v28 }
 0x14f   : > { %1914 = vmatpush3.bf16.msra.mxu1 %v1200_v21  ;;  %1909 = vmatprep.mubr.msk.bf16.mxu1 %vm331_vm0, %v1794_v30 }
 0x150   : > { %1923 = vmatprep.subr.bf16.mxu1 %v1325_v29 }
 0x156   : > { %1910 = vmatmul.mubr.msk.bf16.gmra.mrb[0].mxu1 %vm331_vm0, %v1795_v33 }
 0x157   : > { %1915 = vmatprep.mubr.msk.bf16.mxu1 %vm331_vm0, %v1777_v4  ;;  %v1572_v4 = vld [vmem:[%s2345_s15 + $0x8] sm:$0xff] }
 0x15e   : > { %1916 = vmatmul.mubr.msk.bf16.vlgmr.msra.gmra.mrb[4].mxu1 %vm331_vm0, %v1778_v61 }
 0x15f   : > { %1924 = vmatpush3.bf16.msra.mxu1 %v1325_v29  ;;  %1919 = vmatprep.mubr.msk.bf16.mxu1 %vm331_vm0, %v1779_v12 }
 0x160   : > { %1933 = vmatprep.subr.bf16.mxu1 %v1450_v36 }
 0x166   : > { %1920 = vmatmul.mubr.msk.bf16.gmra.mrb[0].mxu1 %vm331_vm0, %v1799_v38 }
 0x167   : > { %1925 = vmatprep.mubr.msk.bf16.mxu1 %vm331_vm0, %v2223_v31  ;;  %v1438_v31 = vld [vmem:[#allocation2 + $0x92] sm:$0xff] }
 0x168   : > { %v1807_v41 = vpack.c.bf16 %v1438_v31, %v1062_v32 }
 0x16e   : > { %1926 = vmatmul.mubr.msk.bf16.vlgmr.msra.gmra.mrb[4].mxu1 %vm331_vm0, %v2240_v44 }
 0x16f   : > { %1934 = vmatpush3.bf16.msra.mxu1 %v1450_v36  ;;  %1929 = vmatprep.mubr.msk.bf16.mxu1 %vm331_vm0, %v2261_v55 }
 0x176   : > { %1930 = vmatmul.mubr.msk.bf16.gmra.mrb[0].mxu1 %vm331_vm0, %v1803_v40 }
 0x177   : > { %1935 = vmatprep.mubr.msk.bf16.mxu1 %vm331_vm0, %v1781_v20 }
 0x17e   : > { %1936 = vmatmul.mubr.msk.bf16.vlgmr.msra.gmra.mrb[4].mxu1 %vm331_vm0, %v2244_v45 }
 0x17f   : > { %1939 = vmatprep.mubr.msk.bf16.mxu1 %vm331_vm0, %v2265_v56 }
 0x186   : > { %1940 = vmatmul.mubr.msk.bf16.gmra.mrb[0].mxu1 %vm331_vm0, %v1807_v41 }
 0x208   : > { %v1871_v42 = vpop.f32.mrb[20].mxu0 }
 0x209   : > { %v665_v43 = vpop.f32.mrb[21].mxu0 }
 0x20a   : > { %v1872_v44 = vpop.f32.mrb[22].mxu0 }
 0x20b   : > { %v668_v46 = vpop.f32.mrb[23].mxu0 }
 0x210   : > { %v1877_v47 = vpop.f32.mrb[16].mxu0 }
 0x211   : > { %v766_v48 = vpop.f32.mrb[17].mxu0 }
 0x212   : > { %v1878_v49 = vpop.f32.mrb[18].mxu0 }
 0x213   : > { %v769_v50 = vpop.f32.mrb[19].mxu0 }
 0x251   : > { %v1937_v45 = vpop.f32.mrb[4].mxu1 }
 0x252   : > { %v1945_v52 = vadd.f32 %v1937_v45, %v1877_v47  ;;  %v1517_v53 = vpop.f32.mrb[5].mxu1 }
 0x253   : > { %v1946_v55 = vadd.f32 %v1517_v53, %v766_v48  ;;  %v1938_v56 = vpop.f32.mrb[6].mxu1 }
 0x254   : > { %v1565_v57 = vadd.f32 %v1945_v52, %v1766_v51  ;;  %v1947_v60 = vadd.f32 %v1938_v56, %v1878_v49  ;;  %v1520_v62 = vpop.f32.mrb[7].mxu1 }
 0x255   : > { %v1563_v63 = vadd.f32 %v1946_v55, %v1766_v51  ;;  %v1948_v1 = vadd.f32 %v1520_v62, %v769_v50 }
 0x256   : > { %v1581_v2 = vadd.f32 %v1573_v54, %v1565_v57  ;;  %v1566_v3 = vadd.f32 %v1947_v60, %v1766_v51 }
 0x257   : > { %v1579_v5 = vadd.f32 %v1571_v58, %v1563_v63  ;;  %v1564_v61 = vadd.f32 %v1948_v1, %v1766_v51 }
 0x258   : > { %1589 = vst.msk [vmem:[%s2355_s18 + $0x10] sm:$0xff] %vm331_vm0, %v1581_v2  ;;  %v1582_v6 = vadd.f32 %v1574_v0, %v1566_v3 }
 0x259   : > { %1587 = vst.msk [vmem:[%s2355_s18] sm:$0xff] %vm331_vm0, %v1579_v5  ;;  %v1580_v7 = vadd.f32 %v1572_v4, %v1564_v61  ;;  %v1941_v8 = vpop.f32.mrb[0].mxu1 }
 0x25a   : > { %1590 = vst.msk [vmem:[%s2355_s18 + $0x18] sm:$0xff] %vm331_vm0, %v1582_v6  ;;  %v1949_v9 = vadd.f32 %v1941_v8, %v1871_v42  ;;  %v1533_v10 = vpop.f32.mrb[1].mxu1 }
 0x25b   : > { %1588 = vst.msk [vmem:[%s2355_s18 + $0x8] sm:$0xff] %vm331_vm0, %v1580_v7  ;;  %v1950_v12 = vadd.f32 %v1533_v10, %v665_v43  ;;  %v1942_v13 = vpop.f32.mrb[2].mxu1 }
 0x25c   : > { %v1569_v14 = vadd.f32 %v1949_v9, %v1766_v51  ;;  %v1951_v59 = vadd.f32 %v1942_v13, %v1872_v44  ;;  %v1536_v16 = vpop.f32.mrb[3].mxu1 }
 0x25d   : > { %v1567_v17 = vadd.f32 %v1950_v12, %v1766_v51  ;;  %v1952_v20 = vadd.f32 %v1536_v16, %v668_v46 }
 0x25e   : > { %v1585_v18 = vadd.f32 %v1577_v11, %v1569_v14  ;;  %v1570_v21 = vadd.f32 %v1951_v59, %v1766_v51 }
 0x25f   : > { %v1583_v23 = vadd.f32 %v1575_v15, %v1567_v17  ;;  %v1568_v24 = vadd.f32 %v1952_v20, %v1766_v51 }
 0x260   : > { %1593 = vst.msk [vmem:[%s2355_s18 + $0x30] sm:$0xff] %vm331_vm0, %v1585_v18  ;;  %v1586_v25 = vadd.f32 %v1578_v19, %v1570_v21 }
 0x261   : > { %1591 = vst.msk [vmem:[%s2355_s18 + $0x20] sm:$0xff] %vm331_vm0, %v1583_v23  ;;  %v1584_v26 = vadd.f32 %v1576_v22, %v1568_v24 }
 0x262   : > { %1594 = vst.msk [vmem:[%s2355_s18 + $0x38] sm:$0xff] %vm331_vm0, %v1586_v25 }
 0x263   : > { %1592 = vst.msk [vmem:[%s2355_s18 + $0x28] sm:$0xff] %vm331_vm0, %v1584_v26 }
 0x264 PF: > { %s16_s21 = sadd.s32 1, %s2025_s21  }
 0x265   : > { %p13_p4 = scmp.ge.s32.totalorder %s16_s21, 4  }
 0x267   :  { %15 = sbr.rel (!%p13_p4) target bundleno = 1 (0x1), region = 87 }

// kernel: rnlransr_forward.54
= control target key start
LH: loop header
LB: loop body
LE: loop exit
PB: predicated region body
PF: predicated region fallthrough
CT: control target
= control target key end

     0   :  { %s555_s12 = smov 0   ;;  %s557_s13 = smov 0   ;;  %s707_s0 = inlined_call_operand.vmem [shape: f32[2,8,8,144], index: 0, kind: input, shape index: {}]   ;;  %s708_s1 = inlined_call_operand.vmem [shape: f32[144,64], index: 1, kind: input, shape index: {}]   ;;  %s709_s2 = inlined_call_operand.vmem [shape: f32[1,64], index: 2, kind: input, shape index: {}]   ;;  %s710_s3 = inlined_call_operand.vmem [shape: f32[2,8,8,64], index: 3, kind: output, shape index: {}]  }
   0x1   :  { %s559_s14 = smov 0  }
   0x2 LB: > { %s25_s15 = sadd.s32 1, %s528_s13  ;;  %p453_p0 = scmp.ge.s32.totalorder %s532_s14, 1  ;;  %s532_s14 = sphi %s559_s14, %s13_s14   ;;  %s528_s13 = sphi %s557_s13, %s712_s13   ;;  %s524_s12 = sphi %s555_s12, %s711_s12  }
   0x3   : > { %p27_p1 = scmp.ge.s32.totalorder %s25_s15, 2  ;;  %p159_p2 = scmp.lt.s32.totalorder %s532_s14, 3 }
   0x5   : > { %s714_s15 = smov (%p27_p1, %s25_s15), 0  ;;  %p160_p3 = pnand %p453_p0, %p159_p2 }
   0x6   : > { %v238_v0 = vld [vmem:[%s708_s1] sm:$0xff] (!%p160_p3)  ;;  %v239_v1 = vld [vmem:[%s708_s1 + $0x8] sm:$0xff] (!%p160_p3)  ;;  %v240_v2 = vld [vmem:[%s708_s1 + $0x10] sm:$0xff] (!%p160_p3)  ;;  %p193_p4 = scmp.lt.s32.totalorder (!%p160_p3), %s524_s12, 1  ;;  %v534_v3 = vmov (!%p160_p3), 0   ;;  %vm272_vm0 = vcmask (!%p160_p3), 130048  }
   0x7   : > { %163 = sbr.rel (%p160_p3) target bundleno = 270 (0x10e), region = 32  ;;  %285 = vmatprep.subr.bf16.mxu0 (!%p160_p3), %v534_v3  ;;  %467 = vmatprep.subr.bf16.mxu1 (!%p160_p3), %v534_v3  ;;  %v256_v4 = vpack.c.bf16 (!%p160_p3), %v239_v1, %v238_v0  ;;  %v241_v5 = vld [vmem:[%s708_s1 + $0x18] sm:$0xff] (!%p160_p3)  ;;  %v242_v7 = vld [vmem:[%s708_s1 + $0x20] sm:$0xff] (!%p160_p3)  ;;  %v243_v8 = vld [vmem:[%s708_s1 + $0x28] sm:$0xff] (!%p160_p3)  ;;  %vm350_vm1 = vcmask (!%p160_p3), 523264  }
   0x8   : > { %v257_v6 = vpack.c.bf16 (!%p160_p3), %v241_v5, %v240_v2  ;;  %v258_v12 = vpack.c.bf16 (!%p160_p3), %v243_v8, %v242_v7  ;;  %v244_v15 = vld [vmem:[%s708_s1 + $0x30] sm:$0xff] (!%p160_p3)  ;;  %v245_v16 = vld [vmem:[%s708_s1 + $0x38] sm:$0xff] (!%p160_p3)  ;;  %v246_v19 = vld [vmem:[%s708_s1 + $0x40] sm:$0xff] (!%p160_p3) }
   0x9   : > { %286 = vmatpush1.bf16.msra.mxu0 (!%p160_p3), %v256_v4  ;;  %476 = vmatpush1.bf16.msra.mxu1 (!%p160_p3), %v256_v4  ;;  %v259_v18 = vpack.c.bf16 (!%p160_p3), %v245_v16, %v244_v15  ;;  %v247_v20 = vld [vmem:[%s708_s1 + $0x48] sm:$0xff] (!%p160_p3)  ;;  %v248_v22 = vld [vmem:[%s708_s1 + $0x50] sm:$0xff] (!%p160_p3)  ;;  %v249_v23 = vld [vmem:[%s708_s1 + $0x58] sm:$0xff] (!%p160_p3) }
   0xa   : > { %287 = vmatprep.subr.bf16.mxu0 (!%p160_p3), %v534_v3  ;;  %468 = vmatprep.subr.bf16.mxu1 (!%p160_p3), %v534_v3  ;;  %v260_v21 = vpack.c.bf16 (!%p160_p3), %v247_v20, %v246_v19  ;;  %v261_v24 = vpack.c.bf16 (!%p160_p3), %v249_v23, %v248_v22  ;;  %v250_v25 = vld [vmem:[%s708_s1 + $0x60] sm:$0xff] (!%p160_p3)  ;;  %v251_v26 = vld [vmem:[%s708_s1 + $0x68] sm:$0xff] (!%p160_p3)  ;;  %v252_v28 = vld [vmem:[%s708_s1 + $0x70] sm:$0xff] (!%p160_p3) }
   0xb   : > { %v262_v27 = vpack.c.bf16 (!%p160_p3), %v251_v26, %v250_v25  ;;  %v253_v29 = vld [vmem:[%s708_s1 + $0x78] sm:$0xff] (!%p160_p3)  ;;  %v254_v31 = vld [vmem:[%s708_s1 + $0x80] sm:$0xff] (!%p160_p3)  ;;  %v255_v32 = vld [vmem:[%s708_s1 + $0x88] sm:$0xff] (!%p160_p3) }
   0xc   : > { %v263_v30 = vpack.c.bf16 (!%p160_p3), %v253_v29, %v252_v28  ;;  %v264_v35 = vpack.c.bf16 (!%p160_p3), %v255_v32, %v254_v31  ;;  %v458_v52 = vld [vmem:[%s709_s2] ss:$0 sm:$0xff] (!%p160_p3) }
   0xd   : > { %288 = vmatpush1.bf16.msra.mxu0 (!%p160_p3), %v257_v6  ;;  %477 = vmatpush1.bf16.msra.mxu1 (!%p160_p3), %v257_v6 }
   0xe   : > { %s716_s12 = smov (!%p193_p4, %s524_s12), 1  ;;  %289 = vmatprep.subr.bf16.mxu0 %v534_v3  ;;  %469 = vmatprep.subr.bf16.mxu1 %v534_v3 }
   0xf   : > { %s465_s28 = sshll.u32 %s716_s12, 7  ;;  %s466_s7 = sshll.u32 %s716_s12, 6 }
  0x10   : > { %s601_s4 = scalar_lea.vmem %s707_s0, %s465_s28  ;;  %s680_s16 = scalar_lea.vmem %s710_s3, %s466_s7 }
  0x11   : > { %v215_v9 = vld [vmem:[%s601_s4 + $0x8] sm:$0xff]  ;;  %v217_v10 = vld [vmem:[%s601_s4 + $0x18] sm:$0xff]  ;;  %290 = vmatpush1.bf16.msra.mxu0 %v258_v12  ;;  %478 = vmatpush1.bf16.msra.mxu1 %v258_v12  ;;  %v214_v33 = vld [vmem:[%s601_s4] sm:$0xff] }
  0x12   : > { %v223_v11 = vld [vmem:[%s601_s4 + $0x48] sm:$0xff]  ;;  %v231_v13 = vpack.c.bf16 %v217_v10, %v215_v9  ;;  %v225_v14 = vld [vmem:[%s601_s4 + $0x58] sm:$0xff]  ;;  %291 = vmatprep.subr.bf16.mxu0 %v534_v3  ;;  %470 = vmatprep.subr.bf16.mxu1 %v534_v3  ;;  %v216_v34 = vld [vmem:[%s601_s4 + $0x10] sm:$0xff] }
  0x13   : > { %v235_v17 = vpack.c.bf16 %v225_v14, %v223_v11  ;;  %v222_v36 = vld [vmem:[%s601_s4 + $0x40] sm:$0xff]  ;;  %v224_v37 = vld [vmem:[%s601_s4 + $0x50] sm:$0xff]  ;;  %v219_v38 = vld [vmem:[%s601_s4 + $0x28] sm:$0xff]  ;;  %v230_v42 = vpack.c.bf16 %v216_v34, %v214_v33 }
  0x14   : > { %459 = vmatprep.mubr.msk.bf16.mxu0 %vm272_vm0, %v231_v13  ;;  %v221_v39 = vld [vmem:[%s601_s4 + $0x38] sm:$0xff]  ;;  %v227_v40 = vld [vmem:[%s601_s4 + $0x68] sm:$0xff]  ;;  %v234_v43 = vpack.c.bf16 %v224_v37, %v222_v36  ;;  %v218_v46 = vld [vmem:[%s601_s4 + $0x20] sm:$0xff] }
  0x15   : > { %461 = vmatprep.mubr.msk.bf16.mxu1 %vm272_vm0, %v235_v17  ;;  %292 = vmatpush1.bf16.msra.mxu0 %v259_v18  ;;  %v229_v41 = vld [vmem:[%s601_s4 + $0x78] sm:$0xff]  ;;  %v233_v44 = vpack.c.bf16 %v221_v39, %v219_v38  ;;  %v220_v47 = vld [vmem:[%s601_s4 + $0x30] sm:$0xff]  ;;  %v226_v48 = vld [vmem:[%s601_s4 + $0x60] sm:$0xff] }
  0x16   : > { %479 = vmatpush1.bf16.msra.mxu1 %v259_v18  ;;  %293 = vmatprep.subr.bf16.mxu0 %v534_v3  ;;  %v237_v45 = vpack.c.bf16 %v229_v41, %v227_v40  ;;  %v228_v49 = vld [vmem:[%s601_s4 + $0x70] sm:$0xff]  ;;  %v232_v50 = vpack.c.bf16 %v220_v47, %v218_v46 }
  0x17   : > { %471 = vmatprep.subr.bf16.mxu1 %v534_v3  ;;  %v236_v51 = vpack.c.bf16 %v228_v49, %v226_v48 }
  0x19   : > { %294 = vmatpush1.bf16.msra.mxu0 %v260_v21 }
  0x1a   : > { %480 = vmatpush1.bf16.msra.mxu1 %v260_v21  ;;  %295 = vmatprep.subr.bf16.mxu0 %v534_v3 }
  0x1b   : > { %472 = vmatprep.subr.bf16.mxu1 %v534_v3 }
  0x1d   : > { %296 = vmatpush1.bf16.msra.mxu0 %v261_v24 }
  0x1e   : > { %481 = vmatpush1.bf16.msra.mxu1 %v261_v24  ;;  %297 = vmatprep.subr.bf16.mxu0 %v534_v3 }
  0x1f   : > { %473 = vmatprep.subr.bf16.mxu1 %v534_v3 }
  0x21   : > { %298 = vmatpush1.bf16.msra.mxu0 %v262_v27 }
  0x22   : > { %482 = vmatpush1.bf16.msra.mxu1 %v262_v27  ;;  %299 = vmatprep.subr.bf16.mxu0 %v534_v3 }
  0x23   : > { %474 = vmatprep.subr.bf16.mxu1 %v534_v3 }
  0x25   : > { %300 = vmatpush1.bf16.msra.mxu0 %v263_v30 }
  0x26   : > { %483 = vmatpush1.bf16.msra.mxu1 %v263_v30  ;;  %301 = vmatprep.subr.bf16.mxu0 %v534_v3 }
  0x27   : > { %475 = vmatprep.subr.bf16.mxu1 %v534_v3 }
  0x29   : > { %302 = vmatpush1.bf16.msra.mxu0 %v264_v35 }
  0x2a   : > { %484 = vmatpush1.bf16.msra.mxu1 %v264_v35 }
  0x2c   : > { %318 = vmatmul.mubr.bf16.vlgmr.msra.gmra.mrb[0].mxu0 %v230_v42 }
  0x2d   : > { %334 = vmatmul.mubr.bf16.vlgmr.msra.gmra.mrb[0].mxu1 %v234_v43  ;;  %460 = vmatprep.mubr.msk.bf16.mxu0 %vm272_vm0, %v233_v44 }
  0x2e   : > { %462 = vmatprep.mubr.msk.bf16.mxu1 %vm272_vm0, %v237_v45 }
  0x34   : > { %326 = vmatmul.mubr.bf16.gmra.mrb[4].mxu0 %v232_v50 }
  0x35   : > { %342 = vmatmul.mubr.bf16.gmra.mrb[4].mxu1 %v236_v51 }
  0xff   : > { %v319_v53 = vpop.f32.mrb[0].mxu0 }
 0x100   : > { %v335_v54 = vpop.f32.mrb[0].mxu1  ;;  %v320_v55 = vadd.f32 %v458_v52, %v319_v53  ;;  %v321_v57 = vpop.f32.mrb[1].mxu0 }
 0x101   : > { %v336_v56 = vadd.f32 %v458_v52, %v335_v54  ;;  %v337_v58 = vpop.f32.mrb[1].mxu1  ;;  %v322_v59 = vpop.f32.mrb[2].mxu0 }
 0x102   : > { %v338_v60 = vpop.f32.mrb[2].mxu1  ;;  %351 = vst.msk [vmem:[%s680_s16] sm:$0xff] %vm350_vm1, %v320_v55  ;;  %v323_v61 = vadd.f32 %v458_v52, %v322_v59  ;;  %v324_v63 = vpop.f32.mrb[3].mxu0 }
 0x103   : > { %355 = vst.msk [vmem:[%s680_s16 + $0x20] sm:$0xff] %vm350_vm1, %v336_v56  ;;  %v339_v62 = vadd.f32 %v458_v52, %v338_v60  ;;  %v340_v0 = vpop.f32.mrb[3].mxu1 }
 0x104   : > { %352 = vst.msk [vmem:[%s680_s16 + $0x8] sm:$0xff] %vm350_vm1, %v323_v61 }
 0x105   : > { %356 = vst.msk [vmem:[%s680_s16 + $0x28] sm:$0xff] %vm350_vm1, %v339_v62 }
 0x107   : > { %v327_v1 = vpop.f32.mrb[4].mxu0 }
 0x108   : > { %v343_v2 = vpop.f32.mrb[4].mxu1  ;;  %v328_v3 = vadd.f32 %v458_v52, %v327_v1  ;;  %v329_v5 = vpop.f32.mrb[5].mxu0 }
 0x109   : > { %v344_v4 = vadd.f32 %v458_v52, %v343_v2  ;;  %v345_v6 = vpop.f32.mrb[5].mxu1  ;;  %v330_v7 = vpop.f32.mrb[6].mxu0 }
 0x10a   : > { %v346_v8 = vpop.f32.mrb[6].mxu1  ;;  %353 = vst.msk [vmem:[%s680_s16 + $0x10] sm:$0xff] %vm350_vm1, %v328_v3  ;;  %v331_v9 = vadd.f32 %v458_v52, %v330_v7  ;;  %v332_v11 = vpop.f32.mrb[7].mxu0 }
 0x10b   : > { %357 = vst.msk [vmem:[%s680_s16 + $0x30] sm:$0xff] %vm350_vm1, %v344_v4  ;;  %v347_v10 = vadd.f32 %v458_v52, %v346_v8  ;;  %v348_v12 = vpop.f32.mrb[7].mxu1 }
 0x10c   : > { %354 = vst.msk [vmem:[%s680_s16 + $0x18] sm:$0xff] %vm350_vm1, %v331_v9 }
 0x10d   : > { %358 = vst.msk [vmem:[%s680_s16 + $0x38] sm:$0xff] %vm350_vm1, %v347_v10 }
 0x10e PF: > { %s13_s14 = sadd.s32 1, %s532_s14   ;;  %s711_s12 = smov %s528_s13 }
 0x10f   : > { %p10_p5 = scmp.ge.s32.totalorder %s13_s14, 4   ;;  %s712_s13 = smov %s714_s15 }
 0x111   :  { %12 = sbr.rel (!%p10_p5) target bundleno = 2 (0x2), region = 62 }

// kernel: rnlransr_forward.56
= control target key start
LH: loop header
LB: loop body
LE: loop exit
PB: predicated region body
PF: predicated region fallthrough
CT: control target
= control target key end

     0   :  { %s816_s12 = smov 0   ;;  %s818_s13 = smov 0   ;;  %s943_s0 = inlined_call_operand.vmem [shape: f32[2,16,16,16], index: 0, kind: input, shape index: {}]   ;;  %s944_s1 = inlined_call_operand.vmem [shape: f32[16,16], index: 1, kind: input, shape index: {}]   ;;  %s945_s2 = inlined_call_operand.vmem [shape: f32[1,16], index: 2, kind: input, shape index: {}]   ;;  %s946_s3 = inlined_call_operand.vmem [shape: f32[2,16,16,16], index: 3, kind: output, shape index: {}]  }
   0x1   :  { %s820_s14 = smov 0   ;;  %s822_s15 = smov 0  }
   0x2   :  { %s824_s16 = smov 0  }
   0x3 LB: > { %s22_s17 = sadd.s32 1, %s786_s14  ;;  %s25_s18 = sadd.s32 1, %s790_s15  ;;  %s794_s16 = sphi %s824_s16, %s13_s16   ;;  %s790_s15 = sphi %s822_s15, %s950_s15   ;;  %s786_s14 = sphi %s820_s14, %s949_s14   ;;  %s782_s13 = sphi %s818_s13, %s948_s13   ;;  %s778_s12 = sphi %s816_s12, %s947_s12  }
   0x4   : > { %p23_p0 = scmp.ge.s32.totalorder %s22_s17, 2  ;;  %p587_p1 = scmp.ge.s32.totalorder %s794_s16, 1 }
   0x5   : > { %p159_p2 = scmp.lt.s32.totalorder %s794_s16, 5 }
   0x6   : > { %s952_s17 = smov (%p23_p0, %s22_s17), 0  ;;  %s954_s18 = smov (!%p23_p0, %s25_s18), %s790_s15 }
   0x7   : > { %p160_p3 = pnand %p587_p1, %p159_p2  ;;  %p27_p4 = scmp.ge.s32.totalorder %s954_s18, 2 }
   0x8   : > { %v240_v0 = vld [vmem:[%s944_s1] sm:$0xff] (!%p160_p3)  ;;  %v241_v1 = vld [vmem:[%s944_s1 + $0x8] sm:$0xff] (!%p160_p3)  ;;  %s588_s23 = sshll.u32 (!%p160_p3), %s778_s12, 3  ;;  %p194_p5 = scmp.lt.s32.totalorder (!%p160_p3), %s782_s13, 1  ;;  %vm250_vm0 = vcmask (!%p160_p3), 130048  }
   0x9   : > { %s956_s18 = smov (%p27_p4, %s954_s18), 0  ;;  %163 = sbr.rel (%p160_p3) target bundleno = 294 (0x126), region = 32 }
   0xa   : > { %v242_v2 = vpack.c.bf16 (!%p160_p3), %v241_v1, %v240_v0  ;;  %p196_p6 = scmp.lt.s32.totalorder (!%p160_p3), %s588_s23, 15  ;;  %v871_v27 = vld [vmem:[%s945_s2] ss:$0 sm:$0xff] (!%p160_p3) }
   0xc   : > { %632 = vmatprep.subr.bf16.mxu0 (!%p160_p3), %v242_v2  ;;  %650 = vmatprep.subr.bf16.mxu1 (!%p160_p3), %v242_v2 }
   0xd   : > { %633 = vmatpush3.bf16.msra.mxu0 (!%p160_p3), %v242_v2  ;;  %651 = vmatpush3.bf16.msra.mxu1 (!%p160_p3), %v242_v2 }
  0x10   : > { %s958_s13 = smov (!%p194_p5, %s782_s13), 1  ;;  %s960_s23 = smov (!%p196_p6, %s588_s23), 15 }
  0x11   : > { %s590_s24 = sshll.u32 %s958_s13, 5  ;;  %s589_s25 = sshll.u32 %s960_s23, 1 }
  0x12   : > { %s852_s26 = sadd.s32 %s590_s24, %s589_s25 }
  0x13   : > { %s591_s27 = sshll.u32 %s852_s26, 3 }
  0x14   : > { %s202_s30 = scalar_lea.vmem %s943_s0, %s591_s27  ;;  %s894_s8 = scalar_lea.vmem %s946_s3, %s591_s27 }
  0x15   : > { %v216_v3 = vld [vmem:[%s202_s30] sm:$0xff]  ;;  %v217_v4 = vld [vmem:[%s202_s30 + $0x8] sm:$0xff]  ;;  %v218_v8 = vld [vmem:[%s202_s30 + $0x10] sm:$0xff] }
  0x16   : > { %v224_v5 = vld [vmem:[%s202_s30 + $0x40] sm:$0xff]  ;;  %v232_v6 = vpack.c.bf16 %v217_v4, %v216_v3  ;;  %v225_v7 = vld [vmem:[%s202_s30 + $0x48] sm:$0xff]  ;;  %v219_v9 = vld [vmem:[%s202_s30 + $0x18] sm:$0xff] }
  0x17   : > { %v236_v10 = vpack.c.bf16 %v225_v7, %v224_v5  ;;  %v233_v11 = vpack.c.bf16 %v219_v9, %v218_v8  ;;  %v226_v12 = vld [vmem:[%s202_s30 + $0x50] sm:$0xff]  ;;  %v227_v13 = vld [vmem:[%s202_s30 + $0x58] sm:$0xff]  ;;  %v220_v14 = vld [vmem:[%s202_s30 + $0x20] sm:$0xff] }
  0x18   : > { %634 = vmatprep.mubr.msk.bf16.mxu0 %vm250_vm0, %v232_v6  ;;  %v237_v15 = vpack.c.bf16 %v227_v13, %v226_v12  ;;  %v221_v16 = vld [vmem:[%s202_s30 + $0x28] sm:$0xff]  ;;  %v228_v17 = vld [vmem:[%s202_s30 + $0x60] sm:$0xff]  ;;  %v222_v21 = vld [vmem:[%s202_s30 + $0x30] sm:$0xff] }
  0x19   : > { %v229_v18 = vld [vmem:[%s202_s30 + $0x68] sm:$0xff]  ;;  %642 = vmatprep.mubr.msk.bf16.mxu1 %vm250_vm0, %v236_v10  ;;  %635 = vmatmul.mubr.msk.bf16.vlgmr.msra.gmra.mrb[0].mxu0 %vm250_vm0, %v233_v11  ;;  %v234_v19 = vpack.c.bf16 %v221_v16, %v220_v14  ;;  %v223_v22 = vld [vmem:[%s202_s30 + $0x38] sm:$0xff]  ;;  %v230_v23 = vld [vmem:[%s202_s30 + $0x70] sm:$0xff] }
  0x1a   : > { %v238_v20 = vpack.c.bf16 %v229_v18, %v228_v17  ;;  %643 = vmatmul.mubr.msk.bf16.vlgmr.msra.gmra.mrb[0].mxu1 %vm250_vm0, %v237_v15  ;;  %v231_v24 = vld [vmem:[%s202_s30 + $0x78] sm:$0xff]  ;;  %v235_v25 = vpack.c.bf16 %v223_v22, %v222_v21 }
  0x1b   : > { %638 = vmatprep.mubr.msk.bf16.mxu0 %vm250_vm0, %v234_v19  ;;  %v239_v26 = vpack.c.bf16 %v231_v24, %v230_v23 }
  0x1c   : > { %646 = vmatprep.mubr.msk.bf16.mxu1 %vm250_vm0, %v238_v20 }
  0x21   : > { %639 = vmatmul.mubr.msk.bf16.gmra.mrb[4].mxu0 %vm250_vm0, %v235_v25 }
  0x22   : > { %647 = vmatmul.mubr.msk.bf16.gmra.mrb[4].mxu1 %vm250_vm0, %v239_v26 }
  0xec   : > { %v636_v28 = vpop.f32.mrb[0].mxu0 }
  0xed   : > { %v318_v29 = vadd.f32 %v636_v28, %v871_v27  ;;  %v644_v30 = vpop.f32.mrb[0].mxu1  ;;  %v309_v31 = vpop.f32.mrb[1].mxu0 }
  0xee   : > { %v350_v32 = vadd.f32 %v644_v30, %v871_v27  ;;  %v310_v33 = vadd.f32 %v871_v27, %v309_v31  ;;  %v341_v34 = vpop.f32.mrb[1].mxu1  ;;  %v637_v35 = vpop.f32.mrb[2].mxu0 }
  0xef   : > { %v607_v36 = vmul.f32 -1.442695, %v318_v29  ;;  %v342_v37 = vadd.f32 %v871_v27, %v341_v34  ;;  %v321_v38 = vadd.f32 %v637_v35, %v871_v27  ;;  %v645_v39 = vpop.f32.mrb[2].mxu1  ;;  %v312_v40 = vpop.f32.mrb[3].mxu0 }
  0xf0   : > { %v615_v41 = vmul.f32 -1.442695, %v350_v32  ;;  %v605_v42 = vmul.f32 -1.442695, %v310_v33  ;;  %v353_v43 = vadd.f32 %v645_v39, %v871_v27  ;;  %v313_v44 = vadd.f32 %v871_v27, %v312_v40  ;;  %v344_v45 = vpop.f32.mrb[3].mxu1 }
  0xf1   : > { %692 = vpow2.f32 %v607_v36  ;;  %v613_v46 = vmul.f32 -1.442695, %v342_v37  ;;  %v608_v47 = vmul.f32 -1.442695, %v321_v38  ;;  %v345_v48 = vadd.f32 %v871_v27, %v344_v45 }
  0xf2   : > { %694 = vpow2.f32 %v615_v41  ;;  %v616_v49 = vmul.f32 -1.442695, %v353_v43  ;;  %v606_v50 = vmul.f32 -1.442695, %v313_v44 }
  0xf3   : > { %696 = vpow2.f32 %v605_v42  ;;  %v614_v51 = vmul.f32 -1.442695, %v345_v48 }
  0xf4   : > { %698 = vpow2.f32 %v613_v46  ;;  %v640_v52 = vpop.f32.mrb[4].mxu0 }
  0xf5   : > { %700 = vpow2.f32 %v608_v47  ;;  %v334_v53 = vadd.f32 %v640_v52, %v871_v27  ;;  %v648_v54 = vpop.f32.mrb[4].mxu1  ;;  %v325_v55 = vpop.f32.mrb[5].mxu0 }
  0xf6   : > { %702 = vpow2.f32 %v616_v49  ;;  %v366_v56 = vadd.f32 %v648_v54, %v871_v27  ;;  %v326_v57 = vadd.f32 %v871_v27, %v325_v55  ;;  %v357_v58 = vpop.f32.mrb[5].mxu1  ;;  %v641_v59 = vpop.f32.mrb[6].mxu0 }
  0xf7   : > { %704 = vpow2.f32 %v606_v50  ;;  %v611_v60 = vmul.f32 -1.442695, %v334_v53  ;;  %v358_v61 = vadd.f32 %v871_v27, %v357_v58  ;;  %v337_v62 = vadd.f32 %v641_v59, %v871_v27  ;;  %v649_v63 = vpop.f32.mrb[6].mxu1  ;;  %v328_v0 = vpop.f32.mrb[7].mxu0 }
  0xf8   : > { %706 = vpow2.f32 %v614_v51  ;;  %v619_v1 = vmul.f32 -1.442695, %v366_v56  ;;  %v609_v2 = vmul.f32 -1.442695, %v326_v57  ;;  %v360_v3 = vpop.f32.mrb[7].mxu1  ;;  %v369_v23 = vadd.f32 %v649_v63, %v871_v27 }
  0xf9   : > { %708 = vpow2.f32 %v611_v60  ;;  %v617_v4 = vmul.f32 -1.442695, %v358_v61  ;;  %v612_v5 = vmul.f32 -1.442695, %v337_v62  ;;  %v329_v26 = vadd.f32 %v871_v27, %v328_v0 }
  0xfa   : > { %710 = vpow2.f32 %v619_v1  ;;  %v361_v30 = vadd.f32 %v871_v27, %v360_v3  ;;  %v620_v35 = vmul.f32 -1.442695, %v369_v23 }
  0xfb   : > { %v693_v6 = vpop.eup %692  ;;  %712 = vpow2.f32 %v609_v2  ;;  %v610_v37 = vmul.f32 -1.442695, %v329_v26 }
  0xfc   : > { %v695_v7 = vpop.eup %694  ;;  %v422_v8 = vadd.f32 1.0, %v693_v6  ;;  %714 = vpow2.f32 %v617_v4  ;;  %v618_v39 = vmul.f32 -1.442695, %v361_v30 }
  0xfd   : > { %v697_v9 = vpop.eup %696  ;;  %v430_v10 = vadd.f32 1.0, %v695_v7  ;;  %716 = vpow2.f32 %v612_v5 }
  0xfe   : > { %v699_v11 = vpop.eup %698  ;;  %718 = vrcp.f32 %v422_v8  ;;  %v420_v12 = vadd.f32 1.0, %v697_v9 }
  0xff   : > { %v701_v13 = vpop.eup %700  ;;  %720 = vrcp.f32 %v430_v10  ;;  %v428_v14 = vadd.f32 1.0, %v699_v11 }
 0x100   : > { %v703_v15 = vpop.eup %702  ;;  %722 = vrcp.f32 %v420_v12  ;;  %v423_v16 = vadd.f32 1.0, %v701_v13 }
 0x101   : > { %v705_v17 = vpop.eup %704  ;;  %724 = vrcp.f32 %v428_v14  ;;  %v431_v18 = vadd.f32 1.0, %v703_v15 }
 0x102   : > { %v707_v19 = vpop.eup %706  ;;  %726 = vrcp.f32 %v423_v16  ;;  %v421_v20 = vadd.f32 1.0, %v705_v17 }
 0x103   : > { %v709_v21 = vpop.eup %708  ;;  %728 = vrcp.f32 %v431_v18  ;;  %v429_v22 = vadd.f32 1.0, %v707_v19 }
 0x104   : > { %v711_v24 = vpop.eup %710  ;;  %730 = vrcp.f32 %v421_v20  ;;  %v426_v25 = vadd.f32 1.0, %v709_v21 }
 0x105   : > { %v713_v28 = vpop.eup %712  ;;  %732 = vrcp.f32 %v429_v22  ;;  %v434_v29 = vadd.f32 1.0, %v711_v24 }
 0x106   : > { %v715_v31 = vpop.eup %714  ;;  %734 = vrcp.f32 %v426_v25  ;;  %v424_v32 = vadd.f32 1.0, %v713_v28 }
 0x107   : > { %v717_v33 = vpop.eup %716  ;;  %736 = vrcp.f32 %v434_v29  ;;  %v432_v34 = vadd.f32 1.0, %v715_v31 }
 0x108   : > { %v719_v36 = vpop.eup %718  ;;  %738 = vrcp.f32 %v424_v32  ;;  %v427_v27 = vadd.f32 1.0, %v717_v33 }
 0x109   : > { %v721_v38 = vpop.eup %720  ;;  %470 = vst.msk [vmem:[%s894_s8 + $0x10] sm:$0xff] %vm250_vm0, %v719_v36  ;;  %740 = vrcp.f32 %v432_v34 }
 0x10a   : > { %v723_v40 = vpop.eup %722  ;;  %478 = vst.msk [vmem:[%s894_s8 + $0x50] sm:$0xff] %vm250_vm0, %v721_v38  ;;  %742 = vrcp.f32 %v427_v27 }
 0x10b   : > { %v725_v41 = vpop.eup %724  ;;  %468 = vst.msk [vmem:[%s894_s8] sm:$0xff] %vm250_vm0, %v723_v40  ;;  %744 = vpow2.f32 %v620_v35 }
 0x10c   : > { %v727_v42 = vpop.eup %726  ;;  %476 = vst.msk [vmem:[%s894_s8 + $0x40] sm:$0xff] %vm250_vm0, %v725_v41  ;;  %746 = vpow2.f32 %v610_v37 }
 0x10d   : > { %v729_v43 = vpop.eup %728  ;;  %471 = vst.msk [vmem:[%s894_s8 + $0x18] sm:$0xff] %vm250_vm0, %v727_v42  ;;  %748 = vpow2.f32 %v618_v39 }
 0x10e   : > { %v731_v44 = vpop.eup %730  ;;  %479 = vst.msk [vmem:[%s894_s8 + $0x58] sm:$0xff] %vm250_vm0, %v729_v43 }
 0x10f   : > { %v733_v45 = vpop.eup %732  ;;  %469 = vst.msk [vmem:[%s894_s8 + $0x8] sm:$0xff] %vm250_vm0, %v731_v44 }
 0x110   : > { %v735_v46 = vpop.eup %734  ;;  %477 = vst.msk [vmem:[%s894_s8 + $0x48] sm:$0xff] %vm250_vm0, %v733_v45 }
 0x111   : > { %v737_v47 = vpop.eup %736  ;;  %474 = vst.msk [vmem:[%s894_s8 + $0x30] sm:$0xff] %vm250_vm0, %v735_v46 }
 0x112   : > { %v739_v48 = vpop.eup %738  ;;  %482 = vst.msk [vmem:[%s894_s8 + $0x70] sm:$0xff] %vm250_vm0, %v737_v47 }
 0x113   : > { %v741_v49 = vpop.eup %740  ;;  %472 = vst.msk [vmem:[%s894_s8 + $0x20] sm:$0xff] %vm250_vm0, %v739_v48 }
 0x114   : > { %v743_v50 = vpop.eup %742  ;;  %480 = vst.msk [vmem:[%s894_s8 + $0x60] sm:$0xff] %vm250_vm0, %v741_v49 }
 0x115   : > { %v745_v51 = vpop.eup %744  ;;  %475 = vst.msk [vmem:[%s894_s8 + $0x38] sm:$0xff] %vm250_vm0, %v743_v50 }
 0x116   : > { %v747_v52 = vpop.eup %746  ;;  %v435_v53 = vadd.f32 1.0, %v745_v51 }
 0x117   : > { %v749_v54 = vpop.eup %748  ;;  %v425_v55 = vadd.f32 1.0, %v747_v52 }
 0x118   : > { %750 = vrcp.f32 %v435_v53  ;;  %v433_v56 = vadd.f32 1.0, %v749_v54 }
 0x119   : > { %752 = vrcp.f32 %v425_v55 }
 0x11a   : > { %754 = vrcp.f32 %v433_v56 }
 0x122   : > { %v751_v57 = vpop.eup %750 }
 0x123   : > { %v753_v58 = vpop.eup %752  ;;  %483 = vst.msk [vmem:[%s894_s8 + $0x78] sm:$0xff] %vm250_vm0, %v751_v57 }
 0x124   : > { %v755_v59 = vpop.eup %754  ;;  %473 = vst.msk [vmem:[%s894_s8 + $0x28] sm:$0xff] %vm250_vm0, %v753_v58 }
 0x125   : > { %481 = vst.msk [vmem:[%s894_s8 + $0x68] sm:$0xff] %vm250_vm0, %v755_v59 }
 0x126 PF: > { %s13_s16 = sadd.s32 1, %s794_s16   ;;  %s947_s12 = smov %s786_s14 }
 0x127   : > { %p10_p7 = scmp.ge.s32.totalorder %s13_s16, 6   ;;  %s948_s13 = smov %s790_s15 }
 0x128   : > { %s949_s14 = smov %s952_s17  ;;  %s950_s15 = smov %s956_s18 }
 0x129   :  { %12 = sbr.rel (!%p10_p7) target bundleno = 3 (0x3), region = 62 }

// kernel: rnlransr_forward.59
= control target key start
LH: loop header
LB: loop body
LE: loop exit
PB: predicated region body
PF: predicated region fallthrough
CT: control target
= control target key end

     0   :  { %s679_s12 = smov 0   ;;  %s681_s13 = smov 0   ;;  %s887_s0 = inlined_call_operand.vmem [shape: f32[2,16,16,144], index: 0, kind: input, shape index: {}]   ;;  %s888_s1 = inlined_call_operand.vmem [shape: f32[144,16], index: 1, kind: input, shape index: {}]   ;;  %s889_s2 = inlined_call_operand.vmem [shape: f32[1,16], index: 2, kind: input, shape index: {}]   ;;  %s890_s3 = inlined_call_operand.vmem [shape: f32[2,16,16,16], index: 3, kind: output, shape index: {}]  }
   0x1   :  { %s683_s14 = smov 0   ;;  %s685_s15 = smov 0  }
   0x2   :  { %s687_s16 = smov 0  }
   0x3 LB: > { %s22_s17 = sadd.s32 1, %s648_s14  ;;  %s25_s18 = sadd.s32 1, %s652_s15  ;;  %s656_s16 = sphi %s687_s16, %s13_s16   ;;  %s652_s15 = sphi %s685_s15, %s894_s15   ;;  %s648_s14 = sphi %s683_s14, %s893_s14   ;;  %s644_s13 = sphi %s681_s13, %s892_s13   ;;  %s640_s12 = sphi %s679_s12, %s891_s12  }
   0x4   : > { %p23_p0 = scmp.ge.s32.totalorder %s22_s17, 2  ;;  %p539_p1 = scmp.ge.s32.totalorder %s656_s16, 1 }
   0x5   : > { %p159_p2 = scmp.lt.s32.totalorder %s656_s16, 5 }
   0x6   : > { %s896_s17 = smov (%p23_p0, %s22_s17), 0  ;;  %s898_s18 = smov (!%p23_p0, %s25_s18), %s652_s15 }
   0x7   : > { %p160_p3 = pnand %p539_p1, %p159_p2  ;;  %p27_p4 = scmp.ge.s32.totalorder %s898_s18, 2 }
   0x8   : > { %v264_v0 = vld [vmem:[%s888_s1] sm:$0xff] (!%p160_p3)  ;;  %v265_v1 = vld [vmem:[%s888_s1 + $0x8] sm:$0xff] (!%p160_p3)  ;;  %v266_v2 = vld [vmem:[%s888_s1 + $0x10] sm:$0xff] (!%p160_p3)  ;;  %s540_s25 = sshll.u32 (!%p160_p3), %s640_s12, 3  ;;  %p194_p5 = scmp.lt.s32.totalorder (!%p160_p3), %s644_s13, 1  ;;  %v658_v3 = vmov (!%p160_p3), 0  }
   0x9   : > { %s900_s18 = smov (%p27_p4, %s898_s18), 0  ;;  %163 = sbr.rel (%p160_p3) target bundleno = 288 (0x120), region = 32 }
   0xa   : > { %323 = vmatprep.subr.bf16.mxu0 (!%p160_p3), %v658_v3  ;;  %559 = vmatprep.subr.bf16.mxu1 (!%p160_p3), %v658_v3  ;;  %v282_v4 = vpack.c.bf16 (!%p160_p3), %v265_v1, %v264_v0  ;;  %v267_v5 = vld [vmem:[%s888_s1 + $0x18] sm:$0xff] (!%p160_p3)  ;;  %p196_p6 = scmp.lt.s32.totalorder (!%p160_p3), %s540_s25, 15  ;;  %v268_v7 = vld [vmem:[%s888_s1 + $0x20] sm:$0xff] (!%p160_p3)  ;;  %v269_v8 = vld [vmem:[%s888_s1 + $0x28] sm:$0xff] (!%p160_p3)  ;;  %vm298_vm0 = vcmask (!%p160_p3), 130048  }
   0xb   : > { %v283_v6 = vpack.c.bf16 (!%p160_p3), %v267_v5, %v266_v2  ;;  %v284_v9 = vpack.c.bf16 (!%p160_p3), %v269_v8, %v268_v7  ;;  %v270_v10 = vld [vmem:[%s888_s1 + $0x30] sm:$0xff] (!%p160_p3)  ;;  %v271_v11 = vld [vmem:[%s888_s1 + $0x38] sm:$0xff] (!%p160_p3)  ;;  %v272_v19 = vld [vmem:[%s888_s1 + $0x40] sm:$0xff] (!%p160_p3) }
   0xc   : > { %324 = vmatpush1.bf16.msra.mxu0 (!%p160_p3), %v282_v4  ;;  %568 = vmatpush1.bf16.msra.mxu1 (!%p160_p3), %v282_v4  ;;  %v285_v17 = vpack.c.bf16 (!%p160_p3), %v271_v11, %v270_v10  ;;  %v273_v20 = vld [vmem:[%s888_s1 + $0x48] sm:$0xff] (!%p160_p3)  ;;  %v274_v22 = vld [vmem:[%s888_s1 + $0x50] sm:$0xff] (!%p160_p3)  ;;  %v275_v23 = vld [vmem:[%s888_s1 + $0x58] sm:$0xff] (!%p160_p3) }
   0xd   : > { %325 = vmatprep.subr.bf16.mxu0 (!%p160_p3), %v658_v3  ;;  %560 = vmatprep.subr.bf16.mxu1 (!%p160_p3), %v658_v3  ;;  %v286_v21 = vpack.c.bf16 (!%p160_p3), %v273_v20, %v272_v19  ;;  %v287_v24 = vpack.c.bf16 (!%p160_p3), %v275_v23, %v274_v22  ;;  %v276_v25 = vld [vmem:[%s888_s1 + $0x60] sm:$0xff] (!%p160_p3)  ;;  %v277_v26 = vld [vmem:[%s888_s1 + $0x68] sm:$0xff] (!%p160_p3)  ;;  %v278_v28 = vld [vmem:[%s888_s1 + $0x70] sm:$0xff] (!%p160_p3) }
   0xe   : > { %v288_v27 = vpack.c.bf16 (!%p160_p3), %v277_v26, %v276_v25  ;;  %v279_v29 = vld [vmem:[%s888_s1 + $0x78] sm:$0xff] (!%p160_p3)  ;;  %v280_v31 = vld [vmem:[%s888_s1 + $0x80] sm:$0xff] (!%p160_p3)  ;;  %v281_v32 = vld [vmem:[%s888_s1 + $0x88] sm:$0xff] (!%p160_p3) }
   0xf   : > { %v289_v30 = vpack.c.bf16 (!%p160_p3), %v279_v29, %v278_v28  ;;  %v290_v35 = vpack.c.bf16 (!%p160_p3), %v281_v32, %v280_v31 }
  0x10   : > { %s902_s13 = smov (!%p194_p5, %s644_s13), 1  ;;  %s904_s25 = smov (!%p196_p6, %s540_s25), 15  ;;  %326 = vmatpush1.bf16.msra.mxu0 %v283_v6  ;;  %569 = vmatpush1.bf16.msra.mxu1 %v283_v6 }
  0x11   : > { %s542_s5 = sshll.u32 %s902_s13, 6  ;;  %s546_s6 = sshll.u32 %s902_s13, 5  ;;  %327 = vmatprep.subr.bf16.mxu0 %v658_v3  ;;  %561 = vmatprep.subr.bf16.mxu1 %v658_v3 }
  0x12   : > { %s541_s7 = sshll.u32 %s904_s25, 2  ;;  %s545_s8 = sshll.u32 %s904_s25, 1 }
  0x13   : > { %s200_s9 = sadd.s32 %s542_s5, %s541_s7  ;;  %s734_s10 = sadd.s32 %s546_s6, %s545_s8 }
  0x14   : > { %s543_s11 = sshll.u32 %s200_s9, 3  ;;  %328 = vmatpush1.bf16.msra.mxu0 %v284_v9  ;;  %570 = vmatpush1.bf16.msra.mxu1 %v284_v9  ;;  %s547_s24 = sshll.u32 %s734_s10, 3 }
  0x15   : > { %s747_s23 = scalar_lea.vmem %s887_s0, %s543_s11  ;;  %329 = vmatprep.subr.bf16.mxu0 %v658_v3  ;;  %562 = vmatprep.subr.bf16.mxu1 %v658_v3  ;;  %s838_s29 = scalar_lea.vmem %s890_s3, %s547_s24 }
  0x16   : > { %v217_v12 = vld [vmem:[%s747_s23 + $0x8] sm:$0xff]  ;;  %v219_v13 = vld [vmem:[%s747_s23 + $0x18] sm:$0xff]  ;;  %v216_v33 = vld [vmem:[%s747_s23] sm:$0xff] }
  0x17   : > { %v233_v14 = vld [vmem:[%s747_s23 + $0x88] sm:$0xff]  ;;  %v249_v15 = vpack.c.bf16 %v219_v13, %v217_v12  ;;  %v235_v16 = vld [vmem:[%s747_s23 + $0x98] sm:$0xff]  ;;  %v218_v34 = vld [vmem:[%s747_s23 + $0x10] sm:$0xff] }
  0x18   : > { %v257_v18 = vpack.c.bf16 %v235_v16, %v233_v14  ;;  %330 = vmatpush1.bf16.msra.mxu0 %v285_v17  ;;  %571 = vmatpush1.bf16.msra.mxu1 %v285_v17  ;;  %v232_v36 = vld [vmem:[%s747_s23 + $0x80] sm:$0xff]  ;;  %v234_v37 = vld [vmem:[%s747_s23 + $0x90] sm:$0xff]  ;;  %v221_v38 = vld [vmem:[%s747_s23 + $0x28] sm:$0xff]  ;;  %v248_v42 = vpack.c.bf16 %v218_v34, %v216_v33 }
  0x19   : > { %549 = vmatprep.mubr.msk.bf16.mxu0 %vm298_vm0, %v249_v15  ;;  %331 = vmatprep.subr.bf16.mxu0 %v658_v3  ;;  %v223_v39 = vld [vmem:[%s747_s23 + $0x38] sm:$0xff]  ;;  %v237_v40 = vld [vmem:[%s747_s23 + $0xa8] sm:$0xff]  ;;  %v256_v43 = vpack.c.bf16 %v234_v37, %v232_v36  ;;  %v220_v46 = vld [vmem:[%s747_s23 + $0x20] sm:$0xff] }
  0x1a   : > { %553 = vmatprep.mubr.msk.bf16.mxu1 %vm298_vm0, %v257_v18  ;;  %563 = vmatprep.subr.bf16.mxu1 %v658_v3  ;;  %v239_v41 = vld [vmem:[%s747_s23 + $0xb8] sm:$0xff]  ;;  %v251_v44 = vpack.c.bf16 %v223_v39, %v221_v38  ;;  %v222_v47 = vld [vmem:[%s747_s23 + $0x30] sm:$0xff]  ;;  %v236_v48 = vld [vmem:[%s747_s23 + $0xa0] sm:$0xff] }
  0x1b   : > { %v259_v45 = vpack.c.bf16 %v239_v41, %v237_v40  ;;  %v238_v49 = vld [vmem:[%s747_s23 + $0xb0] sm:$0xff]  ;;  %v225_v50 = vld [vmem:[%s747_s23 + $0x48] sm:$0xff]  ;;  %v227_v51 = vld [vmem:[%s747_s23 + $0x58] sm:$0xff]  ;;  %v250_v54 = vpack.c.bf16 %v222_v47, %v220_v46 }
  0x1c   : > { %332 = vmatpush1.bf16.msra.mxu0 %v286_v21  ;;  %572 = vmatpush1.bf16.msra.mxu1 %v286_v21  ;;  %v241_v52 = vld [vmem:[%s747_s23 + $0xc8] sm:$0xff]  ;;  %v243_v53 = vld [vmem:[%s747_s23 + $0xd8] sm:$0xff]  ;;  %v258_v55 = vpack.c.bf16 %v238_v49, %v236_v48  ;;  %v253_v56 = vpack.c.bf16 %v227_v51, %v225_v50  ;;  %v224_v58 = vld [vmem:[%s747_s23 + $0x40] sm:$0xff] }
  0x1d   : > { %333 = vmatprep.subr.bf16.mxu0 %v658_v3  ;;  %564 = vmatprep.subr.bf16.mxu1 %v658_v3  ;;  %v261_v57 = vpack.c.bf16 %v243_v53, %v241_v52  ;;  %v226_v59 = vld [vmem:[%s747_s23 + $0x50] sm:$0xff]  ;;  %v240_v60 = vld [vmem:[%s747_s23 + $0xc0] sm:$0xff]  ;;  %v229_v62 = vld [vmem:[%s747_s23 + $0x68] sm:$0xff] }
  0x1e   : > { %v242_v61 = vld [vmem:[%s747_s23 + $0xd0] sm:$0xff]  ;;  %v231_v63 = vld [vmem:[%s747_s23 + $0x78] sm:$0xff]  ;;  %v245_v0 = vld [vmem:[%s747_s23 + $0xe8] sm:$0xff]  ;;  %v252_v2 = vpack.c.bf16 %v226_v59, %v224_v58 }
  0x1f   : > { %v247_v1 = vld [vmem:[%s747_s23 + $0xf8] sm:$0xff]  ;;  %v255_v4 = vpack.c.bf16 %v231_v63, %v229_v62  ;;  %v228_v6 = vld [vmem:[%s747_s23 + $0x60] sm:$0xff]  ;;  %v230_v7 = vld [vmem:[%s747_s23 + $0x70] sm:$0xff] }
  0x20   : > { %334 = vmatpush1.bf16.msra.mxu0 %v287_v24  ;;  %573 = vmatpush1.bf16.msra.mxu1 %v287_v24  ;;  %v263_v5 = vpack.c.bf16 %v247_v1, %v245_v0  ;;  %v244_v8 = vld [vmem:[%s747_s23 + $0xe0] sm:$0xff]  ;;  %v246_v9 = vld [vmem:[%s747_s23 + $0xf0] sm:$0xff]  ;;  %v254_v10 = vpack.c.bf16 %v230_v7, %v228_v6 }
  0x21   : > { %335 = vmatprep.subr.bf16.mxu0 %v658_v3  ;;  %565 = vmatprep.subr.bf16.mxu1 %v658_v3  ;;  %v262_v11 = vpack.c.bf16 %v246_v9, %v244_v8  ;;  %v548_v12 = vld [vmem:[%s889_s2] ss:$0 sm:$0xff] }
  0x24   : > { %336 = vmatpush1.bf16.msra.mxu0 %v288_v27  ;;  %574 = vmatpush1.bf16.msra.mxu1 %v288_v27 }
  0x25   : > { %337 = vmatprep.subr.bf16.mxu0 %v658_v3  ;;  %566 = vmatprep.subr.bf16.mxu1 %v658_v3 }
  0x28   : > { %338 = vmatpush1.bf16.msra.mxu0 %v289_v30  ;;  %575 = vmatpush1.bf16.msra.mxu1 %v289_v30 }
  0x29   : > { %339 = vmatprep.subr.bf16.mxu0 %v658_v3  ;;  %567 = vmatprep.subr.bf16.mxu1 %v658_v3  ;;  %v260_v3 = vpack.c.bf16 %v242_v61, %v240_v60 }
  0x2c   : > { %340 = vmatpush1.bf16.msra.mxu0 %v290_v35  ;;  %576 = vmatpush1.bf16.msra.mxu1 %v290_v35 }
  0x2f   : > { %356 = vmatmul.mubr.bf16.vlgmr.msra.gmra.mrb[0].mxu0 %v248_v42  ;;  %388 = vmatmul.mubr.bf16.vlgmr.msra.gmra.mrb[0].mxu1 %v256_v43 }
  0x30   : > { %550 = vmatprep.mubr.msk.bf16.mxu0 %vm298_vm0, %v251_v44  ;;  %554 = vmatprep.mubr.msk.bf16.mxu1 %vm298_vm0, %v259_v45 }
  0x37   : > { %364 = vmatmul.mubr.bf16.gmra.mrb[4].mxu0 %v250_v54  ;;  %396 = vmatmul.mubr.bf16.gmra.mrb[4].mxu1 %v258_v55 }
  0x38   : > { %551 = vmatprep.mubr.msk.bf16.mxu0 %vm298_vm0, %v253_v56  ;;  %555 = vmatprep.mubr.msk.bf16.mxu1 %vm298_vm0, %v261_v57 }
  0x3f   : > { %372 = vmatmul.mubr.bf16.gmra.mrb[8].mxu0 %v252_v2  ;;  %404 = vmatmul.mubr.bf16.gmra.mrb[8].mxu1 %v260_v3 }
  0x40   : > { %552 = vmatprep.mubr.msk.bf16.mxu0 %vm298_vm0, %v255_v4  ;;  %556 = vmatprep.mubr.msk.bf16.mxu1 %vm298_vm0, %v263_v5 }
  0x47   : > { %380 = vmatmul.mubr.bf16.gmra.mrb[12].mxu0 %v254_v10  ;;  %412 = vmatmul.mubr.bf16.gmra.mrb[12].mxu1 %v262_v11 }
 0x102   : > { %v357_v13 = vpop.f32.mrb[0].mxu0  ;;  %v389_v14 = vpop.f32.mrb[0].mxu1 }
 0x103   : > { %v358_v15 = vadd.f32 %v548_v12, %v357_v13  ;;  %v390_v16 = vadd.f32 %v548_v12, %v389_v14  ;;  %v359_v17 = vpop.f32.mrb[1].mxu0  ;;  %v391_v18 = vpop.f32.mrb[1].mxu1 }
 0x104   : > { %v360_v19 = vpop.f32.mrb[2].mxu0  ;;  %v392_v20 = vpop.f32.mrb[2].mxu1 }
 0x105   : > { %420 = vst.msk [vmem:[%s838_s29] sm:$0xff] %vm298_vm0, %v358_v15  ;;  %428 = vst.msk [vmem:[%s838_s29 + $0x40] sm:$0xff] %vm298_vm0, %v390_v16  ;;  %v361_v21 = vadd.f32 %v548_v12, %v360_v19  ;;  %v393_v22 = vadd.f32 %v548_v12, %v392_v20  ;;  %v362_v23 = vpop.f32.mrb[3].mxu0  ;;  %v394_v24 = vpop.f32.mrb[3].mxu1 }
 0x107   : > { %421 = vst.msk [vmem:[%s838_s29 + $0x8] sm:$0xff] %vm298_vm0, %v361_v21  ;;  %429 = vst.msk [vmem:[%s838_s29 + $0x48] sm:$0xff] %vm298_vm0, %v393_v22 }
 0x10a   : > { %v365_v25 = vpop.f32.mrb[4].mxu0  ;;  %v397_v26 = vpop.f32.mrb[4].mxu1 }
 0x10b   : > { %v366_v27 = vadd.f32 %v548_v12, %v365_v25  ;;  %v398_v28 = vadd.f32 %v548_v12, %v397_v26  ;;  %v367_v29 = vpop.f32.mrb[5].mxu0  ;;  %v399_v30 = vpop.f32.mrb[5].mxu1 }
 0x10c   : > { %v368_v31 = vpop.f32.mrb[6].mxu0  ;;  %v400_v32 = vpop.f32.mrb[6].mxu1 }
 0x10d   : > { %422 = vst.msk [vmem:[%s838_s29 + $0x10] sm:$0xff] %vm298_vm0, %v366_v27  ;;  %430 = vst.msk [vmem:[%s838_s29 + $0x50] sm:$0xff] %vm298_vm0, %v398_v28  ;;  %v369_v33 = vadd.f32 %v548_v12, %v368_v31  ;;  %v401_v34 = vadd.f32 %v548_v12, %v400_v32  ;;  %v370_v35 = vpop.f32.mrb[7].mxu0  ;;  %v402_v36 = vpop.f32.mrb[7].mxu1 }
 0x10f   : > { %423 = vst.msk [vmem:[%s838_s29 + $0x18] sm:$0xff] %vm298_vm0, %v369_v33  ;;  %431 = vst.msk [vmem:[%s838_s29 + $0x58] sm:$0xff] %vm298_vm0, %v401_v34 }
 0x112   : > { %v373_v37 = vpop.f32.mrb[8].mxu0  ;;  %v405_v38 = vpop.f32.mrb[8].mxu1 }
 0x113   : > { %v374_v39 = vadd.f32 %v548_v12, %v373_v37  ;;  %v406_v40 = vadd.f32 %v548_v12, %v405_v38  ;;  %v375_v41 = vpop.f32.mrb[9].mxu0  ;;  %v407_v42 = vpop.f32.mrb[9].mxu1 }
 0x114   : > { %v376_v43 = vpop.f32.mrb[10].mxu0  ;;  %v408_v44 = vpop.f32.mrb[10].mxu1 }
 0x115   : > { %424 = vst.msk [vmem:[%s838_s29 + $0x20] sm:$0xff] %vm298_vm0, %v374_v39  ;;  %432 = vst.msk [vmem:[%s838_s29 + $0x60] sm:$0xff] %vm298_vm0, %v406_v40  ;;  %v377_v45 = vadd.f32 %v548_v12, %v376_v43  ;;  %v409_v46 = vadd.f32 %v548_v12, %v408_v44  ;;  %v378_v47 = vpop.f32.mrb[11].mxu0  ;;  %v410_v48 = vpop.f32.mrb[11].mxu1 }
 0x117   : > { %425 = vst.msk [vmem:[%s838_s29 + $0x28] sm:$0xff] %vm298_vm0, %v377_v45  ;;  %433 = vst.msk [vmem:[%s838_s29 + $0x68] sm:$0xff] %vm298_vm0, %v409_v46 }
 0x11a   : > { %v381_v49 = vpop.f32.mrb[12].mxu0  ;;  %v413_v50 = vpop.f32.mrb[12].mxu1 }
 0x11b   : > { %v382_v51 = vadd.f32 %v548_v12, %v381_v49  ;;  %v414_v52 = vadd.f32 %v548_v12, %v413_v50  ;;  %v383_v53 = vpop.f32.mrb[13].mxu0  ;;  %v415_v54 = vpop.f32.mrb[13].mxu1 }
 0x11c   : > { %v384_v55 = vpop.f32.mrb[14].mxu0  ;;  %v416_v56 = vpop.f32.mrb[14].mxu1 }
 0x11d   : > { %426 = vst.msk [vmem:[%s838_s29 + $0x30] sm:$0xff] %vm298_vm0, %v382_v51  ;;  %434 = vst.msk [vmem:[%s838_s29 + $0x70] sm:$0xff] %vm298_vm0, %v414_v52  ;;  %v385_v57 = vadd.f32 %v548_v12, %v384_v55  ;;  %v417_v58 = vadd.f32 %v548_v12, %v416_v56  ;;  %v386_v59 = vpop.f32.mrb[15].mxu0  ;;  %v418_v60 = vpop.f32.mrb[15].mxu1 }
 0x11f   : > { %427 = vst.msk [vmem:[%s838_s29 + $0x38] sm:$0xff] %vm298_vm0, %v385_v57  ;;  %435 = vst.msk [vmem:[%s838_s29 + $0x78] sm:$0xff] %vm298_vm0, %v417_v58 }
 0x120 PF: > { %s13_s16 = sadd.s32 1, %s656_s16   ;;  %s891_s12 = smov %s648_s14 }
 0x121   : > { %p10_p7 = scmp.ge.s32.totalorder %s13_s16, 6   ;;  %s892_s13 = smov %s652_s15 }
 0x122   : > { %s893_s14 = smov %s896_s17  ;;  %s894_s15 = smov %s900_s18 }
 0x123   :  { %12 = sbr.rel (!%p10_p7) target bundleno = 3 (0x3), region = 62 }

// kernel: rnlransr_forward.88
= control target key start
LH: loop header
LB: loop body
LE: loop exit
PB: predicated region body
PF: predicated region fallthrough
CT: control target
= control target key end

     0   :  { %s680_s12 = smov 0   ;;  %s682_s13 = smov 0   ;;  %s888_s0 = inlined_call_operand.vmem [shape: f32[2,16,16,144], index: 0, kind: input, shape index: {}]   ;;  %s889_s1 = inlined_call_operand.vmem [shape: f32[144,64], index: 1, kind: input, shape index: {}]   ;;  %s890_s2 = inlined_call_operand.vmem [shape: f32[1,64], index: 2, kind: input, shape index: {}]   ;;  %s891_s3 = inlined_call_operand.vmem [shape: f32[2,16,16,64], index: 3, kind: output, shape index: {}]  }
   0x1   :  { %s684_s14 = smov 0   ;;  %s686_s15 = smov 0  }
   0x2   :  { %s688_s16 = smov 0  }
   0x3 LB: > { %s22_s17 = sadd.s32 1, %s649_s14  ;;  %s25_s18 = sadd.s32 1, %s653_s15  ;;  %s657_s16 = sphi %s688_s16, %s13_s16   ;;  %s653_s15 = sphi %s686_s15, %s895_s15   ;;  %s649_s14 = sphi %s684_s14, %s894_s14   ;;  %s645_s13 = sphi %s682_s13, %s893_s13   ;;  %s641_s12 = sphi %s680_s12, %s892_s12  }
   0x4   : > { %p23_p0 = scmp.ge.s32.totalorder %s22_s17, 2  ;;  %p540_p1 = scmp.ge.s32.totalorder %s657_s16, 1 }
   0x5   : > { %p159_p2 = scmp.lt.s32.totalorder %s657_s16, 5 }
   0x6   : > { %s897_s17 = smov (%p23_p0, %s22_s17), 0  ;;  %s899_s18 = smov (!%p23_p0, %s25_s18), %s653_s15 }
   0x7   : > { %p160_p3 = pnand %p540_p1, %p159_p2  ;;  %p27_p4 = scmp.ge.s32.totalorder %s899_s18, 2 }
   0x8   : > { %v264_v0 = vld [vmem:[%s889_s1] sm:$0xff] (!%p160_p3)  ;;  %v265_v1 = vld [vmem:[%s889_s1 + $0x8] sm:$0xff] (!%p160_p3)  ;;  %v266_v2 = vld [vmem:[%s889_s1 + $0x10] sm:$0xff] (!%p160_p3)  ;;  %s541_s25 = sshll.u32 (!%p160_p3), %s641_s12, 3  ;;  %p194_p5 = scmp.lt.s32.totalorder (!%p160_p3), %s645_s13, 1  ;;  %v659_v3 = vmov (!%p160_p3), 0  }
   0x9   : > { %s901_s18 = smov (%p27_p4, %s899_s18), 0  ;;  %163 = sbr.rel (%p160_p3) target bundleno = 288 (0x120), region = 32 }
   0xa   : > { %323 = vmatprep.subr.bf16.mxu0 (!%p160_p3), %v659_v3  ;;  %560 = vmatprep.subr.bf16.mxu1 (!%p160_p3), %v659_v3  ;;  %v282_v4 = vpack.c.bf16 (!%p160_p3), %v265_v1, %v264_v0  ;;  %v267_v5 = vld [vmem:[%s889_s1 + $0x18] sm:$0xff] (!%p160_p3)  ;;  %p196_p6 = scmp.lt.s32.totalorder (!%p160_p3), %s541_s25, 15  ;;  %v268_v7 = vld [vmem:[%s889_s1 + $0x20] sm:$0xff] (!%p160_p3)  ;;  %v269_v8 = vld [vmem:[%s889_s1 + $0x28] sm:$0xff] (!%p160_p3)  ;;  %vm298_vm0 = vcmask (!%p160_p3), 130048   ;;  %vm420_vm1 = vcmask (!%p160_p3), 523264  }
   0xb   : > { %v283_v6 = vpack.c.bf16 (!%p160_p3), %v267_v5, %v266_v2  ;;  %v284_v9 = vpack.c.bf16 (!%p160_p3), %v269_v8, %v268_v7  ;;  %v270_v10 = vld [vmem:[%s889_s1 + $0x30] sm:$0xff] (!%p160_p3)  ;;  %v271_v11 = vld [vmem:[%s889_s1 + $0x38] sm:$0xff] (!%p160_p3)  ;;  %v272_v19 = vld [vmem:[%s889_s1 + $0x40] sm:$0xff] (!%p160_p3) }
   0xc   : > { %324 = vmatpush1.bf16.msra.mxu0 (!%p160_p3), %v282_v4  ;;  %569 = vmatpush1.bf16.msra.mxu1 (!%p160_p3), %v282_v4  ;;  %v285_v17 = vpack.c.bf16 (!%p160_p3), %v271_v11, %v270_v10  ;;  %v273_v20 = vld [vmem:[%s889_s1 + $0x48] sm:$0xff] (!%p160_p3)  ;;  %v274_v22 = vld [vmem:[%s889_s1 + $0x50] sm:$0xff] (!%p160_p3)  ;;  %v275_v23 = vld [vmem:[%s889_s1 + $0x58] sm:$0xff] (!%p160_p3) }
   0xd   : > { %325 = vmatprep.subr.bf16.mxu0 (!%p160_p3), %v659_v3  ;;  %561 = vmatprep.subr.bf16.mxu1 (!%p160_p3), %v659_v3  ;;  %v286_v21 = vpack.c.bf16 (!%p160_p3), %v273_v20, %v272_v19  ;;  %v287_v24 = vpack.c.bf16 (!%p160_p3), %v275_v23, %v274_v22  ;;  %v276_v25 = vld [vmem:[%s889_s1 + $0x60] sm:$0xff] (!%p160_p3)  ;;  %v277_v26 = vld [vmem:[%s889_s1 + $0x68] sm:$0xff] (!%p160_p3)  ;;  %v278_v28 = vld [vmem:[%s889_s1 + $0x70] sm:$0xff] (!%p160_p3) }
   0xe   : > { %v288_v27 = vpack.c.bf16 (!%p160_p3), %v277_v26, %v276_v25  ;;  %v279_v29 = vld [vmem:[%s889_s1 + $0x78] sm:$0xff] (!%p160_p3)  ;;  %v280_v31 = vld [vmem:[%s889_s1 + $0x80] sm:$0xff] (!%p160_p3)  ;;  %v281_v32 = vld [vmem:[%s889_s1 + $0x88] sm:$0xff] (!%p160_p3) }
   0xf   : > { %v289_v30 = vpack.c.bf16 (!%p160_p3), %v279_v29, %v278_v28  ;;  %v290_v35 = vpack.c.bf16 (!%p160_p3), %v281_v32, %v280_v31 }
  0x10   : > { %s903_s13 = smov (!%p194_p5, %s645_s13), 1  ;;  %s905_s25 = smov (!%p196_p6, %s541_s25), 15  ;;  %326 = vmatpush1.bf16.msra.mxu0 %v283_v6  ;;  %570 = vmatpush1.bf16.msra.mxu1 %v283_v6 }
  0x11   : > { %s543_s5 = sshll.u32 %s903_s13, 6  ;;  %s547_s6 = sshll.u32 %s903_s13, 5  ;;  %327 = vmatprep.subr.bf16.mxu0 %v659_v3  ;;  %562 = vmatprep.subr.bf16.mxu1 %v659_v3 }
  0x12   : > { %s542_s7 = sshll.u32 %s905_s25, 2  ;;  %s546_s8 = sshll.u32 %s905_s25, 1 }
  0x13   : > { %s200_s9 = sadd.s32 %s543_s5, %s542_s7  ;;  %s735_s10 = sadd.s32 %s547_s6, %s546_s8 }
  0x14   : > { %s544_s11 = sshll.u32 %s200_s9, 3  ;;  %328 = vmatpush1.bf16.msra.mxu0 %v284_v9  ;;  %571 = vmatpush1.bf16.msra.mxu1 %v284_v9  ;;  %s548_s24 = sshll.u32 %s735_s10, 3 }
  0x15   : > { %s748_s23 = scalar_lea.vmem %s888_s0, %s544_s11  ;;  %329 = vmatprep.subr.bf16.mxu0 %v659_v3  ;;  %563 = vmatprep.subr.bf16.mxu1 %v659_v3  ;;  %s839_s29 = scalar_lea.vmem %s891_s3, %s548_s24 }
  0x16   : > { %v217_v12 = vld [vmem:[%s748_s23 + $0x8] sm:$0xff]  ;;  %v219_v13 = vld [vmem:[%s748_s23 + $0x18] sm:$0xff]  ;;  %v216_v33 = vld [vmem:[%s748_s23] sm:$0xff] }
  0x17   : > { %v233_v14 = vld [vmem:[%s748_s23 + $0x88] sm:$0xff]  ;;  %v249_v15 = vpack.c.bf16 %v219_v13, %v217_v12  ;;  %v235_v16 = vld [vmem:[%s748_s23 + $0x98] sm:$0xff]  ;;  %v218_v34 = vld [vmem:[%s748_s23 + $0x10] sm:$0xff] }
  0x18   : > { %v257_v18 = vpack.c.bf16 %v235_v16, %v233_v14  ;;  %330 = vmatpush1.bf16.msra.mxu0 %v285_v17  ;;  %572 = vmatpush1.bf16.msra.mxu1 %v285_v17  ;;  %v232_v36 = vld [vmem:[%s748_s23 + $0x80] sm:$0xff]  ;;  %v234_v37 = vld [vmem:[%s748_s23 + $0x90] sm:$0xff]  ;;  %v221_v38 = vld [vmem:[%s748_s23 + $0x28] sm:$0xff]  ;;  %v248_v42 = vpack.c.bf16 %v218_v34, %v216_v33 }
  0x19   : > { %550 = vmatprep.mubr.msk.bf16.mxu0 %vm298_vm0, %v249_v15  ;;  %331 = vmatprep.subr.bf16.mxu0 %v659_v3  ;;  %v223_v39 = vld [vmem:[%s748_s23 + $0x38] sm:$0xff]  ;;  %v237_v40 = vld [vmem:[%s748_s23 + $0xa8] sm:$0xff]  ;;  %v256_v43 = vpack.c.bf16 %v234_v37, %v232_v36  ;;  %v220_v46 = vld [vmem:[%s748_s23 + $0x20] sm:$0xff] }
  0x1a   : > { %554 = vmatprep.mubr.msk.bf16.mxu1 %vm298_vm0, %v257_v18  ;;  %564 = vmatprep.subr.bf16.mxu1 %v659_v3  ;;  %v239_v41 = vld [vmem:[%s748_s23 + $0xb8] sm:$0xff]  ;;  %v251_v44 = vpack.c.bf16 %v223_v39, %v221_v38  ;;  %v222_v47 = vld [vmem:[%s748_s23 + $0x30] sm:$0xff]  ;;  %v236_v48 = vld [vmem:[%s748_s23 + $0xa0] sm:$0xff] }
  0x1b   : > { %v259_v45 = vpack.c.bf16 %v239_v41, %v237_v40  ;;  %v238_v49 = vld [vmem:[%s748_s23 + $0xb0] sm:$0xff]  ;;  %v225_v50 = vld [vmem:[%s748_s23 + $0x48] sm:$0xff]  ;;  %v227_v51 = vld [vmem:[%s748_s23 + $0x58] sm:$0xff]  ;;  %v250_v54 = vpack.c.bf16 %v222_v47, %v220_v46 }
  0x1c   : > { %332 = vmatpush1.bf16.msra.mxu0 %v286_v21  ;;  %573 = vmatpush1.bf16.msra.mxu1 %v286_v21  ;;  %v241_v52 = vld [vmem:[%s748_s23 + $0xc8] sm:$0xff]  ;;  %v243_v53 = vld [vmem:[%s748_s23 + $0xd8] sm:$0xff]  ;;  %v258_v55 = vpack.c.bf16 %v238_v49, %v236_v48  ;;  %v253_v56 = vpack.c.bf16 %v227_v51, %v225_v50  ;;  %v224_v58 = vld [vmem:[%s748_s23 + $0x40] sm:$0xff] }
  0x1d   : > { %333 = vmatprep.subr.bf16.mxu0 %v659_v3  ;;  %565 = vmatprep.subr.bf16.mxu1 %v659_v3  ;;  %v261_v57 = vpack.c.bf16 %v243_v53, %v241_v52  ;;  %v226_v59 = vld [vmem:[%s748_s23 + $0x50] sm:$0xff]  ;;  %v240_v60 = vld [vmem:[%s748_s23 + $0xc0] sm:$0xff]  ;;  %v229_v62 = vld [vmem:[%s748_s23 + $0x68] sm:$0xff] }
  0x1e   : > { %v242_v61 = vld [vmem:[%s748_s23 + $0xd0] sm:$0xff]  ;;  %v231_v63 = vld [vmem:[%s748_s23 + $0x78] sm:$0xff]  ;;  %v245_v0 = vld [vmem:[%s748_s23 + $0xe8] sm:$0xff]  ;;  %v252_v2 = vpack.c.bf16 %v226_v59, %v224_v58 }
  0x1f   : > { %v247_v1 = vld [vmem:[%s748_s23 + $0xf8] sm:$0xff]  ;;  %v255_v4 = vpack.c.bf16 %v231_v63, %v229_v62  ;;  %v228_v6 = vld [vmem:[%s748_s23 + $0x60] sm:$0xff]  ;;  %v230_v7 = vld [vmem:[%s748_s23 + $0x70] sm:$0xff] }
  0x20   : > { %334 = vmatpush1.bf16.msra.mxu0 %v287_v24  ;;  %574 = vmatpush1.bf16.msra.mxu1 %v287_v24  ;;  %v263_v5 = vpack.c.bf16 %v247_v1, %v245_v0  ;;  %v244_v8 = vld [vmem:[%s748_s23 + $0xe0] sm:$0xff]  ;;  %v246_v9 = vld [vmem:[%s748_s23 + $0xf0] sm:$0xff]  ;;  %v254_v10 = vpack.c.bf16 %v230_v7, %v228_v6 }
  0x21   : > { %335 = vmatprep.subr.bf16.mxu0 %v659_v3  ;;  %566 = vmatprep.subr.bf16.mxu1 %v659_v3  ;;  %v262_v11 = vpack.c.bf16 %v246_v9, %v244_v8  ;;  %v549_v12 = vld [vmem:[%s890_s2] ss:$0 sm:$0xff] }
  0x24   : > { %336 = vmatpush1.bf16.msra.mxu0 %v288_v27  ;;  %575 = vmatpush1.bf16.msra.mxu1 %v288_v27 }
  0x25   : > { %337 = vmatprep.subr.bf16.mxu0 %v659_v3  ;;  %567 = vmatprep.subr.bf16.mxu1 %v659_v3 }
  0x28   : > { %338 = vmatpush1.bf16.msra.mxu0 %v289_v30  ;;  %576 = vmatpush1.bf16.msra.mxu1 %v289_v30 }
  0x29   : > { %339 = vmatprep.subr.bf16.mxu0 %v659_v3  ;;  %568 = vmatprep.subr.bf16.mxu1 %v659_v3  ;;  %v260_v3 = vpack.c.bf16 %v242_v61, %v240_v60 }
  0x2c   : > { %340 = vmatpush1.bf16.msra.mxu0 %v290_v35  ;;  %577 = vmatpush1.bf16.msra.mxu1 %v290_v35 }
  0x2f   : > { %356 = vmatmul.mubr.bf16.vlgmr.msra.gmra.mrb[0].mxu0 %v248_v42  ;;  %388 = vmatmul.mubr.bf16.vlgmr.msra.gmra.mrb[0].mxu1 %v256_v43 }
  0x30   : > { %551 = vmatprep.mubr.msk.bf16.mxu0 %vm298_vm0, %v251_v44  ;;  %555 = vmatprep.mubr.msk.bf16.mxu1 %vm298_vm0, %v259_v45 }
  0x37   : > { %364 = vmatmul.mubr.bf16.gmra.mrb[4].mxu0 %v250_v54  ;;  %396 = vmatmul.mubr.bf16.gmra.mrb[4].mxu1 %v258_v55 }
  0x38   : > { %552 = vmatprep.mubr.msk.bf16.mxu0 %vm298_vm0, %v253_v56  ;;  %556 = vmatprep.mubr.msk.bf16.mxu1 %vm298_vm0, %v261_v57 }
  0x3f   : > { %372 = vmatmul.mubr.bf16.gmra.mrb[8].mxu0 %v252_v2  ;;  %404 = vmatmul.mubr.bf16.gmra.mrb[8].mxu1 %v260_v3 }
  0x40   : > { %553 = vmatprep.mubr.msk.bf16.mxu0 %vm298_vm0, %v255_v4  ;;  %557 = vmatprep.mubr.msk.bf16.mxu1 %vm298_vm0, %v263_v5 }
  0x47   : > { %380 = vmatmul.mubr.bf16.gmra.mrb[12].mxu0 %v254_v10  ;;  %412 = vmatmul.mubr.bf16.gmra.mrb[12].mxu1 %v262_v11 }
 0x102   : > { %v357_v13 = vpop.f32.mrb[0].mxu0  ;;  %v389_v14 = vpop.f32.mrb[0].mxu1 }
 0x103   : > { %v358_v15 = vadd.f32 %v549_v12, %v357_v13  ;;  %v390_v16 = vadd.f32 %v549_v12, %v389_v14  ;;  %v359_v17 = vpop.f32.mrb[1].mxu0  ;;  %v391_v18 = vpop.f32.mrb[1].mxu1 }
 0x104   : > { %v360_v19 = vpop.f32.mrb[2].mxu0  ;;  %v392_v20 = vpop.f32.mrb[2].mxu1 }
 0x105   : > { %421 = vst.msk [vmem:[%s839_s29] sm:$0xff] %vm420_vm1, %v358_v15  ;;  %429 = vst.msk [vmem:[%s839_s29 + $0x40] sm:$0xff] %vm420_vm1, %v390_v16  ;;  %v361_v21 = vadd.f32 %v549_v12, %v360_v19  ;;  %v393_v22 = vadd.f32 %v549_v12, %v392_v20  ;;  %v362_v23 = vpop.f32.mrb[3].mxu0  ;;  %v394_v24 = vpop.f32.mrb[3].mxu1 }
 0x107   : > { %422 = vst.msk [vmem:[%s839_s29 + $0x8] sm:$0xff] %vm420_vm1, %v361_v21  ;;  %430 = vst.msk [vmem:[%s839_s29 + $0x48] sm:$0xff] %vm420_vm1, %v393_v22 }
 0x10a   : > { %v365_v25 = vpop.f32.mrb[4].mxu0  ;;  %v397_v26 = vpop.f32.mrb[4].mxu1 }
 0x10b   : > { %v366_v27 = vadd.f32 %v549_v12, %v365_v25  ;;  %v398_v28 = vadd.f32 %v549_v12, %v397_v26  ;;  %v367_v29 = vpop.f32.mrb[5].mxu0  ;;  %v399_v30 = vpop.f32.mrb[5].mxu1 }
 0x10c   : > { %v368_v31 = vpop.f32.mrb[6].mxu0  ;;  %v400_v32 = vpop.f32.mrb[6].mxu1 }
 0x10d   : > { %423 = vst.msk [vmem:[%s839_s29 + $0x10] sm:$0xff] %vm420_vm1, %v366_v27  ;;  %431 = vst.msk [vmem:[%s839_s29 + $0x50] sm:$0xff] %vm420_vm1, %v398_v28  ;;  %v369_v33 = vadd.f32 %v549_v12, %v368_v31  ;;  %v401_v34 = vadd.f32 %v549_v12, %v400_v32  ;;  %v370_v35 = vpop.f32.mrb[7].mxu0  ;;  %v402_v36 = vpop.f32.mrb[7].mxu1 }
 0x10f   : > { %424 = vst.msk [vmem:[%s839_s29 + $0x18] sm:$0xff] %vm420_vm1, %v369_v33  ;;  %432 = vst.msk [vmem:[%s839_s29 + $0x58] sm:$0xff] %vm420_vm1, %v401_v34 }
 0x112   : > { %v373_v37 = vpop.f32.mrb[8].mxu0  ;;  %v405_v38 = vpop.f32.mrb[8].mxu1 }
 0x113   : > { %v374_v39 = vadd.f32 %v549_v12, %v373_v37  ;;  %v406_v40 = vadd.f32 %v549_v12, %v405_v38  ;;  %v375_v41 = vpop.f32.mrb[9].mxu0  ;;  %v407_v42 = vpop.f32.mrb[9].mxu1 }
 0x114   : > { %v376_v43 = vpop.f32.mrb[10].mxu0  ;;  %v408_v44 = vpop.f32.mrb[10].mxu1 }
 0x115   : > { %425 = vst.msk [vmem:[%s839_s29 + $0x20] sm:$0xff] %vm420_vm1, %v374_v39  ;;  %433 = vst.msk [vmem:[%s839_s29 + $0x60] sm:$0xff] %vm420_vm1, %v406_v40  ;;  %v377_v45 = vadd.f32 %v549_v12, %v376_v43  ;;  %v409_v46 = vadd.f32 %v549_v12, %v408_v44  ;;  %v378_v47 = vpop.f32.mrb[11].mxu0  ;;  %v410_v48 = vpop.f32.mrb[11].mxu1 }
 0x117   : > { %426 = vst.msk [vmem:[%s839_s29 + $0x28] sm:$0xff] %vm420_vm1, %v377_v45  ;;  %434 = vst.msk [vmem:[%s839_s29 + $0x68] sm:$0xff] %vm420_vm1, %v409_v46 }
 0x11a   : > { %v381_v49 = vpop.f32.mrb[12].mxu0  ;;  %v413_v50 = vpop.f32.mrb[12].mxu1 }
 0x11b   : > { %v382_v51 = vadd.f32 %v549_v12, %v381_v49  ;;  %v414_v52 = vadd.f32 %v549_v12, %v413_v50  ;;  %v383_v53 = vpop.f32.mrb[13].mxu0  ;;  %v415_v54 = vpop.f32.mrb[13].mxu1 }
 0x11c   : > { %v384_v55 = vpop.f32.mrb[14].mxu0  ;;  %v416_v56 = vpop.f32.mrb[14].mxu1 }
 0x11d   : > { %427 = vst.msk [vmem:[%s839_s29 + $0x30] sm:$0xff] %vm420_vm1, %v382_v51  ;;  %435 = vst.msk [vmem:[%s839_s29 + $0x70] sm:$0xff] %vm420_vm1, %v414_v52  ;;  %v385_v57 = vadd.f32 %v549_v12, %v384_v55  ;;  %v417_v58 = vadd.f32 %v549_v12, %v416_v56  ;;  %v386_v59 = vpop.f32.mrb[15].mxu0  ;;  %v418_v60 = vpop.f32.mrb[15].mxu1 }
 0x11f   : > { %428 = vst.msk [vmem:[%s839_s29 + $0x38] sm:$0xff] %vm420_vm1, %v385_v57  ;;  %436 = vst.msk [vmem:[%s839_s29 + $0x78] sm:$0xff] %vm420_vm1, %v417_v58 }
 0x120 PF: > { %s13_s16 = sadd.s32 1, %s657_s16   ;;  %s892_s12 = smov %s649_s14 }
 0x121   : > { %p10_p7 = scmp.ge.s32.totalorder %s13_s16, 6   ;;  %s893_s13 = smov %s653_s15 }
 0x122   : > { %s894_s14 = smov %s897_s17  ;;  %s895_s15 = smov %s901_s18 }
 0x123   :  { %12 = sbr.rel (!%p10_p7) target bundleno = 3 (0x3), region = 62 }

// kernel: rnlransr_forward.89
= control target key start
LH: loop header
LB: loop body
LE: loop exit
PB: predicated region body
PF: predicated region fallthrough
CT: control target
= control target key end

     0   :  { %s840_s12 = smov 0   ;;  %s842_s13 = smov 0   ;;  %s1154_s0 = inlined_call_operand.vmem [shape: f32[2,32,32,144], index: 0, kind: input, shape index: {}]   ;;  %s1155_s1 = inlined_call_operand.vmem [shape: f32[144,3], index: 1, kind: input, shape index: {}]   ;;  %s1156_s2 = inlined_call_operand.vmem [shape: f32[1,3], index: 2, kind: input, shape index: {}]   ;;  %s1157_s3 = inlined_call_operand.vmem [shape: f32[2,32,32,3], index: 3, kind: output, shape index: {}]  }
   0x1   :  { %s844_s14 = smov 0   ;;  %s846_s15 = smov 0  }
   0x2   :  { %s848_s16 = smov 0  }
   0x3 LB: > { %s22_s17 = sadd.s32 1, %s809_s14  ;;  %s25_s18 = sadd.s32 1, %s813_s15  ;;  %s817_s16 = sphi %s848_s16, %s13_s16   ;;  %s813_s15 = sphi %s846_s15, %s1161_s15   ;;  %s809_s14 = sphi %s844_s14, %s1160_s14   ;;  %s805_s13 = sphi %s842_s13, %s1159_s13   ;;  %s801_s12 = sphi %s840_s12, %s1158_s12  }
   0x4   : > { %p23_p0 = scmp.ge.s32.totalorder %s22_s17, 4  ;;  %p692_p1 = scmp.ge.s32.totalorder %s817_s16, 1 }
   0x5   : > { %p159_p2 = scmp.lt.s32.totalorder %s817_s16, 9 }
   0x6   : > { %s1163_s17 = smov (%p23_p0, %s22_s17), 0  ;;  %s1165_s18 = smov (!%p23_p0, %s25_s18), %s813_s15 }
   0x7   : > { %p160_p3 = pnand %p692_p1, %p159_p2  ;;  %p27_p4 = scmp.ge.s32.totalorder %s1165_s18, 2 }
   0x8   : > { %v312_v0 = vld [vmem:[%s1155_s1] sm:$0xff] (!%p160_p3)  ;;  %v313_v1 = vld [vmem:[%s1155_s1 + $0x8] sm:$0xff] (!%p160_p3)  ;;  %v314_v2 = vld [vmem:[%s1155_s1 + $0x10] sm:$0xff] (!%p160_p3)  ;;  %s693_s25 = sshll.u32 (!%p160_p3), %s801_s12, 3  ;;  %p194_p5 = scmp.lt.s32.totalorder (!%p160_p3), %s805_s13, 1  ;;  %v819_v3 = vmov (!%p160_p3), 0  }
   0x9   : > { %s1167_s18 = smov (%p27_p4, %s1165_s18), 0  ;;  %163 = sbr.rel (%p160_p3) target bundleno = 320 (0x140), region = 32 }
   0xa   : > { %395 = vmatprep.subr.bf16.mxu0 (!%p160_p3), %v819_v3  ;;  %720 = vmatprep.subr.bf16.mxu1 (!%p160_p3), %v819_v3  ;;  %v330_v4 = vpack.c.bf16 (!%p160_p3), %v313_v1, %v312_v0  ;;  %v315_v5 = vld [vmem:[%s1155_s1 + $0x18] sm:$0xff] (!%p160_p3)  ;;  %p196_p6 = scmp.lt.s32.totalorder (!%p160_p3), %s693_s25, 31  ;;  %v316_v7 = vld [vmem:[%s1155_s1 + $0x20] sm:$0xff] (!%p160_p3)  ;;  %v317_v8 = vld [vmem:[%s1155_s1 + $0x28] sm:$0xff] (!%p160_p3)  ;;  %vm346_vm0 = vcmask (!%p160_p3), 130048   ;;  %vm556_vm1 = vcmask (!%p160_p3), 23552  }
   0xb   : > { %v331_v6 = vpack.c.bf16 (!%p160_p3), %v315_v5, %v314_v2  ;;  %v332_v9 = vpack.c.bf16 (!%p160_p3), %v317_v8, %v316_v7  ;;  %v318_v10 = vld [vmem:[%s1155_s1 + $0x30] sm:$0xff] (!%p160_p3)  ;;  %v319_v11 = vld [vmem:[%s1155_s1 + $0x38] sm:$0xff] (!%p160_p3)  ;;  %v320_v19 = vld [vmem:[%s1155_s1 + $0x40] sm:$0xff] (!%p160_p3) }
   0xc   : > { %396 = vmatpush1.bf16.msra.mxu0 (!%p160_p3), %v330_v4  ;;  %729 = vmatpush1.bf16.msra.mxu1 (!%p160_p3), %v330_v4  ;;  %v333_v17 = vpack.c.bf16 (!%p160_p3), %v319_v11, %v318_v10  ;;  %v321_v20 = vld [vmem:[%s1155_s1 + $0x48] sm:$0xff] (!%p160_p3)  ;;  %v322_v22 = vld [vmem:[%s1155_s1 + $0x50] sm:$0xff] (!%p160_p3)  ;;  %v323_v23 = vld [vmem:[%s1155_s1 + $0x58] sm:$0xff] (!%p160_p3) }
   0xd   : > { %397 = vmatprep.subr.bf16.mxu0 (!%p160_p3), %v819_v3  ;;  %721 = vmatprep.subr.bf16.mxu1 (!%p160_p3), %v819_v3  ;;  %v334_v21 = vpack.c.bf16 (!%p160_p3), %v321_v20, %v320_v19  ;;  %v335_v24 = vpack.c.bf16 (!%p160_p3), %v323_v23, %v322_v22  ;;  %v324_v25 = vld [vmem:[%s1155_s1 + $0x60] sm:$0xff] (!%p160_p3)  ;;  %v325_v26 = vld [vmem:[%s1155_s1 + $0x68] sm:$0xff] (!%p160_p3)  ;;  %v326_v28 = vld [vmem:[%s1155_s1 + $0x70] sm:$0xff] (!%p160_p3) }
   0xe   : > { %v336_v27 = vpack.c.bf16 (!%p160_p3), %v325_v26, %v324_v25  ;;  %v327_v29 = vld [vmem:[%s1155_s1 + $0x78] sm:$0xff] (!%p160_p3)  ;;  %v328_v31 = vld [vmem:[%s1155_s1 + $0x80] sm:$0xff] (!%p160_p3)  ;;  %v329_v32 = vld [vmem:[%s1155_s1 + $0x88] sm:$0xff] (!%p160_p3) }
   0xf   : > { %v337_v30 = vpack.c.bf16 (!%p160_p3), %v327_v29, %v326_v28  ;;  %v338_v35 = vpack.c.bf16 (!%p160_p3), %v329_v32, %v328_v31 }
  0x10   : > { %s1169_s13 = smov (!%p194_p5, %s805_s13), 1  ;;  %s1171_s25 = smov (!%p196_p6, %s693_s25), 31  ;;  %398 = vmatpush1.bf16.msra.mxu0 %v331_v6  ;;  %730 = vmatpush1.bf16.msra.mxu1 %v331_v6 }
  0x11   : > { %s695_s5 = sshll.u32 %s1169_s13, 8  ;;  %s699_s6 = sshll.u32 %s1169_s13, 7  ;;  %399 = vmatprep.subr.bf16.mxu0 %v819_v3  ;;  %722 = vmatprep.subr.bf16.mxu1 %v819_v3 }
  0x12   : > { %s694_s7 = sshll.u32 %s1171_s25, 3  ;;  %s698_s8 = sshll.u32 %s1171_s25, 2 }
  0x13   : > { %s200_s9 = sadd.s32 %s695_s5, %s694_s7  ;;  %s895_s10 = sadd.s32 %s699_s6, %s698_s8 }
  0x14   : > { %s696_s11 = sshll.u32 %s200_s9, 3  ;;  %400 = vmatpush1.bf16.msra.mxu0 %v332_v9  ;;  %731 = vmatpush1.bf16.msra.mxu1 %v332_v9  ;;  %s700_s24 = sshll.u32 %s895_s10, 3 }
  0x15   : > { %s908_s23 = scalar_lea.vmem %s1154_s0, %s696_s11  ;;  %401 = vmatprep.subr.bf16.mxu0 %v819_v3  ;;  %723 = vmatprep.subr.bf16.mxu1 %v819_v3  ;;  %s1041_s29 = scalar_lea.vmem %s1157_s3, %s700_s24 }
  0x16   : > { %v217_v12 = vld [vmem:[%s908_s23 + $0x8] sm:$0xff]  ;;  %v219_v13 = vld [vmem:[%s908_s23 + $0x18] sm:$0xff]  ;;  %v216_v33 = vld [vmem:[%s908_s23] sm:$0xff] }
  0x17   : > { %v249_v14 = vld [vmem:[%s908_s23 + $0x108] sm:$0xff]  ;;  %v281_v15 = vpack.c.bf16 %v219_v13, %v217_v12  ;;  %v251_v16 = vld [vmem:[%s908_s23 + $0x118] sm:$0xff]  ;;  %v218_v34 = vld [vmem:[%s908_s23 + $0x10] sm:$0xff] }
  0x18   : > { %v297_v18 = vpack.c.bf16 %v251_v16, %v249_v14  ;;  %402 = vmatpush1.bf16.msra.mxu0 %v333_v17  ;;  %732 = vmatpush1.bf16.msra.mxu1 %v333_v17  ;;  %v248_v36 = vld [vmem:[%s908_s23 + $0x100] sm:$0xff]  ;;  %v250_v37 = vld [vmem:[%s908_s23 + $0x110] sm:$0xff]  ;;  %v221_v38 = vld [vmem:[%s908_s23 + $0x28] sm:$0xff]  ;;  %v280_v42 = vpack.c.bf16 %v218_v34, %v216_v33 }
  0x19   : > { %702 = vmatprep.mubr.msk.bf16.mxu0 %vm346_vm0, %v281_v15  ;;  %403 = vmatprep.subr.bf16.mxu0 %v819_v3  ;;  %v223_v39 = vld [vmem:[%s908_s23 + $0x38] sm:$0xff]  ;;  %v253_v40 = vld [vmem:[%s908_s23 + $0x128] sm:$0xff]  ;;  %v296_v43 = vpack.c.bf16 %v250_v37, %v248_v36  ;;  %v220_v46 = vld [vmem:[%s908_s23 + $0x20] sm:$0xff] }
  0x1a   : > { %710 = vmatprep.mubr.msk.bf16.mxu1 %vm346_vm0, %v297_v18  ;;  %724 = vmatprep.subr.bf16.mxu1 %v819_v3  ;;  %v255_v41 = vld [vmem:[%s908_s23 + $0x138] sm:$0xff]  ;;  %v283_v44 = vpack.c.bf16 %v223_v39, %v221_v38  ;;  %v222_v47 = vld [vmem:[%s908_s23 + $0x30] sm:$0xff]  ;;  %v252_v48 = vld [vmem:[%s908_s23 + $0x120] sm:$0xff] }
  0x1b   : > { %v299_v45 = vpack.c.bf16 %v255_v41, %v253_v40  ;;  %v254_v49 = vld [vmem:[%s908_s23 + $0x130] sm:$0xff]  ;;  %v225_v50 = vld [vmem:[%s908_s23 + $0x48] sm:$0xff]  ;;  %v227_v51 = vld [vmem:[%s908_s23 + $0x58] sm:$0xff]  ;;  %v282_v54 = vpack.c.bf16 %v222_v47, %v220_v46 }
  0x1c   : > { %404 = vmatpush1.bf16.msra.mxu0 %v334_v21  ;;  %733 = vmatpush1.bf16.msra.mxu1 %v334_v21  ;;  %v257_v52 = vld [vmem:[%s908_s23 + $0x148] sm:$0xff]  ;;  %v259_v53 = vld [vmem:[%s908_s23 + $0x158] sm:$0xff]  ;;  %v298_v55 = vpack.c.bf16 %v254_v49, %v252_v48  ;;  %v285_v56 = vpack.c.bf16 %v227_v51, %v225_v50  ;;  %v224_v58 = vld [vmem:[%s908_s23 + $0x40] sm:$0xff] }
  0x1d   : > { %405 = vmatprep.subr.bf16.mxu0 %v819_v3  ;;  %725 = vmatprep.subr.bf16.mxu1 %v819_v3  ;;  %v301_v57 = vpack.c.bf16 %v259_v53, %v257_v52  ;;  %v226_v59 = vld [vmem:[%s908_s23 + $0x50] sm:$0xff]  ;;  %v256_v60 = vld [vmem:[%s908_s23 + $0x140] sm:$0xff]  ;;  %v229_v62 = vld [vmem:[%s908_s23 + $0x68] sm:$0xff] }
  0x1e   : > { %v258_v61 = vld [vmem:[%s908_s23 + $0x150] sm:$0xff]  ;;  %v231_v63 = vld [vmem:[%s908_s23 + $0x78] sm:$0xff]  ;;  %v261_v0 = vld [vmem:[%s908_s23 + $0x168] sm:$0xff]  ;;  %v284_v2 = vpack.c.bf16 %v226_v59, %v224_v58 }
  0x1f   : > { %v263_v1 = vld [vmem:[%s908_s23 + $0x178] sm:$0xff]  ;;  %v287_v4 = vpack.c.bf16 %v231_v63, %v229_v62  ;;  %v228_v6 = vld [vmem:[%s908_s23 + $0x60] sm:$0xff]  ;;  %v230_v7 = vld [vmem:[%s908_s23 + $0x70] sm:$0xff] }
  0x20   : > { %406 = vmatpush1.bf16.msra.mxu0 %v335_v24  ;;  %734 = vmatpush1.bf16.msra.mxu1 %v335_v24  ;;  %v303_v5 = vpack.c.bf16 %v263_v1, %v261_v0  ;;  %v260_v8 = vld [vmem:[%s908_s23 + $0x160] sm:$0xff]  ;;  %v262_v9 = vld [vmem:[%s908_s23 + $0x170] sm:$0xff]  ;;  %v233_v10 = vld [vmem:[%s908_s23 + $0x88] sm:$0xff]  ;;  %v286_v14 = vpack.c.bf16 %v230_v7, %v228_v6 }
  0x21   : > { %407 = vmatprep.subr.bf16.mxu0 %v819_v3  ;;  %726 = vmatprep.subr.bf16.mxu1 %v819_v3  ;;  %v235_v11 = vld [vmem:[%s908_s23 + $0x98] sm:$0xff]  ;;  %v265_v12 = vld [vmem:[%s908_s23 + $0x188] sm:$0xff]  ;;  %v302_v15 = vpack.c.bf16 %v262_v9, %v260_v8  ;;  %v232_v18 = vld [vmem:[%s908_s23 + $0x80] sm:$0xff] }
  0x22   : > { %v267_v13 = vld [vmem:[%s908_s23 + $0x198] sm:$0xff]  ;;  %v289_v16 = vpack.c.bf16 %v235_v11, %v233_v10  ;;  %v234_v19 = vld [vmem:[%s908_s23 + $0x90] sm:$0xff]  ;;  %v264_v20 = vld [vmem:[%s908_s23 + $0x180] sm:$0xff] }
  0x23   : > { %v305_v17 = vpack.c.bf16 %v267_v13, %v265_v12  ;;  %v266_v21 = vld [vmem:[%s908_s23 + $0x190] sm:$0xff]  ;;  %v237_v22 = vld [vmem:[%s908_s23 + $0xa8] sm:$0xff]  ;;  %v239_v23 = vld [vmem:[%s908_s23 + $0xb8] sm:$0xff]  ;;  %v288_v26 = vpack.c.bf16 %v234_v19, %v232_v18 }
  0x24   : > { %408 = vmatpush1.bf16.msra.mxu0 %v336_v27  ;;  %735 = vmatpush1.bf16.msra.mxu1 %v336_v27  ;;  %v269_v24 = vld [vmem:[%s908_s23 + $0x1a8] sm:$0xff]  ;;  %v271_v25 = vld [vmem:[%s908_s23 + $0x1b8] sm:$0xff]  ;;  %v304_v27 = vpack.c.bf16 %v266_v21, %v264_v20  ;;  %v291_v28 = vpack.c.bf16 %v239_v23, %v237_v22  ;;  %v238_v31 = vld [vmem:[%s908_s23 + $0xb0] sm:$0xff] }
  0x25   : > { %409 = vmatprep.subr.bf16.mxu0 %v819_v3  ;;  %727 = vmatprep.subr.bf16.mxu1 %v819_v3  ;;  %v307_v29 = vpack.c.bf16 %v271_v25, %v269_v24  ;;  %v268_v32 = vld [vmem:[%s908_s23 + $0x1a0] sm:$0xff]  ;;  %v270_v33 = vld [vmem:[%s908_s23 + $0x1b0] sm:$0xff]  ;;  %v241_v34 = vld [vmem:[%s908_s23 + $0xc8] sm:$0xff] }
  0x26   : > { %v273_v36 = vld [vmem:[%s908_s23 + $0x1c8] sm:$0xff]  ;;  %v275_v37 = vld [vmem:[%s908_s23 + $0x1d8] sm:$0xff]  ;;  %v306_v39 = vpack.c.bf16 %v270_v33, %v268_v32 }
  0x27   : > { %v309_v41 = vpack.c.bf16 %v275_v37, %v273_v36  ;;  %v245_v46 = vld [vmem:[%s908_s23 + $0xe8] sm:$0xff]  ;;  %v247_v47 = vld [vmem:[%s908_s23 + $0xf8] sm:$0xff] }
  0x28   : > { %410 = vmatpush1.bf16.msra.mxu0 %v337_v30  ;;  %736 = vmatpush1.bf16.msra.mxu1 %v337_v30  ;;  %v236_v30 = vld [vmem:[%s908_s23 + $0xa0] sm:$0xff]  ;;  %v277_v48 = vld [vmem:[%s908_s23 + $0x1e8] sm:$0xff]  ;;  %v279_v49 = vld [vmem:[%s908_s23 + $0x1f8] sm:$0xff]  ;;  %v295_v52 = vpack.c.bf16 %v247_v47, %v245_v46 }
  0x29   : > { %411 = vmatprep.subr.bf16.mxu0 %v819_v3  ;;  %728 = vmatprep.subr.bf16.mxu1 %v819_v3  ;;  %v300_v3 = vpack.c.bf16 %v258_v61, %v256_v60  ;;  %v290_v38 = vpack.c.bf16 %v238_v31, %v236_v30  ;;  %v311_v53 = vpack.c.bf16 %v279_v49, %v277_v48  ;;  %v1036_v60 = vld [vmem:[%s1156_s2] ss:$0 sm:$0xff] }
  0x2c   : > { %412 = vmatpush1.bf16.msra.mxu0 %v338_v35  ;;  %737 = vmatpush1.bf16.msra.mxu1 %v338_v35  ;;  %v243_v35 = vld [vmem:[%s908_s23 + $0xd8] sm:$0xff] }
  0x2d   : > { %v293_v40 = vpack.c.bf16 %v243_v35, %v241_v34 }
  0x2f   : > { %428 = vmatmul.mubr.bf16.vlgmr.msra.gmra.mrb[0].mxu0 %v280_v42  ;;  %492 = vmatmul.mubr.bf16.vlgmr.msra.gmra.mrb[0].mxu1 %v296_v43  ;;  %v240_v42 = vld [vmem:[%s908_s23 + $0xc0] sm:$0xff]  ;;  %v242_v43 = vld [vmem:[%s908_s23 + $0xd0] sm:$0xff] }
  0x30   : > { %703 = vmatprep.mubr.msk.bf16.mxu0 %vm346_vm0, %v283_v44  ;;  %711 = vmatprep.mubr.msk.bf16.mxu1 %vm346_vm0, %v299_v45  ;;  %v272_v44 = vld [vmem:[%s908_s23 + $0x1c0] sm:$0xff]  ;;  %v274_v45 = vld [vmem:[%s908_s23 + $0x1d0] sm:$0xff]  ;;  %v292_v50 = vpack.c.bf16 %v242_v43, %v240_v42 }
  0x31   : > { %v308_v51 = vpack.c.bf16 %v274_v45, %v272_v44 }
  0x37   : > { %436 = vmatmul.mubr.bf16.gmra.mrb[4].mxu0 %v282_v54  ;;  %500 = vmatmul.mubr.bf16.gmra.mrb[4].mxu1 %v298_v55  ;;  %v244_v54 = vld [vmem:[%s908_s23 + $0xe0] sm:$0xff]  ;;  %v246_v55 = vld [vmem:[%s908_s23 + $0xf0] sm:$0xff] }
  0x38   : > { %704 = vmatprep.mubr.msk.bf16.mxu0 %vm346_vm0, %v285_v56  ;;  %712 = vmatprep.mubr.msk.bf16.mxu1 %vm346_vm0, %v301_v57  ;;  %v276_v56 = vld [vmem:[%s908_s23 + $0x1e0] sm:$0xff]  ;;  %v278_v57 = vld [vmem:[%s908_s23 + $0x1f0] sm:$0xff]  ;;  %v294_v58 = vpack.c.bf16 %v246_v55, %v244_v54 }
  0x39   : > { %v310_v59 = vpack.c.bf16 %v278_v57, %v276_v56 }
  0x3f   : > { %444 = vmatmul.mubr.bf16.gmra.mrb[8].mxu0 %v284_v2  ;;  %508 = vmatmul.mubr.bf16.gmra.mrb[8].mxu1 %v300_v3 }
  0x40   : > { %705 = vmatprep.mubr.msk.bf16.mxu0 %vm346_vm0, %v287_v4  ;;  %713 = vmatprep.mubr.msk.bf16.mxu1 %vm346_vm0, %v303_v5 }
  0x47   : > { %452 = vmatmul.mubr.bf16.gmra.mrb[12].mxu0 %v286_v14  ;;  %516 = vmatmul.mubr.bf16.gmra.mrb[12].mxu1 %v302_v15 }
  0x48   : > { %706 = vmatprep.mubr.msk.bf16.mxu0 %vm346_vm0, %v289_v16  ;;  %714 = vmatprep.mubr.msk.bf16.mxu1 %vm346_vm0, %v305_v17 }
  0x4f   : > { %460 = vmatmul.mubr.bf16.gmra.mrb[16].mxu0 %v288_v26  ;;  %524 = vmatmul.mubr.bf16.gmra.mrb[16].mxu1 %v304_v27 }
  0x50   : > { %707 = vmatprep.mubr.msk.bf16.mxu0 %vm346_vm0, %v291_v28  ;;  %715 = vmatprep.mubr.msk.bf16.mxu1 %vm346_vm0, %v307_v29 }
  0x57   : > { %468 = vmatmul.mubr.bf16.gmra.mrb[20].mxu0 %v290_v38  ;;  %532 = vmatmul.mubr.bf16.gmra.mrb[20].mxu1 %v306_v39 }
  0x58   : > { %708 = vmatprep.mubr.msk.bf16.mxu0 %vm346_vm0, %v293_v40  ;;  %716 = vmatprep.mubr.msk.bf16.mxu1 %vm346_vm0, %v309_v41 }
  0x5f   : > { %476 = vmatmul.mubr.bf16.gmra.mrb[24].mxu0 %v292_v50  ;;  %540 = vmatmul.mubr.bf16.gmra.mrb[24].mxu1 %v308_v51 }
  0x60   : > { %709 = vmatprep.mubr.msk.bf16.mxu0 %vm346_vm0, %v295_v52  ;;  %717 = vmatprep.mubr.msk.bf16.mxu1 %vm346_vm0, %v311_v53 }
  0x67   : > { %484 = vmatmul.mubr.bf16.gmra.mrb[28].mxu0 %v294_v58  ;;  %548 = vmatmul.mubr.bf16.gmra.mrb[28].mxu1 %v310_v59 }
 0x102   : > { %v429_v61 = vpop.f32.mrb[0].mxu0  ;;  %v493_v62 = vpop.f32.mrb[0].mxu1 }
 0x103   : > { %v430_v63 = vadd.f32 %v1036_v60, %v429_v61  ;;  %v494_v0 = vadd.f32 %v1036_v60, %v493_v62  ;;  %v431_v1 = vpop.f32.mrb[1].mxu0  ;;  %v495_v2 = vpop.f32.mrb[1].mxu1 }
 0x104   : > { %v432_v3 = vpop.f32.mrb[2].mxu0  ;;  %v496_v4 = vpop.f32.mrb[2].mxu1 }
 0x105   : > { %557 = vst.msk [vmem:[%s1041_s29] sm:$0xff] %vm556_vm1, %v430_v63  ;;  %573 = vst.msk [vmem:[%s1041_s29 + $0x80] sm:$0xff] %vm556_vm1, %v494_v0  ;;  %v433_v5 = vadd.f32 %v1036_v60, %v432_v3  ;;  %v497_v6 = vadd.f32 %v1036_v60, %v496_v4  ;;  %v434_v7 = vpop.f32.mrb[3].mxu0  ;;  %v498_v8 = vpop.f32.mrb[3].mxu1 }
 0x107   : > { %558 = vst.msk [vmem:[%s1041_s29 + $0x8] sm:$0xff] %vm556_vm1, %v433_v5  ;;  %574 = vst.msk [vmem:[%s1041_s29 + $0x88] sm:$0xff] %vm556_vm1, %v497_v6 }
 0x10a   : > { %v437_v9 = vpop.f32.mrb[4].mxu0  ;;  %v501_v10 = vpop.f32.mrb[4].mxu1 }
 0x10b   : > { %v438_v11 = vadd.f32 %v1036_v60, %v437_v9  ;;  %v502_v12 = vadd.f32 %v1036_v60, %v501_v10  ;;  %v439_v13 = vpop.f32.mrb[5].mxu0  ;;  %v503_v14 = vpop.f32.mrb[5].mxu1 }
 0x10c   : > { %v440_v15 = vpop.f32.mrb[6].mxu0  ;;  %v504_v16 = vpop.f32.mrb[6].mxu1 }
 0x10d   : > { %559 = vst.msk [vmem:[%s1041_s29 + $0x10] sm:$0xff] %vm556_vm1, %v438_v11  ;;  %575 = vst.msk [vmem:[%s1041_s29 + $0x90] sm:$0xff] %vm556_vm1, %v502_v12  ;;  %v441_v17 = vadd.f32 %v1036_v60, %v440_v15  ;;  %v505_v18 = vadd.f32 %v1036_v60, %v504_v16  ;;  %v442_v19 = vpop.f32.mrb[7].mxu0  ;;  %v506_v20 = vpop.f32.mrb[7].mxu1 }
 0x10f   : > { %560 = vst.msk [vmem:[%s1041_s29 + $0x18] sm:$0xff] %vm556_vm1, %v441_v17  ;;  %576 = vst.msk [vmem:[%s1041_s29 + $0x98] sm:$0xff] %vm556_vm1, %v505_v18 }
 0x112   : > { %v445_v21 = vpop.f32.mrb[8].mxu0  ;;  %v509_v22 = vpop.f32.mrb[8].mxu1 }
 0x113   : > { %v446_v23 = vadd.f32 %v1036_v60, %v445_v21  ;;  %v510_v24 = vadd.f32 %v1036_v60, %v509_v22  ;;  %v447_v25 = vpop.f32.mrb[9].mxu0  ;;  %v511_v26 = vpop.f32.mrb[9].mxu1 }
 0x114   : > { %v448_v27 = vpop.f32.mrb[10].mxu0  ;;  %v512_v28 = vpop.f32.mrb[10].mxu1 }
 0x115   : > { %561 = vst.msk [vmem:[%s1041_s29 + $0x20] sm:$0xff] %vm556_vm1, %v446_v23  ;;  %577 = vst.msk [vmem:[%s1041_s29 + $0xa0] sm:$0xff] %vm556_vm1, %v510_v24  ;;  %v449_v29 = vadd.f32 %v1036_v60, %v448_v27  ;;  %v513_v30 = vadd.f32 %v1036_v60, %v512_v28  ;;  %v450_v31 = vpop.f32.mrb[11].mxu0  ;;  %v514_v32 = vpop.f32.mrb[11].mxu1 }
 0x117   : > { %562 = vst.msk [vmem:[%s1041_s29 + $0x28] sm:$0xff] %vm556_vm1, %v449_v29  ;;  %578 = vst.msk [vmem:[%s1041_s29 + $0xa8] sm:$0xff] %vm556_vm1, %v513_v30 }
 0x11a   : > { %v453_v33 = vpop.f32.mrb[12].mxu0  ;;  %v517_v34 = vpop.f32.mrb[12].mxu1 }
 0x11b   : > { %v454_v35 = vadd.f32 %v1036_v60, %v453_v33  ;;  %v518_v36 = vadd.f32 %v1036_v60, %v517_v34  ;;  %v455_v37 = vpop.f32.mrb[13].mxu0  ;;  %v519_v38 = vpop.f32.mrb[13].mxu1 }
 0x11c   : > { %v456_v39 = vpop.f32.mrb[14].mxu0  ;;  %v520_v40 = vpop.f32.mrb[14].mxu1 }
 0x11d   : > { %563 = vst.msk [vmem:[%s1041_s29 + $0x30] sm:$0xff] %vm556_vm1, %v454_v35  ;;  %579 = vst.msk [vmem:[%s1041_s29 + $0xb0] sm:$0xff] %vm556_vm1, %v518_v36  ;;  %v457_v41 = vadd.f32 %v1036_v60, %v456_v39  ;;  %v521_v42 = vadd.f32 %v1036_v60, %v520_v40  ;;  %v458_v43 = vpop.f32.mrb[15].mxu0  ;;  %v522_v44 = vpop.f32.mrb[15].mxu1 }
 0x11f   : > { %564 = vst.msk [vmem:[%s1041_s29 + $0x38] sm:$0xff] %vm556_vm1, %v457_v41  ;;  %580 = vst.msk [vmem:[%s1041_s29 + $0xb8] sm:$0xff] %vm556_vm1, %v521_v42 }
 0x122   : > { %v461_v45 = vpop.f32.mrb[16].mxu0  ;;  %v525_v46 = vpop.f32.mrb[16].mxu1 }
 0x123   : > { %v462_v47 = vadd.f32 %v1036_v60, %v461_v45  ;;  %v526_v48 = vadd.f32 %v1036_v60, %v525_v46  ;;  %v463_v49 = vpop.f32.mrb[17].mxu0  ;;  %v527_v50 = vpop.f32.mrb[17].mxu1 }
 0x124   : > { %v464_v51 = vpop.f32.mrb[18].mxu0  ;;  %v528_v52 = vpop.f32.mrb[18].mxu1 }
 0x125   : > { %565 = vst.msk [vmem:[%s1041_s29 + $0x40] sm:$0xff] %vm556_vm1, %v462_v47  ;;  %581 = vst.msk [vmem:[%s1041_s29 + $0xc0] sm:$0xff] %vm556_vm1, %v526_v48  ;;  %v465_v53 = vadd.f32 %v1036_v60, %v464_v51  ;;  %v529_v54 = vadd.f32 %v1036_v60, %v528_v52  ;;  %v466_v55 = vpop.f32.mrb[19].mxu0  ;;  %v530_v56 = vpop.f32.mrb[19].mxu1 }
 0x127   : > { %566 = vst.msk [vmem:[%s1041_s29 + $0x48] sm:$0xff] %vm556_vm1, %v465_v53  ;;  %582 = vst.msk [vmem:[%s1041_s29 + $0xc8] sm:$0xff] %vm556_vm1, %v529_v54 }
 0x12a   : > { %v469_v57 = vpop.f32.mrb[20].mxu0  ;;  %v533_v58 = vpop.f32.mrb[20].mxu1 }
 0x12b   : > { %v470_v59 = vadd.f32 %v1036_v60, %v469_v57  ;;  %v534_v61 = vadd.f32 %v1036_v60, %v533_v58  ;;  %v471_v62 = vpop.f32.mrb[21].mxu0  ;;  %v535_v63 = vpop.f32.mrb[21].mxu1 }
 0x12c   : > { %v472_v0 = vpop.f32.mrb[22].mxu0  ;;  %v536_v1 = vpop.f32.mrb[22].mxu1 }
 0x12d   : > { %567 = vst.msk [vmem:[%s1041_s29 + $0x50] sm:$0xff] %vm556_vm1, %v470_v59  ;;  %583 = vst.msk [vmem:[%s1041_s29 + $0xd0] sm:$0xff] %vm556_vm1, %v534_v61  ;;  %v473_v2 = vadd.f32 %v1036_v60, %v472_v0  ;;  %v537_v3 = vadd.f32 %v1036_v60, %v536_v1  ;;  %v474_v4 = vpop.f32.mrb[23].mxu0  ;;  %v538_v5 = vpop.f32.mrb[23].mxu1 }
 0x12f   : > { %568 = vst.msk [vmem:[%s1041_s29 + $0x58] sm:$0xff] %vm556_vm1, %v473_v2  ;;  %584 = vst.msk [vmem:[%s1041_s29 + $0xd8] sm:$0xff] %vm556_vm1, %v537_v3 }
 0x132   : > { %v477_v6 = vpop.f32.mrb[24].mxu0  ;;  %v541_v7 = vpop.f32.mrb[24].mxu1 }
 0x133   : > { %v478_v8 = vadd.f32 %v1036_v60, %v477_v6  ;;  %v542_v9 = vadd.f32 %v1036_v60, %v541_v7  ;;  %v479_v10 = vpop.f32.mrb[25].mxu0  ;;  %v543_v11 = vpop.f32.mrb[25].mxu1 }
 0x134   : > { %v480_v12 = vpop.f32.mrb[26].mxu0  ;;  %v544_v13 = vpop.f32.mrb[26].mxu1 }
 0x135   : > { %569 = vst.msk [vmem:[%s1041_s29 + $0x60] sm:$0xff] %vm556_vm1, %v478_v8  ;;  %585 = vst.msk [vmem:[%s1041_s29 + $0xe0] sm:$0xff] %vm556_vm1, %v542_v9  ;;  %v481_v14 = vadd.f32 %v1036_v60, %v480_v12  ;;  %v545_v15 = vadd.f32 %v1036_v60, %v544_v13  ;;  %v482_v16 = vpop.f32.mrb[27].mxu0  ;;  %v546_v17 = vpop.f32.mrb[27].mxu1 }
 0x137   : > { %570 = vst.msk [vmem:[%s1041_s29 + $0x68] sm:$0xff] %vm556_vm1, %v481_v14  ;;  %586 = vst.msk [vmem:[%s1041_s29 + $0xe8] sm:$0xff] %vm556_vm1, %v545_v15 }
 0x13a   : > { %v485_v18 = vpop.f32.mrb[28].mxu0  ;;  %v549_v19 = vpop.f32.mrb[28].mxu1 }
 0x13b   : > { %v486_v20 = vadd.f32 %v1036_v60, %v485_v18  ;;  %v550_v21 = vadd.f32 %v1036_v60, %v549_v19  ;;  %v487_v22 = vpop.f32.mrb[29].mxu0  ;;  %v551_v23 = vpop.f32.mrb[29].mxu1 }
 0x13c   : > { %v488_v24 = vpop.f32.mrb[30].mxu0  ;;  %v552_v25 = vpop.f32.mrb[30].mxu1 }
 0x13d   : > { %571 = vst.msk [vmem:[%s1041_s29 + $0x70] sm:$0xff] %vm556_vm1, %v486_v20  ;;  %587 = vst.msk [vmem:[%s1041_s29 + $0xf0] sm:$0xff] %vm556_vm1, %v550_v21  ;;  %v489_v26 = vadd.f32 %v1036_v60, %v488_v24  ;;  %v553_v27 = vadd.f32 %v1036_v60, %v552_v25  ;;  %v490_v28 = vpop.f32.mrb[31].mxu0  ;;  %v554_v29 = vpop.f32.mrb[31].mxu1 }
 0x13f   : > { %572 = vst.msk [vmem:[%s1041_s29 + $0x78] sm:$0xff] %vm556_vm1, %v489_v26  ;;  %588 = vst.msk [vmem:[%s1041_s29 + $0xf8] sm:$0xff] %vm556_vm1, %v553_v27 }
 0x140 PF: > { %s13_s16 = sadd.s32 1, %s817_s16   ;;  %s1158_s12 = smov %s809_s14 }
 0x141   : > { %p10_p7 = scmp.ge.s32.totalorder %s13_s16, 10   ;;  %s1159_s13 = smov %s813_s15 }
 0x142   : > { %s1160_s14 = smov %s1163_s17  ;;  %s1161_s15 = smov %s1167_s18 }
 0x143   :  { %12 = sbr.rel (!%p10_p7) target bundleno = 3 (0x3), region = 62 }

</bundles_post_ra>
